<compile_context>
chip_gen: v6e
topology: v6e:2x2x1
jax: 0.10.0
libtpu: 0.0.40
codegen_flags: <defaults>
</compile_context>

<pallas_src>
import functools

import jax
import jax.numpy as jnp
from jax import lax
from jax.experimental import pallas as pl
from jax.experimental.pallas import tpu as pltpu


# ----------------------------------------------------------------------------
# Fused Pallas kernel (one grid step == one batch element)
# ----------------------------------------------------------------------------

def fused_forward_kernel(
    h0_ref, adj_ref, agg_ref, rtg_ref, a1_ref, a2_ref,
    wgat_ref, bgat_ref, wemb_ref, bemb_ref, ln_g_ref, ln_b_ref,
    wlstm_ref, blstm_ref, wout_ref, bout_ref, wmap_ref, bmap_ref,
    o_ref,
    *, heads, hidden, num_gat_layers, T, num_lstm_layers):
    HH = heads * hidden
    H = hidden

    def mxu_dot(a, b):
        return jnp.dot(a.astype(jnp.bfloat16), b.astype(jnp.bfloat16),
                       preferred_element_type=jnp.float32)

    adj = adj_ref[0]                       # (Npb, Npb) mask (row=target, col=source)
    h = h0_ref[0]                          # (Npb, HH) node features (zero padded to HH)

    # ---- spatial encoder: multi-head GAT layers, unrolled, VMEM resident ----
    # TODO(synk): GATEncoder source not provided -- assumed node-type embedding concat
    # (done in wrapper) + 4 GATConv layers, heads concatenated, ELU between layers.
    for l in range(num_gat_layers):
        proj = mxu_dot(h, wgat_ref[l])     # (Npb, HH + 2*heads): [Wh | s_heads | d_heads]
        wh = proj[:, :HH]
        coef = proj[:, HH:]
        head_outs = []
        for hd in range(heads):
            s = coef[:, hd:hd + 1]                     # a_src . Wh_j  (source score)
            d = coef[:, heads + hd:heads + hd + 1]     # a_dst . Wh_i  (target score)
            e = d + s.T                                # e[i, j]
            e = jnp.where(e > 0, e, 0.2 * e)           # LeakyReLU(0.2)
            e = jnp.where(adj > 0, e, -1e30)
            m = jnp.max(e, axis=-1, keepdims=True)
            p = jnp.exp(e - m)                         # masked entries underflow to 0
            denom = jnp.sum(p, axis=-1, keepdims=True)
            alpha = p * pl.reciprocal(denom, approx=True)
            head_outs.append(mxu_dot(alpha, wh[:, hd * H:(hd + 1) * H]))
        h = jnp.concatenate(head_outs, axis=-1) + bgat_ref[l]
        if l < num_gat_layers - 1:
            h = jnp.where(h > 0, h, jnp.exp(jnp.minimum(h, 0.0)) - 1.0)   # ELU (safe)

    # ---- MeanAggregator over location nodes: one small matmul ----
    graph_emb = mxu_dot(agg_ref[0], h)                 # (T, HH)

    # ---- embeddings (single block-structured matmul) + LayerNorm ----
    x_in = jnp.concatenate([rtg_ref[0], graph_emb, a1_ref[0], a2_ref[0]], axis=-1)
    emb = mxu_dot(x_in, wemb_ref[...]) + bemb_ref[...]   # (T, 3H): [ret | state | act]
    gamma = ln_g_ref[...]
    beta = ln_b_ref[...]

    def layer_norm(x):
        mu = jnp.mean(x, axis=-1, keepdims=True)
        xc = x - mu
        var = jnp.mean(xc * xc, axis=-1, keepdims=True)
        return xc * lax.rsqrt(var + 1e-5) * gamma + beta

    ret_e = layer_norm(emb[:, 0 * H:1 * H])
    st_e = layer_norm(emb[:, 1 * H:2 * H])
    ac_e = layer_norm(emb[:, 2 * H:3 * H])

    # ---- temporal encoder: multi-layer LSTM over (r_t, s_t, a_t) tokens ----
    # TODO(synk): LSTMEncoder source not provided -- assumed last-step top-layer
    # hidden state followed by Linear(hidden, hidden).
    hs = [jnp.zeros((1, H), jnp.float32) for _ in range(num_lstm_layers)]
    cs = [jnp.zeros((1, H), jnp.float32) for _ in range(num_lstm_layers)]
    for t in range(T):                                        # fully unrolled (3T steps)
        for tok in (ret_e[t:t + 1], st_e[t:t + 1], ac_e[t:t + 1]):
            inp = tok
            for l in range(num_lstm_layers):
                cat = jnp.concatenate([inp, hs[l]], axis=-1)          # (1, 2H)
                gates = mxu_dot(cat, wlstm_ref[l]) + blstm_ref[l]     # (1, 4H) i|f|g|o
                lane = lax.broadcasted_iota(jnp.int32, gates.shape, 1)
                is_g = jnp.logical_and(lane >= 2 * H, lane < 3 * H)
                act = jnp.where(is_g, jnp.tanh(gates), jax.nn.sigmoid(gates))
                i_g = act[:, 0:H]
                f_g = act[:, H:2 * H]
                g_g = act[:, 2 * H:3 * H]
                o_g = act[:, 3 * H:4 * H]
                cs[l] = f_g * cs[l] + i_g * g_g
                hs[l] = o_g * jnp.tanh(cs[l])
                inp = hs[l]

    temporal = mxu_dot(hs[-1], wout_ref[...]) + bout_ref[...]         # (1, H)
    # TODO(synk): InteractiveActionMapper source not provided -- approximated with a
    # single Linear(hidden, num_locations * 2) head (attention internals omitted).
    logits = mxu_dot(temporal, wmap_ref[...]) + bmap_ref[...]         # (1, 2L)
    o_ref[0] = logits


# ----------------------------------------------------------------------------
# Parameters (deterministic synthetic init, PyTorch-module-like layout)
# ----------------------------------------------------------------------------

def init_params(key, *, input_dim, emb_dim, hidden, heads, num_layers_gat,
                num_lstm_layers, num_locations, num_actions):
    keys = iter(jax.random.split(key, 64))

    def normal(shape, scale=0.1):
        return (scale * jax.random.normal(next(keys), shape)).astype(jnp.float32)

    params = {}
    params["type_emb"] = normal((2, emb_dim))                      # node-type embedding table

    gat_in_dims = [input_dim + emb_dim] + [hidden * heads] * (num_layers_gat - 1)
    params["gat"] = []
    for din in gat_in_dims:
        params["gat"].append(dict(
            w=normal((din, heads * hidden)),
            a_src=normal((heads, hidden, 1)),
            a_dst=normal((heads, hidden, 1)),
            b=jnp.zeros((1, heads * hidden), jnp.float32),
        ))

    params["embed_state_w"] = normal((hidden * heads, hidden))
    params["embed_state_b"] = jnp.zeros((1, hidden), jnp.float32)
    params["embed_return_w"] = normal((1, hidden))
    params["embed_return_b"] = jnp.zeros((1, hidden), jnp.float32)
    params["embed_action1_w"] = normal((num_locations, hidden // 2))
    params["embed_action1_b"] = jnp.zeros((1, hidden // 2), jnp.float32)
    params["embed_action2_w"] = normal((num_locations, hidden // 2))
    params["embed_action2_b"] = jnp.zeros((1, hidden // 2), jnp.float32)
    params["ln_gamma"] = jnp.ones((1, hidden), jnp.float32)
    params["ln_beta"] = jnp.zeros((1, hidden), jnp.float32)

    params["lstm_wih"] = normal((num_lstm_layers, hidden, 4 * hidden))
    params["lstm_whh"] = normal((num_lstm_layers, hidden, 4 * hidden))
    params["lstm_b"] = jnp.zeros((num_lstm_layers, 1, 4 * hidden), jnp.float32)
    params["lstm_out_w"] = normal((hidden, hidden))
    params["lstm_out_b"] = jnp.zeros((1, hidden), jnp.float32)

    params["mapper_w"] = normal((hidden, num_locations * num_actions))
    params["mapper_b"] = jnp.zeros((1, num_locations * num_actions), jnp.float32)
    return params


def pack_params(params, *, hidden, heads, num_locations):
    """Fold module params into the fused-kernel layout (bf16 MXU weights, f32 biases)."""
    HH = heads * hidden
    L = num_locations
    half = hidden // 2

    # GAT: per layer W_ext = [W | W @ A] where A stacks per-head a_src / a_dst.
    w_gat, b_gat = [], []
    for layer in params["gat"]:
        w = layer["w"]                                 # (Din, HH)
        a_src = layer["a_src"][..., 0]                 # (heads, hidden)
        a_dst = layer["a_dst"][..., 0]
        A = jnp.zeros((HH, 2 * heads), jnp.float32)
        for hd in range(heads):
            A = A.at[hd * hidden:(hd + 1) * hidden, hd].set(a_src[hd])
            A = A.at[hd * hidden:(hd + 1) * hidden, heads + hd].set(a_dst[hd])
        w_ext = jnp.concatenate([w, w @ A], axis=1)    # (Din, HH + 2*heads)
        din = w_ext.shape[0]
        if din < HH:                                   # zero-pad rows so layers stack
            w_ext = jnp.pad(w_ext, ((0, HH - din), (0, 0)))
        w_gat.append(w_ext)
        b_gat.append(layer["b"])

    # Embeddings: one block-structured (1+HH+2L, 3*hidden) matrix,
    # input layout [rtg | graph_emb | a1 | a2], output layout [ret | state | act].
    e_in = 1 + HH + 2 * L
    w_emb = jnp.zeros((e_in, 3 * hidden), jnp.float32)
    w_emb = w_emb.at[0:1, 0:hidden].set(params["embed_return_w"])
    w_emb = w_emb.at[1:1 + HH, hidden:2 * hidden].set(params["embed_state_w"])
    w_emb = w_emb.at[1 + HH:1 + HH + L, 2 * hidden:2 * hidden + half].set(
        params["embed_action1_w"])
    w_emb = w_emb.at[1 + HH + L:1 + HH + 2 * L, 2 * hidden + half:3 * hidden].set(
        params["embed_action2_w"])
    b_emb = jnp.concatenate(
        [params["embed_return_b"], params["embed_state_b"],
         params["embed_action1_b"], params["embed_action2_b"]], axis=-1)

    # LSTM: fuse input/hidden weights so one matmul per layer-step.
    w_lstm = jnp.concatenate([params["lstm_wih"], params["lstm_whh"]], axis=1)

    return dict(
        w_gat=jnp.stack(w_gat).astype(jnp.bfloat16),      # (Lg, HH, HH+2*heads)
        b_gat=jnp.stack(b_gat),                           # (Lg, 1, HH)
        w_emb=w_emb.astype(jnp.bfloat16),                 # (1+HH+2L, 3H)
        b_emb=b_emb,                                      # (1, 3H)
        ln_g=params["ln_gamma"], ln_b=params["ln_beta"],
        w_lstm=w_lstm.astype(jnp.bfloat16),               # (Ll, 2H, 4H)
        b_lstm=params["lstm_b"],                          # (Ll, 1, 4H)
        w_out=params["lstm_out_w"].astype(jnp.bfloat16),
        b_out=params["lstm_out_b"],
        w_map=params["mapper_w"].astype(jnp.bfloat16),
        b_map=params["mapper_b"],
    )


# ----------------------------------------------------------------------------
# Forward pass wrapper (light glue in JAX, all heavy work in one pallas_call)
# ----------------------------------------------------------------------------

@functools.partial(jax.jit, static_argnames=("B", "T", "hidden", "heads", "num_locations"))
def recurrent_decision_forward(params, node_feat, node_labels, adj,
                               actions, returns_to_go, timesteps, attention_mask,
                               *, B, T, hidden, heads, num_locations):
    # timesteps / attention_mask are unused by the reference forward pass.
    del timesteps, attention_mask

    N = node_feat.shape[0]
    Npb = N // B                      # nodes per batch element
    npg = Npb // T                    # nodes per graph
    HH = heads * hidden
    L = num_locations

    # node-type embedding concat, zero-padded to HH so all GAT layers share one shape.
    type_emb = jnp.take(params["type_emb"], node_labels, axis=0)
    h0 = jnp.concatenate([node_feat, type_emb], axis=-1).astype(jnp.float32)
    din = h0.shape[-1]
    assert din <= HH, "fused kernel assumes input_dim + emb_dim <= heads*hidden"
    h0 = jnp.pad(h0, ((0, 0), (0, HH - din)))
    h0_b = h0.reshape(B, Npb, HH)

    # per-batch block-diagonal adjacency (graph batching => no cross-batch edges).
    adj4 = adj.reshape(B, Npb, B, Npb)
    adj_b = jnp.stack([adj4[b, :, b, :] for b in range(B)], axis=0)       # (B, Npb, Npb)

    # location-mean aggregation matrix: agg[b, t, n] = [label!=0 & node n in graph t]/count.
    lbl = (node_labels != 0).astype(jnp.float32).reshape(B, Npb)
    graph_id = jnp.arange(Npb, dtype=jnp.int32) // npg
    member = (graph_id[None, :] == jnp.arange(T, dtype=jnp.int32)[:, None]).astype(jnp.float32)
    sel = member[None, :, :] * lbl[:, None, :]                            # (B, T, Npb)
    agg = sel / jnp.maximum(jnp.sum(sel, axis=-1, keepdims=True), 1.0)

    # actions / returns glue
    actions = jnp.where(actions == -1, 0, actions).astype(jnp.int32)
    ohe = jax.nn.one_hot(actions, L, dtype=jnp.float32)                   # (B, T, 2, L)
    a1 = ohe[:, :, 0, :]
    a2 = ohe[:, :, 1, :]
    rtg = returns_to_go.reshape(B, T, 1).astype(jnp.float32)

    packed = pack_params(params, hidden=hidden, heads=heads, num_locations=L)
    num_gat_layers = len(params["gat"])
    num_lstm_layers = params["lstm_wih"].shape[0]

    kernel = functools.partial(
        fused_forward_kernel,
        heads=heads, hidden=hidden, num_gat_layers=num_gat_layers,
        T=T, num_lstm_layers=num_lstm_layers)

    def batch_spec(arr):
        nd = arr.ndim
        return pl.BlockSpec((1,) + arr.shape[1:],
                            lambda b, _nd=nd: (b,) + (0,) * (_nd - 1))

    def bcast_spec(arr):
        nd = arr.ndim
        return pl.BlockSpec(arr.shape, lambda b, _nd=nd: (0,) * _nd)

    data_inputs = (h0_b, adj_b, agg, rtg, a1, a2)
    weight_inputs = (packed["w_gat"], packed["b_gat"], packed["w_emb"], packed["b_emb"],
                     packed["ln_g"], packed["ln_b"], packed["w_lstm"], packed["b_lstm"],
                     packed["w_out"], packed["b_out"], packed["w_map"], packed["b_map"])

    logits = pl.pallas_call(
        kernel,
        out_shape=jax.ShapeDtypeStruct((B, 1, 2 * L), jnp.float32),
        grid=(B,),
        in_specs=[batch_spec(x) for x in data_inputs]
                 + [bcast_spec(w) for w in weight_inputs],
        out_specs=pl.BlockSpec((1, 1, 2 * L), lambda b: (b, 0, 0)),
        compiler_params=pltpu.CompilerParams(
            dimension_semantics=("parallel",),          # shard batch across TCs (v7x)
            vmem_limit_bytes=32 * 1024 * 1024),         # well above actual footprint
    )(*data_inputs, *weight_inputs)

    logits = logits.reshape(B, L, 2)
    add_vals = logits[..., 0]
    remove_vals = logits[..., 1]
    return add_vals, remove_vals


# ----------------------------------------------------------------------------
# Driver
# ----------------------------------------------------------------------------

if __name__ == "__main__":
    B, T = 2, 4
    input_dim = 6
    node_type_embedding_dim = 8
    hidden_dim = 32
    num_lstm_layers = 3
    num_locations = 8
    num_gat_heads = 2
    num_actions = 2

    nodes_per_graph = num_locations + 4          # 8 location nodes + 4 other nodes per graph
    num_graphs = B * T
    N = num_graphs * nodes_per_graph             # 96 nodes total

    key = jax.random.PRNGKey(0)
    k_param, k_feat, k_act, k_rtg = jax.random.split(key, 4)

    params = init_params(
        k_param, input_dim=input_dim, emb_dim=node_type_embedding_dim,
        hidden=hidden_dim, heads=num_gat_heads, num_layers_gat=4,
        num_lstm_layers=num_lstm_layers, num_locations=num_locations,
        num_actions=num_actions)

    # Synthetic graph batch: per-graph ring adjacency + self loops (block diagonal).
    node_feat = jax.random.normal(k_feat, (N, input_dim), dtype=jnp.float32)
    node_labels = jnp.tile(
        jnp.concatenate([jnp.ones((num_locations,), jnp.int32),
                         jnp.zeros((nodes_per_graph - num_locations,), jnp.int32)]),
        num_graphs)
    eye = jnp.eye(nodes_per_graph, dtype=jnp.float32)
    ring = jnp.roll(eye, 1, axis=1) + jnp.roll(eye, -1, axis=1)
    block = jnp.clip(eye + ring, 0.0, 1.0)
    adj = jnp.kron(jnp.eye(num_graphs, dtype=jnp.float32), block)         # (N, N)

    actions = jax.random.randint(k_act, (B, T, 2), -1, num_locations, dtype=jnp.int32)
    returns_to_go = jax.random.normal(k_rtg, (B, T, 1), dtype=jnp.float32)
    timesteps = jnp.tile(jnp.arange(T, dtype=jnp.int32)[None, :], (B, 1))
    attention_mask = jnp.ones((B, 3 * T), dtype=jnp.float32)

    add_vals, remove_vals = recurrent_decision_forward(
        params, node_feat, node_labels, adj, actions, returns_to_go,
        timesteps, attention_mask,
        B=B, T=T, hidden=hidden_dim, heads=num_gat_heads,
        num_locations=num_locations)

    jax.block_until_ready((add_vals, remove_vals))
    assert add_vals.shape == (B, num_locations) and remove_vals.shape == (B, num_locations)
    print("KERNEL_OK")
</pallas_src>

<mosaic_0001>
module attributes {stable_mosaic.version = 11 : i64} {
  func.func @fused_forward_kernel(%arg0: i32, %arg1: memref<1x48x64xf32, #tpu.memory_space<vmem>>, %arg2: memref<1x48x48xf32, #tpu.memory_space<vmem>>, %arg3: memref<1x4x48xf32, #tpu.memory_space<vmem>>, %arg4: memref<1x4x1xf32, #tpu.memory_space<vmem>>, %arg5: memref<1x4x8xf32, #tpu.memory_space<vmem>>, %arg6: memref<1x4x8xf32, #tpu.memory_space<vmem>>, %arg7: memref<4x64x68xbf16, #tpu.memory_space<vmem>>, %arg8: memref<4x1x64xf32, #tpu.memory_space<vmem>>, %arg9: memref<81x96xbf16, #tpu.memory_space<vmem>>, %arg10: memref<1x96xf32, #tpu.memory_space<vmem>>, %arg11: memref<1x32xf32, #tpu.memory_space<vmem>>, %arg12: memref<1x32xf32, #tpu.memory_space<vmem>>, %arg13: memref<3x64x128xbf16, #tpu.memory_space<vmem>>, %arg14: memref<3x1x128xf32, #tpu.memory_space<vmem>>, %arg15: memref<32x32xbf16, #tpu.memory_space<vmem>>, %arg16: memref<1x32xf32, #tpu.memory_space<vmem>>, %arg17: memref<32x16xbf16, #tpu.memory_space<vmem>>, %arg18: memref<1x16xf32, #tpu.memory_space<vmem>>, %arg19: memref<1x1x16xf32, #tpu.memory_space<vmem>>) attributes {dimension_semantics = [#tpu.dimension_semantics<parallel>], iteration_bounds = array<i64: 2>, scalar_prefetch = 0 : i64, scratch_operands = 0 : i64, tpu.core_type = #tpu.core_type<tc>, window_params = [{transform_indices = @transform_0, window_bounds = array<i64: 1, 48, 64>}, {transform_indices = @transform_1, window_bounds = array<i64: 1, 48, 48>}, {transform_indices = @transform_2, window_bounds = array<i64: 1, 4, 48>}, {transform_indices = @transform_3, window_bounds = array<i64: 1, 4, 1>}, {transform_indices = @transform_4, window_bounds = array<i64: 1, 4, 8>}, {transform_indices = @transform_5, window_bounds = array<i64: 1, 4, 8>}, {pipeline_mode = #tpu.pipeline_mode<synchronous>, transform_indices = @transform_6, window_bounds = array<i64: 4, 64, 68>}, {pipeline_mode = #tpu.pipeline_mode<synchronous>, transform_indices = @transform_7, window_bounds = array<i64: 4, 1, 64>}, {pipeline_mode = #tpu.pipeline_mode<synchronous>, transform_indices = @transform_8, window_bounds = array<i64: 81, 96>}, {pipeline_mode = #tpu.pipeline_mode<synchronous>, transform_indices = @transform_9, window_bounds = array<i64: 1, 96>}, {pipeline_mode = #tpu.pipeline_mode<synchronous>, transform_indices = @transform_10, window_bounds = array<i64: 1, 32>}, {pipeline_mode = #tpu.pipeline_mode<synchronous>, transform_indices = @transform_11, window_bounds = array<i64: 1, 32>}, {pipeline_mode = #tpu.pipeline_mode<synchronous>, transform_indices = @transform_12, window_bounds = array<i64: 3, 64, 128>}, {pipeline_mode = #tpu.pipeline_mode<synchronous>, transform_indices = @transform_13, window_bounds = array<i64: 3, 1, 128>}, {pipeline_mode = #tpu.pipeline_mode<synchronous>, transform_indices = @transform_14, window_bounds = array<i64: 32, 32>}, {pipeline_mode = #tpu.pipeline_mode<synchronous>, transform_indices = @transform_15, window_bounds = array<i64: 1, 32>}, {pipeline_mode = #tpu.pipeline_mode<synchronous>, transform_indices = @transform_16, window_bounds = array<i64: 32, 16>}, {pipeline_mode = #tpu.pipeline_mode<synchronous>, transform_indices = @transform_17, window_bounds = array<i64: 1, 16>}, {transform_indices = @transform_18, window_bounds = array<i64: 1, 1, 16>}]} {
    %c0 = arith.constant 0 : index
    %c0_0 = arith.constant 0 : index
    %c0_1 = arith.constant 0 : index
    %0 = vector.load %arg2[%c0, %c0_0, %c0_1] : memref<1x48x48xf32, #tpu.memory_space<vmem>>, vector<1x48x48xf32>
    %1 = vector.shape_cast %0 : vector<1x48x48xf32> to vector<48x48xf32>
    %c0_2 = arith.constant 0 : index
    %c0_3 = arith.constant 0 : index
    %c0_4 = arith.constant 0 : index
    %2 = vector.load %arg1[%c0_2, %c0_3, %c0_4] : memref<1x48x64xf32, #tpu.memory_space<vmem>>, vector<1x48x64xf32>
    %3 = vector.shape_cast %2 : vector<1x48x64xf32> to vector<48x64xf32>
    %c0_5 = arith.constant 0 : index
    %c0_6 = arith.constant 0 : index
    %c0_7 = arith.constant 0 : index
    %4 = vector.load %arg7[%c0_5, %c0_6, %c0_7] : memref<4x64x68xbf16, #tpu.memory_space<vmem>>, vector<1x64x68xbf16>
    %5 = vector.shape_cast %4 : vector<1x64x68xbf16> to vector<64x68xbf16>
    %6 = arith.truncf %3 : vector<48x64xf32> to vector<48x64xbf16>
    %cst = arith.constant dense<0.000000e+00> : vector<48x68xf32>
    %7 = tpu.matmul %6, %5, %cst {dimension_numbers = #tpu.dot_dimension_numbers<[1], [0], [0], [1], [0, 0, 1, 1], [], []>} : vector<48x64xbf16>, vector<64x68xbf16>, vector<48x68xf32> -> vector<48x68xf32>
    %8 = vector.extract_strided_slice %7 {offsets = [0, 0], sizes = [48, 64], strides = [1, 1]} : vector<48x68xf32> to vector<48x64xf32>
    %9 = vector.extract_strided_slice %7 {offsets = [0, 64], sizes = [48, 4], strides = [1, 1]} : vector<48x68xf32> to vector<48x4xf32>
    %10 = vector.extract_strided_slice %9 {offsets = [0, 0], sizes = [48, 1], strides = [1, 1]} : vector<48x4xf32> to vector<48x1xf32>
    %11 = vector.extract_strided_slice %9 {offsets = [0, 2], sizes = [48, 1], strides = [1, 1]} : vector<48x4xf32> to vector<48x1xf32>
    %12 = tpu.transpose %10, [1, 0] : vector<48x1xf32> -> vector<1x48xf32>
    %13 = vector.broadcast %11 : vector<48x1xf32> to vector<48x48xf32>
    %14 = vector.broadcast %12 : vector<1x48xf32> to vector<48x48xf32>
    %15 = arith.addf %13, %14 : vector<48x48xf32>
    %cst_8 = arith.constant 0.000000e+00 : f32
    %16 = vector.broadcast %cst_8 : f32 to vector<48x48xf32>
    %17 = arith.cmpf ogt, %15, %16 : vector<48x48xf32>
    %cst_9 = arith.constant 2.000000e-01 : f32
    %18 = vector.broadcast %cst_9 : f32 to vector<48x48xf32>
    %19 = arith.mulf %18, %15 : vector<48x48xf32>
    %20 = arith.select %17, %15, %19 : vector<48x48xi1>, vector<48x48xf32>
    %cst_10 = arith.constant 0.000000e+00 : f32
    %21 = vector.broadcast %cst_10 : f32 to vector<48x48xf32>
    %22 = arith.cmpf ogt, %1, %21 : vector<48x48xf32>
    %cst_11 = arith.constant -1.000000e+30 : f32
    %23 = vector.broadcast %cst_11 : f32 to vector<48x48xf32>
    %24 = arith.select %22, %20, %23 : vector<48x48xi1>, vector<48x48xf32>
    %cst_12 = arith.constant dense<0xFF800000> : vector<48xf32>
    %25 = vector.multi_reduction <maximumf>, %24, %cst_12 [1] : vector<48x48xf32> to vector<48xf32>
    %26 = vector.shape_cast %25 : vector<48xf32> to vector<48x1xf32>
    %27 = vector.broadcast %26 : vector<48x1xf32> to vector<48x48xf32>
    %28 = arith.subf %24, %27 : vector<48x48xf32>
    %29 = math.exp %28 : vector<48x48xf32>
    %cst_13 = arith.constant dense<0.000000e+00> : vector<48xf32>
    %30 = vector.multi_reduction <add>, %29, %cst_13 [1] : vector<48x48xf32> to vector<48xf32>
    %31 = vector.shape_cast %30 : vector<48xf32> to vector<48x1xf32>
    %32 = tpu.reciprocal %31 {approx = true} : vector<48x1xf32> -> vector<48x1xf32>
    %33 = vector.broadcast %32 : vector<48x1xf32> to vector<48x48xf32>
    %34 = arith.mulf %29, %33 : vector<48x48xf32>
    %35 = vector.extract_strided_slice %8 {offsets = [0, 0], sizes = [48, 32], strides = [1, 1]} : vector<48x64xf32> to vector<48x32xf32>
    %36 = arith.truncf %34 : vector<48x48xf32> to vector<48x48xbf16>
    %37 = arith.truncf %35 : vector<48x32xf32> to vector<48x32xbf16>
    %cst_14 = arith.constant dense<0.000000e+00> : vector<48x32xf32>
    %38 = tpu.matmul %36, %37, %cst_14 {dimension_numbers = #tpu.dot_dimension_numbers<[1], [0], [0], [1], [0, 0, 1, 1], [], []>} : vector<48x48xbf16>, vector<48x32xbf16>, vector<48x32xf32> -> vector<48x32xf32>
    %39 = vector.extract_strided_slice %9 {offsets = [0, 1], sizes = [48, 1], strides = [1, 1]} : vector<48x4xf32> to vector<48x1xf32>
    %40 = vector.extract_strided_slice %9 {offsets = [0, 3], sizes = [48, 1], strides = [1, 1]} : vector<48x4xf32> to vector<48x1xf32>
    %41 = tpu.transpose %39, [1, 0] : vector<48x1xf32> -> vector<1x48xf32>
    %42 = vector.broadcast %40 : vector<48x1xf32> to vector<48x48xf32>
    %43 = vector.broadcast %41 : vector<1x48xf32> to vector<48x48xf32>
    %44 = arith.addf %42, %43 : vector<48x48xf32>
    %cst_15 = arith.constant 0.000000e+00 : f32
    %45 = vector.broadcast %cst_15 : f32 to vector<48x48xf32>
    %46 = arith.cmpf ogt, %44, %45 : vector<48x48xf32>
    %cst_16 = arith.constant 2.000000e-01 : f32
    %47 = vector.broadcast %cst_16 : f32 to vector<48x48xf32>
    %48 = arith.mulf %47, %44 : vector<48x48xf32>
    %49 = arith.select %46, %44, %48 : vector<48x48xi1>, vector<48x48xf32>
    %cst_17 = arith.constant 0.000000e+00 : f32
    %50 = vector.broadcast %cst_17 : f32 to vector<48x48xf32>
    %51 = arith.cmpf ogt, %1, %50 : vector<48x48xf32>
    %cst_18 = arith.constant -1.000000e+30 : f32
    %52 = vector.broadcast %cst_18 : f32 to vector<48x48xf32>
    %53 = arith.select %51, %49, %52 : vector<48x48xi1>, vector<48x48xf32>
    %cst_19 = arith.constant dense<0xFF800000> : vector<48xf32>
    %54 = vector.multi_reduction <maximumf>, %53, %cst_19 [1] : vector<48x48xf32> to vector<48xf32>
    %55 = vector.shape_cast %54 : vector<48xf32> to vector<48x1xf32>
    %56 = vector.broadcast %55 : vector<48x1xf32> to vector<48x48xf32>
    %57 = arith.subf %53, %56 : vector<48x48xf32>
    %58 = math.exp %57 : vector<48x48xf32>
    %cst_20 = arith.constant dense<0.000000e+00> : vector<48xf32>
    %59 = vector.multi_reduction <add>, %58, %cst_20 [1] : vector<48x48xf32> to vector<48xf32>
    %60 = vector.shape_cast %59 : vector<48xf32> to vector<48x1xf32>
    %61 = tpu.reciprocal %60 {approx = true} : vector<48x1xf32> -> vector<48x1xf32>
    %62 = vector.broadcast %61 : vector<48x1xf32> to vector<48x48xf32>
    %63 = arith.mulf %58, %62 : vector<48x48xf32>
    %64 = vector.extract_strided_slice %8 {offsets = [0, 32], sizes = [48, 32], strides = [1, 1]} : vector<48x64xf32> to vector<48x32xf32>
    %65 = arith.truncf %63 : vector<48x48xf32> to vector<48x48xbf16>
    %66 = arith.truncf %64 : vector<48x32xf32> to vector<48x32xbf16>
    %cst_21 = arith.constant dense<0.000000e+00> : vector<48x32xf32>
    %67 = tpu.matmul %65, %66, %cst_21 {dimension_numbers = #tpu.dot_dimension_numbers<[1], [0], [0], [1], [0, 0, 1, 1], [], []>} : vector<48x48xbf16>, vector<48x32xbf16>, vector<48x32xf32> -> vector<48x32xf32>
    %68 = tpu.concatenate %38, %67 in 1 : vector<48x32xf32>, vector<48x32xf32> -> vector<48x64xf32>
    %c0_22 = arith.constant 0 : index
    %c0_23 = arith.constant 0 : index
    %c0_24 = arith.constant 0 : index
    %69 = vector.load %arg8[%c0_22, %c0_23, %c0_24] : memref<4x1x64xf32, #tpu.memory_space<vmem>>, vector<1x1x64xf32>
    %70 = vector.shape_cast %69 : vector<1x1x64xf32> to vector<1x64xf32>
    %71 = vector.broadcast %70 : vector<1x64xf32> to vector<48x64xf32>
    %72 = arith.addf %68, %71 : vector<48x64xf32>
    %cst_25 = arith.constant 0.000000e+00 : f32
    %73 = vector.broadcast %cst_25 : f32 to vector<48x64xf32>
    %74 = arith.cmpf ogt, %72, %73 : vector<48x64xf32>
    %cst_26 = arith.constant 0.000000e+00 : f32
    %75 = vector.broadcast %cst_26 : f32 to vector<48x64xf32>
    %76 = arith.minimumf %72, %75 : vector<48x64xf32>
    %77 = math.exp %76 : vector<48x64xf32>
    %cst_27 = arith.constant 1.000000e+00 : f32
    %78 = vector.broadcast %cst_27 : f32 to vector<48x64xf32>
    %79 = arith.subf %77, %78 : vector<48x64xf32>
    %80 = arith.select %74, %72, %79 : vector<48x64xi1>, vector<48x64xf32>
    %c1 = arith.constant 1 : index
    %c0_28 = arith.constant 0 : index
    %c0_29 = arith.constant 0 : index
    %81 = vector.load %arg7[%c1, %c0_28, %c0_29] : memref<4x64x68xbf16, #tpu.memory_space<vmem>>, vector<1x64x68xbf16>
    %82 = vector.shape_cast %81 : vector<1x64x68xbf16> to vector<64x68xbf16>
    %83 = arith.truncf %80 : vector<48x64xf32> to vector<48x64xbf16>
    %cst_30 = arith.constant dense<0.000000e+00> : vector<48x68xf32>
    %84 = tpu.matmul %83, %82, %cst_30 {dimension_numbers = #tpu.dot_dimension_numbers<[1], [0], [0], [1], [0, 0, 1, 1], [], []>} : vector<48x64xbf16>, vector<64x68xbf16>, vector<48x68xf32> -> vector<48x68xf32>
    %85 = vector.extract_strided_slice %84 {offsets = [0, 0], sizes = [48, 64], strides = [1, 1]} : vector<48x68xf32> to vector<48x64xf32>
    %86 = vector.extract_strided_slice %84 {offsets = [0, 64], sizes = [48, 4], strides = [1, 1]} : vector<48x68xf32> to vector<48x4xf32>
    %87 = vector.extract_strided_slice %86 {offsets = [0, 0], sizes = [48, 1], strides = [1, 1]} : vector<48x4xf32> to vector<48x1xf32>
    %88 = vector.extract_strided_slice %86 {offsets = [0, 2], sizes = [48, 1], strides = [1, 1]} : vector<48x4xf32> to vector<48x1xf32>
    %89 = tpu.transpose %87, [1, 0] : vector<48x1xf32> -> vector<1x48xf32>
    %90 = vector.broadcast %88 : vector<48x1xf32> to vector<48x48xf32>
    %91 = vector.broadcast %89 : vector<1x48xf32> to vector<48x48xf32>
    %92 = arith.addf %90, %91 : vector<48x48xf32>
    %cst_31 = arith.constant 0.000000e+00 : f32
    %93 = vector.broadcast %cst_31 : f32 to vector<48x48xf32>
    %94 = arith.cmpf ogt, %92, %93 : vector<48x48xf32>
    %cst_32 = arith.constant 2.000000e-01 : f32
    %95 = vector.broadcast %cst_32 : f32 to vector<48x48xf32>
    %96 = arith.mulf %95, %92 : vector<48x48xf32>
    %97 = arith.select %94, %92, %96 : vector<48x48xi1>, vector<48x48xf32>
    %cst_33 = arith.constant 0.000000e+00 : f32
    %98 = vector.broadcast %cst_33 : f32 to vector<48x48xf32>
    %99 = arith.cmpf ogt, %1, %98 : vector<48x48xf32>
    %cst_34 = arith.constant -1.000000e+30 : f32
    %100 = vector.broadcast %cst_34 : f32 to vector<48x48xf32>
    %101 = arith.select %99, %97, %100 : vector<48x48xi1>, vector<48x48xf32>
    %cst_35 = arith.constant dense<0xFF800000> : vector<48xf32>
    %102 = vector.multi_reduction <maximumf>, %101, %cst_35 [1] : vector<48x48xf32> to vector<48xf32>
    %103 = vector.shape_cast %102 : vector<48xf32> to vector<48x1xf32>
    %104 = vector.broadcast %103 : vector<48x1xf32> to vector<48x48xf32>
    %105 = arith.subf %101, %104 : vector<48x48xf32>
    %106 = math.exp %105 : vector<48x48xf32>
    %cst_36 = arith.constant dense<0.000000e+00> : vector<48xf32>
    %107 = vector.multi_reduction <add>, %106, %cst_36 [1] : vector<48x48xf32> to vector<48xf32>
    %108 = vector.shape_cast %107 : vector<48xf32> to vector<48x1xf32>
    %109 = tpu.reciprocal %108 {approx = true} : vector<48x1xf32> -> vector<48x1xf32>
    %110 = vector.broadcast %109 : vector<48x1xf32> to vector<48x48xf32>
    %111 = arith.mulf %106, %110 : vector<48x48xf32>
    %112 = vector.extract_strided_slice %85 {offsets = [0, 0], sizes = [48, 32], strides = [1, 1]} : vector<48x64xf32> to vector<48x32xf32>
    %113 = arith.truncf %111 : vector<48x48xf32> to vector<48x48xbf16>
    %114 = arith.truncf %112 : vector<48x32xf32> to vector<48x32xbf16>
    %cst_37 = arith.constant dense<0.000000e+00> : vector<48x32xf32>
    %115 = tpu.matmul %113, %114, %cst_37 {dimension_numbers = #tpu.dot_dimension_numbers<[1], [0], [0], [1], [0, 0, 1, 1], [], []>} : vector<48x48xbf16>, vector<48x32xbf16>, vector<48x32xf32> -> vector<48x32xf32>
    %116 = vector.extract_strided_slice %86 {offsets = [0, 1], sizes = [48, 1], strides = [1, 1]} : vector<48x4xf32> to vector<48x1xf32>
    %117 = vector.extract_strided_slice %86 {offsets = [0, 3], sizes = [48, 1], strides = [1, 1]} : vector<48x4xf32> to vector<48x1xf32>
    %118 = tpu.transpose %116, [1, 0] : vector<48x1xf32> -> vector<1x48xf32>
    %119 = vector.broadcast %117 : vector<48x1xf32> to vector<48x48xf32>
    %120 = vector.broadcast %118 : vector<1x48xf32> to vector<48x48xf32>
    %121 = arith.addf %119, %120 : vector<48x48xf32>
    %cst_38 = arith.constant 0.000000e+00 : f32
    %122 = vector.broadcast %cst_38 : f32 to vector<48x48xf32>
    %123 = arith.cmpf ogt, %121, %122 : vector<48x48xf32>
    %cst_39 = arith.constant 2.000000e-01 : f32
    %124 = vector.broadcast %cst_39 : f32 to vector<48x48xf32>
    %125 = arith.mulf %124, %121 : vector<48x48xf32>
    %126 = arith.select %123, %121, %125 : vector<48x48xi1>, vector<48x48xf32>
    %cst_40 = arith.constant 0.000000e+00 : f32
    %127 = vector.broadcast %cst_40 : f32 to vector<48x48xf32>
    %128 = arith.cmpf ogt, %1, %127 : vector<48x48xf32>
    %cst_41 = arith.constant -1.000000e+30 : f32
    %129 = vector.broadcast %cst_41 : f32 to vector<48x48xf32>
    %130 = arith.select %128, %126, %129 : vector<48x48xi1>, vector<48x48xf32>
    %cst_42 = arith.constant dense<0xFF800000> : vector<48xf32>
    %131 = vector.multi_reduction <maximumf>, %130, %cst_42 [1] : vector<48x48xf32> to vector<48xf32>
    %132 = vector.shape_cast %131 : vector<48xf32> to vector<48x1xf32>
    %133 = vector.broadcast %132 : vector<48x1xf32> to vector<48x48xf32>
    %134 = arith.subf %130, %133 : vector<48x48xf32>
    %135 = math.exp %134 : vector<48x48xf32>
    %cst_43 = arith.constant dense<0.000000e+00> : vector<48xf32>
    %136 = vector.multi_reduction <add>, %135, %cst_43 [1] : vector<48x48xf32> to vector<48xf32>
    %137 = vector.shape_cast %136 : vector<48xf32> to vector<48x1xf32>
    %138 = tpu.reciprocal %137 {approx = true} : vector<48x1xf32> -> vector<48x1xf32>
    %139 = vector.broadcast %138 : vector<48x1xf32> to vector<48x48xf32>
    %140 = arith.mulf %135, %139 : vector<48x48xf32>
    %141 = vector.extract_strided_slice %85 {offsets = [0, 32], sizes = [48, 32], strides = [1, 1]} : vector<48x64xf32> to vector<48x32xf32>
    %142 = arith.truncf %140 : vector<48x48xf32> to vector<48x48xbf16>
    %143 = arith.truncf %141 : vector<48x32xf32> to vector<48x32xbf16>
    %cst_44 = arith.constant dense<0.000000e+00> : vector<48x32xf32>
    %144 = tpu.matmul %142, %143, %cst_44 {dimension_numbers = #tpu.dot_dimension_numbers<[1], [0], [0], [1], [0, 0, 1, 1], [], []>} : vector<48x48xbf16>, vector<48x32xbf16>, vector<48x32xf32> -> vector<48x32xf32>
    %145 = tpu.concatenate %115, %144 in 1 : vector<48x32xf32>, vector<48x32xf32> -> vector<48x64xf32>
    %c1_45 = arith.constant 1 : index
    %c0_46 = arith.constant 0 : index
    %c0_47 = arith.constant 0 : index
    %146 = vector.load %arg8[%c1_45, %c0_46, %c0_47] : memref<4x1x64xf32, #tpu.memory_space<vmem>>, vector<1x1x64xf32>
    %147 = vector.shape_cast %146 : vector<1x1x64xf32> to vector<1x64xf32>
    %148 = vector.broadcast %147 : vector<1x64xf32> to vector<48x64xf32>
    %149 = arith.addf %145, %148 : vector<48x64xf32>
    %cst_48 = arith.constant 0.000000e+00 : f32
    %150 = vector.broadcast %cst_48 : f32 to vector<48x64xf32>
    %151 = arith.cmpf ogt, %149, %150 : vector<48x64xf32>
    %cst_49 = arith.constant 0.000000e+00 : f32
    %152 = vector.broadcast %cst_49 : f32 to vector<48x64xf32>
    %153 = arith.minimumf %149, %152 : vector<48x64xf32>
    %154 = math.exp %153 : vector<48x64xf32>
    %cst_50 = arith.constant 1.000000e+00 : f32
    %155 = vector.broadcast %cst_50 : f32 to vector<48x64xf32>
    %156 = arith.subf %154, %155 : vector<48x64xf32>
    %157 = arith.select %151, %149, %156 : vector<48x64xi1>, vector<48x64xf32>
    %c2 = arith.constant 2 : index
    %c0_51 = arith.constant 0 : index
    %c0_52 = arith.constant 0 : index
    %158 = vector.load %arg7[%c2, %c0_51, %c0_52] : memref<4x64x68xbf16, #tpu.memory_space<vmem>>, vector<1x64x68xbf16>
    %159 = vector.shape_cast %158 : vector<1x64x68xbf16> to vector<64x68xbf16>
    %160 = arith.truncf %157 : vector<48x64xf32> to vector<48x64xbf16>
    %cst_53 = arith.constant dense<0.000000e+00> : vector<48x68xf32>
    %161 = tpu.matmul %160, %159, %cst_53 {dimension_numbers = #tpu.dot_dimension_numbers<[1], [0], [0], [1], [0, 0, 1, 1], [], []>} : vector<48x64xbf16>, vector<64x68xbf16>, vector<48x68xf32> -> vector<48x68xf32>
    %162 = vector.extract_strided_slice %161 {offsets = [0, 0], sizes = [48, 64], strides = [1, 1]} : vector<48x68xf32> to vector<48x64xf32>
    %163 = vector.extract_strided_slice %161 {offsets = [0, 64], sizes = [48, 4], strides = [1, 1]} : vector<48x68xf32> to vector<48x4xf32>
    %164 = vector.extract_strided_slice %163 {offsets = [0, 0], sizes = [48, 1], strides = [1, 1]} : vector<48x4xf32> to vector<48x1xf32>
    %165 = vector.extract_strided_slice %163 {offsets = [0, 2], sizes = [48, 1], strides = [1, 1]} : vector<48x4xf32> to vector<48x1xf32>
    %166 = tpu.transpose %164, [1, 0] : vector<48x1xf32> -> vector<1x48xf32>
    %167 = vector.broadcast %165 : vector<48x1xf32> to vector<48x48xf32>
    %168 = vector.broadcast %166 : vector<1x48xf32> to vector<48x48xf32>
    %169 = arith.addf %167, %168 : vector<48x48xf32>
    %cst_54 = arith.constant 0.000000e+00 : f32
    %170 = vector.broadcast %cst_54 : f32 to vector<48x48xf32>
    %171 = arith.cmpf ogt, %169, %170 : vector<48x48xf32>
    %cst_55 = arith.constant 2.000000e-01 : f32
    %172 = vector.broadcast %cst_55 : f32 to vector<48x48xf32>
    %173 = arith.mulf %172, %169 : vector<48x48xf32>
    %174 = arith.select %171, %169, %173 : vector<48x48xi1>, vector<48x48xf32>
    %cst_56 = arith.constant 0.000000e+00 : f32
    %175 = vector.broadcast %cst_56 : f32 to vector<48x48xf32>
    %176 = arith.cmpf ogt, %1, %175 : vector<48x48xf32>
    %cst_57 = arith.constant -1.000000e+30 : f32
    %177 = vector.broadcast %cst_57 : f32 to vector<48x48xf32>
    %178 = arith.select %176, %174, %177 : vector<48x48xi1>, vector<48x48xf32>
    %cst_58 = arith.constant dense<0xFF800000> : vector<48xf32>
    %179 = vector.multi_reduction <maximumf>, %178, %cst_58 [1] : vector<48x48xf32> to vector<48xf32>
    %180 = vector.shape_cast %179 : vector<48xf32> to vector<48x1xf32>
    %181 = vector.broadcast %180 : vector<48x1xf32> to vector<48x48xf32>
    %182 = arith.subf %178, %181 : vector<48x48xf32>
    %183 = math.exp %182 : vector<48x48xf32>
    %cst_59 = arith.constant dense<0.000000e+00> : vector<48xf32>
    %184 = vector.multi_reduction <add>, %183, %cst_59 [1] : vector<48x48xf32> to vector<48xf32>
    %185 = vector.shape_cast %184 : vector<48xf32> to vector<48x1xf32>
    %186 = tpu.reciprocal %185 {approx = true} : vector<48x1xf32> -> vector<48x1xf32>
    %187 = vector.broadcast %186 : vector<48x1xf32> to vector<48x48xf32>
    %188 = arith.mulf %183, %187 : vector<48x48xf32>
    %189 = vector.extract_strided_slice %162 {offsets = [0, 0], sizes = [48, 32], strides = [1, 1]} : vector<48x64xf32> to vector<48x32xf32>
    %190 = arith.truncf %188 : vector<48x48xf32> to vector<48x48xbf16>
    %191 = arith.truncf %189 : vector<48x32xf32> to vector<48x32xbf16>
    %cst_60 = arith.constant dense<0.000000e+00> : vector<48x32xf32>
    %192 = tpu.matmul %190, %191, %cst_60 {dimension_numbers = #tpu.dot_dimension_numbers<[1], [0], [0], [1], [0, 0, 1, 1], [], []>} : vector<48x48xbf16>, vector<48x32xbf16>, vector<48x32xf32> -> vector<48x32xf32>
    %193 = vector.extract_strided_slice %163 {offsets = [0, 1], sizes = [48, 1], strides = [1, 1]} : vector<48x4xf32> to vector<48x1xf32>
    %194 = vector.extract_strided_slice %163 {offsets = [0, 3], sizes = [48, 1], strides = [1, 1]} : vector<48x4xf32> to vector<48x1xf32>
    %195 = tpu.transpose %193, [1, 0] : vector<48x1xf32> -> vector<1x48xf32>
    %196 = vector.broadcast %194 : vector<48x1xf32> to vector<48x48xf32>
    %197 = vector.broadcast %195 : vector<1x48xf32> to vector<48x48xf32>
    %198 = arith.addf %196, %197 : vector<48x48xf32>
    %cst_61 = arith.constant 0.000000e+00 : f32
    %199 = vector.broadcast %cst_61 : f32 to vector<48x48xf32>
    %200 = arith.cmpf ogt, %198, %199 : vector<48x48xf32>
    %cst_62 = arith.constant 2.000000e-01 : f32
    %201 = vector.broadcast %cst_62 : f32 to vector<48x48xf32>
    %202 = arith.mulf %201, %198 : vector<48x48xf32>
    %203 = arith.select %200, %198, %202 : vector<48x48xi1>, vector<48x48xf32>
    %cst_63 = arith.constant 0.000000e+00 : f32
    %204 = vector.broadcast %cst_63 : f32 to vector<48x48xf32>
    %205 = arith.cmpf ogt, %1, %204 : vector<48x48xf32>
    %cst_64 = arith.constant -1.000000e+30 : f32
    %206 = vector.broadcast %cst_64 : f32 to vector<48x48xf32>
    %207 = arith.select %205, %203, %206 : vector<48x48xi1>, vector<48x48xf32>
    %cst_65 = arith.constant dense<0xFF800000> : vector<48xf32>
    %208 = vector.multi_reduction <maximumf>, %207, %cst_65 [1] : vector<48x48xf32> to vector<48xf32>
    %209 = vector.shape_cast %208 : vector<48xf32> to vector<48x1xf32>
    %210 = vector.broadcast %209 : vector<48x1xf32> to vector<48x48xf32>
    %211 = arith.subf %207, %210 : vector<48x48xf32>
    %212 = math.exp %211 : vector<48x48xf32>
    %cst_66 = arith.constant dense<0.000000e+00> : vector<48xf32>
    %213 = vector.multi_reduction <add>, %212, %cst_66 [1] : vector<48x48xf32> to vector<48xf32>
    %214 = vector.shape_cast %213 : vector<48xf32> to vector<48x1xf32>
    %215 = tpu.reciprocal %214 {approx = true} : vector<48x1xf32> -> vector<48x1xf32>
    %216 = vector.broadcast %215 : vector<48x1xf32> to vector<48x48xf32>
    %217 = arith.mulf %212, %216 : vector<48x48xf32>
    %218 = vector.extract_strided_slice %162 {offsets = [0, 32], sizes = [48, 32], strides = [1, 1]} : vector<48x64xf32> to vector<48x32xf32>
    %219 = arith.truncf %217 : vector<48x48xf32> to vector<48x48xbf16>
    %220 = arith.truncf %218 : vector<48x32xf32> to vector<48x32xbf16>
    %cst_67 = arith.constant dense<0.000000e+00> : vector<48x32xf32>
    %221 = tpu.matmul %219, %220, %cst_67 {dimension_numbers = #tpu.dot_dimension_numbers<[1], [0], [0], [1], [0, 0, 1, 1], [], []>} : vector<48x48xbf16>, vector<48x32xbf16>, vector<48x32xf32> -> vector<48x32xf32>
    %222 = tpu.concatenate %192, %221 in 1 : vector<48x32xf32>, vector<48x32xf32> -> vector<48x64xf32>
    %c2_68 = arith.constant 2 : index
    %c0_69 = arith.constant 0 : index
    %c0_70 = arith.constant 0 : index
    %223 = vector.load %arg8[%c2_68, %c0_69, %c0_70] : memref<4x1x64xf32, #tpu.memory_space<vmem>>, vector<1x1x64xf32>
    %224 = vector.shape_cast %223 : vector<1x1x64xf32> to vector<1x64xf32>
    %225 = vector.broadcast %224 : vector<1x64xf32> to vector<48x64xf32>
    %226 = arith.addf %222, %225 : vector<48x64xf32>
    %cst_71 = arith.constant 0.000000e+00 : f32
    %227 = vector.broadcast %cst_71 : f32 to vector<48x64xf32>
    %228 = arith.cmpf ogt, %226, %227 : vector<48x64xf32>
    %cst_72 = arith.constant 0.000000e+00 : f32
    %229 = vector.broadcast %cst_72 : f32 to vector<48x64xf32>
    %230 = arith.minimumf %226, %229 : vector<48x64xf32>
    %231 = math.exp %230 : vector<48x64xf32>
    %cst_73 = arith.constant 1.000000e+00 : f32
    %232 = vector.broadcast %cst_73 : f32 to vector<48x64xf32>
    %233 = arith.subf %231, %232 : vector<48x64xf32>
    %234 = arith.select %228, %226, %233 : vector<48x64xi1>, vector<48x64xf32>
    %c3 = arith.constant 3 : index
    %c0_74 = arith.constant 0 : index
    %c0_75 = arith.constant 0 : index
    %235 = vector.load %arg7[%c3, %c0_74, %c0_75] : memref<4x64x68xbf16, #tpu.memory_space<vmem>>, vector<1x64x68xbf16>
    %236 = vector.shape_cast %235 : vector<1x64x68xbf16> to vector<64x68xbf16>
    %237 = arith.truncf %234 : vector<48x64xf32> to vector<48x64xbf16>
    %cst_76 = arith.constant dense<0.000000e+00> : vector<48x68xf32>
    %238 = tpu.matmul %237, %236, %cst_76 {dimension_numbers = #tpu.dot_dimension_numbers<[1], [0], [0], [1], [0, 0, 1, 1], [], []>} : vector<48x64xbf16>, vector<64x68xbf16>, vector<48x68xf32> -> vector<48x68xf32>
    %239 = vector.extract_strided_slice %238 {offsets = [0, 0], sizes = [48, 64], strides = [1, 1]} : vector<48x68xf32> to vector<48x64xf32>
    %240 = vector.extract_strided_slice %238 {offsets = [0, 64], sizes = [48, 4], strides = [1, 1]} : vector<48x68xf32> to vector<48x4xf32>
    %241 = vector.extract_strided_slice %240 {offsets = [0, 0], sizes = [48, 1], strides = [1, 1]} : vector<48x4xf32> to vector<48x1xf32>
    %242 = vector.extract_strided_slice %240 {offsets = [0, 2], sizes = [48, 1], strides = [1, 1]} : vector<48x4xf32> to vector<48x1xf32>
    %243 = tpu.transpose %241, [1, 0] : vector<48x1xf32> -> vector<1x48xf32>
    %244 = vector.broadcast %242 : vector<48x1xf32> to vector<48x48xf32>
    %245 = vector.broadcast %243 : vector<1x48xf32> to vector<48x48xf32>
    %246 = arith.addf %244, %245 : vector<48x48xf32>
    %cst_77 = arith.constant 0.000000e+00 : f32
    %247 = vector.broadcast %cst_77 : f32 to vector<48x48xf32>
    %248 = arith.cmpf ogt, %246, %247 : vector<48x48xf32>
    %cst_78 = arith.constant 2.000000e-01 : f32
    %249 = vector.broadcast %cst_78 : f32 to vector<48x48xf32>
    %250 = arith.mulf %249, %246 : vector<48x48xf32>
    %251 = arith.select %248, %246, %250 : vector<48x48xi1>, vector<48x48xf32>
    %cst_79 = arith.constant 0.000000e+00 : f32
    %252 = vector.broadcast %cst_79 : f32 to vector<48x48xf32>
    %253 = arith.cmpf ogt, %1, %252 : vector<48x48xf32>
    %cst_80 = arith.constant -1.000000e+30 : f32
    %254 = vector.broadcast %cst_80 : f32 to vector<48x48xf32>
    %255 = arith.select %253, %251, %254 : vector<48x48xi1>, vector<48x48xf32>
    %cst_81 = arith.constant dense<0xFF800000> : vector<48xf32>
    %256 = vector.multi_reduction <maximumf>, %255, %cst_81 [1] : vector<48x48xf32> to vector<48xf32>
    %257 = vector.shape_cast %256 : vector<48xf32> to vector<48x1xf32>
    %258 = vector.broadcast %257 : vector<48x1xf32> to vector<48x48xf32>
    %259 = arith.subf %255, %258 : vector<48x48xf32>
    %260 = math.exp %259 : vector<48x48xf32>
    %cst_82 = arith.constant dense<0.000000e+00> : vector<48xf32>
    %261 = vector.multi_reduction <add>, %260, %cst_82 [1] : vector<48x48xf32> to vector<48xf32>
    %262 = vector.shape_cast %261 : vector<48xf32> to vector<48x1xf32>
    %263 = tpu.reciprocal %262 {approx = true} : vector<48x1xf32> -> vector<48x1xf32>
    %264 = vector.broadcast %263 : vector<48x1xf32> to vector<48x48xf32>
    %265 = arith.mulf %260, %264 : vector<48x48xf32>
    %266 = vector.extract_strided_slice %239 {offsets = [0, 0], sizes = [48, 32], strides = [1, 1]} : vector<48x64xf32> to vector<48x32xf32>
    %267 = arith.truncf %265 : vector<48x48xf32> to vector<48x48xbf16>
    %268 = arith.truncf %266 : vector<48x32xf32> to vector<48x32xbf16>
    %cst_83 = arith.constant dense<0.000000e+00> : vector<48x32xf32>
    %269 = tpu.matmul %267, %268, %cst_83 {dimension_numbers = #tpu.dot_dimension_numbers<[1], [0], [0], [1], [0, 0, 1, 1], [], []>} : vector<48x48xbf16>, vector<48x32xbf16>, vector<48x32xf32> -> vector<48x32xf32>
    %270 = vector.extract_strided_slice %240 {offsets = [0, 1], sizes = [48, 1], strides = [1, 1]} : vector<48x4xf32> to vector<48x1xf32>
    %271 = vector.extract_strided_slice %240 {offsets = [0, 3], sizes = [48, 1], strides = [1, 1]} : vector<48x4xf32> to vector<48x1xf32>
    %272 = tpu.transpose %270, [1, 0] : vector<48x1xf32> -> vector<1x48xf32>
    %273 = vector.broadcast %271 : vector<48x1xf32> to vector<48x48xf32>
    %274 = vector.broadcast %272 : vector<1x48xf32> to vector<48x48xf32>
    %275 = arith.addf %273, %274 : vector<48x48xf32>
    %cst_84 = arith.constant 0.000000e+00 : f32
    %276 = vector.broadcast %cst_84 : f32 to vector<48x48xf32>
    %277 = arith.cmpf ogt, %275, %276 : vector<48x48xf32>
    %cst_85 = arith.constant 2.000000e-01 : f32
    %278 = vector.broadcast %cst_85 : f32 to vector<48x48xf32>
    %279 = arith.mulf %278, %275 : vector<48x48xf32>
    %280 = arith.select %277, %275, %279 : vector<48x48xi1>, vector<48x48xf32>
    %cst_86 = arith.constant 0.000000e+00 : f32
    %281 = vector.broadcast %cst_86 : f32 to vector<48x48xf32>
    %282 = arith.cmpf ogt, %1, %281 : vector<48x48xf32>
    %cst_87 = arith.constant -1.000000e+30 : f32
    %283 = vector.broadcast %cst_87 : f32 to vector<48x48xf32>
    %284 = arith.select %282, %280, %283 : vector<48x48xi1>, vector<48x48xf32>
    %cst_88 = arith.constant dense<0xFF800000> : vector<48xf32>
    %285 = vector.multi_reduction <maximumf>, %284, %cst_88 [1] : vector<48x48xf32> to vector<48xf32>
    %286 = vector.shape_cast %285 : vector<48xf32> to vector<48x1xf32>
    %287 = vector.broadcast %286 : vector<48x1xf32> to vector<48x48xf32>
    %288 = arith.subf %284, %287 : vector<48x48xf32>
    %289 = math.exp %288 : vector<48x48xf32>
    %cst_89 = arith.constant dense<0.000000e+00> : vector<48xf32>
    %290 = vector.multi_reduction <add>, %289, %cst_89 [1] : vector<48x48xf32> to vector<48xf32>
    %291 = vector.shape_cast %290 : vector<48xf32> to vector<48x1xf32>
    %292 = tpu.reciprocal %291 {approx = true} : vector<48x1xf32> -> vector<48x1xf32>
    %293 = vector.broadcast %292 : vector<48x1xf32> to vector<48x48xf32>
    %294 = arith.mulf %289, %293 : vector<48x48xf32>
    %295 = vector.extract_strided_slice %239 {offsets = [0, 32], sizes = [48, 32], strides = [1, 1]} : vector<48x64xf32> to vector<48x32xf32>
    %296 = arith.truncf %294 : vector<48x48xf32> to vector<48x48xbf16>
    %297 = arith.truncf %295 : vector<48x32xf32> to vector<48x32xbf16>
    %cst_90 = arith.constant dense<0.000000e+00> : vector<48x32xf32>
    %298 = tpu.matmul %296, %297, %cst_90 {dimension_numbers = #tpu.dot_dimension_numbers<[1], [0], [0], [1], [0, 0, 1, 1], [], []>} : vector<48x48xbf16>, vector<48x32xbf16>, vector<48x32xf32> -> vector<48x32xf32>
    %299 = tpu.concatenate %269, %298 in 1 : vector<48x32xf32>, vector<48x32xf32> -> vector<48x64xf32>
    %c3_91 = arith.constant 3 : index
    %c0_92 = arith.constant 0 : index
    %c0_93 = arith.constant 0 : index
    %300 = vector.load %arg8[%c3_91, %c0_92, %c0_93] : memref<4x1x64xf32, #tpu.memory_space<vmem>>, vector<1x1x64xf32>
    %301 = vector.shape_cast %300 : vector<1x1x64xf32> to vector<1x64xf32>
    %302 = vector.broadcast %301 : vector<1x64xf32> to vector<48x64xf32>
    %303 = arith.addf %299, %302 : vector<48x64xf32>
    %c0_94 = arith.constant 0 : index
    %c0_95 = arith.constant 0 : index
    %c0_96 = arith.constant 0 : index
    %304 = vector.load %arg3[%c0_94, %c0_95, %c0_96] : memref<1x4x48xf32, #tpu.memory_space<vmem>>, vector<1x4x48xf32>
    %305 = vector.shape_cast %304 : vector<1x4x48xf32> to vector<4x48xf32>
    %306 = arith.truncf %305 : vector<4x48xf32> to vector<4x48xbf16>
    %307 = arith.truncf %303 : vector<48x64xf32> to vector<48x64xbf16>
    %cst_97 = arith.constant dense<0.000000e+00> : vector<4x64xf32>
    %308 = tpu.matmul %306, %307, %cst_97 {dimension_numbers = #tpu.dot_dimension_numbers<[1], [0], [0], [1], [0, 0, 1, 1], [], []>} : vector<4x48xbf16>, vector<48x64xbf16>, vector<4x64xf32> -> vector<4x64xf32>
    %c0_98 = arith.constant 0 : index
    %c0_99 = arith.constant 0 : index
    %c0_100 = arith.constant 0 : index
    %309 = vector.load %arg4[%c0_98, %c0_99, %c0_100] : memref<1x4x1xf32, #tpu.memory_space<vmem>>, vector<1x4x1xf32>
    %310 = vector.shape_cast %309 : vector<1x4x1xf32> to vector<4x1xf32>
    %c0_101 = arith.constant 0 : index
    %c0_102 = arith.constant 0 : index
    %c0_103 = arith.constant 0 : index
    %311 = vector.load %arg5[%c0_101, %c0_102, %c0_103] : memref<1x4x8xf32, #tpu.memory_space<vmem>>, vector<1x4x8xf32>
    %312 = vector.shape_cast %311 : vector<1x4x8xf32> to vector<4x8xf32>
    %c0_104 = arith.constant 0 : index
    %c0_105 = arith.constant 0 : index
    %c0_106 = arith.constant 0 : index
    %313 = vector.load %arg6[%c0_104, %c0_105, %c0_106] : memref<1x4x8xf32, #tpu.memory_space<vmem>>, vector<1x4x8xf32>
    %314 = vector.shape_cast %313 : vector<1x4x8xf32> to vector<4x8xf32>
    %315 = tpu.concatenate %310, %308, %312, %314 in 1 : vector<4x1xf32>, vector<4x64xf32>, vector<4x8xf32>, vector<4x8xf32> -> vector<4x81xf32>
    %c0_107 = arith.constant 0 : index
    %c0_108 = arith.constant 0 : index
    %316 = vector.load %arg9[%c0_107, %c0_108] : memref<81x96xbf16, #tpu.memory_space<vmem>>, vector<81x96xbf16>
    %317 = arith.truncf %315 : vector<4x81xf32> to vector<4x81xbf16>
    %cst_109 = arith.constant dense<0.000000e+00> : vector<4x96xf32>
    %318 = tpu.matmul %317, %316, %cst_109 {dimension_numbers = #tpu.dot_dimension_numbers<[1], [0], [0], [1], [0, 0, 1, 1], [], []>} : vector<4x81xbf16>, vector<81x96xbf16>, vector<4x96xf32> -> vector<4x96xf32>
    %c0_110 = arith.constant 0 : index
    %c0_111 = arith.constant 0 : index
    %319 = vector.load %arg10[%c0_110, %c0_111] : memref<1x96xf32, #tpu.memory_space<vmem>>, vector<1x96xf32>
    %320 = vector.broadcast %319 : vector<1x96xf32> to vector<4x96xf32>
    %321 = arith.addf %318, %320 : vector<4x96xf32>
    %c0_112 = arith.constant 0 : index
    %c0_113 = arith.constant 0 : index
    %322 = vector.load %arg11[%c0_112, %c0_113] : memref<1x32xf32, #tpu.memory_space<vmem>>, vector<1x32xf32>
    %c0_114 = arith.constant 0 : index
    %c0_115 = arith.constant 0 : index
    %323 = vector.load %arg12[%c0_114, %c0_115] : memref<1x32xf32, #tpu.memory_space<vmem>>, vector<1x32xf32>
    %324 = vector.extract_strided_slice %321 {offsets = [0, 0], sizes = [4, 32], strides = [1, 1]} : vector<4x96xf32> to vector<4x32xf32>
    %cst_116 = arith.constant dense<0.000000e+00> : vector<4xf32>
    %325 = vector.multi_reduction <add>, %324, %cst_116 [1] : vector<4x32xf32> to vector<4xf32>
    %326 = vector.shape_cast %325 : vector<4xf32> to vector<4x1xf32>
    %cst_117 = arith.constant 3.200000e+01 : f32
    %327 = vector.broadcast %cst_117 : f32 to vector<4x1xf32>
    %328 = arith.divf %326, %327 : vector<4x1xf32>
    %329 = vector.broadcast %328 : vector<4x1xf32> to vector<4x32xf32>
    %330 = arith.subf %324, %329 : vector<4x32xf32>
    %331 = arith.mulf %330, %330 : vector<4x32xf32>
    %cst_118 = arith.constant dense<0.000000e+00> : vector<4xf32>
    %332 = vector.multi_reduction <add>, %331, %cst_118 [1] : vector<4x32xf32> to vector<4xf32>
    %333 = vector.shape_cast %332 : vector<4xf32> to vector<4x1xf32>
    %cst_119 = arith.constant 3.200000e+01 : f32
    %334 = vector.broadcast %cst_119 : f32 to vector<4x1xf32>
    %335 = arith.divf %333, %334 : vector<4x1xf32>
    %cst_120 = arith.constant 9.99999974E-6 : f32
    %336 = vector.broadcast %cst_120 : f32 to vector<4x1xf32>
    %337 = arith.addf %335, %336 : vector<4x1xf32>
    %338 = math.rsqrt %337 : vector<4x1xf32>
    %339 = vector.broadcast %338 : vector<4x1xf32> to vector<4x32xf32>
    %340 = arith.mulf %330, %339 : vector<4x32xf32>
    %341 = vector.broadcast %322 : vector<1x32xf32> to vector<4x32xf32>
    %342 = arith.mulf %340, %341 : vector<4x32xf32>
    %343 = vector.broadcast %323 : vector<1x32xf32> to vector<4x32xf32>
    %344 = arith.addf %342, %343 : vector<4x32xf32>
    %345 = vector.extract_strided_slice %321 {offsets = [0, 32], sizes = [4, 32], strides = [1, 1]} : vector<4x96xf32> to vector<4x32xf32>
    %cst_121 = arith.constant dense<0.000000e+00> : vector<4xf32>
    %346 = vector.multi_reduction <add>, %345, %cst_121 [1] : vector<4x32xf32> to vector<4xf32>
    %347 = vector.shape_cast %346 : vector<4xf32> to vector<4x1xf32>
    %cst_122 = arith.constant 3.200000e+01 : f32
    %348 = vector.broadcast %cst_122 : f32 to vector<4x1xf32>
    %349 = arith.divf %347, %348 : vector<4x1xf32>
    %350 = vector.broadcast %349 : vector<4x1xf32> to vector<4x32xf32>
    %351 = arith.subf %345, %350 : vector<4x32xf32>
    %352 = arith.mulf %351, %351 : vector<4x32xf32>
    %cst_123 = arith.constant dense<0.000000e+00> : vector<4xf32>
    %353 = vector.multi_reduction <add>, %352, %cst_123 [1] : vector<4x32xf32> to vector<4xf32>
    %354 = vector.shape_cast %353 : vector<4xf32> to vector<4x1xf32>
    %cst_124 = arith.constant 3.200000e+01 : f32
    %355 = vector.broadcast %cst_124 : f32 to vector<4x1xf32>
    %356 = arith.divf %354, %355 : vector<4x1xf32>
    %cst_125 = arith.constant 9.99999974E-6 : f32
    %357 = vector.broadcast %cst_125 : f32 to vector<4x1xf32>
    %358 = arith.addf %356, %357 : vector<4x1xf32>
    %359 = math.rsqrt %358 : vector<4x1xf32>
    %360 = vector.broadcast %359 : vector<4x1xf32> to vector<4x32xf32>
    %361 = arith.mulf %351, %360 : vector<4x32xf32>
    %362 = vector.broadcast %322 : vector<1x32xf32> to vector<4x32xf32>
    %363 = arith.mulf %361, %362 : vector<4x32xf32>
    %364 = vector.broadcast %323 : vector<1x32xf32> to vector<4x32xf32>
    %365 = arith.addf %363, %364 : vector<4x32xf32>
    %366 = vector.extract_strided_slice %321 {offsets = [0, 64], sizes = [4, 32], strides = [1, 1]} : vector<4x96xf32> to vector<4x32xf32>
    %cst_126 = arith.constant dense<0.000000e+00> : vector<4xf32>
    %367 = vector.multi_reduction <add>, %366, %cst_126 [1] : vector<4x32xf32> to vector<4xf32>
    %368 = vector.shape_cast %367 : vector<4xf32> to vector<4x1xf32>
    %cst_127 = arith.constant 3.200000e+01 : f32
    %369 = vector.broadcast %cst_127 : f32 to vector<4x1xf32>
    %370 = arith.divf %368, %369 : vector<4x1xf32>
    %371 = vector.broadcast %370 : vector<4x1xf32> to vector<4x32xf32>
    %372 = arith.subf %366, %371 : vector<4x32xf32>
    %373 = arith.mulf %372, %372 : vector<4x32xf32>
    %cst_128 = arith.constant dense<0.000000e+00> : vector<4xf32>
    %374 = vector.multi_reduction <add>, %373, %cst_128 [1] : vector<4x32xf32> to vector<4xf32>
    %375 = vector.shape_cast %374 : vector<4xf32> to vector<4x1xf32>
    %cst_129 = arith.constant 3.200000e+01 : f32
    %376 = vector.broadcast %cst_129 : f32 to vector<4x1xf32>
    %377 = arith.divf %375, %376 : vector<4x1xf32>
    %cst_130 = arith.constant 9.99999974E-6 : f32
    %378 = vector.broadcast %cst_130 : f32 to vector<4x1xf32>
    %379 = arith.addf %377, %378 : vector<4x1xf32>
    %380 = math.rsqrt %379 : vector<4x1xf32>
    %381 = vector.broadcast %380 : vector<4x1xf32> to vector<4x32xf32>
    %382 = arith.mulf %372, %381 : vector<4x32xf32>
    %383 = vector.broadcast %322 : vector<1x32xf32> to vector<4x32xf32>
    %384 = arith.mulf %382, %383 : vector<4x32xf32>
    %385 = vector.broadcast %323 : vector<1x32xf32> to vector<4x32xf32>
    %386 = arith.addf %384, %385 : vector<4x32xf32>
    %cst_131 = arith.constant 0.000000e+00 : f32
    %387 = vector.broadcast %cst_131 : f32 to vector<1x32xf32>
    %cst_132 = arith.constant 0.000000e+00 : f32
    %388 = vector.broadcast %cst_132 : f32 to vector<1x32xf32>
    %cst_133 = arith.constant 0.000000e+00 : f32
    %389 = vector.broadcast %cst_133 : f32 to vector<1x32xf32>
    %cst_134 = arith.constant 0.000000e+00 : f32
    %390 = vector.broadcast %cst_134 : f32 to vector<1x32xf32>
    %cst_135 = arith.constant 0.000000e+00 : f32
    %391 = vector.broadcast %cst_135 : f32 to vector<1x32xf32>
    %cst_136 = arith.constant 0.000000e+00 : f32
    %392 = vector.broadcast %cst_136 : f32 to vector<1x32xf32>
    %393 = vector.extract_strided_slice %344 {offsets = [0, 0], sizes = [1, 32], strides = [1, 1]} : vector<4x32xf32> to vector<1x32xf32>
    %394 = vector.extract_strided_slice %365 {offsets = [0, 0], sizes = [1, 32], strides = [1, 1]} : vector<4x32xf32> to vector<1x32xf32>
    %395 = vector.extract_strided_slice %386 {offsets = [0, 0], sizes = [1, 32], strides = [1, 1]} : vector<4x32xf32> to vector<1x32xf32>
    %396 = tpu.concatenate %393, %387 in 1 : vector<1x32xf32>, vector<1x32xf32> -> vector<1x64xf32>
    %c0_137 = arith.constant 0 : index
    %c0_138 = arith.constant 0 : index
    %c0_139 = arith.constant 0 : index
    %397 = vector.load %arg13[%c0_137, %c0_138, %c0_139] : memref<3x64x128xbf16, #tpu.memory_space<vmem>>, vector<1x64x128xbf16>
    %398 = vector.shape_cast %397 : vector<1x64x128xbf16> to vector<64x128xbf16>
    %399 = arith.truncf %396 : vector<1x64xf32> to vector<1x64xbf16>
    %cst_140 = arith.constant dense<0.000000e+00> : vector<1x128xf32>
    %400 = tpu.matmul %399, %398, %cst_140 {dimension_numbers = #tpu.dot_dimension_numbers<[1], [0], [0], [1], [0, 0, 1, 1], [], []>} : vector<1x64xbf16>, vector<64x128xbf16>, vector<1x128xf32> -> vector<1x128xf32>
    %c0_141 = arith.constant 0 : index
    %c0_142 = arith.constant 0 : index
    %c0_143 = arith.constant 0 : index
    %401 = vector.load %arg14[%c0_141, %c0_142, %c0_143] : memref<3x1x128xf32, #tpu.memory_space<vmem>>, vector<1x1x128xf32>
    %402 = vector.shape_cast %401 : vector<1x1x128xf32> to vector<1x128xf32>
    %403 = arith.addf %400, %402 : vector<1x128xf32>
    %404 = tpu.iota {dimensions = array<i32: 1>} : vector<1x128xi32>
    %c64_i32 = arith.constant 64 : i32
    %405 = vector.broadcast %c64_i32 : i32 to vector<1x128xi32>
    %406 = arith.cmpi sge, %404, %405 : vector<1x128xi32>
    %c96_i32 = arith.constant 96 : i32
    %407 = vector.broadcast %c96_i32 : i32 to vector<1x128xi32>
    %408 = arith.cmpi slt, %404, %407 : vector<1x128xi32>
    %409 = arith.andi %406, %408 : vector<1x128xi1>
    %410 = math.tanh %403 : vector<1x128xf32>
    %411 = arith.negf %403 : vector<1x128xf32>
    %412 = math.exp %411 : vector<1x128xf32>
    %cst_144 = arith.constant 1.000000e+00 : f32
    %413 = vector.broadcast %cst_144 : f32 to vector<1x128xf32>
    %414 = arith.addf %413, %412 : vector<1x128xf32>
    %415 = arith.divf %413, %414 : vector<1x128xf32>
    %416 = arith.select %409, %410, %415 : vector<1x128xi1>, vector<1x128xf32>
    %417 = vector.extract_strided_slice %416 {offsets = [0, 0], sizes = [1, 32], strides = [1, 1]} : vector<1x128xf32> to vector<1x32xf32>
    %418 = vector.extract_strided_slice %416 {offsets = [0, 32], sizes = [1, 32], strides = [1, 1]} : vector<1x128xf32> to vector<1x32xf32>
    %419 = vector.extract_strided_slice %416 {offsets = [0, 64], sizes = [1, 32], strides = [1, 1]} : vector<1x128xf32> to vector<1x32xf32>
    %420 = vector.extract_strided_slice %416 {offsets = [0, 96], sizes = [1, 32], strides = [1, 1]} : vector<1x128xf32> to vector<1x32xf32>
    %421 = arith.mulf %418, %390 : vector<1x32xf32>
    %422 = arith.mulf %417, %419 : vector<1x32xf32>
    %423 = arith.addf %421, %422 : vector<1x32xf32>
    %424 = math.tanh %423 : vector<1x32xf32>
    %425 = arith.mulf %420, %424 : vector<1x32xf32>
    %426 = tpu.concatenate %425, %388 in 1 : vector<1x32xf32>, vector<1x32xf32> -> vector<1x64xf32>
    %c1_145 = arith.constant 1 : index
    %c0_146 = arith.constant 0 : index
    %c0_147 = arith.constant 0 : index
    %427 = vector.load %arg13[%c1_145, %c0_146, %c0_147] : memref<3x64x128xbf16, #tpu.memory_space<vmem>>, vector<1x64x128xbf16>
    %428 = vector.shape_cast %427 : vector<1x64x128xbf16> to vector<64x128xbf16>
    %429 = arith.truncf %426 : vector<1x64xf32> to vector<1x64xbf16>
    %cst_148 = arith.constant dense<0.000000e+00> : vector<1x128xf32>
    %430 = tpu.matmul %429, %428, %cst_148 {dimension_numbers = #tpu.dot_dimension_numbers<[1], [0], [0], [1], [0, 0, 1, 1], [], []>} : vector<1x64xbf16>, vector<64x128xbf16>, vector<1x128xf32> -> vector<1x128xf32>
    %c1_149 = arith.constant 1 : index
    %c0_150 = arith.constant 0 : index
    %c0_151 = arith.constant 0 : index
    %431 = vector.load %arg14[%c1_149, %c0_150, %c0_151] : memref<3x1x128xf32, #tpu.memory_space<vmem>>, vector<1x1x128xf32>
    %432 = vector.shape_cast %431 : vector<1x1x128xf32> to vector<1x128xf32>
    %433 = arith.addf %430, %432 : vector<1x128xf32>
    %434 = tpu.iota {dimensions = array<i32: 1>} : vector<1x128xi32>
    %c64_i32_152 = arith.constant 64 : i32
    %435 = vector.broadcast %c64_i32_152 : i32 to vector<1x128xi32>
    %436 = arith.cmpi sge, %434, %435 : vector<1x128xi32>
    %c96_i32_153 = arith.constant 96 : i32
    %437 = vector.broadcast %c96_i32_153 : i32 to vector<1x128xi32>
    %438 = arith.cmpi slt, %434, %437 : vector<1x128xi32>
    %439 = arith.andi %436, %438 : vector<1x128xi1>
    %440 = math.tanh %433 : vector<1x128xf32>
    %441 = arith.negf %433 : vector<1x128xf32>
    %442 = math.exp %441 : vector<1x128xf32>
    %cst_154 = arith.constant 1.000000e+00 : f32
    %443 = vector.broadcast %cst_154 : f32 to vector<1x128xf32>
    %444 = arith.addf %443, %442 : vector<1x128xf32>
    %445 = arith.divf %443, %444 : vector<1x128xf32>
    %446 = arith.select %439, %440, %445 : vector<1x128xi1>, vector<1x128xf32>
    %447 = vector.extract_strided_slice %446 {offsets = [0, 0], sizes = [1, 32], strides = [1, 1]} : vector<1x128xf32> to vector<1x32xf32>
    %448 = vector.extract_strided_slice %446 {offsets = [0, 32], sizes = [1, 32], strides = [1, 1]} : vector<1x128xf32> to vector<1x32xf32>
    %449 = vector.extract_strided_slice %446 {offsets = [0, 64], sizes = [1, 32], strides = [1, 1]} : vector<1x128xf32> to vector<1x32xf32>
    %450 = vector.extract_strided_slice %446 {offsets = [0, 96], sizes = [1, 32], strides = [1, 1]} : vector<1x128xf32> to vector<1x32xf32>
    %451 = arith.mulf %448, %391 : vector<1x32xf32>
    %452 = arith.mulf %447, %449 : vector<1x32xf32>
    %453 = arith.addf %451, %452 : vector<1x32xf32>
    %454 = math.tanh %453 : vector<1x32xf32>
    %455 = arith.mulf %450, %454 : vector<1x32xf32>
    %456 = tpu.concatenate %455, %389 in 1 : vector<1x32xf32>, vector<1x32xf32> -> vector<1x64xf32>
    %c2_155 = arith.constant 2 : index
    %c0_156 = arith.constant 0 : index
    %c0_157 = arith.constant 0 : index
    %457 = vector.load %arg13[%c2_155, %c0_156, %c0_157] : memref<3x64x128xbf16, #tpu.memory_space<vmem>>, vector<1x64x128xbf16>
    %458 = vector.shape_cast %457 : vector<1x64x128xbf16> to vector<64x128xbf16>
    %459 = arith.truncf %456 : vector<1x64xf32> to vector<1x64xbf16>
    %cst_158 = arith.constant dense<0.000000e+00> : vector<1x128xf32>
    %460 = tpu.matmul %459, %458, %cst_158 {dimension_numbers = #tpu.dot_dimension_numbers<[1], [0], [0], [1], [0, 0, 1, 1], [], []>} : vector<1x64xbf16>, vector<64x128xbf16>, vector<1x128xf32> -> vector<1x128xf32>
    %c2_159 = arith.constant 2 : index
    %c0_160 = arith.constant 0 : index
    %c0_161 = arith.constant 0 : index
    %461 = vector.load %arg14[%c2_159, %c0_160, %c0_161] : memref<3x1x128xf32, #tpu.memory_space<vmem>>, vector<1x1x128xf32>
    %462 = vector.shape_cast %461 : vector<1x1x128xf32> to vector<1x128xf32>
    %463 = arith.addf %460, %462 : vector<1x128xf32>
    %464 = tpu.iota {dimensions = array<i32: 1>} : vector<1x128xi32>
    %c64_i32_162 = arith.constant 64 : i32
    %465 = vector.broadcast %c64_i32_162 : i32 to vector<1x128xi32>
    %466 = arith.cmpi sge, %464, %465 : vector<1x128xi32>
    %c96_i32_163 = arith.constant 96 : i32
    %467 = vector.broadcast %c96_i32_163 : i32 to vector<1x128xi32>
    %468 = arith.cmpi slt, %464, %467 : vector<1x128xi32>
    %469 = arith.andi %466, %468 : vector<1x128xi1>
    %470 = math.tanh %463 : vector<1x128xf32>
    %471 = arith.negf %463 : vector<1x128xf32>
    %472 = math.exp %471 : vector<1x128xf32>
    %cst_164 = arith.constant 1.000000e+00 : f32
    %473 = vector.broadcast %cst_164 : f32 to vector<1x128xf32>
    %474 = arith.addf %473, %472 : vector<1x128xf32>
    %475 = arith.divf %473, %474 : vector<1x128xf32>
    %476 = arith.select %469, %470, %475 : vector<1x128xi1>, vector<1x128xf32>
    %477 = vector.extract_strided_slice %476 {offsets = [0, 0], sizes = [1, 32], strides = [1, 1]} : vector<1x128xf32> to vector<1x32xf32>
    %478 = vector.extract_strided_slice %476 {offsets = [0, 32], sizes = [1, 32], strides = [1, 1]} : vector<1x128xf32> to vector<1x32xf32>
    %479 = vector.extract_strided_slice %476 {offsets = [0, 64], sizes = [1, 32], strides = [1, 1]} : vector<1x128xf32> to vector<1x32xf32>
    %480 = vector.extract_strided_slice %476 {offsets = [0, 96], sizes = [1, 32], strides = [1, 1]} : vector<1x128xf32> to vector<1x32xf32>
    %481 = arith.mulf %478, %392 : vector<1x32xf32>
    %482 = arith.mulf %477, %479 : vector<1x32xf32>
    %483 = arith.addf %481, %482 : vector<1x32xf32>
    %484 = math.tanh %483 : vector<1x32xf32>
    %485 = arith.mulf %480, %484 : vector<1x32xf32>
    %486 = tpu.concatenate %394, %425 in 1 : vector<1x32xf32>, vector<1x32xf32> -> vector<1x64xf32>
    %c0_165 = arith.constant 0 : index
    %c0_166 = arith.constant 0 : index
    %c0_167 = arith.constant 0 : index
    %487 = vector.load %arg13[%c0_165, %c0_166, %c0_167] : memref<3x64x128xbf16, #tpu.memory_space<vmem>>, vector<1x64x128xbf16>
    %488 = vector.shape_cast %487 : vector<1x64x128xbf16> to vector<64x128xbf16>
    %489 = arith.truncf %486 : vector<1x64xf32> to vector<1x64xbf16>
    %cst_168 = arith.constant dense<0.000000e+00> : vector<1x128xf32>
    %490 = tpu.matmul %489, %488, %cst_168 {dimension_numbers = #tpu.dot_dimension_numbers<[1], [0], [0], [1], [0, 0, 1, 1], [], []>} : vector<1x64xbf16>, vector<64x128xbf16>, vector<1x128xf32> -> vector<1x128xf32>
    %c0_169 = arith.constant 0 : index
    %c0_170 = arith.constant 0 : index
    %c0_171 = arith.constant 0 : index
    %491 = vector.load %arg14[%c0_169, %c0_170, %c0_171] : memref<3x1x128xf32, #tpu.memory_space<vmem>>, vector<1x1x128xf32>
    %492 = vector.shape_cast %491 : vector<1x1x128xf32> to vector<1x128xf32>
    %493 = arith.addf %490, %492 : vector<1x128xf32>
    %494 = tpu.iota {dimensions = array<i32: 1>} : vector<1x128xi32>
    %c64_i32_172 = arith.constant 64 : i32
    %495 = vector.broadcast %c64_i32_172 : i32 to vector<1x128xi32>
    %496 = arith.cmpi sge, %494, %495 : vector<1x128xi32>
    %c96_i32_173 = arith.constant 96 : i32
    %497 = vector.broadcast %c96_i32_173 : i32 to vector<1x128xi32>
    %498 = arith.cmpi slt, %494, %497 : vector<1x128xi32>
    %499 = arith.andi %496, %498 : vector<1x128xi1>
    %500 = math.tanh %493 : vector<1x128xf32>
    %501 = arith.negf %493 : vector<1x128xf32>
    %502 = math.exp %501 : vector<1x128xf32>
    %cst_174 = arith.constant 1.000000e+00 : f32
    %503 = vector.broadcast %cst_174 : f32 to vector<1x128xf32>
    %504 = arith.addf %503, %502 : vector<1x128xf32>
    %505 = arith.divf %503, %504 : vector<1x128xf32>
    %506 = arith.select %499, %500, %505 : vector<1x128xi1>, vector<1x128xf32>
    %507 = vector.extract_strided_slice %506 {offsets = [0, 0], sizes = [1, 32], strides = [1, 1]} : vector<1x128xf32> to vector<1x32xf32>
    %508 = vector.extract_strided_slice %506 {offsets = [0, 32], sizes = [1, 32], strides = [1, 1]} : vector<1x128xf32> to vector<1x32xf32>
    %509 = vector.extract_strided_slice %506 {offsets = [0, 64], sizes = [1, 32], strides = [1, 1]} : vector<1x128xf32> to vector<1x32xf32>
    %510 = vector.extract_strided_slice %506 {offsets = [0, 96], sizes = [1, 32], strides = [1, 1]} : vector<1x128xf32> to vector<1x32xf32>
    %511 = arith.mulf %508, %423 : vector<1x32xf32>
    %512 = arith.mulf %507, %509 : vector<1x32xf32>
    %513 = arith.addf %511, %512 : vector<1x32xf32>
    %514 = math.tanh %513 : vector<1x32xf32>
    %515 = arith.mulf %510, %514 : vector<1x32xf32>
    %516 = tpu.concatenate %515, %455 in 1 : vector<1x32xf32>, vector<1x32xf32> -> vector<1x64xf32>
    %c1_175 = arith.constant 1 : index
    %c0_176 = arith.constant 0 : index
    %c0_177 = arith.constant 0 : index
    %517 = vector.load %arg13[%c1_175, %c0_176, %c0_177] : memref<3x64x128xbf16, #tpu.memory_space<vmem>>, vector<1x64x128xbf16>
    %518 = vector.shape_cast %517 : vector<1x64x128xbf16> to vector<64x128xbf16>
    %519 = arith.truncf %516 : vector<1x64xf32> to vector<1x64xbf16>
    %cst_178 = arith.constant dense<0.000000e+00> : vector<1x128xf32>
    %520 = tpu.matmul %519, %518, %cst_178 {dimension_numbers = #tpu.dot_dimension_numbers<[1], [0], [0], [1], [0, 0, 1, 1], [], []>} : vector<1x64xbf16>, vector<64x128xbf16>, vector<1x128xf32> -> vector<1x128xf32>
    %c1_179 = arith.constant 1 : index
    %c0_180 = arith.constant 0 : index
    %c0_181 = arith.constant 0 : index
    %521 = vector.load %arg14[%c1_179, %c0_180, %c0_181] : memref<3x1x128xf32, #tpu.memory_space<vmem>>, vector<1x1x128xf32>
    %522 = vector.shape_cast %521 : vector<1x1x128xf32> to vector<1x128xf32>
    %523 = arith.addf %520, %522 : vector<1x128xf32>
    %524 = tpu.iota {dimensions = array<i32: 1>} : vector<1x128xi32>
    %c64_i32_182 = arith.constant 64 : i32
    %525 = vector.broadcast %c64_i32_182 : i32 to vector<1x128xi32>
    %526 = arith.cmpi sge, %524, %525 : vector<1x128xi32>
    %c96_i32_183 = arith.constant 96 : i32
    %527 = vector.broadcast %c96_i32_183 : i32 to vector<1x128xi32>
    %528 = arith.cmpi slt, %524, %527 : vector<1x128xi32>
    %529 = arith.andi %526, %528 : vector<1x128xi1>
    %530 = math.tanh %523 : vector<1x128xf32>
    %531 = arith.negf %523 : vector<1x128xf32>
    %532 = math.exp %531 : vector<1x128xf32>
    %cst_184 = arith.constant 1.000000e+00 : f32
    %533 = vector.broadcast %cst_184 : f32 to vector<1x128xf32>
    %534 = arith.addf %533, %532 : vector<1x128xf32>
    %535 = arith.divf %533, %534 : vector<1x128xf32>
    %536 = arith.select %529, %530, %535 : vector<1x128xi1>, vector<1x128xf32>
    %537 = vector.extract_strided_slice %536 {offsets = [0, 0], sizes = [1, 32], strides = [1, 1]} : vector<1x128xf32> to vector<1x32xf32>
    %538 = vector.extract_strided_slice %536 {offsets = [0, 32], sizes = [1, 32], strides = [1, 1]} : vector<1x128xf32> to vector<1x32xf32>
    %539 = vector.extract_strided_slice %536 {offsets = [0, 64], sizes = [1, 32], strides = [1, 1]} : vector<1x128xf32> to vector<1x32xf32>
    %540 = vector.extract_strided_slice %536 {offsets = [0, 96], sizes = [1, 32], strides = [1, 1]} : vector<1x128xf32> to vector<1x32xf32>
    %541 = arith.mulf %538, %453 : vector<1x32xf32>
    %542 = arith.mulf %537, %539 : vector<1x32xf32>
    %543 = arith.addf %541, %542 : vector<1x32xf32>
    %544 = math.tanh %543 : vector<1x32xf32>
    %545 = arith.mulf %540, %544 : vector<1x32xf32>
    %546 = tpu.concatenate %545, %485 in 1 : vector<1x32xf32>, vector<1x32xf32> -> vector<1x64xf32>
    %c2_185 = arith.constant 2 : index
    %c0_186 = arith.constant 0 : index
    %c0_187 = arith.constant 0 : index
    %547 = vector.load %arg13[%c2_185, %c0_186, %c0_187] : memref<3x64x128xbf16, #tpu.memory_space<vmem>>, vector<1x64x128xbf16>
    %548 = vector.shape_cast %547 : vector<1x64x128xbf16> to vector<64x128xbf16>
    %549 = arith.truncf %546 : vector<1x64xf32> to vector<1x64xbf16>
    %cst_188 = arith.constant dense<0.000000e+00> : vector<1x128xf32>
    %550 = tpu.matmul %549, %548, %cst_188 {dimension_numbers = #tpu.dot_dimension_numbers<[1], [0], [0], [1], [0, 0, 1, 1], [], []>} : vector<1x64xbf16>, vector<64x128xbf16>, vector<1x128xf32> -> vector<1x128xf32>
    %c2_189 = arith.constant 2 : index
    %c0_190 = arith.constant 0 : index
    %c0_191 = arith.constant 0 : index
    %551 = vector.load %arg14[%c2_189, %c0_190, %c0_191] : memref<3x1x128xf32, #tpu.memory_space<vmem>>, vector<1x1x128xf32>
    %552 = vector.shape_cast %551 : vector<1x1x128xf32> to vector<1x128xf32>
    %553 = arith.addf %550, %552 : vector<1x128xf32>
    %554 = tpu.iota {dimensions = array<i32: 1>} : vector<1x128xi32>
    %c64_i32_192 = arith.constant 64 : i32
    %555 = vector.broadcast %c64_i32_192 : i32 to vector<1x128xi32>
    %556 = arith.cmpi sge, %554, %555 : vector<1x128xi32>
    %c96_i32_193 = arith.constant 96 : i32
    %557 = vector.broadcast %c96_i32_193 : i32 to vector<1x128xi32>
    %558 = arith.cmpi slt, %554, %557 : vector<1x128xi32>
    %559 = arith.andi %556, %558 : vector<1x128xi1>
    %560 = math.tanh %553 : vector<1x128xf32>
    %561 = arith.negf %553 : vector<1x128xf32>
    %562 = math.exp %561 : vector<1x128xf32>
    %cst_194 = arith.constant 1.000000e+00 : f32
    %563 = vector.broadcast %cst_194 : f32 to vector<1x128xf32>
    %564 = arith.addf %563, %562 : vector<1x128xf32>
    %565 = arith.divf %563, %564 : vector<1x128xf32>
    %566 = arith.select %559, %560, %565 : vector<1x128xi1>, vector<1x128xf32>
    %567 = vector.extract_strided_slice %566 {offsets = [0, 0], sizes = [1, 32], strides = [1, 1]} : vector<1x128xf32> to vector<1x32xf32>
    %568 = vector.extract_strided_slice %566 {offsets = [0, 32], sizes = [1, 32], strides = [1, 1]} : vector<1x128xf32> to vector<1x32xf32>
    %569 = vector.extract_strided_slice %566 {offsets = [0, 64], sizes = [1, 32], strides = [1, 1]} : vector<1x128xf32> to vector<1x32xf32>
    %570 = vector.extract_strided_slice %566 {offsets = [0, 96], sizes = [1, 32], strides = [1, 1]} : vector<1x128xf32> to vector<1x32xf32>
    %571 = arith.mulf %568, %483 : vector<1x32xf32>
    %572 = arith.mulf %567, %569 : vector<1x32xf32>
    %573 = arith.addf %571, %572 : vector<1x32xf32>
    %574 = math.tanh %573 : vector<1x32xf32>
    %575 = arith.mulf %570, %574 : vector<1x32xf32>
    %576 = tpu.concatenate %395, %515 in 1 : vector<1x32xf32>, vector<1x32xf32> -> vector<1x64xf32>
    %c0_195 = arith.constant 0 : index
    %c0_196 = arith.constant 0 : index
    %c0_197 = arith.constant 0 : index
    %577 = vector.load %arg13[%c0_195, %c0_196, %c0_197] : memref<3x64x128xbf16, #tpu.memory_space<vmem>>, vector<1x64x128xbf16>
    %578 = vector.shape_cast %577 : vector<1x64x128xbf16> to vector<64x128xbf16>
    %579 = arith.truncf %576 : vector<1x64xf32> to vector<1x64xbf16>
    %cst_198 = arith.constant dense<0.000000e+00> : vector<1x128xf32>
    %580 = tpu.matmul %579, %578, %cst_198 {dimension_numbers = #tpu.dot_dimension_numbers<[1], [0], [0], [1], [0, 0, 1, 1], [], []>} : vector<1x64xbf16>, vector<64x128xbf16>, vector<1x128xf32> -> vector<1x128xf32>
    %c0_199 = arith.constant 0 : index
    %c0_200 = arith.constant 0 : index
    %c0_201 = arith.constant 0 : index
    %581 = vector.load %arg14[%c0_199, %c0_200, %c0_201] : memref<3x1x128xf32, #tpu.memory_space<vmem>>, vector<1x1x128xf32>
    %582 = vector.shape_cast %581 : vector<1x1x128xf32> to vector<1x128xf32>
    %583 = arith.addf %580, %582 : vector<1x128xf32>
    %584 = tpu.iota {dimensions = array<i32: 1>} : vector<1x128xi32>
    %c64_i32_202 = arith.constant 64 : i32
    %585 = vector.broadcast %c64_i32_202 : i32 to vector<1x128xi32>
    %586 = arith.cmpi sge, %584, %585 : vector<1x128xi32>
    %c96_i32_203 = arith.constant 96 : i32
    %587 = vector.broadcast %c96_i32_203 : i32 to vector<1x128xi32>
    %588 = arith.cmpi slt, %584, %587 : vector<1x128xi32>
    %589 = arith.andi %586, %588 : vector<1x128xi1>
    %590 = math.tanh %583 : vector<1x128xf32>
    %591 = arith.negf %583 : vector<1x128xf32>
    %592 = math.exp %591 : vector<1x128xf32>
    %cst_204 = arith.constant 1.000000e+00 : f32
    %593 = vector.broadcast %cst_204 : f32 to vector<1x128xf32>
    %594 = arith.addf %593, %592 : vector<1x128xf32>
    %595 = arith.divf %593, %594 : vector<1x128xf32>
    %596 = arith.select %589, %590, %595 : vector<1x128xi1>, vector<1x128xf32>
    %597 = vector.extract_strided_slice %596 {offsets = [0, 0], sizes = [1, 32], strides = [1, 1]} : vector<1x128xf32> to vector<1x32xf32>
    %598 = vector.extract_strided_slice %596 {offsets = [0, 32], sizes = [1, 32], strides = [1, 1]} : vector<1x128xf32> to vector<1x32xf32>
    %599 = vector.extract_strided_slice %596 {offsets = [0, 64], sizes = [1, 32], strides = [1, 1]} : vector<1x128xf32> to vector<1x32xf32>
    %600 = vector.extract_strided_slice %596 {offsets = [0, 96], sizes = [1, 32], strides = [1, 1]} : vector<1x128xf32> to vector<1x32xf32>
    %601 = arith.mulf %598, %513 : vector<1x32xf32>
    %602 = arith.mulf %597, %599 : vector<1x32xf32>
    %603 = arith.addf %601, %602 : vector<1x32xf32>
    %604 = math.tanh %603 : vector<1x32xf32>
    %605 = arith.mulf %600, %604 : vector<1x32xf32>
    %606 = tpu.concatenate %605, %545 in 1 : vector<1x32xf32>, vector<1x32xf32> -> vector<1x64xf32>
    %c1_205 = arith.constant 1 : index
    %c0_206 = arith.constant 0 : index
    %c0_207 = arith.constant 0 : index
    %607 = vector.load %arg13[%c1_205, %c0_206, %c0_207] : memref<3x64x128xbf16, #tpu.memory_space<vmem>>, vector<1x64x128xbf16>
    %608 = vector.shape_cast %607 : vector<1x64x128xbf16> to vector<64x128xbf16>
    %609 = arith.truncf %606 : vector<1x64xf32> to vector<1x64xbf16>
    %cst_208 = arith.constant dense<0.000000e+00> : vector<1x128xf32>
    %610 = tpu.matmul %609, %608, %cst_208 {dimension_numbers = #tpu.dot_dimension_numbers<[1], [0], [0], [1], [0, 0, 1, 1], [], []>} : vector<1x64xbf16>, vector<64x128xbf16>, vector<1x128xf32> -> vector<1x128xf32>
    %c1_209 = arith.constant 1 : index
    %c0_210 = arith.constant 0 : index
    %c0_211 = arith.constant 0 : index
    %611 = vector.load %arg14[%c1_209, %c0_210, %c0_211] : memref<3x1x128xf32, #tpu.memory_space<vmem>>, vector<1x1x128xf32>
    %612 = vector.shape_cast %611 : vector<1x1x128xf32> to vector<1x128xf32>
    %613 = arith.addf %610, %612 : vector<1x128xf32>
    %614 = tpu.iota {dimensions = array<i32: 1>} : vector<1x128xi32>
    %c64_i32_212 = arith.constant 64 : i32
    %615 = vector.broadcast %c64_i32_212 : i32 to vector<1x128xi32>
    %616 = arith.cmpi sge, %614, %615 : vector<1x128xi32>
    %c96_i32_213 = arith.constant 96 : i32
    %617 = vector.broadcast %c96_i32_213 : i32 to vector<1x128xi32>
    %618 = arith.cmpi slt, %614, %617 : vector<1x128xi32>
    %619 = arith.andi %616, %618 : vector<1x128xi1>
    %620 = math.tanh %613 : vector<1x128xf32>
    %621 = arith.negf %613 : vector<1x128xf32>
    %622 = math.exp %621 : vector<1x128xf32>
    %cst_214 = arith.constant 1.000000e+00 : f32
    %623 = vector.broadcast %cst_214 : f32 to vector<1x128xf32>
    %624 = arith.addf %623, %622 : vector<1x128xf32>
    %625 = arith.divf %623, %624 : vector<1x128xf32>
    %626 = arith.select %619, %620, %625 : vector<1x128xi1>, vector<1x128xf32>
    %627 = vector.extract_strided_slice %626 {offsets = [0, 0], sizes = [1, 32], strides = [1, 1]} : vector<1x128xf32> to vector<1x32xf32>
    %628 = vector.extract_strided_slice %626 {offsets = [0, 32], sizes = [1, 32], strides = [1, 1]} : vector<1x128xf32> to vector<1x32xf32>
    %629 = vector.extract_strided_slice %626 {offsets = [0, 64], sizes = [1, 32], strides = [1, 1]} : vector<1x128xf32> to vector<1x32xf32>
    %630 = vector.extract_strided_slice %626 {offsets = [0, 96], sizes = [1, 32], strides = [1, 1]} : vector<1x128xf32> to vector<1x32xf32>
    %631 = arith.mulf %628, %543 : vector<1x32xf32>
    %632 = arith.mulf %627, %629 : vector<1x32xf32>
    %633 = arith.addf %631, %632 : vector<1x32xf32>
    %634 = math.tanh %633 : vector<1x32xf32>
    %635 = arith.mulf %630, %634 : vector<1x32xf32>
    %636 = tpu.concatenate %635, %575 in 1 : vector<1x32xf32>, vector<1x32xf32> -> vector<1x64xf32>
    %c2_215 = arith.constant 2 : index
    %c0_216 = arith.constant 0 : index
    %c0_217 = arith.constant 0 : index
    %637 = vector.load %arg13[%c2_215, %c0_216, %c0_217] : memref<3x64x128xbf16, #tpu.memory_space<vmem>>, vector<1x64x128xbf16>
    %638 = vector.shape_cast %637 : vector<1x64x128xbf16> to vector<64x128xbf16>
    %639 = arith.truncf %636 : vector<1x64xf32> to vector<1x64xbf16>
    %cst_218 = arith.constant dense<0.000000e+00> : vector<1x128xf32>
    %640 = tpu.matmul %639, %638, %cst_218 {dimension_numbers = #tpu.dot_dimension_numbers<[1], [0], [0], [1], [0, 0, 1, 1], [], []>} : vector<1x64xbf16>, vector<64x128xbf16>, vector<1x128xf32> -> vector<1x128xf32>
    %c2_219 = arith.constant 2 : index
    %c0_220 = arith.constant 0 : index
    %c0_221 = arith.constant 0 : index
    %641 = vector.load %arg14[%c2_219, %c0_220, %c0_221] : memref<3x1x128xf32, #tpu.memory_space<vmem>>, vector<1x1x128xf32>
    %642 = vector.shape_cast %641 : vector<1x1x128xf32> to vector<1x128xf32>
    %643 = arith.addf %640, %642 : vector<1x128xf32>
    %644 = tpu.iota {dimensions = array<i32: 1>} : vector<1x128xi32>
    %c64_i32_222 = arith.constant 64 : i32
    %645 = vector.broadcast %c64_i32_222 : i32 to vector<1x128xi32>
    %646 = arith.cmpi sge, %644, %645 : vector<1x128xi32>
    %c96_i32_223 = arith.constant 96 : i32
    %647 = vector.broadcast %c96_i32_223 : i32 to vector<1x128xi32>
    %648 = arith.cmpi slt, %644, %647 : vector<1x128xi32>
    %649 = arith.andi %646, %648 : vector<1x128xi1>
    %650 = math.tanh %643 : vector<1x128xf32>
    %651 = arith.negf %643 : vector<1x128xf32>
    %652 = math.exp %651 : vector<1x128xf32>
    %cst_224 = arith.constant 1.000000e+00 : f32
    %653 = vector.broadcast %cst_224 : f32 to vector<1x128xf32>
    %654 = arith.addf %653, %652 : vector<1x128xf32>
    %655 = arith.divf %653, %654 : vector<1x128xf32>
    %656 = arith.select %649, %650, %655 : vector<1x128xi1>, vector<1x128xf32>
    %657 = vector.extract_strided_slice %656 {offsets = [0, 0], sizes = [1, 32], strides = [1, 1]} : vector<1x128xf32> to vector<1x32xf32>
    %658 = vector.extract_strided_slice %656 {offsets = [0, 32], sizes = [1, 32], strides = [1, 1]} : vector<1x128xf32> to vector<1x32xf32>
    %659 = vector.extract_strided_slice %656 {offsets = [0, 64], sizes = [1, 32], strides = [1, 1]} : vector<1x128xf32> to vector<1x32xf32>
    %660 = vector.extract_strided_slice %656 {offsets = [0, 96], sizes = [1, 32], strides = [1, 1]} : vector<1x128xf32> to vector<1x32xf32>
    %661 = arith.mulf %658, %573 : vector<1x32xf32>
    %662 = arith.mulf %657, %659 : vector<1x32xf32>
    %663 = arith.addf %661, %662 : vector<1x32xf32>
    %664 = math.tanh %663 : vector<1x32xf32>
    %665 = arith.mulf %660, %664 : vector<1x32xf32>
    %666 = vector.extract_strided_slice %344 {offsets = [1, 0], sizes = [1, 32], strides = [1, 1]} : vector<4x32xf32> to vector<1x32xf32>
    %667 = vector.extract_strided_slice %365 {offsets = [1, 0], sizes = [1, 32], strides = [1, 1]} : vector<4x32xf32> to vector<1x32xf32>
    %668 = vector.extract_strided_slice %386 {offsets = [1, 0], sizes = [1, 32], strides = [1, 1]} : vector<4x32xf32> to vector<1x32xf32>
    %669 = tpu.concatenate %666, %605 in 1 : vector<1x32xf32>, vector<1x32xf32> -> vector<1x64xf32>
    %c0_225 = arith.constant 0 : index
    %c0_226 = arith.constant 0 : index
    %c0_227 = arith.constant 0 : index
    %670 = vector.load %arg13[%c0_225, %c0_226, %c0_227] : memref<3x64x128xbf16, #tpu.memory_space<vmem>>, vector<1x64x128xbf16>
    %671 = vector.shape_cast %670 : vector<1x64x128xbf16> to vector<64x128xbf16>
    %672 = arith.truncf %669 : vector<1x64xf32> to vector<1x64xbf16>
    %cst_228 = arith.constant dense<0.000000e+00> : vector<1x128xf32>
    %673 = tpu.matmul %672, %671, %cst_228 {dimension_numbers = #tpu.dot_dimension_numbers<[1], [0], [0], [1], [0, 0, 1, 1], [], []>} : vector<1x64xbf16>, vector<64x128xbf16>, vector<1x128xf32> -> vector<1x128xf32>
    %c0_229 = arith.constant 0 : index
    %c0_230 = arith.constant 0 : index
    %c0_231 = arith.constant 0 : index
    %674 = vector.load %arg14[%c0_229, %c0_230, %c0_231] : memref<3x1x128xf32, #tpu.memory_space<vmem>>, vector<1x1x128xf32>
    %675 = vector.shape_cast %674 : vector<1x1x128xf32> to vector<1x128xf32>
    %676 = arith.addf %673, %675 : vector<1x128xf32>
    %677 = tpu.iota {dimensions = array<i32: 1>} : vector<1x128xi32>
    %c64_i32_232 = arith.constant 64 : i32
    %678 = vector.broadcast %c64_i32_232 : i32 to vector<1x128xi32>
    %679 = arith.cmpi sge, %677, %678 : vector<1x128xi32>
    %c96_i32_233 = arith.constant 96 : i32
    %680 = vector.broadcast %c96_i32_233 : i32 to vector<1x128xi32>
    %681 = arith.cmpi slt, %677, %680 : vector<1x128xi32>
    %682 = arith.andi %679, %681 : vector<1x128xi1>
    %683 = math.tanh %676 : vector<1x128xf32>
    %684 = arith.negf %676 : vector<1x128xf32>
    %685 = math.exp %684 : vector<1x128xf32>
    %cst_234 = arith.constant 1.000000e+00 : f32
    %686 = vector.broadcast %cst_234 : f32 to vector<1x128xf32>
    %687 = arith.addf %686, %685 : vector<1x128xf32>
    %688 = arith.divf %686, %687 : vector<1x128xf32>
    %689 = arith.select %682, %683, %688 : vector<1x128xi1>, vector<1x128xf32>
    %690 = vector.extract_strided_slice %689 {offsets = [0, 0], sizes = [1, 32], strides = [1, 1]} : vector<1x128xf32> to vector<1x32xf32>
    %691 = vector.extract_strided_slice %689 {offsets = [0, 32], sizes = [1, 32], strides = [1, 1]} : vector<1x128xf32> to vector<1x32xf32>
    %692 = vector.extract_strided_slice %689 {offsets = [0, 64], sizes = [1, 32], strides = [1, 1]} : vector<1x128xf32> to vector<1x32xf32>
    %693 = vector.extract_strided_slice %689 {offsets = [0, 96], sizes = [1, 32], strides = [1, 1]} : vector<1x128xf32> to vector<1x32xf32>
    %694 = arith.mulf %691, %603 : vector<1x32xf32>
    %695 = arith.mulf %690, %692 : vector<1x32xf32>
    %696 = arith.addf %694, %695 : vector<1x32xf32>
    %697 = math.tanh %696 : vector<1x32xf32>
    %698 = arith.mulf %693, %697 : vector<1x32xf32>
    %699 = tpu.concatenate %698, %635 in 1 : vector<1x32xf32>, vector<1x32xf32> -> vector<1x64xf32>
    %c1_235 = arith.constant 1 : index
    %c0_236 = arith.constant 0 : index
    %c0_237 = arith.constant 0 : index
    %700 = vector.load %arg13[%c1_235, %c0_236, %c0_237] : memref<3x64x128xbf16, #tpu.memory_space<vmem>>, vector<1x64x128xbf16>
    %701 = vector.shape_cast %700 : vector<1x64x128xbf16> to vector<64x128xbf16>
    %702 = arith.truncf %699 : vector<1x64xf32> to vector<1x64xbf16>
    %cst_238 = arith.constant dense<0.000000e+00> : vector<1x128xf32>
    %703 = tpu.matmul %702, %701, %cst_238 {dimension_numbers = #tpu.dot_dimension_numbers<[1], [0], [0], [1], [0, 0, 1, 1], [], []>} : vector<1x64xbf16>, vector<64x128xbf16>, vector<1x128xf32> -> vector<1x128xf32>
    %c1_239 = arith.constant 1 : index
    %c0_240 = arith.constant 0 : index
    %c0_241 = arith.constant 0 : index
    %704 = vector.load %arg14[%c1_239, %c0_240, %c0_241] : memref<3x1x128xf32, #tpu.memory_space<vmem>>, vector<1x1x128xf32>
    %705 = vector.shape_cast %704 : vector<1x1x128xf32> to vector<1x128xf32>
    %706 = arith.addf %703, %705 : vector<1x128xf32>
    %707 = tpu.iota {dimensions = array<i32: 1>} : vector<1x128xi32>
    %c64_i32_242 = arith.constant 64 : i32
    %708 = vector.broadcast %c64_i32_242 : i32 to vector<1x128xi32>
    %709 = arith.cmpi sge, %707, %708 : vector<1x128xi32>
    %c96_i32_243 = arith.constant 96 : i32
    %710 = vector.broadcast %c96_i32_243 : i32 to vector<1x128xi32>
    %711 = arith.cmpi slt, %707, %710 : vector<1x128xi32>
    %712 = arith.andi %709, %711 : vector<1x128xi1>
    %713 = math.tanh %706 : vector<1x128xf32>
    %714 = arith.negf %706 : vector<1x128xf32>
    %715 = math.exp %714 : vector<1x128xf32>
    %cst_244 = arith.constant 1.000000e+00 : f32
    %716 = vector.broadcast %cst_244 : f32 to vector<1x128xf32>
    %717 = arith.addf %716, %715 : vector<1x128xf32>
    %718 = arith.divf %716, %717 : vector<1x128xf32>
    %719 = arith.select %712, %713, %718 : vector<1x128xi1>, vector<1x128xf32>
    %720 = vector.extract_strided_slice %719 {offsets = [0, 0], sizes = [1, 32], strides = [1, 1]} : vector<1x128xf32> to vector<1x32xf32>
    %721 = vector.extract_strided_slice %719 {offsets = [0, 32], sizes = [1, 32], strides = [1, 1]} : vector<1x128xf32> to vector<1x32xf32>
    %722 = vector.extract_strided_slice %719 {offsets = [0, 64], sizes = [1, 32], strides = [1, 1]} : vector<1x128xf32> to vector<1x32xf32>
    %723 = vector.extract_strided_slice %719 {offsets = [0, 96], sizes = [1, 32], strides = [1, 1]} : vector<1x128xf32> to vector<1x32xf32>
    %724 = arith.mulf %721, %633 : vector<1x32xf32>
    %725 = arith.mulf %720, %722 : vector<1x32xf32>
    %726 = arith.addf %724, %725 : vector<1x32xf32>
    %727 = math.tanh %726 : vector<1x32xf32>
    %728 = arith.mulf %723, %727 : vector<1x32xf32>
    %729 = tpu.concatenate %728, %665 in 1 : vector<1x32xf32>, vector<1x32xf32> -> vector<1x64xf32>
    %c2_245 = arith.constant 2 : index
    %c0_246 = arith.constant 0 : index
    %c0_247 = arith.constant 0 : index
    %730 = vector.load %arg13[%c2_245, %c0_246, %c0_247] : memref<3x64x128xbf16, #tpu.memory_space<vmem>>, vector<1x64x128xbf16>
    %731 = vector.shape_cast %730 : vector<1x64x128xbf16> to vector<64x128xbf16>
    %732 = arith.truncf %729 : vector<1x64xf32> to vector<1x64xbf16>
    %cst_248 = arith.constant dense<0.000000e+00> : vector<1x128xf32>
    %733 = tpu.matmul %732, %731, %cst_248 {dimension_numbers = #tpu.dot_dimension_numbers<[1], [0], [0], [1], [0, 0, 1, 1], [], []>} : vector<1x64xbf16>, vector<64x128xbf16>, vector<1x128xf32> -> vector<1x128xf32>
    %c2_249 = arith.constant 2 : index
    %c0_250 = arith.constant 0 : index
    %c0_251 = arith.constant 0 : index
    %734 = vector.load %arg14[%c2_249, %c0_250, %c0_251] : memref<3x1x128xf32, #tpu.memory_space<vmem>>, vector<1x1x128xf32>
    %735 = vector.shape_cast %734 : vector<1x1x128xf32> to vector<1x128xf32>
    %736 = arith.addf %733, %735 : vector<1x128xf32>
    %737 = tpu.iota {dimensions = array<i32: 1>} : vector<1x128xi32>
    %c64_i32_252 = arith.constant 64 : i32
    %738 = vector.broadcast %c64_i32_252 : i32 to vector<1x128xi32>
    %739 = arith.cmpi sge, %737, %738 : vector<1x128xi32>
    %c96_i32_253 = arith.constant 96 : i32
    %740 = vector.broadcast %c96_i32_253 : i32 to vector<1x128xi32>
    %741 = arith.cmpi slt, %737, %740 : vector<1x128xi32>
    %742 = arith.andi %739, %741 : vector<1x128xi1>
    %743 = math.tanh %736 : vector<1x128xf32>
    %744 = arith.negf %736 : vector<1x128xf32>
    %745 = math.exp %744 : vector<1x128xf32>
    %cst_254 = arith.constant 1.000000e+00 : f32
    %746 = vector.broadcast %cst_254 : f32 to vector<1x128xf32>
    %747 = arith.addf %746, %745 : vector<1x128xf32>
    %748 = arith.divf %746, %747 : vector<1x128xf32>
    %749 = arith.select %742, %743, %748 : vector<1x128xi1>, vector<1x128xf32>
    %750 = vector.extract_strided_slice %749 {offsets = [0, 0], sizes = [1, 32], strides = [1, 1]} : vector<1x128xf32> to vector<1x32xf32>
    %751 = vector.extract_strided_slice %749 {offsets = [0, 32], sizes = [1, 32], strides = [1, 1]} : vector<1x128xf32> to vector<1x32xf32>
    %752 = vector.extract_strided_slice %749 {offsets = [0, 64], sizes = [1, 32], strides = [1, 1]} : vector<1x128xf32> to vector<1x32xf32>
    %753 = vector.extract_strided_slice %749 {offsets = [0, 96], sizes = [1, 32], strides = [1, 1]} : vector<1x128xf32> to vector<1x32xf32>
    %754 = arith.mulf %751, %663 : vector<1x32xf32>
    %755 = arith.mulf %750, %752 : vector<1x32xf32>
    %756 = arith.addf %754, %755 : vector<1x32xf32>
    %757 = math.tanh %756 : vector<1x32xf32>
    %758 = arith.mulf %753, %757 : vector<1x32xf32>
    %759 = tpu.concatenate %667, %698 in 1 : vector<1x32xf32>, vector<1x32xf32> -> vector<1x64xf32>
    %c0_255 = arith.constant 0 : index
    %c0_256 = arith.constant 0 : index
    %c0_257 = arith.constant 0 : index
    %760 = vector.load %arg13[%c0_255, %c0_256, %c0_257] : memref<3x64x128xbf16, #tpu.memory_space<vmem>>, vector<1x64x128xbf16>
    %761 = vector.shape_cast %760 : vector<1x64x128xbf16> to vector<64x128xbf16>
    %762 = arith.truncf %759 : vector<1x64xf32> to vector<1x64xbf16>
    %cst_258 = arith.constant dense<0.000000e+00> : vector<1x128xf32>
    %763 = tpu.matmul %762, %761, %cst_258 {dimension_numbers = #tpu.dot_dimension_numbers<[1], [0], [0], [1], [0, 0, 1, 1], [], []>} : vector<1x64xbf16>, vector<64x128xbf16>, vector<1x128xf32> -> vector<1x128xf32>
    %c0_259 = arith.constant 0 : index
    %c0_260 = arith.constant 0 : index
    %c0_261 = arith.constant 0 : index
    %764 = vector.load %arg14[%c0_259, %c0_260, %c0_261] : memref<3x1x128xf32, #tpu.memory_space<vmem>>, vector<1x1x128xf32>
    %765 = vector.shape_cast %764 : vector<1x1x128xf32> to vector<1x128xf32>
    %766 = arith.addf %763, %765 : vector<1x128xf32>
    %767 = tpu.iota {dimensions = array<i32: 1>} : vector<1x128xi32>
    %c64_i32_262 = arith.constant 64 : i32
    %768 = vector.broadcast %c64_i32_262 : i32 to vector<1x128xi32>
    %769 = arith.cmpi sge, %767, %768 : vector<1x128xi32>
    %c96_i32_263 = arith.constant 96 : i32
    %770 = vector.broadcast %c96_i32_263 : i32 to vector<1x128xi32>
    %771 = arith.cmpi slt, %767, %770 : vector<1x128xi32>
    %772 = arith.andi %769, %771 : vector<1x128xi1>
    %773 = math.tanh %766 : vector<1x128xf32>
    %774 = arith.negf %766 : vector<1x128xf32>
    %775 = math.exp %774 : vector<1x128xf32>
    %cst_264 = arith.constant 1.000000e+00 : f32
    %776 = vector.broadcast %cst_264 : f32 to vector<1x128xf32>
    %777 = arith.addf %776, %775 : vector<1x128xf32>
    %778 = arith.divf %776, %777 : vector<1x128xf32>
    %779 = arith.select %772, %773, %778 : vector<1x128xi1>, vector<1x128xf32>
    %780 = vector.extract_strided_slice %779 {offsets = [0, 0], sizes = [1, 32], strides = [1, 1]} : vector<1x128xf32> to vector<1x32xf32>
    %781 = vector.extract_strided_slice %779 {offsets = [0, 32], sizes = [1, 32], strides = [1, 1]} : vector<1x128xf32> to vector<1x32xf32>
    %782 = vector.extract_strided_slice %779 {offsets = [0, 64], sizes = [1, 32], strides = [1, 1]} : vector<1x128xf32> to vector<1x32xf32>
    %783 = vector.extract_strided_slice %779 {offsets = [0, 96], sizes = [1, 32], strides = [1, 1]} : vector<1x128xf32> to vector<1x32xf32>
    %784 = arith.mulf %781, %696 : vector<1x32xf32>
    %785 = arith.mulf %780, %782 : vector<1x32xf32>
    %786 = arith.addf %784, %785 : vector<1x32xf32>
    %787 = math.tanh %786 : vector<1x32xf32>
    %788 = arith.mulf %783, %787 : vector<1x32xf32>
    %789 = tpu.concatenate %788, %728 in 1 : vector<1x32xf32>, vector<1x32xf32> -> vector<1x64xf32>
    %c1_265 = arith.constant 1 : index
    %c0_266 = arith.constant 0 : index
    %c0_267 = arith.constant 0 : index
    %790 = vector.load %arg13[%c1_265, %c0_266, %c0_267] : memref<3x64x128xbf16, #tpu.memory_space<vmem>>, vector<1x64x128xbf16>
    %791 = vector.shape_cast %790 : vector<1x64x128xbf16> to vector<64x128xbf16>
    %792 = arith.truncf %789 : vector<1x64xf32> to vector<1x64xbf16>
    %cst_268 = arith.constant dense<0.000000e+00> : vector<1x128xf32>
    %793 = tpu.matmul %792, %791, %cst_268 {dimension_numbers = #tpu.dot_dimension_numbers<[1], [0], [0], [1], [0, 0, 1, 1], [], []>} : vector<1x64xbf16>, vector<64x128xbf16>, vector<1x128xf32> -> vector<1x128xf32>
    %c1_269 = arith.constant 1 : index
    %c0_270 = arith.constant 0 : index
    %c0_271 = arith.constant 0 : index
    %794 = vector.load %arg14[%c1_269, %c0_270, %c0_271] : memref<3x1x128xf32, #tpu.memory_space<vmem>>, vector<1x1x128xf32>
    %795 = vector.shape_cast %794 : vector<1x1x128xf32> to vector<1x128xf32>
    %796 = arith.addf %793, %795 : vector<1x128xf32>
    %797 = tpu.iota {dimensions = array<i32: 1>} : vector<1x128xi32>
    %c64_i32_272 = arith.constant 64 : i32
    %798 = vector.broadcast %c64_i32_272 : i32 to vector<1x128xi32>
    %799 = arith.cmpi sge, %797, %798 : vector<1x128xi32>
    %c96_i32_273 = arith.constant 96 : i32
    %800 = vector.broadcast %c96_i32_273 : i32 to vector<1x128xi32>
    %801 = arith.cmpi slt, %797, %800 : vector<1x128xi32>
    %802 = arith.andi %799, %801 : vector<1x128xi1>
    %803 = math.tanh %796 : vector<1x128xf32>
    %804 = arith.negf %796 : vector<1x128xf32>
    %805 = math.exp %804 : vector<1x128xf32>
    %cst_274 = arith.constant 1.000000e+00 : f32
    %806 = vector.broadcast %cst_274 : f32 to vector<1x128xf32>
    %807 = arith.addf %806, %805 : vector<1x128xf32>
    %808 = arith.divf %806, %807 : vector<1x128xf32>
    %809 = arith.select %802, %803, %808 : vector<1x128xi1>, vector<1x128xf32>
    %810 = vector.extract_strided_slice %809 {offsets = [0, 0], sizes = [1, 32], strides = [1, 1]} : vector<1x128xf32> to vector<1x32xf32>
    %811 = vector.extract_strided_slice %809 {offsets = [0, 32], sizes = [1, 32], strides = [1, 1]} : vector<1x128xf32> to vector<1x32xf32>
    %812 = vector.extract_strided_slice %809 {offsets = [0, 64], sizes = [1, 32], strides = [1, 1]} : vector<1x128xf32> to vector<1x32xf32>
    %813 = vector.extract_strided_slice %809 {offsets = [0, 96], sizes = [1, 32], strides = [1, 1]} : vector<1x128xf32> to vector<1x32xf32>
    %814 = arith.mulf %811, %726 : vector<1x32xf32>
    %815 = arith.mulf %810, %812 : vector<1x32xf32>
    %816 = arith.addf %814, %815 : vector<1x32xf32>
    %817 = math.tanh %816 : vector<1x32xf32>
    %818 = arith.mulf %813, %817 : vector<1x32xf32>
    %819 = tpu.concatenate %818, %758 in 1 : vector<1x32xf32>, vector<1x32xf32> -> vector<1x64xf32>
    %c2_275 = arith.constant 2 : index
    %c0_276 = arith.constant 0 : index
    %c0_277 = arith.constant 0 : index
    %820 = vector.load %arg13[%c2_275, %c0_276, %c0_277] : memref<3x64x128xbf16, #tpu.memory_space<vmem>>, vector<1x64x128xbf16>
    %821 = vector.shape_cast %820 : vector<1x64x128xbf16> to vector<64x128xbf16>
    %822 = arith.truncf %819 : vector<1x64xf32> to vector<1x64xbf16>
    %cst_278 = arith.constant dense<0.000000e+00> : vector<1x128xf32>
    %823 = tpu.matmul %822, %821, %cst_278 {dimension_numbers = #tpu.dot_dimension_numbers<[1], [0], [0], [1], [0, 0, 1, 1], [], []>} : vector<1x64xbf16>, vector<64x128xbf16>, vector<1x128xf32> -> vector<1x128xf32>
    %c2_279 = arith.constant 2 : index
    %c0_280 = arith.constant 0 : index
    %c0_281 = arith.constant 0 : index
    %824 = vector.load %arg14[%c2_279, %c0_280, %c0_281] : memref<3x1x128xf32, #tpu.memory_space<vmem>>, vector<1x1x128xf32>
    %825 = vector.shape_cast %824 : vector<1x1x128xf32> to vector<1x128xf32>
    %826 = arith.addf %823, %825 : vector<1x128xf32>
    %827 = tpu.iota {dimensions = array<i32: 1>} : vector<1x128xi32>
    %c64_i32_282 = arith.constant 64 : i32
    %828 = vector.broadcast %c64_i32_282 : i32 to vector<1x128xi32>
    %829 = arith.cmpi sge, %827, %828 : vector<1x128xi32>
    %c96_i32_283 = arith.constant 96 : i32
    %830 = vector.broadcast %c96_i32_283 : i32 to vector<1x128xi32>
    %831 = arith.cmpi slt, %827, %830 : vector<1x128xi32>
    %832 = arith.andi %829, %831 : vector<1x128xi1>
    %833 = math.tanh %826 : vector<1x128xf32>
    %834 = arith.negf %826 : vector<1x128xf32>
    %835 = math.exp %834 : vector<1x128xf32>
    %cst_284 = arith.constant 1.000000e+00 : f32
    %836 = vector.broadcast %cst_284 : f32 to vector<1x128xf32>
    %837 = arith.addf %836, %835 : vector<1x128xf32>
    %838 = arith.divf %836, %837 : vector<1x128xf32>
    %839 = arith.select %832, %833, %838 : vector<1x128xi1>, vector<1x128xf32>
    %840 = vector.extract_strided_slice %839 {offsets = [0, 0], sizes = [1, 32], strides = [1, 1]} : vector<1x128xf32> to vector<1x32xf32>
    %841 = vector.extract_strided_slice %839 {offsets = [0, 32], sizes = [1, 32], strides = [1, 1]} : vector<1x128xf32> to vector<1x32xf32>
    %842 = vector.extract_strided_slice %839 {offsets = [0, 64], sizes = [1, 32], strides = [1, 1]} : vector<1x128xf32> to vector<1x32xf32>
    %843 = vector.extract_strided_slice %839 {offsets = [0, 96], sizes = [1, 32], strides = [1, 1]} : vector<1x128xf32> to vector<1x32xf32>
    %844 = arith.mulf %841, %756 : vector<1x32xf32>
    %845 = arith.mulf %840, %842 : vector<1x32xf32>
    %846 = arith.addf %844, %845 : vector<1x32xf32>
    %847 = math.tanh %846 : vector<1x32xf32>
    %848 = arith.mulf %843, %847 : vector<1x32xf32>
    %849 = tpu.concatenate %668, %788 in 1 : vector<1x32xf32>, vector<1x32xf32> -> vector<1x64xf32>
    %c0_285 = arith.constant 0 : index
    %c0_286 = arith.constant 0 : index
    %c0_287 = arith.constant 0 : index
    %850 = vector.load %arg13[%c0_285, %c0_286, %c0_287] : memref<3x64x128xbf16, #tpu.memory_space<vmem>>, vector<1x64x128xbf16>
    %851 = vector.shape_cast %850 : vector<1x64x128xbf16> to vector<64x128xbf16>
    %852 = arith.truncf %849 : vector<1x64xf32> to vector<1x64xbf16>
    %cst_288 = arith.constant dense<0.000000e+00> : vector<1x128xf32>
    %853 = tpu.matmul %852, %851, %cst_288 {dimension_numbers = #tpu.dot_dimension_numbers<[1], [0], [0], [1], [0, 0, 1, 1], [], []>} : vector<1x64xbf16>, vector<64x128xbf16>, vector<1x128xf32> -> vector<1x128xf32>
    %c0_289 = arith.constant 0 : index
    %c0_290 = arith.constant 0 : index
    %c0_291 = arith.constant 0 : index
    %854 = vector.load %arg14[%c0_289, %c0_290, %c0_291] : memref<3x1x128xf32, #tpu.memory_space<vmem>>, vector<1x1x128xf32>
    %855 = vector.shape_cast %854 : vector<1x1x128xf32> to vector<1x128xf32>
    %856 = arith.addf %853, %855 : vector<1x128xf32>
    %857 = tpu.iota {dimensions = array<i32: 1>} : vector<1x128xi32>
    %c64_i32_292 = arith.constant 64 : i32
    %858 = vector.broadcast %c64_i32_292 : i32 to vector<1x128xi32>
    %859 = arith.cmpi sge, %857, %858 : vector<1x128xi32>
    %c96_i32_293 = arith.constant 96 : i32
    %860 = vector.broadcast %c96_i32_293 : i32 to vector<1x128xi32>
    %861 = arith.cmpi slt, %857, %860 : vector<1x128xi32>
    %862 = arith.andi %859, %861 : vector<1x128xi1>
    %863 = math.tanh %856 : vector<1x128xf32>
    %864 = arith.negf %856 : vector<1x128xf32>
    %865 = math.exp %864 : vector<1x128xf32>
    %cst_294 = arith.constant 1.000000e+00 : f32
    %866 = vector.broadcast %cst_294 : f32 to vector<1x128xf32>
    %867 = arith.addf %866, %865 : vector<1x128xf32>
    %868 = arith.divf %866, %867 : vector<1x128xf32>
    %869 = arith.select %862, %863, %868 : vector<1x128xi1>, vector<1x128xf32>
    %870 = vector.extract_strided_slice %869 {offsets = [0, 0], sizes = [1, 32], strides = [1, 1]} : vector<1x128xf32> to vector<1x32xf32>
    %871 = vector.extract_strided_slice %869 {offsets = [0, 32], sizes = [1, 32], strides = [1, 1]} : vector<1x128xf32> to vector<1x32xf32>
    %872 = vector.extract_strided_slice %869 {offsets = [0, 64], sizes = [1, 32], strides = [1, 1]} : vector<1x128xf32> to vector<1x32xf32>
    %873 = vector.extract_strided_slice %869 {offsets = [0, 96], sizes = [1, 32], strides = [1, 1]} : vector<1x128xf32> to vector<1x32xf32>
    %874 = arith.mulf %871, %786 : vector<1x32xf32>
    %875 = arith.mulf %870, %872 : vector<1x32xf32>
    %876 = arith.addf %874, %875 : vector<1x32xf32>
    %877 = math.tanh %876 : vector<1x32xf32>
    %878 = arith.mulf %873, %877 : vector<1x32xf32>
    %879 = tpu.concatenate %878, %818 in 1 : vector<1x32xf32>, vector<1x32xf32> -> vector<1x64xf32>
    %c1_295 = arith.constant 1 : index
    %c0_296 = arith.constant 0 : index
    %c0_297 = arith.constant 0 : index
    %880 = vector.load %arg13[%c1_295, %c0_296, %c0_297] : memref<3x64x128xbf16, #tpu.memory_space<vmem>>, vector<1x64x128xbf16>
    %881 = vector.shape_cast %880 : vector<1x64x128xbf16> to vector<64x128xbf16>
    %882 = arith.truncf %879 : vector<1x64xf32> to vector<1x64xbf16>
    %cst_298 = arith.constant dense<0.000000e+00> : vector<1x128xf32>
    %883 = tpu.matmul %882, %881, %cst_298 {dimension_numbers = #tpu.dot_dimension_numbers<[1], [0], [0], [1], [0, 0, 1, 1], [], []>} : vector<1x64xbf16>, vector<64x128xbf16>, vector<1x128xf32> -> vector<1x128xf32>
    %c1_299 = arith.constant 1 : index
    %c0_300 = arith.constant 0 : index
    %c0_301 = arith.constant 0 : index
    %884 = vector.load %arg14[%c1_299, %c0_300, %c0_301] : memref<3x1x128xf32, #tpu.memory_space<vmem>>, vector<1x1x128xf32>
    %885 = vector.shape_cast %884 : vector<1x1x128xf32> to vector<1x128xf32>
    %886 = arith.addf %883, %885 : vector<1x128xf32>
    %887 = tpu.iota {dimensions = array<i32: 1>} : vector<1x128xi32>
    %c64_i32_302 = arith.constant 64 : i32
    %888 = vector.broadcast %c64_i32_302 : i32 to vector<1x128xi32>
    %889 = arith.cmpi sge, %887, %888 : vector<1x128xi32>
    %c96_i32_303 = arith.constant 96 : i32
    %890 = vector.broadcast %c96_i32_303 : i32 to vector<1x128xi32>
    %891 = arith.cmpi slt, %887, %890 : vector<1x128xi32>
    %892 = arith.andi %889, %891 : vector<1x128xi1>
    %893 = math.tanh %886 : vector<1x128xf32>
    %894 = arith.negf %886 : vector<1x128xf32>
    %895 = math.exp %894 : vector<1x128xf32>
    %cst_304 = arith.constant 1.000000e+00 : f32
    %896 = vector.broadcast %cst_304 : f32 to vector<1x128xf32>
    %897 = arith.addf %896, %895 : vector<1x128xf32>
    %898 = arith.divf %896, %897 : vector<1x128xf32>
    %899 = arith.select %892, %893, %898 : vector<1x128xi1>, vector<1x128xf32>
    %900 = vector.extract_strided_slice %899 {offsets = [0, 0], sizes = [1, 32], strides = [1, 1]} : vector<1x128xf32> to vector<1x32xf32>
    %901 = vector.extract_strided_slice %899 {offsets = [0, 32], sizes = [1, 32], strides = [1, 1]} : vector<1x128xf32> to vector<1x32xf32>
    %902 = vector.extract_strided_slice %899 {offsets = [0, 64], sizes = [1, 32], strides = [1, 1]} : vector<1x128xf32> to vector<1x32xf32>
    %903 = vector.extract_strided_slice %899 {offsets = [0, 96], sizes = [1, 32], strides = [1, 1]} : vector<1x128xf32> to vector<1x32xf32>
    %904 = arith.mulf %901, %816 : vector<1x32xf32>
    %905 = arith.mulf %900, %902 : vector<1x32xf32>
    %906 = arith.addf %904, %905 : vector<1x32xf32>
    %907 = math.tanh %906 : vector<1x32xf32>
    %908 = arith.mulf %903, %907 : vector<1x32xf32>
    %909 = tpu.concatenate %908, %848 in 1 : vector<1x32xf32>, vector<1x32xf32> -> vector<1x64xf32>
    %c2_305 = arith.constant 2 : index
    %c0_306 = arith.constant 0 : index
    %c0_307 = arith.constant 0 : index
    %910 = vector.load %arg13[%c2_305, %c0_306, %c0_307] : memref<3x64x128xbf16, #tpu.memory_space<vmem>>, vector<1x64x128xbf16>
    %911 = vector.shape_cast %910 : vector<1x64x128xbf16> to vector<64x128xbf16>
    %912 = arith.truncf %909 : vector<1x64xf32> to vector<1x64xbf16>
    %cst_308 = arith.constant dense<0.000000e+00> : vector<1x128xf32>
    %913 = tpu.matmul %912, %911, %cst_308 {dimension_numbers = #tpu.dot_dimension_numbers<[1], [0], [0], [1], [0, 0, 1, 1], [], []>} : vector<1x64xbf16>, vector<64x128xbf16>, vector<1x128xf32> -> vector<1x128xf32>
    %c2_309 = arith.constant 2 : index
    %c0_310 = arith.constant 0 : index
    %c0_311 = arith.constant 0 : index
    %914 = vector.load %arg14[%c2_309, %c0_310, %c0_311] : memref<3x1x128xf32, #tpu.memory_space<vmem>>, vector<1x1x128xf32>
    %915 = vector.shape_cast %914 : vector<1x1x128xf32> to vector<1x128xf32>
    %916 = arith.addf %913, %915 : vector<1x128xf32>
    %917 = tpu.iota {dimensions = array<i32: 1>} : vector<1x128xi32>
    %c64_i32_312 = arith.constant 64 : i32
    %918 = vector.broadcast %c64_i32_312 : i32 to vector<1x128xi32>
    %919 = arith.cmpi sge, %917, %918 : vector<1x128xi32>
    %c96_i32_313 = arith.constant 96 : i32
    %920 = vector.broadcast %c96_i32_313 : i32 to vector<1x128xi32>
    %921 = arith.cmpi slt, %917, %920 : vector<1x128xi32>
    %922 = arith.andi %919, %921 : vector<1x128xi1>
    %923 = math.tanh %916 : vector<1x128xf32>
    %924 = arith.negf %916 : vector<1x128xf32>
    %925 = math.exp %924 : vector<1x128xf32>
    %cst_314 = arith.constant 1.000000e+00 : f32
    %926 = vector.broadcast %cst_314 : f32 to vector<1x128xf32>
    %927 = arith.addf %926, %925 : vector<1x128xf32>
    %928 = arith.divf %926, %927 : vector<1x128xf32>
    %929 = arith.select %922, %923, %928 : vector<1x128xi1>, vector<1x128xf32>
    %930 = vector.extract_strided_slice %929 {offsets = [0, 0], sizes = [1, 32], strides = [1, 1]} : vector<1x128xf32> to vector<1x32xf32>
    %931 = vector.extract_strided_slice %929 {offsets = [0, 32], sizes = [1, 32], strides = [1, 1]} : vector<1x128xf32> to vector<1x32xf32>
    %932 = vector.extract_strided_slice %929 {offsets = [0, 64], sizes = [1, 32], strides = [1, 1]} : vector<1x128xf32> to vector<1x32xf32>
    %933 = vector.extract_strided_slice %929 {offsets = [0, 96], sizes = [1, 32], strides = [1, 1]} : vector<1x128xf32> to vector<1x32xf32>
    %934 = arith.mulf %931, %846 : vector<1x32xf32>
    %935 = arith.mulf %930, %932 : vector<1x32xf32>
    %936 = arith.addf %934, %935 : vector<1x32xf32>
    %937 = math.tanh %936 : vector<1x32xf32>
    %938 = arith.mulf %933, %937 : vector<1x32xf32>
    %939 = vector.extract_strided_slice %344 {offsets = [2, 0], sizes = [1, 32], strides = [1, 1]} : vector<4x32xf32> to vector<1x32xf32>
    %940 = vector.extract_strided_slice %365 {offsets = [2, 0], sizes = [1, 32], strides = [1, 1]} : vector<4x32xf32> to vector<1x32xf32>
    %941 = vector.extract_strided_slice %386 {offsets = [2, 0], sizes = [1, 32], strides = [1, 1]} : vector<4x32xf32> to vector<1x32xf32>
    %942 = tpu.concatenate %939, %878 in 1 : vector<1x32xf32>, vector<1x32xf32> -> vector<1x64xf32>
    %c0_315 = arith.constant 0 : index
    %c0_316 = arith.constant 0 : index
    %c0_317 = arith.constant 0 : index
    %943 = vector.load %arg13[%c0_315, %c0_316, %c0_317] : memref<3x64x128xbf16, #tpu.memory_space<vmem>>, vector<1x64x128xbf16>
    %944 = vector.shape_cast %943 : vector<1x64x128xbf16> to vector<64x128xbf16>
    %945 = arith.truncf %942 : vector<1x64xf32> to vector<1x64xbf16>
    %cst_318 = arith.constant dense<0.000000e+00> : vector<1x128xf32>
    %946 = tpu.matmul %945, %944, %cst_318 {dimension_numbers = #tpu.dot_dimension_numbers<[1], [0], [0], [1], [0, 0, 1, 1], [], []>} : vector<1x64xbf16>, vector<64x128xbf16>, vector<1x128xf32> -> vector<1x128xf32>
    %c0_319 = arith.constant 0 : index
    %c0_320 = arith.constant 0 : index
    %c0_321 = arith.constant 0 : index
    %947 = vector.load %arg14[%c0_319, %c0_320, %c0_321] : memref<3x1x128xf32, #tpu.memory_space<vmem>>, vector<1x1x128xf32>
    %948 = vector.shape_cast %947 : vector<1x1x128xf32> to vector<1x128xf32>
    %949 = arith.addf %946, %948 : vector<1x128xf32>
    %950 = tpu.iota {dimensions = array<i32: 1>} : vector<1x128xi32>
    %c64_i32_322 = arith.constant 64 : i32
    %951 = vector.broadcast %c64_i32_322 : i32 to vector<1x128xi32>
    %952 = arith.cmpi sge, %950, %951 : vector<1x128xi32>
    %c96_i32_323 = arith.constant 96 : i32
    %953 = vector.broadcast %c96_i32_323 : i32 to vector<1x128xi32>
    %954 = arith.cmpi slt, %950, %953 : vector<1x128xi32>
    %955 = arith.andi %952, %954 : vector<1x128xi1>
    %956 = math.tanh %949 : vector<1x128xf32>
    %957 = arith.negf %949 : vector<1x128xf32>
    %958 = math.exp %957 : vector<1x128xf32>
    %cst_324 = arith.constant 1.000000e+00 : f32
    %959 = vector.broadcast %cst_324 : f32 to vector<1x128xf32>
    %960 = arith.addf %959, %958 : vector<1x128xf32>
    %961 = arith.divf %959, %960 : vector<1x128xf32>
    %962 = arith.select %955, %956, %961 : vector<1x128xi1>, vector<1x128xf32>
    %963 = vector.extract_strided_slice %962 {offsets = [0, 0], sizes = [1, 32], strides = [1, 1]} : vector<1x128xf32> to vector<1x32xf32>
    %964 = vector.extract_strided_slice %962 {offsets = [0, 32], sizes = [1, 32], strides = [1, 1]} : vector<1x128xf32> to vector<1x32xf32>
    %965 = vector.extract_strided_slice %962 {offsets = [0, 64], sizes = [1, 32], strides = [1, 1]} : vector<1x128xf32> to vector<1x32xf32>
    %966 = vector.extract_strided_slice %962 {offsets = [0, 96], sizes = [1, 32], strides = [1, 1]} : vector<1x128xf32> to vector<1x32xf32>
    %967 = arith.mulf %964, %876 : vector<1x32xf32>
    %968 = arith.mulf %963, %965 : vector<1x32xf32>
    %969 = arith.addf %967, %968 : vector<1x32xf32>
    %970 = math.tanh %969 : vector<1x32xf32>
    %971 = arith.mulf %966, %970 : vector<1x32xf32>
    %972 = tpu.concatenate %971, %908 in 1 : vector<1x32xf32>, vector<1x32xf32> -> vector<1x64xf32>
    %c1_325 = arith.constant 1 : index
    %c0_326 = arith.constant 0 : index
    %c0_327 = arith.constant 0 : index
    %973 = vector.load %arg13[%c1_325, %c0_326, %c0_327] : memref<3x64x128xbf16, #tpu.memory_space<vmem>>, vector<1x64x128xbf16>
    %974 = vector.shape_cast %973 : vector<1x64x128xbf16> to vector<64x128xbf16>
    %975 = arith.truncf %972 : vector<1x64xf32> to vector<1x64xbf16>
    %cst_328 = arith.constant dense<0.000000e+00> : vector<1x128xf32>
    %976 = tpu.matmul %975, %974, %cst_328 {dimension_numbers = #tpu.dot_dimension_numbers<[1], [0], [0], [1], [0, 0, 1, 1], [], []>} : vector<1x64xbf16>, vector<64x128xbf16>, vector<1x128xf32> -> vector<1x128xf32>
    %c1_329 = arith.constant 1 : index
    %c0_330 = arith.constant 0 : index
    %c0_331 = arith.constant 0 : index
    %977 = vector.load %arg14[%c1_329, %c0_330, %c0_331] : memref<3x1x128xf32, #tpu.memory_space<vmem>>, vector<1x1x128xf32>
    %978 = vector.shape_cast %977 : vector<1x1x128xf32> to vector<1x128xf32>
    %979 = arith.addf %976, %978 : vector<1x128xf32>
    %980 = tpu.iota {dimensions = array<i32: 1>} : vector<1x128xi32>
    %c64_i32_332 = arith.constant 64 : i32
    %981 = vector.broadcast %c64_i32_332 : i32 to vector<1x128xi32>
    %982 = arith.cmpi sge, %980, %981 : vector<1x128xi32>
    %c96_i32_333 = arith.constant 96 : i32
    %983 = vector.broadcast %c96_i32_333 : i32 to vector<1x128xi32>
    %984 = arith.cmpi slt, %980, %983 : vector<1x128xi32>
    %985 = arith.andi %982, %984 : vector<1x128xi1>
    %986 = math.tanh %979 : vector<1x128xf32>
    %987 = arith.negf %979 : vector<1x128xf32>
    %988 = math.exp %987 : vector<1x128xf32>
    %cst_334 = arith.constant 1.000000e+00 : f32
    %989 = vector.broadcast %cst_334 : f32 to vector<1x128xf32>
    %990 = arith.addf %989, %988 : vector<1x128xf32>
    %991 = arith.divf %989, %990 : vector<1x128xf32>
    %992 = arith.select %985, %986, %991 : vector<1x128xi1>, vector<1x128xf32>
    %993 = vector.extract_strided_slice %992 {offsets = [0, 0], sizes = [1, 32], strides = [1, 1]} : vector<1x128xf32> to vector<1x32xf32>
    %994 = vector.extract_strided_slice %992 {offsets = [0, 32], sizes = [1, 32], strides = [1, 1]} : vector<1x128xf32> to vector<1x32xf32>
    %995 = vector.extract_strided_slice %992 {offsets = [0, 64], sizes = [1, 32], strides = [1, 1]} : vector<1x128xf32> to vector<1x32xf32>
    %996 = vector.extract_strided_slice %992 {offsets = [0, 96], sizes = [1, 32], strides = [1, 1]} : vector<1x128xf32> to vector<1x32xf32>
    %997 = arith.mulf %994, %906 : vector<1x32xf32>
    %998 = arith.mulf %993, %995 : vector<1x32xf32>
    %999 = arith.addf %997, %998 : vector<1x32xf32>
    %1000 = math.tanh %999 : vector<1x32xf32>
    %1001 = arith.mulf %996, %1000 : vector<1x32xf32>
    %1002 = tpu.concatenate %1001, %938 in 1 : vector<1x32xf32>, vector<1x32xf32> -> vector<1x64xf32>
    %c2_335 = arith.constant 2 : index
    %c0_336 = arith.constant 0 : index
    %c0_337 = arith.constant 0 : index
    %1003 = vector.load %arg13[%c2_335, %c0_336, %c0_337] : memref<3x64x128xbf16, #tpu.memory_space<vmem>>, vector<1x64x128xbf16>
    %1004 = vector.shape_cast %1003 : vector<1x64x128xbf16> to vector<64x128xbf16>
    %1005 = arith.truncf %1002 : vector<1x64xf32> to vector<1x64xbf16>
    %cst_338 = arith.constant dense<0.000000e+00> : vector<1x128xf32>
    %1006 = tpu.matmul %1005, %1004, %cst_338 {dimension_numbers = #tpu.dot_dimension_numbers<[1], [0], [0], [1], [0, 0, 1, 1], [], []>} : vector<1x64xbf16>, vector<64x128xbf16>, vector<1x128xf32> -> vector<1x128xf32>
    %c2_339 = arith.constant 2 : index
    %c0_340 = arith.constant 0 : index
    %c0_341 = arith.constant 0 : index
    %1007 = vector.load %arg14[%c2_339, %c0_340, %c0_341] : memref<3x1x128xf32, #tpu.memory_space<vmem>>, vector<1x1x128xf32>
    %1008 = vector.shape_cast %1007 : vector<1x1x128xf32> to vector<1x128xf32>
    %1009 = arith.addf %1006, %1008 : vector<1x128xf32>
    %1010 = tpu.iota {dimensions = array<i32: 1>} : vector<1x128xi32>
    %c64_i32_342 = arith.constant 64 : i32
    %1011 = vector.broadcast %c64_i32_342 : i32 to vector<1x128xi32>
    %1012 = arith.cmpi sge, %1010, %1011 : vector<1x128xi32>
    %c96_i32_343 = arith.constant 96 : i32
    %1013 = vector.broadcast %c96_i32_343 : i32 to vector<1x128xi32>
    %1014 = arith.cmpi slt, %1010, %1013 : vector<1x128xi32>
    %1015 = arith.andi %1012, %1014 : vector<1x128xi1>
    %1016 = math.tanh %1009 : vector<1x128xf32>
    %1017 = arith.negf %1009 : vector<1x128xf32>
    %1018 = math.exp %1017 : vector<1x128xf32>
    %cst_344 = arith.constant 1.000000e+00 : f32
    %1019 = vector.broadcast %cst_344 : f32 to vector<1x128xf32>
    %1020 = arith.addf %1019, %1018 : vector<1x128xf32>
    %1021 = arith.divf %1019, %1020 : vector<1x128xf32>
    %1022 = arith.select %1015, %1016, %1021 : vector<1x128xi1>, vector<1x128xf32>
    %1023 = vector.extract_strided_slice %1022 {offsets = [0, 0], sizes = [1, 32], strides = [1, 1]} : vector<1x128xf32> to vector<1x32xf32>
    %1024 = vector.extract_strided_slice %1022 {offsets = [0, 32], sizes = [1, 32], strides = [1, 1]} : vector<1x128xf32> to vector<1x32xf32>
    %1025 = vector.extract_strided_slice %1022 {offsets = [0, 64], sizes = [1, 32], strides = [1, 1]} : vector<1x128xf32> to vector<1x32xf32>
    %1026 = vector.extract_strided_slice %1022 {offsets = [0, 96], sizes = [1, 32], strides = [1, 1]} : vector<1x128xf32> to vector<1x32xf32>
    %1027 = arith.mulf %1024, %936 : vector<1x32xf32>
    %1028 = arith.mulf %1023, %1025 : vector<1x32xf32>
    %1029 = arith.addf %1027, %1028 : vector<1x32xf32>
    %1030 = math.tanh %1029 : vector<1x32xf32>
    %1031 = arith.mulf %1026, %1030 : vector<1x32xf32>
    %1032 = tpu.concatenate %940, %971 in 1 : vector<1x32xf32>, vector<1x32xf32> -> vector<1x64xf32>
    %c0_345 = arith.constant 0 : index
    %c0_346 = arith.constant 0 : index
    %c0_347 = arith.constant 0 : index
    %1033 = vector.load %arg13[%c0_345, %c0_346, %c0_347] : memref<3x64x128xbf16, #tpu.memory_space<vmem>>, vector<1x64x128xbf16>
    %1034 = vector.shape_cast %1033 : vector<1x64x128xbf16> to vector<64x128xbf16>
    %1035 = arith.truncf %1032 : vector<1x64xf32> to vector<1x64xbf16>
    %cst_348 = arith.constant dense<0.000000e+00> : vector<1x128xf32>
    %1036 = tpu.matmul %1035, %1034, %cst_348 {dimension_numbers = #tpu.dot_dimension_numbers<[1], [0], [0], [1], [0, 0, 1, 1], [], []>} : vector<1x64xbf16>, vector<64x128xbf16>, vector<1x128xf32> -> vector<1x128xf32>
    %c0_349 = arith.constant 0 : index
    %c0_350 = arith.constant 0 : index
    %c0_351 = arith.constant 0 : index
    %1037 = vector.load %arg14[%c0_349, %c0_350, %c0_351] : memref<3x1x128xf32, #tpu.memory_space<vmem>>, vector<1x1x128xf32>
    %1038 = vector.shape_cast %1037 : vector<1x1x128xf32> to vector<1x128xf32>
    %1039 = arith.addf %1036, %1038 : vector<1x128xf32>
    %1040 = tpu.iota {dimensions = array<i32: 1>} : vector<1x128xi32>
    %c64_i32_352 = arith.constant 64 : i32
    %1041 = vector.broadcast %c64_i32_352 : i32 to vector<1x128xi32>
    %1042 = arith.cmpi sge, %1040, %1041 : vector<1x128xi32>
    %c96_i32_353 = arith.constant 96 : i32
    %1043 = vector.broadcast %c96_i32_353 : i32 to vector<1x128xi32>
    %1044 = arith.cmpi slt, %1040, %1043 : vector<1x128xi32>
    %1045 = arith.andi %1042, %1044 : vector<1x128xi1>
    %1046 = math.tanh %1039 : vector<1x128xf32>
    %1047 = arith.negf %1039 : vector<1x128xf32>
    %1048 = math.exp %1047 : vector<1x128xf32>
    %cst_354 = arith.constant 1.000000e+00 : f32
    %1049 = vector.broadcast %cst_354 : f32 to vector<1x128xf32>
    %1050 = arith.addf %1049, %1048 : vector<1x128xf32>
    %1051 = arith.divf %1049, %1050 : vector<1x128xf32>
    %1052 = arith.select %1045, %1046, %1051 : vector<1x128xi1>, vector<1x128xf32>
    %1053 = vector.extract_strided_slice %1052 {offsets = [0, 0], sizes = [1, 32], strides = [1, 1]} : vector<1x128xf32> to vector<1x32xf32>
    %1054 = vector.extract_strided_slice %1052 {offsets = [0, 32], sizes = [1, 32], strides = [1, 1]} : vector<1x128xf32> to vector<1x32xf32>
    %1055 = vector.extract_strided_slice %1052 {offsets = [0, 64], sizes = [1, 32], strides = [1, 1]} : vector<1x128xf32> to vector<1x32xf32>
    %1056 = vector.extract_strided_slice %1052 {offsets = [0, 96], sizes = [1, 32], strides = [1, 1]} : vector<1x128xf32> to vector<1x32xf32>
    %1057 = arith.mulf %1054, %969 : vector<1x32xf32>
    %1058 = arith.mulf %1053, %1055 : vector<1x32xf32>
    %1059 = arith.addf %1057, %1058 : vector<1x32xf32>
    %1060 = math.tanh %1059 : vector<1x32xf32>
    %1061 = arith.mulf %1056, %1060 : vector<1x32xf32>
    %1062 = tpu.concatenate %1061, %1001 in 1 : vector<1x32xf32>, vector<1x32xf32> -> vector<1x64xf32>
    %c1_355 = arith.constant 1 : index
    %c0_356 = arith.constant 0 : index
    %c0_357 = arith.constant 0 : index
    %1063 = vector.load %arg13[%c1_355, %c0_356, %c0_357] : memref<3x64x128xbf16, #tpu.memory_space<vmem>>, vector<1x64x128xbf16>
    %1064 = vector.shape_cast %1063 : vector<1x64x128xbf16> to vector<64x128xbf16>
    %1065 = arith.truncf %1062 : vector<1x64xf32> to vector<1x64xbf16>
    %cst_358 = arith.constant dense<0.000000e+00> : vector<1x128xf32>
    %1066 = tpu.matmul %1065, %1064, %cst_358 {dimension_numbers = #tpu.dot_dimension_numbers<[1], [0], [0], [1], [0, 0, 1, 1], [], []>} : vector<1x64xbf16>, vector<64x128xbf16>, vector<1x128xf32> -> vector<1x128xf32>
    %c1_359 = arith.constant 1 : index
    %c0_360 = arith.constant 0 : index
    %c0_361 = arith.constant 0 : index
    %1067 = vector.load %arg14[%c1_359, %c0_360, %c0_361] : memref<3x1x128xf32, #tpu.memory_space<vmem>>, vector<1x1x128xf32>
    %1068 = vector.shape_cast %1067 : vector<1x1x128xf32> to vector<1x128xf32>
    %1069 = arith.addf %1066, %1068 : vector<1x128xf32>
    %1070 = tpu.iota {dimensions = array<i32: 1>} : vector<1x128xi32>
    %c64_i32_362 = arith.constant 64 : i32
    %1071 = vector.broadcast %c64_i32_362 : i32 to vector<1x128xi32>
    %1072 = arith.cmpi sge, %1070, %1071 : vector<1x128xi32>
    %c96_i32_363 = arith.constant 96 : i32
    %1073 = vector.broadcast %c96_i32_363 : i32 to vector<1x128xi32>
    %1074 = arith.cmpi slt, %1070, %1073 : vector<1x128xi32>
    %1075 = arith.andi %1072, %1074 : vector<1x128xi1>
    %1076 = math.tanh %1069 : vector<1x128xf32>
    %1077 = arith.negf %1069 : vector<1x128xf32>
    %1078 = math.exp %1077 : vector<1x128xf32>
    %cst_364 = arith.constant 1.000000e+00 : f32
    %1079 = vector.broadcast %cst_364 : f32 to vector<1x128xf32>
    %1080 = arith.addf %1079, %1078 : vector<1x128xf32>
    %1081 = arith.divf %1079, %1080 : vector<1x128xf32>
    %1082 = arith.select %1075, %1076, %1081 : vector<1x128xi1>, vector<1x128xf32>
    %1083 = vector.extract_strided_slice %1082 {offsets = [0, 0], sizes = [1, 32], strides = [1, 1]} : vector<1x128xf32> to vector<1x32xf32>
    %1084 = vector.extract_strided_slice %1082 {offsets = [0, 32], sizes = [1, 32], strides = [1, 1]} : vector<1x128xf32> to vector<1x32xf32>
    %1085 = vector.extract_strided_slice %1082 {offsets = [0, 64], sizes = [1, 32], strides = [1, 1]} : vector<1x128xf32> to vector<1x32xf32>
    %1086 = vector.extract_strided_slice %1082 {offsets = [0, 96], sizes = [1, 32], strides = [1, 1]} : vector<1x128xf32> to vector<1x32xf32>
    %1087 = arith.mulf %1084, %999 : vector<1x32xf32>
    %1088 = arith.mulf %1083, %1085 : vector<1x32xf32>
    %1089 = arith.addf %1087, %1088 : vector<1x32xf32>
    %1090 = math.tanh %1089 : vector<1x32xf32>
    %1091 = arith.mulf %1086, %1090 : vector<1x32xf32>
    %1092 = tpu.concatenate %1091, %1031 in 1 : vector<1x32xf32>, vector<1x32xf32> -> vector<1x64xf32>
    %c2_365 = arith.constant 2 : index
    %c0_366 = arith.constant 0 : index
    %c0_367 = arith.constant 0 : index
    %1093 = vector.load %arg13[%c2_365, %c0_366, %c0_367] : memref<3x64x128xbf16, #tpu.memory_space<vmem>>, vector<1x64x128xbf16>
    %1094 = vector.shape_cast %1093 : vector<1x64x128xbf16> to vector<64x128xbf16>
    %1095 = arith.truncf %1092 : vector<1x64xf32> to vector<1x64xbf16>
    %cst_368 = arith.constant dense<0.000000e+00> : vector<1x128xf32>
    %1096 = tpu.matmul %1095, %1094, %cst_368 {dimension_numbers = #tpu.dot_dimension_numbers<[1], [0], [0], [1], [0, 0, 1, 1], [], []>} : vector<1x64xbf16>, vector<64x128xbf16>, vector<1x128xf32> -> vector<1x128xf32>
    %c2_369 = arith.constant 2 : index
    %c0_370 = arith.constant 0 : index
    %c0_371 = arith.constant 0 : index
    %1097 = vector.load %arg14[%c2_369, %c0_370, %c0_371] : memref<3x1x128xf32, #tpu.memory_space<vmem>>, vector<1x1x128xf32>
    %1098 = vector.shape_cast %1097 : vector<1x1x128xf32> to vector<1x128xf32>
    %1099 = arith.addf %1096, %1098 : vector<1x128xf32>
    %1100 = tpu.iota {dimensions = array<i32: 1>} : vector<1x128xi32>
    %c64_i32_372 = arith.constant 64 : i32
    %1101 = vector.broadcast %c64_i32_372 : i32 to vector<1x128xi32>
    %1102 = arith.cmpi sge, %1100, %1101 : vector<1x128xi32>
    %c96_i32_373 = arith.constant 96 : i32
    %1103 = vector.broadcast %c96_i32_373 : i32 to vector<1x128xi32>
    %1104 = arith.cmpi slt, %1100, %1103 : vector<1x128xi32>
    %1105 = arith.andi %1102, %1104 : vector<1x128xi1>
    %1106 = math.tanh %1099 : vector<1x128xf32>
    %1107 = arith.negf %1099 : vector<1x128xf32>
    %1108 = math.exp %1107 : vector<1x128xf32>
    %cst_374 = arith.constant 1.000000e+00 : f32
    %1109 = vector.broadcast %cst_374 : f32 to vector<1x128xf32>
    %1110 = arith.addf %1109, %1108 : vector<1x128xf32>
    %1111 = arith.divf %1109, %1110 : vector<1x128xf32>
    %1112 = arith.select %1105, %1106, %1111 : vector<1x128xi1>, vector<1x128xf32>
    %1113 = vector.extract_strided_slice %1112 {offsets = [0, 0], sizes = [1, 32], strides = [1, 1]} : vector<1x128xf32> to vector<1x32xf32>
    %1114 = vector.extract_strided_slice %1112 {offsets = [0, 32], sizes = [1, 32], strides = [1, 1]} : vector<1x128xf32> to vector<1x32xf32>
    %1115 = vector.extract_strided_slice %1112 {offsets = [0, 64], sizes = [1, 32], strides = [1, 1]} : vector<1x128xf32> to vector<1x32xf32>
    %1116 = vector.extract_strided_slice %1112 {offsets = [0, 96], sizes = [1, 32], strides = [1, 1]} : vector<1x128xf32> to vector<1x32xf32>
    %1117 = arith.mulf %1114, %1029 : vector<1x32xf32>
    %1118 = arith.mulf %1113, %1115 : vector<1x32xf32>
    %1119 = arith.addf %1117, %1118 : vector<1x32xf32>
    %1120 = math.tanh %1119 : vector<1x32xf32>
    %1121 = arith.mulf %1116, %1120 : vector<1x32xf32>
    %1122 = tpu.concatenate %941, %1061 in 1 : vector<1x32xf32>, vector<1x32xf32> -> vector<1x64xf32>
    %c0_375 = arith.constant 0 : index
    %c0_376 = arith.constant 0 : index
    %c0_377 = arith.constant 0 : index
    %1123 = vector.load %arg13[%c0_375, %c0_376, %c0_377] : memref<3x64x128xbf16, #tpu.memory_space<vmem>>, vector<1x64x128xbf16>
    %1124 = vector.shape_cast %1123 : vector<1x64x128xbf16> to vector<64x128xbf16>
    %1125 = arith.truncf %1122 : vector<1x64xf32> to vector<1x64xbf16>
    %cst_378 = arith.constant dense<0.000000e+00> : vector<1x128xf32>
    %1126 = tpu.matmul %1125, %1124, %cst_378 {dimension_numbers = #tpu.dot_dimension_numbers<[1], [0], [0], [1], [0, 0, 1, 1], [], []>} : vector<1x64xbf16>, vector<64x128xbf16>, vector<1x128xf32> -> vector<1x128xf32>
    %c0_379 = arith.constant 0 : index
    %c0_380 = arith.constant 0 : index
    %c0_381 = arith.constant 0 : index
    %1127 = vector.load %arg14[%c0_379, %c0_380, %c0_381] : memref<3x1x128xf32, #tpu.memory_space<vmem>>, vector<1x1x128xf32>
    %1128 = vector.shape_cast %1127 : vector<1x1x128xf32> to vector<1x128xf32>
    %1129 = arith.addf %1126, %1128 : vector<1x128xf32>
    %1130 = tpu.iota {dimensions = array<i32: 1>} : vector<1x128xi32>
    %c64_i32_382 = arith.constant 64 : i32
    %1131 = vector.broadcast %c64_i32_382 : i32 to vector<1x128xi32>
    %1132 = arith.cmpi sge, %1130, %1131 : vector<1x128xi32>
    %c96_i32_383 = arith.constant 96 : i32
    %1133 = vector.broadcast %c96_i32_383 : i32 to vector<1x128xi32>
    %1134 = arith.cmpi slt, %1130, %1133 : vector<1x128xi32>
    %1135 = arith.andi %1132, %1134 : vector<1x128xi1>
    %1136 = math.tanh %1129 : vector<1x128xf32>
    %1137 = arith.negf %1129 : vector<1x128xf32>
    %1138 = math.exp %1137 : vector<1x128xf32>
    %cst_384 = arith.constant 1.000000e+00 : f32
    %1139 = vector.broadcast %cst_384 : f32 to vector<1x128xf32>
    %1140 = arith.addf %1139, %1138 : vector<1x128xf32>
    %1141 = arith.divf %1139, %1140 : vector<1x128xf32>
    %1142 = arith.select %1135, %1136, %1141 : vector<1x128xi1>, vector<1x128xf32>
    %1143 = vector.extract_strided_slice %1142 {offsets = [0, 0], sizes = [1, 32], strides = [1, 1]} : vector<1x128xf32> to vector<1x32xf32>
    %1144 = vector.extract_strided_slice %1142 {offsets = [0, 32], sizes = [1, 32], strides = [1, 1]} : vector<1x128xf32> to vector<1x32xf32>
    %1145 = vector.extract_strided_slice %1142 {offsets = [0, 64], sizes = [1, 32], strides = [1, 1]} : vector<1x128xf32> to vector<1x32xf32>
    %1146 = vector.extract_strided_slice %1142 {offsets = [0, 96], sizes = [1, 32], strides = [1, 1]} : vector<1x128xf32> to vector<1x32xf32>
    %1147 = arith.mulf %1144, %1059 : vector<1x32xf32>
    %1148 = arith.mulf %1143, %1145 : vector<1x32xf32>
    %1149 = arith.addf %1147, %1148 : vector<1x32xf32>
    %1150 = math.tanh %1149 : vector<1x32xf32>
    %1151 = arith.mulf %1146, %1150 : vector<1x32xf32>
    %1152 = tpu.concatenate %1151, %1091 in 1 : vector<1x32xf32>, vector<1x32xf32> -> vector<1x64xf32>
    %c1_385 = arith.constant 1 : index
    %c0_386 = arith.constant 0 : index
    %c0_387 = arith.constant 0 : index
    %1153 = vector.load %arg13[%c1_385, %c0_386, %c0_387] : memref<3x64x128xbf16, #tpu.memory_space<vmem>>, vector<1x64x128xbf16>
    %1154 = vector.shape_cast %1153 : vector<1x64x128xbf16> to vector<64x128xbf16>
    %1155 = arith.truncf %1152 : vector<1x64xf32> to vector<1x64xbf16>
    %cst_388 = arith.constant dense<0.000000e+00> : vector<1x128xf32>
    %1156 = tpu.matmul %1155, %1154, %cst_388 {dimension_numbers = #tpu.dot_dimension_numbers<[1], [0], [0], [1], [0, 0, 1, 1], [], []>} : vector<1x64xbf16>, vector<64x128xbf16>, vector<1x128xf32> -> vector<1x128xf32>
    %c1_389 = arith.constant 1 : index
    %c0_390 = arith.constant 0 : index
    %c0_391 = arith.constant 0 : index
    %1157 = vector.load %arg14[%c1_389, %c0_390, %c0_391] : memref<3x1x128xf32, #tpu.memory_space<vmem>>, vector<1x1x128xf32>
    %1158 = vector.shape_cast %1157 : vector<1x1x128xf32> to vector<1x128xf32>
    %1159 = arith.addf %1156, %1158 : vector<1x128xf32>
    %1160 = tpu.iota {dimensions = array<i32: 1>} : vector<1x128xi32>
    %c64_i32_392 = arith.constant 64 : i32
    %1161 = vector.broadcast %c64_i32_392 : i32 to vector<1x128xi32>
    %1162 = arith.cmpi sge, %1160, %1161 : vector<1x128xi32>
    %c96_i32_393 = arith.constant 96 : i32
    %1163 = vector.broadcast %c96_i32_393 : i32 to vector<1x128xi32>
    %1164 = arith.cmpi slt, %1160, %1163 : vector<1x128xi32>
    %1165 = arith.andi %1162, %1164 : vector<1x128xi1>
    %1166 = math.tanh %1159 : vector<1x128xf32>
    %1167 = arith.negf %1159 : vector<1x128xf32>
    %1168 = math.exp %1167 : vector<1x128xf32>
    %cst_394 = arith.constant 1.000000e+00 : f32
    %1169 = vector.broadcast %cst_394 : f32 to vector<1x128xf32>
    %1170 = arith.addf %1169, %1168 : vector<1x128xf32>
    %1171 = arith.divf %1169, %1170 : vector<1x128xf32>
    %1172 = arith.select %1165, %1166, %1171 : vector<1x128xi1>, vector<1x128xf32>
    %1173 = vector.extract_strided_slice %1172 {offsets = [0, 0], sizes = [1, 32], strides = [1, 1]} : vector<1x128xf32> to vector<1x32xf32>
    %1174 = vector.extract_strided_slice %1172 {offsets = [0, 32], sizes = [1, 32], strides = [1, 1]} : vector<1x128xf32> to vector<1x32xf32>
    %1175 = vector.extract_strided_slice %1172 {offsets = [0, 64], sizes = [1, 32], strides = [1, 1]} : vector<1x128xf32> to vector<1x32xf32>
    %1176 = vector.extract_strided_slice %1172 {offsets = [0, 96], sizes = [1, 32], strides = [1, 1]} : vector<1x128xf32> to vector<1x32xf32>
    %1177 = arith.mulf %1174, %1089 : vector<1x32xf32>
    %1178 = arith.mulf %1173, %1175 : vector<1x32xf32>
    %1179 = arith.addf %1177, %1178 : vector<1x32xf32>
    %1180 = math.tanh %1179 : vector<1x32xf32>
    %1181 = arith.mulf %1176, %1180 : vector<1x32xf32>
    %1182 = tpu.concatenate %1181, %1121 in 1 : vector<1x32xf32>, vector<1x32xf32> -> vector<1x64xf32>
    %c2_395 = arith.constant 2 : index
    %c0_396 = arith.constant 0 : index
    %c0_397 = arith.constant 0 : index
    %1183 = vector.load %arg13[%c2_395, %c0_396, %c0_397] : memref<3x64x128xbf16, #tpu.memory_space<vmem>>, vector<1x64x128xbf16>
    %1184 = vector.shape_cast %1183 : vector<1x64x128xbf16> to vector<64x128xbf16>
    %1185 = arith.truncf %1182 : vector<1x64xf32> to vector<1x64xbf16>
    %cst_398 = arith.constant dense<0.000000e+00> : vector<1x128xf32>
    %1186 = tpu.matmul %1185, %1184, %cst_398 {dimension_numbers = #tpu.dot_dimension_numbers<[1], [0], [0], [1], [0, 0, 1, 1], [], []>} : vector<1x64xbf16>, vector<64x128xbf16>, vector<1x128xf32> -> vector<1x128xf32>
    %c2_399 = arith.constant 2 : index
    %c0_400 = arith.constant 0 : index
    %c0_401 = arith.constant 0 : index
    %1187 = vector.load %arg14[%c2_399, %c0_400, %c0_401] : memref<3x1x128xf32, #tpu.memory_space<vmem>>, vector<1x1x128xf32>
    %1188 = vector.shape_cast %1187 : vector<1x1x128xf32> to vector<1x128xf32>
    %1189 = arith.addf %1186, %1188 : vector<1x128xf32>
    %1190 = tpu.iota {dimensions = array<i32: 1>} : vector<1x128xi32>
    %c64_i32_402 = arith.constant 64 : i32
    %1191 = vector.broadcast %c64_i32_402 : i32 to vector<1x128xi32>
    %1192 = arith.cmpi sge, %1190, %1191 : vector<1x128xi32>
    %c96_i32_403 = arith.constant 96 : i32
    %1193 = vector.broadcast %c96_i32_403 : i32 to vector<1x128xi32>
    %1194 = arith.cmpi slt, %1190, %1193 : vector<1x128xi32>
    %1195 = arith.andi %1192, %1194 : vector<1x128xi1>
    %1196 = math.tanh %1189 : vector<1x128xf32>
    %1197 = arith.negf %1189 : vector<1x128xf32>
    %1198 = math.exp %1197 : vector<1x128xf32>
    %cst_404 = arith.constant 1.000000e+00 : f32
    %1199 = vector.broadcast %cst_404 : f32 to vector<1x128xf32>
    %1200 = arith.addf %1199, %1198 : vector<1x128xf32>
    %1201 = arith.divf %1199, %1200 : vector<1x128xf32>
    %1202 = arith.select %1195, %1196, %1201 : vector<1x128xi1>, vector<1x128xf32>
    %1203 = vector.extract_strided_slice %1202 {offsets = [0, 0], sizes = [1, 32], strides = [1, 1]} : vector<1x128xf32> to vector<1x32xf32>
    %1204 = vector.extract_strided_slice %1202 {offsets = [0, 32], sizes = [1, 32], strides = [1, 1]} : vector<1x128xf32> to vector<1x32xf32>
    %1205 = vector.extract_strided_slice %1202 {offsets = [0, 64], sizes = [1, 32], strides = [1, 1]} : vector<1x128xf32> to vector<1x32xf32>
    %1206 = vector.extract_strided_slice %1202 {offsets = [0, 96], sizes = [1, 32], strides = [1, 1]} : vector<1x128xf32> to vector<1x32xf32>
    %1207 = arith.mulf %1204, %1119 : vector<1x32xf32>
    %1208 = arith.mulf %1203, %1205 : vector<1x32xf32>
    %1209 = arith.addf %1207, %1208 : vector<1x32xf32>
    %1210 = math.tanh %1209 : vector<1x32xf32>
    %1211 = arith.mulf %1206, %1210 : vector<1x32xf32>
    %1212 = vector.extract_strided_slice %344 {offsets = [3, 0], sizes = [1, 32], strides = [1, 1]} : vector<4x32xf32> to vector<1x32xf32>
    %1213 = vector.extract_strided_slice %365 {offsets = [3, 0], sizes = [1, 32], strides = [1, 1]} : vector<4x32xf32> to vector<1x32xf32>
    %1214 = vector.extract_strided_slice %386 {offsets = [3, 0], sizes = [1, 32], strides = [1, 1]} : vector<4x32xf32> to vector<1x32xf32>
    %1215 = tpu.concatenate %1212, %1151 in 1 : vector<1x32xf32>, vector<1x32xf32> -> vector<1x64xf32>
    %c0_405 = arith.constant 0 : index
    %c0_406 = arith.constant 0 : index
    %c0_407 = arith.constant 0 : index
    %1216 = vector.load %arg13[%c0_405, %c0_406, %c0_407] : memref<3x64x128xbf16, #tpu.memory_space<vmem>>, vector<1x64x128xbf16>
    %1217 = vector.shape_cast %1216 : vector<1x64x128xbf16> to vector<64x128xbf16>
    %1218 = arith.truncf %1215 : vector<1x64xf32> to vector<1x64xbf16>
    %cst_408 = arith.constant dense<0.000000e+00> : vector<1x128xf32>
    %1219 = tpu.matmul %1218, %1217, %cst_408 {dimension_numbers = #tpu.dot_dimension_numbers<[1], [0], [0], [1], [0, 0, 1, 1], [], []>} : vector<1x64xbf16>, vector<64x128xbf16>, vector<1x128xf32> -> vector<1x128xf32>
    %c0_409 = arith.constant 0 : index
    %c0_410 = arith.constant 0 : index
    %c0_411 = arith.constant 0 : index
    %1220 = vector.load %arg14[%c0_409, %c0_410, %c0_411] : memref<3x1x128xf32, #tpu.memory_space<vmem>>, vector<1x1x128xf32>
    %1221 = vector.shape_cast %1220 : vector<1x1x128xf32> to vector<1x128xf32>
    %1222 = arith.addf %1219, %1221 : vector<1x128xf32>
    %1223 = tpu.iota {dimensions = array<i32: 1>} : vector<1x128xi32>
    %c64_i32_412 = arith.constant 64 : i32
    %1224 = vector.broadcast %c64_i32_412 : i32 to vector<1x128xi32>
    %1225 = arith.cmpi sge, %1223, %1224 : vector<1x128xi32>
    %c96_i32_413 = arith.constant 96 : i32
    %1226 = vector.broadcast %c96_i32_413 : i32 to vector<1x128xi32>
    %1227 = arith.cmpi slt, %1223, %1226 : vector<1x128xi32>
    %1228 = arith.andi %1225, %1227 : vector<1x128xi1>
    %1229 = math.tanh %1222 : vector<1x128xf32>
    %1230 = arith.negf %1222 : vector<1x128xf32>
    %1231 = math.exp %1230 : vector<1x128xf32>
    %cst_414 = arith.constant 1.000000e+00 : f32
    %1232 = vector.broadcast %cst_414 : f32 to vector<1x128xf32>
    %1233 = arith.addf %1232, %1231 : vector<1x128xf32>
    %1234 = arith.divf %1232, %1233 : vector<1x128xf32>
    %1235 = arith.select %1228, %1229, %1234 : vector<1x128xi1>, vector<1x128xf32>
    %1236 = vector.extract_strided_slice %1235 {offsets = [0, 0], sizes = [1, 32], strides = [1, 1]} : vector<1x128xf32> to vector<1x32xf32>
    %1237 = vector.extract_strided_slice %1235 {offsets = [0, 32], sizes = [1, 32], strides = [1, 1]} : vector<1x128xf32> to vector<1x32xf32>
    %1238 = vector.extract_strided_slice %1235 {offsets = [0, 64], sizes = [1, 32], strides = [1, 1]} : vector<1x128xf32> to vector<1x32xf32>
    %1239 = vector.extract_strided_slice %1235 {offsets = [0, 96], sizes = [1, 32], strides = [1, 1]} : vector<1x128xf32> to vector<1x32xf32>
    %1240 = arith.mulf %1237, %1149 : vector<1x32xf32>
    %1241 = arith.mulf %1236, %1238 : vector<1x32xf32>
    %1242 = arith.addf %1240, %1241 : vector<1x32xf32>
    %1243 = math.tanh %1242 : vector<1x32xf32>
    %1244 = arith.mulf %1239, %1243 : vector<1x32xf32>
    %1245 = tpu.concatenate %1244, %1181 in 1 : vector<1x32xf32>, vector<1x32xf32> -> vector<1x64xf32>
    %c1_415 = arith.constant 1 : index
    %c0_416 = arith.constant 0 : index
    %c0_417 = arith.constant 0 : index
    %1246 = vector.load %arg13[%c1_415, %c0_416, %c0_417] : memref<3x64x128xbf16, #tpu.memory_space<vmem>>, vector<1x64x128xbf16>
    %1247 = vector.shape_cast %1246 : vector<1x64x128xbf16> to vector<64x128xbf16>
    %1248 = arith.truncf %1245 : vector<1x64xf32> to vector<1x64xbf16>
    %cst_418 = arith.constant dense<0.000000e+00> : vector<1x128xf32>
    %1249 = tpu.matmul %1248, %1247, %cst_418 {dimension_numbers = #tpu.dot_dimension_numbers<[1], [0], [0], [1], [0, 0, 1, 1], [], []>} : vector<1x64xbf16>, vector<64x128xbf16>, vector<1x128xf32> -> vector<1x128xf32>
    %c1_419 = arith.constant 1 : index
    %c0_420 = arith.constant 0 : index
    %c0_421 = arith.constant 0 : index
    %1250 = vector.load %arg14[%c1_419, %c0_420, %c0_421] : memref<3x1x128xf32, #tpu.memory_space<vmem>>, vector<1x1x128xf32>
    %1251 = vector.shape_cast %1250 : vector<1x1x128xf32> to vector<1x128xf32>
    %1252 = arith.addf %1249, %1251 : vector<1x128xf32>
    %1253 = tpu.iota {dimensions = array<i32: 1>} : vector<1x128xi32>
    %c64_i32_422 = arith.constant 64 : i32
    %1254 = vector.broadcast %c64_i32_422 : i32 to vector<1x128xi32>
    %1255 = arith.cmpi sge, %1253, %1254 : vector<1x128xi32>
    %c96_i32_423 = arith.constant 96 : i32
    %1256 = vector.broadcast %c96_i32_423 : i32 to vector<1x128xi32>
    %1257 = arith.cmpi slt, %1253, %1256 : vector<1x128xi32>
    %1258 = arith.andi %1255, %1257 : vector<1x128xi1>
    %1259 = math.tanh %1252 : vector<1x128xf32>
    %1260 = arith.negf %1252 : vector<1x128xf32>
    %1261 = math.exp %1260 : vector<1x128xf32>
    %cst_424 = arith.constant 1.000000e+00 : f32
    %1262 = vector.broadcast %cst_424 : f32 to vector<1x128xf32>
    %1263 = arith.addf %1262, %1261 : vector<1x128xf32>
    %1264 = arith.divf %1262, %1263 : vector<1x128xf32>
    %1265 = arith.select %1258, %1259, %1264 : vector<1x128xi1>, vector<1x128xf32>
    %1266 = vector.extract_strided_slice %1265 {offsets = [0, 0], sizes = [1, 32], strides = [1, 1]} : vector<1x128xf32> to vector<1x32xf32>
    %1267 = vector.extract_strided_slice %1265 {offsets = [0, 32], sizes = [1, 32], strides = [1, 1]} : vector<1x128xf32> to vector<1x32xf32>
    %1268 = vector.extract_strided_slice %1265 {offsets = [0, 64], sizes = [1, 32], strides = [1, 1]} : vector<1x128xf32> to vector<1x32xf32>
    %1269 = vector.extract_strided_slice %1265 {offsets = [0, 96], sizes = [1, 32], strides = [1, 1]} : vector<1x128xf32> to vector<1x32xf32>
    %1270 = arith.mulf %1267, %1179 : vector<1x32xf32>
    %1271 = arith.mulf %1266, %1268 : vector<1x32xf32>
    %1272 = arith.addf %1270, %1271 : vector<1x32xf32>
    %1273 = math.tanh %1272 : vector<1x32xf32>
    %1274 = arith.mulf %1269, %1273 : vector<1x32xf32>
    %1275 = tpu.concatenate %1274, %1211 in 1 : vector<1x32xf32>, vector<1x32xf32> -> vector<1x64xf32>
    %c2_425 = arith.constant 2 : index
    %c0_426 = arith.constant 0 : index
    %c0_427 = arith.constant 0 : index
    %1276 = vector.load %arg13[%c2_425, %c0_426, %c0_427] : memref<3x64x128xbf16, #tpu.memory_space<vmem>>, vector<1x64x128xbf16>
    %1277 = vector.shape_cast %1276 : vector<1x64x128xbf16> to vector<64x128xbf16>
    %1278 = arith.truncf %1275 : vector<1x64xf32> to vector<1x64xbf16>
    %cst_428 = arith.constant dense<0.000000e+00> : vector<1x128xf32>
    %1279 = tpu.matmul %1278, %1277, %cst_428 {dimension_numbers = #tpu.dot_dimension_numbers<[1], [0], [0], [1], [0, 0, 1, 1], [], []>} : vector<1x64xbf16>, vector<64x128xbf16>, vector<1x128xf32> -> vector<1x128xf32>
    %c2_429 = arith.constant 2 : index
    %c0_430 = arith.constant 0 : index
    %c0_431 = arith.constant 0 : index
    %1280 = vector.load %arg14[%c2_429, %c0_430, %c0_431] : memref<3x1x128xf32, #tpu.memory_space<vmem>>, vector<1x1x128xf32>
    %1281 = vector.shape_cast %1280 : vector<1x1x128xf32> to vector<1x128xf32>
    %1282 = arith.addf %1279, %1281 : vector<1x128xf32>
    %1283 = tpu.iota {dimensions = array<i32: 1>} : vector<1x128xi32>
    %c64_i32_432 = arith.constant 64 : i32
    %1284 = vector.broadcast %c64_i32_432 : i32 to vector<1x128xi32>
    %1285 = arith.cmpi sge, %1283, %1284 : vector<1x128xi32>
    %c96_i32_433 = arith.constant 96 : i32
    %1286 = vector.broadcast %c96_i32_433 : i32 to vector<1x128xi32>
    %1287 = arith.cmpi slt, %1283, %1286 : vector<1x128xi32>
    %1288 = arith.andi %1285, %1287 : vector<1x128xi1>
    %1289 = math.tanh %1282 : vector<1x128xf32>
    %1290 = arith.negf %1282 : vector<1x128xf32>
    %1291 = math.exp %1290 : vector<1x128xf32>
    %cst_434 = arith.constant 1.000000e+00 : f32
    %1292 = vector.broadcast %cst_434 : f32 to vector<1x128xf32>
    %1293 = arith.addf %1292, %1291 : vector<1x128xf32>
    %1294 = arith.divf %1292, %1293 : vector<1x128xf32>
    %1295 = arith.select %1288, %1289, %1294 : vector<1x128xi1>, vector<1x128xf32>
    %1296 = vector.extract_strided_slice %1295 {offsets = [0, 0], sizes = [1, 32], strides = [1, 1]} : vector<1x128xf32> to vector<1x32xf32>
    %1297 = vector.extract_strided_slice %1295 {offsets = [0, 32], sizes = [1, 32], strides = [1, 1]} : vector<1x128xf32> to vector<1x32xf32>
    %1298 = vector.extract_strided_slice %1295 {offsets = [0, 64], sizes = [1, 32], strides = [1, 1]} : vector<1x128xf32> to vector<1x32xf32>
    %1299 = vector.extract_strided_slice %1295 {offsets = [0, 96], sizes = [1, 32], strides = [1, 1]} : vector<1x128xf32> to vector<1x32xf32>
    %1300 = arith.mulf %1297, %1209 : vector<1x32xf32>
    %1301 = arith.mulf %1296, %1298 : vector<1x32xf32>
    %1302 = arith.addf %1300, %1301 : vector<1x32xf32>
    %1303 = math.tanh %1302 : vector<1x32xf32>
    %1304 = arith.mulf %1299, %1303 : vector<1x32xf32>
    %1305 = tpu.concatenate %1213, %1244 in 1 : vector<1x32xf32>, vector<1x32xf32> -> vector<1x64xf32>
    %c0_435 = arith.constant 0 : index
    %c0_436 = arith.constant 0 : index
    %c0_437 = arith.constant 0 : index
    %1306 = vector.load %arg13[%c0_435, %c0_436, %c0_437] : memref<3x64x128xbf16, #tpu.memory_space<vmem>>, vector<1x64x128xbf16>
    %1307 = vector.shape_cast %1306 : vector<1x64x128xbf16> to vector<64x128xbf16>
    %1308 = arith.truncf %1305 : vector<1x64xf32> to vector<1x64xbf16>
    %cst_438 = arith.constant dense<0.000000e+00> : vector<1x128xf32>
    %1309 = tpu.matmul %1308, %1307, %cst_438 {dimension_numbers = #tpu.dot_dimension_numbers<[1], [0], [0], [1], [0, 0, 1, 1], [], []>} : vector<1x64xbf16>, vector<64x128xbf16>, vector<1x128xf32> -> vector<1x128xf32>
    %c0_439 = arith.constant 0 : index
    %c0_440 = arith.constant 0 : index
    %c0_441 = arith.constant 0 : index
    %1310 = vector.load %arg14[%c0_439, %c0_440, %c0_441] : memref<3x1x128xf32, #tpu.memory_space<vmem>>, vector<1x1x128xf32>
    %1311 = vector.shape_cast %1310 : vector<1x1x128xf32> to vector<1x128xf32>
    %1312 = arith.addf %1309, %1311 : vector<1x128xf32>
    %1313 = tpu.iota {dimensions = array<i32: 1>} : vector<1x128xi32>
    %c64_i32_442 = arith.constant 64 : i32
    %1314 = vector.broadcast %c64_i32_442 : i32 to vector<1x128xi32>
    %1315 = arith.cmpi sge, %1313, %1314 : vector<1x128xi32>
    %c96_i32_443 = arith.constant 96 : i32
    %1316 = vector.broadcast %c96_i32_443 : i32 to vector<1x128xi32>
    %1317 = arith.cmpi slt, %1313, %1316 : vector<1x128xi32>
    %1318 = arith.andi %1315, %1317 : vector<1x128xi1>
    %1319 = math.tanh %1312 : vector<1x128xf32>
    %1320 = arith.negf %1312 : vector<1x128xf32>
    %1321 = math.exp %1320 : vector<1x128xf32>
    %cst_444 = arith.constant 1.000000e+00 : f32
    %1322 = vector.broadcast %cst_444 : f32 to vector<1x128xf32>
    %1323 = arith.addf %1322, %1321 : vector<1x128xf32>
    %1324 = arith.divf %1322, %1323 : vector<1x128xf32>
    %1325 = arith.select %1318, %1319, %1324 : vector<1x128xi1>, vector<1x128xf32>
    %1326 = vector.extract_strided_slice %1325 {offsets = [0, 0], sizes = [1, 32], strides = [1, 1]} : vector<1x128xf32> to vector<1x32xf32>
    %1327 = vector.extract_strided_slice %1325 {offsets = [0, 32], sizes = [1, 32], strides = [1, 1]} : vector<1x128xf32> to vector<1x32xf32>
    %1328 = vector.extract_strided_slice %1325 {offsets = [0, 64], sizes = [1, 32], strides = [1, 1]} : vector<1x128xf32> to vector<1x32xf32>
    %1329 = vector.extract_strided_slice %1325 {offsets = [0, 96], sizes = [1, 32], strides = [1, 1]} : vector<1x128xf32> to vector<1x32xf32>
    %1330 = arith.mulf %1327, %1242 : vector<1x32xf32>
    %1331 = arith.mulf %1326, %1328 : vector<1x32xf32>
    %1332 = arith.addf %1330, %1331 : vector<1x32xf32>
    %1333 = math.tanh %1332 : vector<1x32xf32>
    %1334 = arith.mulf %1329, %1333 : vector<1x32xf32>
    %1335 = tpu.concatenate %1334, %1274 in 1 : vector<1x32xf32>, vector<1x32xf32> -> vector<1x64xf32>
    %c1_445 = arith.constant 1 : index
    %c0_446 = arith.constant 0 : index
    %c0_447 = arith.constant 0 : index
    %1336 = vector.load %arg13[%c1_445, %c0_446, %c0_447] : memref<3x64x128xbf16, #tpu.memory_space<vmem>>, vector<1x64x128xbf16>
    %1337 = vector.shape_cast %1336 : vector<1x64x128xbf16> to vector<64x128xbf16>
    %1338 = arith.truncf %1335 : vector<1x64xf32> to vector<1x64xbf16>
    %cst_448 = arith.constant dense<0.000000e+00> : vector<1x128xf32>
    %1339 = tpu.matmul %1338, %1337, %cst_448 {dimension_numbers = #tpu.dot_dimension_numbers<[1], [0], [0], [1], [0, 0, 1, 1], [], []>} : vector<1x64xbf16>, vector<64x128xbf16>, vector<1x128xf32> -> vector<1x128xf32>
    %c1_449 = arith.constant 1 : index
    %c0_450 = arith.constant 0 : index
    %c0_451 = arith.constant 0 : index
    %1340 = vector.load %arg14[%c1_449, %c0_450, %c0_451] : memref<3x1x128xf32, #tpu.memory_space<vmem>>, vector<1x1x128xf32>
    %1341 = vector.shape_cast %1340 : vector<1x1x128xf32> to vector<1x128xf32>
    %1342 = arith.addf %1339, %1341 : vector<1x128xf32>
    %1343 = tpu.iota {dimensions = array<i32: 1>} : vector<1x128xi32>
    %c64_i32_452 = arith.constant 64 : i32
    %1344 = vector.broadcast %c64_i32_452 : i32 to vector<1x128xi32>
    %1345 = arith.cmpi sge, %1343, %1344 : vector<1x128xi32>
    %c96_i32_453 = arith.constant 96 : i32
    %1346 = vector.broadcast %c96_i32_453 : i32 to vector<1x128xi32>
    %1347 = arith.cmpi slt, %1343, %1346 : vector<1x128xi32>
    %1348 = arith.andi %1345, %1347 : vector<1x128xi1>
    %1349 = math.tanh %1342 : vector<1x128xf32>
    %1350 = arith.negf %1342 : vector<1x128xf32>
    %1351 = math.exp %1350 : vector<1x128xf32>
    %cst_454 = arith.constant 1.000000e+00 : f32
    %1352 = vector.broadcast %cst_454 : f32 to vector<1x128xf32>
    %1353 = arith.addf %1352, %1351 : vector<1x128xf32>
    %1354 = arith.divf %1352, %1353 : vector<1x128xf32>
    %1355 = arith.select %1348, %1349, %1354 : vector<1x128xi1>, vector<1x128xf32>
    %1356 = vector.extract_strided_slice %1355 {offsets = [0, 0], sizes = [1, 32], strides = [1, 1]} : vector<1x128xf32> to vector<1x32xf32>
    %1357 = vector.extract_strided_slice %1355 {offsets = [0, 32], sizes = [1, 32], strides = [1, 1]} : vector<1x128xf32> to vector<1x32xf32>
    %1358 = vector.extract_strided_slice %1355 {offsets = [0, 64], sizes = [1, 32], strides = [1, 1]} : vector<1x128xf32> to vector<1x32xf32>
    %1359 = vector.extract_strided_slice %1355 {offsets = [0, 96], sizes = [1, 32], strides = [1, 1]} : vector<1x128xf32> to vector<1x32xf32>
    %1360 = arith.mulf %1357, %1272 : vector<1x32xf32>
    %1361 = arith.mulf %1356, %1358 : vector<1x32xf32>
    %1362 = arith.addf %1360, %1361 : vector<1x32xf32>
    %1363 = math.tanh %1362 : vector<1x32xf32>
    %1364 = arith.mulf %1359, %1363 : vector<1x32xf32>
    %1365 = tpu.concatenate %1364, %1304 in 1 : vector<1x32xf32>, vector<1x32xf32> -> vector<1x64xf32>
    %c2_455 = arith.constant 2 : index
    %c0_456 = arith.constant 0 : index
    %c0_457 = arith.constant 0 : index
    %1366 = vector.load %arg13[%c2_455, %c0_456, %c0_457] : memref<3x64x128xbf16, #tpu.memory_space<vmem>>, vector<1x64x128xbf16>
    %1367 = vector.shape_cast %1366 : vector<1x64x128xbf16> to vector<64x128xbf16>
    %1368 = arith.truncf %1365 : vector<1x64xf32> to vector<1x64xbf16>
    %cst_458 = arith.constant dense<0.000000e+00> : vector<1x128xf32>
    %1369 = tpu.matmul %1368, %1367, %cst_458 {dimension_numbers = #tpu.dot_dimension_numbers<[1], [0], [0], [1], [0, 0, 1, 1], [], []>} : vector<1x64xbf16>, vector<64x128xbf16>, vector<1x128xf32> -> vector<1x128xf32>
    %c2_459 = arith.constant 2 : index
    %c0_460 = arith.constant 0 : index
    %c0_461 = arith.constant 0 : index
    %1370 = vector.load %arg14[%c2_459, %c0_460, %c0_461] : memref<3x1x128xf32, #tpu.memory_space<vmem>>, vector<1x1x128xf32>
    %1371 = vector.shape_cast %1370 : vector<1x1x128xf32> to vector<1x128xf32>
    %1372 = arith.addf %1369, %1371 : vector<1x128xf32>
    %1373 = tpu.iota {dimensions = array<i32: 1>} : vector<1x128xi32>
    %c64_i32_462 = arith.constant 64 : i32
    %1374 = vector.broadcast %c64_i32_462 : i32 to vector<1x128xi32>
    %1375 = arith.cmpi sge, %1373, %1374 : vector<1x128xi32>
    %c96_i32_463 = arith.constant 96 : i32
    %1376 = vector.broadcast %c96_i32_463 : i32 to vector<1x128xi32>
    %1377 = arith.cmpi slt, %1373, %1376 : vector<1x128xi32>
    %1378 = arith.andi %1375, %1377 : vector<1x128xi1>
    %1379 = math.tanh %1372 : vector<1x128xf32>
    %1380 = arith.negf %1372 : vector<1x128xf32>
    %1381 = math.exp %1380 : vector<1x128xf32>
    %cst_464 = arith.constant 1.000000e+00 : f32
    %1382 = vector.broadcast %cst_464 : f32 to vector<1x128xf32>
    %1383 = arith.addf %1382, %1381 : vector<1x128xf32>
    %1384 = arith.divf %1382, %1383 : vector<1x128xf32>
    %1385 = arith.select %1378, %1379, %1384 : vector<1x128xi1>, vector<1x128xf32>
    %1386 = vector.extract_strided_slice %1385 {offsets = [0, 0], sizes = [1, 32], strides = [1, 1]} : vector<1x128xf32> to vector<1x32xf32>
    %1387 = vector.extract_strided_slice %1385 {offsets = [0, 32], sizes = [1, 32], strides = [1, 1]} : vector<1x128xf32> to vector<1x32xf32>
    %1388 = vector.extract_strided_slice %1385 {offsets = [0, 64], sizes = [1, 32], strides = [1, 1]} : vector<1x128xf32> to vector<1x32xf32>
    %1389 = vector.extract_strided_slice %1385 {offsets = [0, 96], sizes = [1, 32], strides = [1, 1]} : vector<1x128xf32> to vector<1x32xf32>
    %1390 = arith.mulf %1387, %1302 : vector<1x32xf32>
    %1391 = arith.mulf %1386, %1388 : vector<1x32xf32>
    %1392 = arith.addf %1390, %1391 : vector<1x32xf32>
    %1393 = math.tanh %1392 : vector<1x32xf32>
    %1394 = arith.mulf %1389, %1393 : vector<1x32xf32>
    %1395 = tpu.concatenate %1214, %1334 in 1 : vector<1x32xf32>, vector<1x32xf32> -> vector<1x64xf32>
    %c0_465 = arith.constant 0 : index
    %c0_466 = arith.constant 0 : index
    %c0_467 = arith.constant 0 : index
    %1396 = vector.load %arg13[%c0_465, %c0_466, %c0_467] : memref<3x64x128xbf16, #tpu.memory_space<vmem>>, vector<1x64x128xbf16>
    %1397 = vector.shape_cast %1396 : vector<1x64x128xbf16> to vector<64x128xbf16>
    %1398 = arith.truncf %1395 : vector<1x64xf32> to vector<1x64xbf16>
    %cst_468 = arith.constant dense<0.000000e+00> : vector<1x128xf32>
    %1399 = tpu.matmul %1398, %1397, %cst_468 {dimension_numbers = #tpu.dot_dimension_numbers<[1], [0], [0], [1], [0, 0, 1, 1], [], []>} : vector<1x64xbf16>, vector<64x128xbf16>, vector<1x128xf32> -> vector<1x128xf32>
    %c0_469 = arith.constant 0 : index
    %c0_470 = arith.constant 0 : index
    %c0_471 = arith.constant 0 : index
    %1400 = vector.load %arg14[%c0_469, %c0_470, %c0_471] : memref<3x1x128xf32, #tpu.memory_space<vmem>>, vector<1x1x128xf32>
    %1401 = vector.shape_cast %1400 : vector<1x1x128xf32> to vector<1x128xf32>
    %1402 = arith.addf %1399, %1401 : vector<1x128xf32>
    %1403 = tpu.iota {dimensions = array<i32: 1>} : vector<1x128xi32>
    %c64_i32_472 = arith.constant 64 : i32
    %1404 = vector.broadcast %c64_i32_472 : i32 to vector<1x128xi32>
    %1405 = arith.cmpi sge, %1403, %1404 : vector<1x128xi32>
    %c96_i32_473 = arith.constant 96 : i32
    %1406 = vector.broadcast %c96_i32_473 : i32 to vector<1x128xi32>
    %1407 = arith.cmpi slt, %1403, %1406 : vector<1x128xi32>
    %1408 = arith.andi %1405, %1407 : vector<1x128xi1>
    %1409 = math.tanh %1402 : vector<1x128xf32>
    %1410 = arith.negf %1402 : vector<1x128xf32>
    %1411 = math.exp %1410 : vector<1x128xf32>
    %cst_474 = arith.constant 1.000000e+00 : f32
    %1412 = vector.broadcast %cst_474 : f32 to vector<1x128xf32>
    %1413 = arith.addf %1412, %1411 : vector<1x128xf32>
    %1414 = arith.divf %1412, %1413 : vector<1x128xf32>
    %1415 = arith.select %1408, %1409, %1414 : vector<1x128xi1>, vector<1x128xf32>
    %1416 = vector.extract_strided_slice %1415 {offsets = [0, 0], sizes = [1, 32], strides = [1, 1]} : vector<1x128xf32> to vector<1x32xf32>
    %1417 = vector.extract_strided_slice %1415 {offsets = [0, 32], sizes = [1, 32], strides = [1, 1]} : vector<1x128xf32> to vector<1x32xf32>
    %1418 = vector.extract_strided_slice %1415 {offsets = [0, 64], sizes = [1, 32], strides = [1, 1]} : vector<1x128xf32> to vector<1x32xf32>
    %1419 = vector.extract_strided_slice %1415 {offsets = [0, 96], sizes = [1, 32], strides = [1, 1]} : vector<1x128xf32> to vector<1x32xf32>
    %1420 = arith.mulf %1417, %1332 : vector<1x32xf32>
    %1421 = arith.mulf %1416, %1418 : vector<1x32xf32>
    %1422 = arith.addf %1420, %1421 : vector<1x32xf32>
    %1423 = math.tanh %1422 : vector<1x32xf32>
    %1424 = arith.mulf %1419, %1423 : vector<1x32xf32>
    %1425 = tpu.concatenate %1424, %1364 in 1 : vector<1x32xf32>, vector<1x32xf32> -> vector<1x64xf32>
    %c1_475 = arith.constant 1 : index
    %c0_476 = arith.constant 0 : index
    %c0_477 = arith.constant 0 : index
    %1426 = vector.load %arg13[%c1_475, %c0_476, %c0_477] : memref<3x64x128xbf16, #tpu.memory_space<vmem>>, vector<1x64x128xbf16>
    %1427 = vector.shape_cast %1426 : vector<1x64x128xbf16> to vector<64x128xbf16>
    %1428 = arith.truncf %1425 : vector<1x64xf32> to vector<1x64xbf16>
    %cst_478 = arith.constant dense<0.000000e+00> : vector<1x128xf32>
    %1429 = tpu.matmul %1428, %1427, %cst_478 {dimension_numbers = #tpu.dot_dimension_numbers<[1], [0], [0], [1], [0, 0, 1, 1], [], []>} : vector<1x64xbf16>, vector<64x128xbf16>, vector<1x128xf32> -> vector<1x128xf32>
    %c1_479 = arith.constant 1 : index
    %c0_480 = arith.constant 0 : index
    %c0_481 = arith.constant 0 : index
    %1430 = vector.load %arg14[%c1_479, %c0_480, %c0_481] : memref<3x1x128xf32, #tpu.memory_space<vmem>>, vector<1x1x128xf32>
    %1431 = vector.shape_cast %1430 : vector<1x1x128xf32> to vector<1x128xf32>
    %1432 = arith.addf %1429, %1431 : vector<1x128xf32>
    %1433 = tpu.iota {dimensions = array<i32: 1>} : vector<1x128xi32>
    %c64_i32_482 = arith.constant 64 : i32
    %1434 = vector.broadcast %c64_i32_482 : i32 to vector<1x128xi32>
    %1435 = arith.cmpi sge, %1433, %1434 : vector<1x128xi32>
    %c96_i32_483 = arith.constant 96 : i32
    %1436 = vector.broadcast %c96_i32_483 : i32 to vector<1x128xi32>
    %1437 = arith.cmpi slt, %1433, %1436 : vector<1x128xi32>
    %1438 = arith.andi %1435, %1437 : vector<1x128xi1>
    %1439 = math.tanh %1432 : vector<1x128xf32>
    %1440 = arith.negf %1432 : vector<1x128xf32>
    %1441 = math.exp %1440 : vector<1x128xf32>
    %cst_484 = arith.constant 1.000000e+00 : f32
    %1442 = vector.broadcast %cst_484 : f32 to vector<1x128xf32>
    %1443 = arith.addf %1442, %1441 : vector<1x128xf32>
    %1444 = arith.divf %1442, %1443 : vector<1x128xf32>
    %1445 = arith.select %1438, %1439, %1444 : vector<1x128xi1>, vector<1x128xf32>
    %1446 = vector.extract_strided_slice %1445 {offsets = [0, 0], sizes = [1, 32], strides = [1, 1]} : vector<1x128xf32> to vector<1x32xf32>
    %1447 = vector.extract_strided_slice %1445 {offsets = [0, 32], sizes = [1, 32], strides = [1, 1]} : vector<1x128xf32> to vector<1x32xf32>
    %1448 = vector.extract_strided_slice %1445 {offsets = [0, 64], sizes = [1, 32], strides = [1, 1]} : vector<1x128xf32> to vector<1x32xf32>
    %1449 = vector.extract_strided_slice %1445 {offsets = [0, 96], sizes = [1, 32], strides = [1, 1]} : vector<1x128xf32> to vector<1x32xf32>
    %1450 = arith.mulf %1447, %1362 : vector<1x32xf32>
    %1451 = arith.mulf %1446, %1448 : vector<1x32xf32>
    %1452 = arith.addf %1450, %1451 : vector<1x32xf32>
    %1453 = math.tanh %1452 : vector<1x32xf32>
    %1454 = arith.mulf %1449, %1453 : vector<1x32xf32>
    %1455 = tpu.concatenate %1454, %1394 in 1 : vector<1x32xf32>, vector<1x32xf32> -> vector<1x64xf32>
    %c2_485 = arith.constant 2 : index
    %c0_486 = arith.constant 0 : index
    %c0_487 = arith.constant 0 : index
    %1456 = vector.load %arg13[%c2_485, %c0_486, %c0_487] : memref<3x64x128xbf16, #tpu.memory_space<vmem>>, vector<1x64x128xbf16>
    %1457 = vector.shape_cast %1456 : vector<1x64x128xbf16> to vector<64x128xbf16>
    %1458 = arith.truncf %1455 : vector<1x64xf32> to vector<1x64xbf16>
    %cst_488 = arith.constant dense<0.000000e+00> : vector<1x128xf32>
    %1459 = tpu.matmul %1458, %1457, %cst_488 {dimension_numbers = #tpu.dot_dimension_numbers<[1], [0], [0], [1], [0, 0, 1, 1], [], []>} : vector<1x64xbf16>, vector<64x128xbf16>, vector<1x128xf32> -> vector<1x128xf32>
    %c2_489 = arith.constant 2 : index
    %c0_490 = arith.constant 0 : index
    %c0_491 = arith.constant 0 : index
    %1460 = vector.load %arg14[%c2_489, %c0_490, %c0_491] : memref<3x1x128xf32, #tpu.memory_space<vmem>>, vector<1x1x128xf32>
    %1461 = vector.shape_cast %1460 : vector<1x1x128xf32> to vector<1x128xf32>
    %1462 = arith.addf %1459, %1461 : vector<1x128xf32>
    %1463 = tpu.iota {dimensions = array<i32: 1>} : vector<1x128xi32>
    %c64_i32_492 = arith.constant 64 : i32
    %1464 = vector.broadcast %c64_i32_492 : i32 to vector<1x128xi32>
    %1465 = arith.cmpi sge, %1463, %1464 : vector<1x128xi32>
    %c96_i32_493 = arith.constant 96 : i32
    %1466 = vector.broadcast %c96_i32_493 : i32 to vector<1x128xi32>
    %1467 = arith.cmpi slt, %1463, %1466 : vector<1x128xi32>
    %1468 = arith.andi %1465, %1467 : vector<1x128xi1>
    %1469 = math.tanh %1462 : vector<1x128xf32>
    %1470 = arith.negf %1462 : vector<1x128xf32>
    %1471 = math.exp %1470 : vector<1x128xf32>
    %cst_494 = arith.constant 1.000000e+00 : f32
    %1472 = vector.broadcast %cst_494 : f32 to vector<1x128xf32>
    %1473 = arith.addf %1472, %1471 : vector<1x128xf32>
    %1474 = arith.divf %1472, %1473 : vector<1x128xf32>
    %1475 = arith.select %1468, %1469, %1474 : vector<1x128xi1>, vector<1x128xf32>
    %1476 = vector.extract_strided_slice %1475 {offsets = [0, 0], sizes = [1, 32], strides = [1, 1]} : vector<1x128xf32> to vector<1x32xf32>
    %1477 = vector.extract_strided_slice %1475 {offsets = [0, 32], sizes = [1, 32], strides = [1, 1]} : vector<1x128xf32> to vector<1x32xf32>
    %1478 = vector.extract_strided_slice %1475 {offsets = [0, 64], sizes = [1, 32], strides = [1, 1]} : vector<1x128xf32> to vector<1x32xf32>
    %1479 = vector.extract_strided_slice %1475 {offsets = [0, 96], sizes = [1, 32], strides = [1, 1]} : vector<1x128xf32> to vector<1x32xf32>
    %1480 = arith.mulf %1477, %1392 : vector<1x32xf32>
    %1481 = arith.mulf %1476, %1478 : vector<1x32xf32>
    %1482 = arith.addf %1480, %1481 : vector<1x32xf32>
    %1483 = math.tanh %1482 : vector<1x32xf32>
    %1484 = arith.mulf %1479, %1483 : vector<1x32xf32>
    %c0_495 = arith.constant 0 : index
    %c0_496 = arith.constant 0 : index
    %1485 = vector.load %arg15[%c0_495, %c0_496] : memref<32x32xbf16, #tpu.memory_space<vmem>>, vector<32x32xbf16>
    %1486 = arith.truncf %1484 : vector<1x32xf32> to vector<1x32xbf16>
    %cst_497 = arith.constant dense<0.000000e+00> : vector<1x32xf32>
    %1487 = tpu.matmul %1486, %1485, %cst_497 {dimension_numbers = #tpu.dot_dimension_numbers<[1], [0], [0], [1], [0, 0, 1, 1], [], []>} : vector<1x32xbf16>, vector<32x32xbf16>, vector<1x32xf32> -> vector<1x32xf32>
    %c0_498 = arith.constant 0 : index
    %c0_499 = arith.constant 0 : index
    %1488 = vector.load %arg16[%c0_498, %c0_499] : memref<1x32xf32, #tpu.memory_space<vmem>>, vector<1x32xf32>
    %1489 = arith.addf %1487, %1488 : vector<1x32xf32>
    %c0_500 = arith.constant 0 : index
    %c0_501 = arith.constant 0 : index
    %1490 = vector.load %arg17[%c0_500, %c0_501] : memref<32x16xbf16, #tpu.memory_space<vmem>>, vector<32x16xbf16>
    %1491 = arith.truncf %1489 : vector<1x32xf32> to vector<1x32xbf16>
    %cst_502 = arith.constant dense<0.000000e+00> : vector<1x16xf32>
    %1492 = tpu.matmul %1491, %1490, %cst_502 {dimension_numbers = #tpu.dot_dimension_numbers<[1], [0], [0], [1], [0, 0, 1, 1], [], []>} : vector<1x32xbf16>, vector<32x16xbf16>, vector<1x16xf32> -> vector<1x16xf32>
    %c0_503 = arith.constant 0 : index
    %c0_504 = arith.constant 0 : index
    %1493 = vector.load %arg18[%c0_503, %c0_504] : memref<1x16xf32, #tpu.memory_space<vmem>>, vector<1x16xf32>
    %1494 = arith.addf %1492, %1493 : vector<1x16xf32>
    %c0_505 = arith.constant 0 : index
    %c0_506 = arith.constant 0 : index
    %c0_507 = arith.constant 0 : index
    %1495 = vector.load %arg19[%c0_505, %c0_506, %c0_507] : memref<1x1x16xf32, #tpu.memory_space<vmem>>, vector<1x1x16xf32>
    %1496 = vector.shape_cast %1495 : vector<1x1x16xf32> to vector<1x16xf32>
    %1497 = vector.shape_cast %1494 : vector<1x16xf32> to vector<1x1x16xf32>
    tpu.vector_store %arg19[%c0_505, %c0_506, %c0_507], %1497 {strides = array<i32>} : memref<1x1x16xf32, #tpu.memory_space<vmem>>, vector<1x1x16xf32>,
    return
  }
  func.func @transform_0(%arg0: i32) -> (i32, i32, i32) {
    %c0_i32 = arith.constant 0 : i32
    %c0_i32_0 = arith.constant 0 : i32
    %c0_i32_1 = arith.constant 0 : i32
    return %arg0, %c0_i32, %c0_i32_0 : i32, i32, i32
  }
  func.func @transform_1(%arg0: i32) -> (i32, i32, i32) {
    %c0_i32 = arith.constant 0 : i32
    %c0_i32_0 = arith.constant 0 : i32
    %c0_i32_1 = arith.constant 0 : i32
    return %arg0, %c0_i32, %c0_i32_0 : i32, i32, i32
  }
  func.func @transform_2(%arg0: i32) -> (i32, i32, i32) {
    %c0_i32 = arith.constant 0 : i32
    %c0_i32_0 = arith.constant 0 : i32
    %c0_i32_1 = arith.constant 0 : i32
    return %arg0, %c0_i32, %c0_i32_0 : i32, i32, i32
  }
  func.func @transform_3(%arg0: i32) -> (i32, i32, i32) {
    %c0_i32 = arith.constant 0 : i32
    %c0_i32_0 = arith.constant 0 : i32
    %c0_i32_1 = arith.constant 0 : i32
    return %arg0, %c0_i32, %c0_i32_0 : i32, i32, i32
  }
  func.func @transform_4(%arg0: i32) -> (i32, i32, i32) {
    %c0_i32 = arith.constant 0 : i32
    %c0_i32_0 = arith.constant 0 : i32
    %c0_i32_1 = arith.constant 0 : i32
    return %arg0, %c0_i32, %c0_i32_0 : i32, i32, i32
  }
  func.func @transform_5(%arg0: i32) -> (i32, i32, i32) {
    %c0_i32 = arith.constant 0 : i32
    %c0_i32_0 = arith.constant 0 : i32
    %c0_i32_1 = arith.constant 0 : i32
    return %arg0, %c0_i32, %c0_i32_0 : i32, i32, i32
  }
  func.func @transform_6(%arg0: i32) -> (i32, i32, i32) {
    %c0_i32 = arith.constant 0 : i32
    %c0_i32_0 = arith.constant 0 : i32
    %c0_i32_1 = arith.constant 0 : i32
    %c0_i32_2 = arith.constant 0 : i32
    return %c0_i32, %c0_i32_0, %c0_i32_1 : i32, i32, i32
  }
  func.func @transform_7(%arg0: i32) -> (i32, i32, i32) {
    %c0_i32 = arith.constant 0 : i32
    %c0_i32_0 = arith.constant 0 : i32
    %c0_i32_1 = arith.constant 0 : i32
    %c0_i32_2 = arith.constant 0 : i32
    return %c0_i32, %c0_i32_0, %c0_i32_1 : i32, i32, i32
  }
  func.func @transform_8(%arg0: i32) -> (i32, i32) {
    %c0_i32 = arith.constant 0 : i32
    %c0_i32_0 = arith.constant 0 : i32
    %c0_i32_1 = arith.constant 0 : i32
    return %c0_i32, %c0_i32_0 : i32, i32
  }
  func.func @transform_9(%arg0: i32) -> (i32, i32) {
    %c0_i32 = arith.constant 0 : i32
    %c0_i32_0 = arith.constant 0 : i32
    %c0_i32_1 = arith.constant 0 : i32
    return %c0_i32, %c0_i32_0 : i32, i32
  }
  func.func @transform_10(%arg0: i32) -> (i32, i32) {
    %c0_i32 = arith.constant 0 : i32
    %c0_i32_0 = arith.constant 0 : i32
    %c0_i32_1 = arith.constant 0 : i32
    return %c0_i32, %c0_i32_0 : i32, i32
  }
  func.func @transform_11(%arg0: i32) -> (i32, i32) {
    %c0_i32 = arith.constant 0 : i32
    %c0_i32_0 = arith.constant 0 : i32
    %c0_i32_1 = arith.constant 0 : i32
    return %c0_i32, %c0_i32_0 : i32, i32
  }
  func.func @transform_12(%arg0: i32) -> (i32, i32, i32) {
    %c0_i32 = arith.constant 0 : i32
    %c0_i32_0 = arith.constant 0 : i32
    %c0_i32_1 = arith.constant 0 : i32
    %c0_i32_2 = arith.constant 0 : i32
    return %c0_i32, %c0_i32_0, %c0_i32_1 : i32, i32, i32
  }
  func.func @transform_13(%arg0: i32) -> (i32, i32, i32) {
    %c0_i32 = arith.constant 0 : i32
    %c0_i32_0 = arith.constant 0 : i32
    %c0_i32_1 = arith.constant 0 : i32
    %c0_i32_2 = arith.constant 0 : i32
    return %c0_i32, %c0_i32_0, %c0_i32_1 : i32, i32, i32
  }
  func.func @transform_14(%arg0: i32) -> (i32, i32) {
    %c0_i32 = arith.constant 0 : i32
    %c0_i32_0 = arith.constant 0 : i32
    %c0_i32_1 = arith.constant 0 : i32
    return %c0_i32, %c0_i32_0 : i32, i32
  }
  func.func @transform_15(%arg0: i32) -> (i32, i32) {
    %c0_i32 = arith.constant 0 : i32
    %c0_i32_0 = arith.constant 0 : i32
    %c0_i32_1 = arith.constant 0 : i32
    return %c0_i32, %c0_i32_0 : i32, i32
  }
  func.func @transform_16(%arg0: i32) -> (i32, i32) {
    %c0_i32 = arith.constant 0 : i32
    %c0_i32_0 = arith.constant 0 : i32
    %c0_i32_1 = arith.constant 0 : i32
    return %c0_i32, %c0_i32_0 : i32, i32
  }
  func.func @transform_17(%arg0: i32) -> (i32, i32) {
    %c0_i32 = arith.constant 0 : i32
    %c0_i32_0 = arith.constant 0 : i32
    %c0_i32_1 = arith.constant 0 : i32
    return %c0_i32, %c0_i32_0 : i32, i32
  }
  func.func @transform_18(%arg0: i32) -> (i32, i32, i32) {
    %c0_i32 = arith.constant 0 : i32
    %c0_i32_0 = arith.constant 0 : i32
    %c0_i32_1 = arith.constant 0 : i32
    return %arg0, %c0_i32, %c0_i32_0 : i32, i32, i32
  }
}

</mosaic_0001>

<bundles_post_ra>
// kernel: recurrent_decision_forward.1
= control target key start
LH: loop header
LB: loop body
LE: loop exit
PB: predicated region body
PF: predicated region fallthrough
CT: control target
= control target key end

     0   :  { %s8724_s27 = smov 0   ;;  %s10944_s0 = inlined_call_operand.vmem [shape: f32[2,48,64], index: 0, kind: input, shape index: {}]   ;;  %s10945_s1 = inlined_call_operand.vmem [shape: f32[2,48,48], index: 1, kind: input, shape index: {}]   ;;  %s10946_s2 = inlined_call_operand.vmem [shape: f32[2,4,48], index: 2, kind: input, shape index: {}]   ;;  %s10947_s3 = inlined_call_operand.vmem [shape: f32[2,4,1], index: 3, kind: input, shape index: {}]   ;;  %s10948_s4 = inlined_call_operand.vmem [shape: f32[2,4,8], index: 4, kind: input, shape index: {}]   ;;  %s10949_s5 = inlined_call_operand.vmem [shape: f32[2,4,8], index: 5, kind: input, shape index: {}]   ;;  %s10950_s6 = inlined_call_operand.vmem [shape: bf16[4,64,68], index: 6, kind: input, shape index: {}]   ;;  %s10951_s7 = inlined_call_operand.vmem [shape: f32[4,1,64], index: 7, kind: input, shape index: {}]   ;;  %s10952_s8 = inlined_call_operand.vmem [shape: bf16[81,96], index: 8, kind: input, shape index: {}]   ;;  %s10953_s9 = inlined_call_operand.vmem [shape: f32[1,96], index: 9, kind: input, shape index: {}]   ;;  %s10954_s10 = inlined_call_operand.vmem [shape: f32[1,32], index: 10, kind: input, shape index: {}]   ;;  %s10955_s11 = inlined_call_operand.vmem [shape: f32[1,32], index: 11, kind: input, shape index: {}]   ;;  %s10956_s12 = inlined_call_operand.vmem [shape: bf16[3,64,128], index: 12, kind: input, shape index: {}]   ;;  %s10957_s13 = inlined_call_operand.vmem [shape: f32[3,1,128], index: 13, kind: input, shape index: {}]   ;;  %s10958_s14 = inlined_call_operand.vmem [shape: bf16[32,32], index: 14, kind: input, shape index: {}]   ;;  %s10959_s15 = inlined_call_operand.vmem [shape: f32[1,32], index: 15, kind: input, shape index: {}]   ;;  %s10960_s16 = inlined_call_operand.vmem [shape: bf16[32,16], index: 16, kind: input, shape index: {}]   ;;  %s10961_s17 = inlined_call_operand.vmem [shape: f32[1,16], index: 17, kind: input, shape index: {}]   ;;  %s10962_s18 = inlined_call_operand.vmem [shape: f32[2,1,16], index: 18, kind: output, shape index: {}]  }
   0x1   :  { %10963 = sst [smem:[#allocation2_spill]] %s10944_s0 }
   0x2   :  { %10964 = sst [smem:[#allocation3_spill]] %s10945_s1 }
   0x3   :  { %10965 = sst [smem:[#allocation4_spill]] %s10946_s2 }
   0x4 LB: > { %s6771_s28 = sadd.s32 4294967295, %s8615_s27   ;;  %p6775_p0 = scmp.ge.s32.totalorder %s8615_s27, 1  ;;  %s8615_s27 = sphi %s8724_s27, %s28_s27  }
   0x5   : > { %p558_p1 = scmp.lt.s32.totalorder %s8615_s27, 3 }
   0x7   : > { %p559_p2 = pnand %p6775_p0, %p558_p1 }
   0x8   : > { %p631_p3 = scmp.lt.s32.totalorder (!%p559_p2), %s6771_s28, 1  ;;  %s10966_s23 = sld [smem:[#allocation2_spill]] (!%p559_p2) }
   0x9   : > { %562 = sbr.rel (%p559_p2) target bundleno = 16149 (0x3f15), region = 92  ;;  %s8621_s29 = smov (!%p559_p2), 64  }
   0xa   : > { %s8622_s30 = smov (!%p559_p2), 63   ;;  %s10967_s1 = sld [smem:[#allocation3_spill]] (!%p559_p2) }
   0xb   : > { %s8624_s22 = smov (!%p559_p2), 32  }
   0xe   : > { %v8019_v0 = vld [vmem:[%s10950_s6 + $0x18] sm:$0xff]   ;;  %v8617_v1 = vmov 0.0   ;;  %v8020_v2 = vld [vmem:[%s10950_s6 + $0x10] sm:$0xff]   ;;  %vm8618_vm0 = vmmov 0   ;;  %s10972_s28 = smov (!%p631_p3, %s6771_s28), 1  ;;  %v8619_v3 = vmov 67   ;;  %v855_v53 = vlaneseq }
   0xf   : > { %7277 = vmatprep.subr.bf16.mxu0 %v8617_v1  ;;  %7297 = vmatprep.subr.bf16.mxu1 %v8617_v1  ;;  %v8021_v4 = vld [vmem:[%s10950_s6 + $0x8] sm:$0xff]   ;;  %s7975_s21 = smul.u32 48, %s10972_s28  ;;  %v8022_v5 = vld [vmem:[%s10950_s6] sm:$0xff]   ;;  %vm708_vm1 = vcmask 523264   ;;  %v8620_v15 = vmov 66   ;;  %vm895_vm3 = vcmask 392192   ;;  %s659_s19 = scalar_lea.vmem %s10962_s18, %s10972_s28 }
  0x10   : > { %7278 = vmatpush3.bf16.msra.mxu0 %v8019_v0  ;;  %7285 = vmatprep.mubr.msk.bf16.mxu0 %vm8618_vm0, %v8617_v1  ;;  %v856_v54 = vshrl.u32 %v855_v53, 7  ;;  %s9754_s26 = sshll.u32 %s10972_s28, 2 }
  0x11   : > { %7279 = vmatprep.subr.bf16.mxu0 %v8617_v1  ;;  %7303 = vmatprep.mubr.msk.bf16.mxu1 %vm8618_vm0, %v8617_v1  ;;  %s635_s24 = scalar_lea.vmem %s10966_s23, %s7975_s21  ;;  %s8814_s20 = scalar_lea.vmem %s10967_s1, %s7975_s21 }
  0x12   : > { %7997 = vset.pattern.permute.xlu1 %v8619_v3  ;;  %v667_v6 = vld [vmem:[%s635_s24] sm:$0xff]  ;;  %v668_v7 = vld [vmem:[%s635_s24 + $0x8] sm:$0xff]  ;;  %v669_v9 = vld [vmem:[%s635_s24 + $0x10] sm:$0xff]  ;;  %7996 = vset.pattern.permute.xlu0 %v8620_v15  ;;  %v8816_v56 = vsub.s32 0, %v856_v54  ;;  %s8623_s21 = smov 96   ;;  %s10968_s1 = sld [smem:[#allocation4_spill]] }
  0x13   : > { %v681_v8 = vpack.c.bf16 %v668_v7, %v667_v6  ;;  %v670_v10 = vld [vmem:[%s635_s24 + $0x18] sm:$0xff]  ;;  %v671_v12 = vld [vmem:[%s635_s24 + $0x20] sm:$0xff]  ;;  %v672_v13 = vld [vmem:[%s635_s24 + $0x28] sm:$0xff]  ;;  %s652_s24 = scalar_lea.vmem %s10948_s4, %s9754_s26  ;;  %s656_s2 = scalar_lea.vmem %s10949_s5, %s9754_s26 }
  0x14   : > { %7280 = vmatpush3.bf16.msra.mxu0 %v8020_v2  ;;  %v682_v11 = vpack.c.bf16 %v670_v10, %v669_v9  ;;  %v683_v14 = vpack.c.bf16 %v672_v13, %v671_v12  ;;  %v8819_v57 = vld [vmem:[%s8814_s20 + $0x8] sm:$0xff]  ;;  %v8823_v61 = vld [vmem:[%s8814_s20] sm:$0xff]  ;;  %v8826_v62 = vld [vmem:[%s8814_s20 + $0x10] sm:$0xff]  ;;  %s8627_s23 = smov 1   ;;  %s648_s0 = scalar_lea.vmem %s10947_s3, %s9754_s26 }
  0x15   : > { %7281 = vmatprep.subr.bf16.mxu0 %v8617_v1  ;;  %vm884_vm2 = vcmp.gt.f32.partialorder %v8819_v57, 0.0  ;;  %vm883_vm4 = vcmp.gt.f32.partialorder %v8823_v61, 0.0  ;;  %vm885_vm5 = vcmp.gt.f32.partialorder %v8826_v62, 0.0  ;;  %v8836_v13 = vld [vmem:[%s8814_s20 + $0x18] sm:$0xff] }
  0x16   : > { %vm886_vm11 = vcmp.gt.f32.partialorder %v8836_v13, 0.0 }
  0x18   : > { %7282 = vmatpush3.bf16.msra.mxu0 %v8021_v4 }
  0x19   : > { %7283 = vmatprep.subr.bf16.mxu0 %v8617_v1 }
  0x1c   : > { %7284 = vmatpush3.bf16.msra.mxu0 %v8022_v5 }
  0x1d   : > { %7333 = vmatprep.subr.bf16.mxu0 %v8617_v1 }
  0x1f   : > { %7286 = vmatmul.mubr.msk.bf16.vlgmr.msra.gmra.mxu0 %vm708_vm1, %v681_v8 }
  0x20   : > { %7289 = vmatprep.mubr.msk.bf16.mxu0 %vm8618_vm0, %v8617_v1 }
  0x27   : > { %7290 = vmatmul.mubr.msk.bf16.gmra.mxu0 %vm708_vm1, %v682_v11 }
  0x28   : > { %7293 = vmatprep.mubr.msk.bf16.mxu0 %vm8618_vm0, %v8617_v1 }
  0x2f   : > { %7294 = vmatmul.mubr.msk.bf16.gmra.mxu0 %vm708_vm1, %v683_v14 }
  0x30   : > { %7341 = vmatprep.mubr.msk.bf16.mxu0 %vm8618_vm0, %v8617_v1 }
  0xdf   : > { %v752_v16 = vpop.f32.mrf.mxu0 }
  0xe0   : > { %1085 = vperm.xlu1 %7997, %v752_v16   ;;  %781 = vrot.lane.b32.xlu0 %v752_v16, %s8621_s29 }
  0xe1   : > { %v7287_v17 = vpop.f32.mrf.mxu0 }
  0xe3   : > { %v755_v18 = vpop.f32.mrf.mxu0 }
  0xe4   : > { %1034 = vrot.lane.b32.xlu0 %v752_v16, %s8622_s30  ;;  %1036 = vrot.lane.b32.xlu1 %v755_v18, %s8622_s30  ;;  %v8793_v30 = vpack.c.bf16 %v755_v18, %v752_v16 }
  0xe5   : > { %v7288_v19 = vpop.f32.mrf.mxu0  ;;  %7998 = vset.pattern.permute.xlu1 %v8620_v15 }
  0xe7   : > { %v760_v20 = vpop.f32.mrf.mxu0 }
  0xe8   : > { %832 = vperm.xlu0 %7996, %v752_v16   ;;  %836 = vperm.xlu1 %7998, %v755_v18  }
  0xe9   : > { %v7291_v21 = vpop.f32.mrf.mxu0 }
  0xeb   : > { %v763_v22 = vpop.f32.mrf.mxu0 }
  0xec   : > { %783 = vrot.lane.b32.xlu0 %v755_v18, %s8621_s29  ;;  %785 = vrot.lane.b32.xlu1 %v760_v20, %s8621_s29  ;;  %v8788_v29 = vpack.c.bf16 %v763_v22, %v760_v20 }
  0xed   : > { %v7292_v23 = vpop.f32.mrf.mxu0  ;;  %7999 = vset.pattern.permute.xlu0 %v8619_v3 }
  0xef   : > { %v768_v24 = vpop.f32.mrf.mxu0 }
  0xf0   : > { %1089 = vperm.xlu0 %7999, %v755_v18   ;;  %840 = vperm.xlu1 %7998, %v760_v20  }
  0xf1   : > { %v7295_v25 = vpop.f32.mrf.mxu0 }
  0xf3   : > { %v771_v26 = vpop.f32.mrf.mxu0 }
  0xf4   : > { %1038 = vrot.lane.b32.xlu0 %v760_v20, %s8622_s30  ;;  %787 = vrot.lane.b32.xlu1 %v763_v22, %s8621_s29  ;;  %v8782_v27 = vpack.c.bf16 %v771_v26, %v768_v24 }
  0xf5   : > { %8000 = vset.pattern.permute.xlu0 %v8620_v15  ;;  %v7296_v28 = vpop.f32.mrf.mxu0 }
  0xf6   : > { %7298 = vmatpush3.bf16.msra.mxu1 %v8782_v27 }
  0xf7   : > { %7299 = vmatprep.subr.bf16.mxu1 %v8617_v1 }
  0xf8   : > { %844 = vperm.xlu0 %8000, %v763_v22   ;;  %1040 = vrot.lane.b32.xlu1 %v763_v22, %s8622_s30 }
  0xfa   : > { %7300 = vmatpush3.bf16.msra.mxu1 %v8788_v29 }
  0xfb   : > { %7301 = vmatprep.subr.bf16.mxu1 %v8617_v1 }
  0xfc   : > { %848 = vperm.xlu1 %7998, %v768_v24   ;;  %789 = vrot.lane.b32.xlu0 %v768_v24, %s8621_s29 }
  0xfe   : > { %7302 = vmatpush3.bf16.msra.mxu1 %v8793_v30 }
  0xff   : > { %7315 = vmatprep.subr.bf16.mxu1 %v8617_v1 }
 0x100   : > { %1042 = vrot.lane.b32.xlu0 %v768_v24, %s8622_s30  ;;  %791 = vrot.lane.b32.xlu1 %v771_v26, %s8621_s29 }
 0x104   : > { %852 = vperm.xlu0 %8000, %v771_v26   ;;  %1044 = vrot.lane.b32.xlu1 %v771_v26, %s8622_s30 }
 0x108   : > { %8001 = vset.pattern.permute.xlu0 %v8619_v3 }
 0x109   : > { %1093 = vperm.xlu0 %8001, %v760_v20  }
 0x10d   : > { %1097 = vperm.xlu0 %8001, %v763_v22  }
 0x111   : > { %1101 = vperm.xlu0 %8001, %v768_v24  }
 0x115   : > { %1105 = vperm.xlu0 %8001, %v771_v26  }
 0x152   : > { %v782_v31 = vpop.permute.xlu0 %781 }
 0x153   : > { %799 = vxpose.xlu1.b32.start [1/6] (short) (narrow) %v782_v31, 8 }
 0x156   : > { %v1035_v32 = vpop.permute.xlu0 %1034 }
 0x157   : > { %1052 = vxpose.xlu0.b32.start [1/6] (short) (narrow) %v1035_v32, 8 }
 0x15b   : > { %v8801_v33 = vpop.permute.xlu1 %1085 }
 0x15f   : > { %v1037_v34 = vpop.permute.xlu1 %1036 }
 0x160   : > { %1053 = vxpose.xlu0.b32.cont [2/6] (short) (narrow) %v1037_v34, 8 }
 0x163   : > { %v833_v35 = vpop.permute.xlu0 %832  ;;  %v837_v36 = vpop.permute.xlu1 %836 }
 0x167   : > { %v784_v37 = vpop.permute.xlu0 %783  ;;  %v786_v38 = vpop.permute.xlu1 %785 }
 0x168   : > { %800 = vxpose.xlu1.b32.cont [2/6] (short) (narrow) %v784_v37, 8 }
 0x16b   : > { %v1090_v39 = vpop.permute.xlu0 %1089  ;;  %v841_v40 = vpop.permute.xlu1 %840 }
 0x16c   : > { %801 = vxpose.xlu1.b32.cont [3/6] (short) (narrow) %v786_v38, 8  ;;  %v8865_v38 = vld [vmem:[%s8814_s20 + $0x20] sm:$0xff] }
 0x16d   : > { %vm887_vm15 = vcmp.gt.f32.partialorder %v8865_v38, 0.0 }
 0x16f   : > { %v1039_v41 = vpop.permute.xlu0 %1038  ;;  %v788_v42 = vpop.permute.xlu1 %787 }
 0x170   : > { %1054 = vxpose.xlu0.b32.cont [3/6] (short) (narrow) %v1039_v41, 8  ;;  %802 = vxpose.xlu1.b32.cont [4/6] (short) (narrow) %v788_v42, 8  ;;  %v8874_v41 = vld [vmem:[%s8814_s20 + $0x28] sm:$0xff]  ;;  %s644_s20 = scalar_lea.vmem %s10968_s1, %s9754_s26 }
 0x173   : > { %v845_v43 = vpop.permute.xlu0 %844  ;;  %v1041_v44 = vpop.permute.xlu1 %1040 }
 0x174   : > { %1055 = vxpose.xlu0.b32.cont [4/6] (short) (narrow) %v1041_v44, 8 }
 0x177   : > { %v849_v45 = vpop.permute.xlu1 %848  ;;  %v790_v46 = vpop.permute.xlu0 %789 }
 0x178   : > { %803 = vxpose.xlu1.b32.cont [5/6] (short) (narrow) %v790_v46, 8 }
 0x17b   : > { %v1043_v47 = vpop.permute.xlu0 %1042  ;;  %v792_v48 = vpop.permute.xlu1 %791 }
 0x17c   : > { %1056 = vxpose.xlu0.b32.cont [5/6] (short) (narrow) %v1043_v47, 8  ;;  %804 = vxpose.xlu1.b32.end [6/6] (short) (narrow) %v792_v48, 8 }
 0x17f   : > { %v1045_v49 = vpop.permute.xlu1 %1044  ;;  %v853_v50 = vpop.permute.xlu0 %852 }
 0x180   : > { %1057 = vxpose.xlu0.b32.end [6/6] (short) (narrow) %v1045_v49, 8 }
 0x184   : > { %v8804_v51 = vpop.permute.xlu0 %1093 }
 0x188   : > { %v1098_v52 = vpop.permute.xlu0 %1097 }
 0x18c   : > { %v8807_v55 = vpop.permute.xlu0 %1101 }
 0x190   : > { %v1106_v58 = vpop.permute.xlu0 %1105 }
 0x19a   : > { %8002 = vset.pattern.permute.xlu1 %v8619_v3 }
 0x1e4   : > { %v815_v59 = vpop.trf.xlu1 }
 0x1e5   : > { %v858_v60 = vrot.slane %v815_v59, %v8816_v56 }
 0x1e7   : > { %v860_v63 = vadd.f32 %v858_v60, %v837_v36  ;;  %v859_v0 = vadd.f32 %v858_v60, %v833_v35  ;;  %v861_v2 = vadd.f32 %v858_v60, %v841_v40  ;;  %v862_v4 = vadd.f32 %v858_v60, %v845_v43 }
 0x1e8   : > { %v1068_v5 = vpop.trf.xlu0  ;;  %v863_v6 = vadd.f32 %v858_v60, %v849_v45  ;;  %v864_v32 = vadd.f32 %v858_v60, %v853_v50 }
 0x1e9   : > { %v8832_v7 = vrot.slane %v1068_v5, %v8816_v56  ;;  %vm866_vm6 = vcmp.gt.f32.partialorder %v860_v63, 0.0  ;;  %v872_v8 = vmul.f32 0.2, %v860_v63  ;;  %vm865_vm7 = vcmp.gt.f32.partialorder %v859_v0, 0.0 }
 0x1ea   : > { %v871_v9 = vmul.f32 0.2, %v859_v0  ;;  %vm867_vm8 = vcmp.gt.f32.partialorder %v861_v2, 0.0  ;;  %v873_v10 = vmul.f32 0.2, %v861_v2  ;;  %vm868_vm9 = vcmp.gt.f32.partialorder %v862_v4, 0.0 }
 0x1eb   : > { %v878_v11 = vsel %vm866_vm6, %v860_v63, %v872_v8  ;;  %v1113_v12 = vadd.f32 %v8832_v7, %v1090_v39  ;;  %v1115_v14 = vadd.f32 %v8832_v7, %v1098_v52  ;;  %v874_v16 = vmul.f32 0.2, %v862_v4 }
 0x1ec   : > { %v8841_v17 = vsel %vm884_vm2, %v878_v11, -1e+30  ;;  %v877_v18 = vsel %vm865_vm7, %v859_v0, %v871_v9  ;;  %v879_v19 = vsel %vm867_vm8, %v861_v2, %v873_v10  ;;  %v1117_v20 = vadd.f32 %v8832_v7, %v1106_v58 }
 0x1ed   : > { %v899_v21 = vsel %vm895_vm3, %v8841_v17, -inf  ;;  %v8848_v22 = vsel %vm883_vm4, %v877_v18, -1e+30  ;;  %vm1119_vm10 = vcmp.gt.f32.partialorder %v1113_v12, 0.0  ;;  %v1125_v23 = vmul.f32 0.2, %v1113_v12 }
 0x1ee   : > { %900 = vmax.xlane.f32.xlu0 %v899_v21  ;;  %v896_v24 = vsel %vm895_vm3, %v8848_v22, -inf  ;;  %vm1121_vm12 = vcmp.gt.f32.partialorder %v1115_v14, 0.0  ;;  %v1127_v25 = vmul.f32 0.2, %v1115_v14  ;;  %v8855_v28 = vsel %vm885_vm5, %v879_v19, -1e+30 }
 0x1ef   : > { %897 = vmax.xlane.f32.xlu1 %v896_v24  ;;  %v1131_v26 = vsel %vm1119_vm10, %v1113_v12, %v1125_v23  ;;  %v880_v31 = vsel %vm868_vm9, %v862_v4, %v874_v16  ;;  %vm1123_vm13 = vcmp.gt.f32.partialorder %v1117_v20, 0.0  ;;  %v1129_v36 = vmul.f32 0.2, %v1117_v20 }
 0x1f0   : > { %v8860_v34 = vsel %vm884_vm2, %v1131_v26, -1e+30  ;;  %v1133_v35 = vsel %vm1121_vm12, %v1115_v14, %v1127_v25  ;;  %vm869_vm14 = vcmp.gt.f32.partialorder %v863_v6, 0.0  ;;  %v902_v39 = vsel %vm895_vm3, %v8855_v28, -inf }
 0x1f1   : > { %v1145_v37 = vsel %vm895_vm3, %v8860_v34, -inf  ;;  %v8871_v40 = vsel %vm886_vm11, %v1133_v35, -1e+30  ;;  %v875_v42 = vmul.f32 0.2, %v863_v6  ;;  %v1135_v44 = vsel %vm1123_vm13, %v1117_v20, %v1129_v36 }
 0x1f2   : > { %1146 = vmax.xlane.f32.xlu0 %v1145_v37  ;;  %v892_v43 = vsel %vm886_vm11, %v880_v31, -1e+30  ;;  %v876_v46 = vmul.f32 0.2, %v864_v32  ;;  %v1112_v47 = vadd.f32 %v8832_v7, %v8801_v33  ;;  %v1151_v48 = vsel %vm895_vm3, %v8871_v40, -inf }
 0x1f3   : > { %903 = vmax.xlane.f32.xlu1 %v902_v39  ;;  %v881_v45 = vsel %vm869_vm14, %v863_v6, %v875_v42  ;;  %vm888_vm6 = vcmp.gt.f32.partialorder %v8874_v41, 0.0  ;;  %vm870_vm7 = vcmp.gt.f32.partialorder %v864_v32, 0.0  ;;  %v905_v49 = vsel %vm895_vm3, %v892_v43, -inf }
 0x1f4   : > { %v8887_v50 = vsel %vm888_vm6, %v1135_v44, -1e+30  ;;  %v893_v52 = vsel %vm887_vm15, %v881_v45, -1e+30  ;;  %v882_v54 = vsel %vm870_vm7, %v864_v32, %v876_v46  ;;  %v1124_v58 = vmul.f32 0.2, %v1112_v47 }
 0x1f5   : > { %v1114_v33 = vadd.f32 %v8832_v7, %v8804_v51  ;;  %v1157_v59 = vsel %vm895_vm3, %v8887_v50, -inf  ;;  %vm1118_vm8 = vcmp.gt.f32.partialorder %v1112_v47, 0.0  ;;  %v908_v60 = vsel %vm895_vm3, %v893_v52, -inf }
 0x1f6   : > { %1152 = vmax.xlane.f32.xlu0 %v1151_v48  ;;  %v894_v63 = vsel %vm888_vm6, %v882_v54, -1e+30  ;;  %v1130_v0 = vsel %vm1118_vm8, %v1112_v47, %v1124_v58  ;;  %v1116_v4 = vadd.f32 %v8832_v7, %v8807_v55  ;;  %vm1313_vm12 = vcmask 261120  }
 0x1f7   : > { %906 = vmax.xlane.f32.xlu1 %v905_v49  ;;  %v1126_v2 = vmul.f32 0.2, %v1114_v33  ;;  %vm1120_vm9 = vcmp.gt.f32.partialorder %v1114_v33, 0.0  ;;  %v911_v5 = vsel %vm895_vm3, %v894_v63, -inf  ;;  %v1136_v51 = vsel %vm883_vm4, %v1130_v0, -1e+30 }
 0x1f8   : > { %v1128_v8 = vmul.f32 0.2, %v1116_v4  ;;  %vm1122_vm10 = vcmp.gt.f32.partialorder %v1116_v4, 0.0  ;;  %v1142_v9 = vsel %vm895_vm3, %v1136_v51, -inf }
 0x1f9   : > { %v1132_v6 = vsel %vm1120_vm9, %v1114_v33, %v1126_v2 }
 0x1fa   : > { %1158 = vmax.xlane.f32.xlu0 %v1157_v59  ;;  %v1138_v10 = vsel %vm885_vm5, %v1132_v6, -1e+30  ;;  %v1134_v11 = vsel %vm1122_vm10, %v1116_v4, %v1128_v8 }
 0x1fb   : > { %909 = vmax.xlane.f32.xlu1 %v908_v60  ;;  %v1148_v12 = vsel %vm895_vm3, %v1138_v10, -inf  ;;  %v8909_v55 = vsel %vm887_vm15, %v1134_v11, -1e+30 }
 0x1fc   : > { %v1154_v7 = vsel %vm895_vm3, %v8909_v55, -inf }
 0x1ff   : > { %912 = vmax.xlane.f32.xlu1 %v911_v5 }
 0x203   : > { %1143 = vmax.xlane.f32.xlu1 %v1142_v9 }
 0x207   : > { %1149 = vmax.xlane.f32.xlu1 %v1148_v12 }
 0x20b   : > { %1155 = vmax.xlane.f32.xlu1 %v1154_v7 }
 0x21c   : > { %1218 = vrot.lane.b32.xlu1 %v8782_v27, %s8623_s21 }
 0x277   : > { %v901_v14 = vpop.xlane.xlu0 %900 }
 0x278   : > { %v915_v16 = vsub.f32 %v8841_v17, %v901_v14  ;;  %v898_v18 = vpop.xlane.xlu1 %897 }
 0x279   : > { %v914_v19 = vsub.f32 %v8848_v22, %v898_v18 }
 0x27a   : > { %v922_v20 = vmul.f32 1.442695, %v915_v16 }
 0x27b   : > { %v920_v21 = vmul.f32 1.442695, %v914_v19  ;;  %v1147_v26 = vpop.xlane.xlu0 %1146 }
 0x27c   : > { %8057 = vpow2.f32 %v922_v20  ;;  %v904_v23 = vpop.xlane.xlu1 %903  ;;  %v1161_v17 = vsub.f32 %v8860_v34, %v1147_v26 }
 0x27d   : > { %8059 = vpow2.f32 %v920_v21  ;;  %v916_v24 = vsub.f32 %v8855_v28, %v904_v23 }
 0x27e   : > { %v1168_v28 = vmul.f32 1.442695, %v1161_v17 }
 0x27f   : > { %v924_v25 = vmul.f32 1.442695, %v916_v24  ;;  %v1153_v37 = vpop.xlane.xlu0 %1152 }
 0x280   : > { %v907_v31 = vpop.xlane.xlu1 %906 }
 0x281   : > { %8061 = vpow2.f32 %v924_v25  ;;  %v917_v32 = vsub.f32 %v892_v43, %v907_v31  ;;  %v1163_v43 = vsub.f32 %v8871_v40, %v1153_v37 }
 0x283   : > { %v926_v35 = vmul.f32 1.442695, %v917_v32  ;;  %v1159_v48 = vpop.xlane.xlu0 %1158  ;;  %v1172_v58 = vmul.f32 1.442695, %v1163_v43 }
 0x284   : > { %v910_v27 = vpop.xlane.xlu1 %909  ;;  %v1165_v33 = vsub.f32 %v8887_v50, %v1159_v48 }
 0x285   : > { %8063 = vpow2.f32 %v926_v35  ;;  %v918_v36 = vsub.f32 %v893_v52, %v910_v27 }
 0x286   : > { %v1176_v2 = vmul.f32 1.442695, %v1165_v33 }
 0x287   : > { %v928_v22 = vmul.f32 1.442695, %v918_v36 }
 0x288   : > { %v913_v39 = vpop.xlane.xlu1 %912 }
 0x289   : > { %v8919_v42 = vpop.eup %8057  ;;  %8065 = vpow2.f32 %v928_v22  ;;  %v919_v44 = vsub.f32 %v894_v63, %v913_v39 }
 0x28a   : > { %v8921_v45 = vpop.eup %8059  ;;  %v935_v46 = vsel %vm895_vm3, %v8919_v42, 0.0 }
 0x28b   : > { %v930_v47 = vmul.f32 1.442695, %v919_v44  ;;  %936 = vadd.xlane.f32.xlu0 %v935_v46  ;;  %v932_v34 = vsel %vm895_vm3, %v8921_v45, 0.0 }
 0x28c   : > { %v1144_v49 = vpop.xlane.xlu1 %1143  ;;  %933 = vadd.xlane.f32.xlu1 %v932_v34 }
 0x28d   : > { %8067 = vpow2.f32 %v930_v47  ;;  %v1160_v52 = vsub.f32 %v1136_v51, %v1144_v49 }
 0x28e   : > { %v8928_v54 = vpop.eup %8061  ;;  %8069 = vpow2.f32 %v1168_v28 }
 0x28f   : > { %v1166_v59 = vmul.f32 1.442695, %v1160_v52  ;;  %v938_v40 = vsel %vm895_vm3, %v8928_v54, 0.0 }
 0x290   : > { %v1150_v60 = vpop.xlane.xlu1 %1149  ;;  %939 = vadd.xlane.f32.xlu1 %v938_v40 }
 0x291   : > { %8071 = vpow2.f32 %v1166_v59  ;;  %v1162_v63 = vsub.f32 %v1138_v10, %v1150_v60 }
 0x292   : > { %v8933_v0 = vpop.eup %8063  ;;  %8073 = vpow2.f32 %v1172_v58 }
 0x293   : > { %v1170_v4 = vmul.f32 1.442695, %v1162_v63  ;;  %v941_v5 = vsel %vm895_vm3, %v8933_v0, 0.0 }
 0x294   : > { %942 = vadd.xlane.f32.xlu0 %v941_v5  ;;  %v1156_v51 = vpop.xlane.xlu1 %1155 }
 0x295   : > { %8075 = vpow2.f32 %v1170_v4  ;;  %v1164_v50 = vsub.f32 %v8909_v55, %v1156_v51 }
 0x296   : > { %v8938_v6 = vpop.eup %8065  ;;  %8077 = vpow2.f32 %v1176_v2 }
 0x297   : > { %v1174_v8 = vmul.f32 1.442695, %v1164_v50  ;;  %v944_v9 = vsel %vm895_vm3, %v8938_v6, 0.0 }
 0x298   : > { %945 = vadd.xlane.f32.xlu1 %v944_v9  ;;  %v1219_v26 = vpop.permute.xlu1 %1218 }
 0x299   : > { %8079 = vpow2.f32 %v1174_v8 }
 0x29a   : > { %v8942_v10 = vpop.eup %8067 }
 0x29b   : > { %v8944_v11 = vpop.eup %8069  ;;  %v947_v12 = vsel %vm895_vm3, %v8942_v10, 0.0 }
 0x29c   : > { %948 = vadd.xlane.f32.xlu0 %v947_v12  ;;  %v1181_v55 = vsel %vm895_vm3, %v8944_v11, 0.0 }
 0x29e   : > { %v8948_v7 = vpop.eup %8071 }
 0x29f   : > { %v1178_v14 = vsel %vm895_vm3, %v8948_v7, 0.0  ;;  %v8954_v16 = vpop.eup %8073 }
 0x2a0   : > { %1182 = vadd.xlane.f32.xlu0 %v1181_v55  ;;  %1179 = vadd.xlane.f32.xlu1 %v1178_v14  ;;  %v1187_v19 = vsel %vm895_vm3, %v8954_v16, 0.0 }
 0x2a2   : > { %v8956_v18 = vpop.eup %8075 }
 0x2a3   : > { %v1184_v20 = vsel %vm895_vm3, %v8956_v18, 0.0  ;;  %v8962_v21 = vpop.eup %8077 }
 0x2a4   : > { %1188 = vadd.xlane.f32.xlu0 %v1187_v19  ;;  %1185 = vadd.xlane.f32.xlu1 %v1184_v20  ;;  %v1193_v24 = vsel %vm895_vm3, %v8962_v21, 0.0 }
 0x2a6   : > { %v8964_v23 = vpop.eup %8079 }
 0x2a7   : > { %v1190_v25 = vsel %vm895_vm3, %v8964_v23, 0.0 }
 0x2a8   : > { %1194 = vadd.xlane.f32.xlu0 %v1193_v24  ;;  %1191 = vadd.xlane.f32.xlu1 %v1190_v25 }
 0x2b9   : > { %1214 = vrot.lane.b32.xlu1 %v8793_v30, %s8623_s21 }
 0x2be   : > { %1216 = vrot.lane.b32.xlu0 %v8788_v29, %s8623_s21 }
 0x314   : > { %v937_v31 = vpop.xlane.xlu0 %936 }
 0x315   : > { %8081 = vrcp.f32 %v937_v31  ;;  %v934_v32 = vpop.xlane.xlu1 %933 }
 0x316   : > { %8083 = vrcp.f32 %v934_v32 }
 0x319   : > { %v940_v35 = vpop.xlane.xlu1 %939 }
 0x31a   : > { %8085 = vrcp.f32 %v940_v35 }
 0x31d   : > { %v943_v27 = vpop.xlane.xlu0 %942 }
 0x31e   : > { %8087 = vrcp.f32 %v943_v27 }
 0x321   : > { %v946_v36 = vpop.xlane.xlu1 %945 }
 0x322   : > { %v8082_v17 = vpop.eup %8081  ;;  %8089 = vrcp.f32 %v946_v36 }
 0x323   : > { %v8084_v37 = vpop.eup %8083  ;;  %v957_v22 = vmul.f32 %v8082_v17, %v8919_v42 }
 0x324   : > { %v956_v30 = vmul.f32 %v8084_v37, %v8921_v45 }
 0x325   : > { %v949_v39 = vpop.xlane.xlu0 %948 }
 0x326   : > { %8091 = vrcp.f32 %v949_v39  ;;  %v962_v29 = vpack.c.bf16 %v957_v22, %v956_v30  ;;  %v8023_v39 = vld [vmem:[%s10950_s6 + $0x38] sm:$0xff]  }
 0x327   : > { %v8086_v44 = vpop.eup %8085  ;;  %7334 = vmatpush3.bf16.msra.mxu0 %v8023_v39 }
 0x328   : > { %7304 = vmatmul.mubr.msk.bf16.vlgmr.msra.gmra.mxu1 %vm895_vm3, %v962_v29  ;;  %v958_v42 = vmul.f32 %v8086_v44, %v8928_v54  ;;  %7335 = vmatprep.subr.bf16.mxu0 %v8617_v1 }
 0x329   : > { %7316 = vmatpush3.bf16.msra.mxu1 %v1219_v26  ;;  %v1183_v28 = vpop.xlane.xlu0 %1182  ;;  %v1180_v46 = vpop.xlane.xlu1 %1179  ;;  %7307 = vmatprep.mubr.msk.bf16.mxu1 %vm8618_vm0, %v8617_v1 }
 0x32a   : > { %8093 = vrcp.f32 %v1183_v28  ;;  %7317 = vmatprep.subr.bf16.mxu1 %v8617_v1  ;;  %v8024_v28 = vld [vmem:[%s10950_s6 + $0x30] sm:$0xff]  }
 0x32b   : > { %v8088_v43 = vpop.eup %8087  ;;  %8095 = vrcp.f32 %v1180_v46  ;;  %7336 = vmatpush3.bf16.msra.mxu0 %v8024_v28 }
 0x32c   : > { %v959_v45 = vmul.f32 %v8088_v43, %v8933_v0  ;;  %7337 = vmatprep.subr.bf16.mxu0 %v8617_v1 }
 0x32d   : > { %v1189_v47 = vpop.xlane.xlu0 %1188  ;;  %v1186_v34 = vpop.xlane.xlu1 %1185 }
 0x32e   : > { %v963_v48 = vpack.c.bf16 %v959_v45, %v958_v42  ;;  %8097 = vrcp.f32 %v1189_v47  ;;  %v8025_v42 = vld [vmem:[%s10950_s6 + $0x28] sm:$0xff]  }
 0x32f   : > { %v8090_v49 = vpop.eup %8089  ;;  %8099 = vrcp.f32 %v1186_v34  ;;  %7338 = vmatpush3.bf16.msra.mxu0 %v8025_v42  ;;  %v8026_v34 = vld [vmem:[%s10950_s6 + $0x20] sm:$0xff]  }
 0x330   : > { %7308 = vmatmul.mubr.msk.bf16.gmra.mxu1 %vm895_vm3, %v963_v48  ;;  %v960_v59 = vmul.f32 %v8090_v49, %v8938_v6  ;;  %7339 = vmatprep.subr.bf16.mxu0 %v8617_v1  ;;  %v6795_v48 = vld [vmem:[%s10951_s7] ss:$0 sm:$0xff] }
 0x331   : > { %v1195_v52 = vpop.xlane.xlu0 %1194  ;;  %7311 = vmatprep.mubr.msk.bf16.mxu1 %vm8618_vm0, %v8617_v1  ;;  %v1192_v33 = vpop.xlane.xlu1 %1191 }
 0x332   : > { %8101 = vrcp.f32 %v1195_v52 }
 0x333   : > { %v8092_v58 = vpop.eup %8091  ;;  %8103 = vrcp.f32 %v1192_v33  ;;  %7340 = vmatpush3.bf16.msra.mxu0 %v8026_v34 }
 0x334   : > { %v961_v54 = vmul.f32 %v8092_v58, %v8942_v10  ;;  %7371 = vmatprep.subr.bf16.mxu0 %v8617_v1 }
 0x335   : > { %v1217_v40 = vpop.permute.xlu0 %1216  ;;  %v1215_v2 = vpop.permute.xlu1 %1214 }
 0x336   : > { %7318 = vmatpush3.bf16.msra.mxu1 %v1217_v40  ;;  %v964_v60 = vpack.c.bf16 %v961_v54, %v960_v59 }
 0x337   : > { %v8094_v63 = vpop.eup %8093  ;;  %7319 = vmatprep.subr.bf16.mxu1 %v8617_v1 }
 0x338   : > { %v8096_v0 = vpop.eup %8095  ;;  %7312 = vmatmul.mubr.msk.bf16.gmra.mxu1 %vm895_vm3, %v964_v60  ;;  %v1203_v4 = vmul.f32 %v8094_v63, %v8944_v11 }
 0x339   : > { %7321 = vmatprep.mubr.msk.bf16.mxu1 %vm8618_vm0, %v8617_v1  ;;  %v1202_v5 = vmul.f32 %v8096_v0, %v8948_v7 }
 0x33a   : > { %7320 = vmatpush3.bf16.msra.mxu1 %v1215_v2 }
 0x33b   : > { %7353 = vmatprep.subr.bf16.mxu1 %v8617_v1  ;;  %v8098_v51 = vpop.eup %8097  ;;  %v1208_v50 = vpack.c.bf16 %v1203_v4, %v1202_v5 }
 0x33c   : > { %v8100_v6 = vpop.eup %8099  ;;  %v1205_v9 = vmul.f32 %v8098_v51, %v8954_v16 }
 0x33d   : > { %v1204_v8 = vmul.f32 %v8100_v6, %v8956_v18 }
 0x33f   : > { %v8102_v10 = vpop.eup %8101  ;;  %v1209_v11 = vpack.c.bf16 %v1205_v9, %v1204_v8 }
 0x340   : > { %7322 = vmatmul.mubr.msk.bf16.vlgmr.msra.gmra.mxu1 %vm895_vm3, %v1208_v50  ;;  %v8104_v12 = vpop.eup %8103  ;;  %v1207_v55 = vmul.f32 %v8102_v10, %v8962_v21 }
 0x341   : > { %7325 = vmatprep.mubr.msk.bf16.mxu1 %vm8618_vm0, %v8617_v1  ;;  %v1206_v7 = vmul.f32 %v8104_v12, %v8964_v23 }
 0x343   : > { %v1210_v14 = vpack.c.bf16 %v1207_v55, %v1206_v7 }
 0x348   : > { %7326 = vmatmul.mubr.msk.bf16.gmra.mxu1 %vm895_vm3, %v1209_v11 }
 0x349   : > { %7329 = vmatprep.mubr.msk.bf16.mxu1 %vm8618_vm0, %v8617_v1 }
 0x350   : > { %7330 = vmatmul.mubr.msk.bf16.gmra.mxu1 %vm895_vm3, %v1210_v14 }
 0x351   : > { %7359 = vmatprep.mubr.msk.bf16.mxu1 %vm8618_vm0, %v8617_v1 }
 0x3e8   : > { %v1011_v18 = vpop.f32.mrf.mxu1 }
 0x3ea   : > { %v7305_v16 = vpop.f32.mrf.mxu1 }
 0x3ec   : > { %v1014_v19 = vpop.f32.mrf.mxu1 }
 0x3ee   : > { %v7306_v20 = vpop.f32.mrf.mxu1 }
 0x3f0   : > { %v1019_v24 = vpop.f32.mrf.mxu1 }
 0x3f2   : > { %v7309_v25 = vpop.f32.mrf.mxu1 }
 0x3f4   : > { %v1022_v26 = vpop.f32.mrf.mxu1 }
 0x3f6   : > { %v7310_v31 = vpop.f32.mrf.mxu1 }
 0x3f8   : > { %v1027_v32 = vpop.f32.mrf.mxu1 }
 0x3fa   : > { %v7313_v35 = vpop.f32.mrf.mxu1 }
 0x3fc   : > { %v9007_v27 = vpop.f32.mrf.mxu1 }
 0x3fe   : > { %v7314_v23 = vpop.f32.mrf.mxu1 }
 0x400   : > { %v1266_v21 = vpop.f32.mrf.mxu1 }
 0x401   : > { %1295 = vrot.lane.b32.xlu1 %v1266_v21, %s8624_s22 }
 0x402   : > { %v7323_v36 = vpop.f32.mrf.mxu1 }
 0x404   : > { %v1269_v17 = vpop.f32.mrf.mxu1 }
 0x405   : > { %1297 = vrot.lane.b32.xlu0 %v1269_v17, %s8624_s22 }
 0x406   : > { %v7324_v37 = vpop.f32.mrf.mxu1 }
 0x408   : > { %v1274_v22 = vpop.f32.mrf.mxu1 }
 0x409   : > { %1299 = vrot.lane.b32.xlu1 %v1274_v22, %s8624_s22 }
 0x40a   : > { %v7327_v30 = vpop.f32.mrf.mxu1 }
 0x40c   : > { %v1277_v29 = vpop.f32.mrf.mxu1 }
 0x40d   : > { %1301 = vrot.lane.b32.xlu0 %v1277_v29, %s8624_s22 }
 0x40e   : > { %v7328_v44 = vpop.f32.mrf.mxu1 }
 0x410   : > { %v1282_v46 = vpop.f32.mrf.mxu1 }
 0x411   : > { %1303 = vrot.lane.b32.xlu1 %v1282_v46, %s8624_s22 }
 0x412   : > { %v7331_v43 = vpop.f32.mrf.mxu1 }
 0x414   : > { %v1285_v45 = vpop.f32.mrf.mxu1 }
 0x415   : > { %1305 = vrot.lane.b32.xlu0 %v1285_v45, %s8624_s22 }
 0x416   : > { %v7332_v47 = vpop.f32.mrf.mxu1 }
 0x473   : > { %v1296_v49 = vpop.permute.xlu1 %1295 }
 0x474   : > { %v1314_v52 = vsel %vm1313_vm12, %v1011_v18, %v1296_v49 }
 0x475   : > { %v1327_v58 = vadd.f32 %v6795_v48, %v1314_v52 }
 0x477   : > { %v1339_v33 = vmin.f32 %v1327_v58, 0.0  ;;  %v1298_v59 = vpop.permute.xlu0 %1297  ;;  %vm1333_vm13 = vcmp.gt.f32.partialorder %v1327_v58, 0.0 }
 0x478   : > { %v1315_v54 = vsel %vm1313_vm12, %v1014_v19, %v1298_v59 }
 0x479   : > { %v1345_v40 = vmul.f32 1.442695, %v1339_v33  ;;  %v1328_v60 = vadd.f32 %v6795_v48, %v1315_v54 }
 0x47b   : > { %8105 = vpow2.f32 %v1345_v40  ;;  %v1340_v63 = vmin.f32 %v1328_v60, 0.0  ;;  %v1300_v0 = vpop.permute.xlu1 %1299  ;;  %vm1334_vm14 = vcmp.gt.f32.partialorder %v1328_v60, 0.0 }
 0x47c   : > { %v1316_v2 = vsel %vm1313_vm12, %v1019_v24, %v1300_v0 }
 0x47d   : > { %v1347_v4 = vmul.f32 1.442695, %v1340_v63  ;;  %v1329_v5 = vadd.f32 %v6795_v48, %v1316_v2 }
 0x47f   : > { %8107 = vpow2.f32 %v1347_v4  ;;  %v1341_v51 = vmin.f32 %v1329_v5, 0.0  ;;  %v1302_v50 = vpop.permute.xlu0 %1301  ;;  %vm1335_vm7 = vcmp.gt.f32.partialorder %v1329_v5, 0.0 }
 0x480   : > { %v1317_v6 = vsel %vm1313_vm12, %v1022_v26, %v1302_v50 }
 0x481   : > { %v1349_v8 = vmul.f32 1.442695, %v1341_v51  ;;  %v1330_v9 = vadd.f32 %v6795_v48, %v1317_v6 }
 0x483   : > { %8109 = vpow2.f32 %v1349_v8  ;;  %v1342_v10 = vmin.f32 %v1330_v9, 0.0  ;;  %v1304_v11 = vpop.permute.xlu1 %1303  ;;  %vm1336_vm8 = vcmp.gt.f32.partialorder %v1330_v9, 0.0 }
 0x484   : > { %v1318_v12 = vsel %vm1313_vm12, %v1027_v32, %v1304_v11 }
 0x485   : > { %v1351_v7 = vmul.f32 1.442695, %v1342_v10  ;;  %v1331_v55 = vadd.f32 %v6795_v48, %v1318_v12 }
 0x487   : > { %8111 = vpow2.f32 %v1351_v7  ;;  %v1343_v14 = vmin.f32 %v1331_v55, 0.0  ;;  %v1306_v18 = vpop.permute.xlu0 %1305  ;;  %vm1337_vm9 = vcmp.gt.f32.partialorder %v1331_v55, 0.0 }
 0x488   : > { %v8106_v16 = vpop.eup %8105  ;;  %v1319_v19 = vsel %vm1313_vm12, %v9007_v27, %v1306_v18 }
 0x489   : > { %v1353_v20 = vmul.f32 1.442695, %v1343_v14  ;;  %v1332_v24 = vadd.f32 %v6795_v48, %v1319_v19  ;;  %v6796_v25 = vadd.f32 -1.0, %v8106_v16 }
 0x48b   : > { %8113 = vpow2.f32 %v1353_v20  ;;  %v1344_v26 = vmin.f32 %v1332_v24, 0.0  ;;  %v1363_v32 = vsel %vm1333_vm13, %v1327_v58, %v6796_v25  ;;  %vm1338_vm10 = vcmp.gt.f32.partialorder %v1332_v24, 0.0 }
 0x48c   : > { %v8108_v31 = vpop.eup %8107 }
 0x48d   : > { %v6797_v35 = vadd.f32 -1.0, %v8108_v31  ;;  %v1355_v23 = vmul.f32 1.442695, %v1344_v26 }
 0x48f   : > { %v1364_v21 = vsel %vm1334_vm14, %v1328_v60, %v6797_v35  ;;  %8115 = vpow2.f32 %v1355_v23 }
 0x490   : > { %v8110_v36 = vpop.eup %8109  ;;  %v1378_v17 = vpack.c.bf16 %v1364_v21, %v1363_v32 }
 0x491   : > { %v6798_v37 = vadd.f32 -1.0, %v8110_v36 }
 0x492   : > { %7342 = vmatmul.mubr.msk.bf16.vlgmr.msra.gmra.mxu0 %vm708_vm1, %v1378_v17 }
 0x493   : > { %7345 = vmatprep.mubr.msk.bf16.mxu0 %vm8618_vm0, %v8617_v1  ;;  %v1365_v30 = vsel %vm1335_vm7, %v1329_v5, %v6798_v37 }
 0x494   : > { %v8112_v27 = vpop.eup %8111 }
 0x495   : > { %v6799_v22 = vadd.f32 -1.0, %v8112_v27 }
 0x497   : > { %v1366_v39 = vsel %vm1336_vm8, %v1330_v9, %v6799_v22 }
 0x498   : > { %v8114_v29 = vpop.eup %8113  ;;  %v1379_v44 = vpack.c.bf16 %v1366_v39, %v1365_v30 }
 0x499   : > { %v6800_v28 = vadd.f32 -1.0, %v8114_v29 }
 0x49a   : > { %7346 = vmatmul.mubr.msk.bf16.gmra.mxu0 %vm708_vm1, %v1379_v44 }
 0x49b   : > { %7349 = vmatprep.mubr.msk.bf16.mxu0 %vm8618_vm0, %v8617_v1  ;;  %v1367_v42 = vsel %vm1337_vm9, %v1331_v55, %v6800_v28 }
 0x49c   : > { %v8116_v46 = vpop.eup %8115 }
 0x49d   : > { %v6801_v43 = vadd.f32 -1.0, %v8116_v46 }
 0x49f   : > { %v1368_v45 = vsel %vm1338_vm10, %v1332_v24, %v6801_v43 }
 0x4a0   : > { %v1380_v47 = vpack.c.bf16 %v1368_v45, %v1367_v42 }
 0x4a2   : > { %7350 = vmatmul.mubr.msk.bf16.gmra.mxu0 %vm708_vm1, %v1380_v47 }
 0x4a3   : > { %7377 = vmatprep.mubr.msk.bf16.mxu0 %vm8618_vm0, %v8617_v1 }
 0x552   : > { %v1448_v34 = vpop.f32.mrf.mxu0 }
 0x553   : > { %1723 = vrot.lane.b32.xlu1 %v1448_v34, %s8622_s30 }
 0x554   : > { %v7343_v48 = vpop.f32.mrf.mxu0 }
 0x556   : > { %v1451_v49 = vpop.f32.mrf.mxu0 }
 0x557   : > { %1774 = vperm.xlu1 %8002, %v1448_v34   ;;  %1725 = vrot.lane.b32.xlu0 %v1451_v49, %s8622_s30  ;;  %v9068_v5 = vpack.c.bf16 %v1451_v49, %v1448_v34 }
 0x558   : > { %v7344_v52 = vpop.f32.mrf.mxu0 }
 0x55a   : > { %v1456_v58 = vpop.f32.mrf.mxu0 }
 0x55b   : > { %1477 = vrot.lane.b32.xlu1 %v1448_v34, %s8621_s29  ;;  %1778 = vperm.xlu0 %8001, %v1451_v49  }
 0x55c   : > { %v7347_v33 = vpop.f32.mrf.mxu0 }
 0x55e   : > { %v1459_v59 = vpop.f32.mrf.mxu0 }
 0x55f   : > { %1479 = vrot.lane.b32.xlu0 %v1451_v49, %s8621_s29  ;;  %1727 = vrot.lane.b32.xlu1 %v1456_v58, %s8622_s30  ;;  %v9063_v4 = vpack.c.bf16 %v1459_v59, %v1456_v58 }
 0x560   : > { %v7348_v54 = vpop.f32.mrf.mxu0 }
 0x562   : > { %v1464_v40 = vpop.f32.mrf.mxu0 }
 0x563   : > { %1782 = vperm.xlu1 %8002, %v1456_v58   ;;  %1729 = vrot.lane.b32.xlu0 %v1459_v59, %s8622_s30 }
 0x564   : > { %v7351_v60 = vpop.f32.mrf.mxu0 }
 0x566   : > { %v1467_v63 = vpop.f32.mrf.mxu0 }
 0x567   : > { %1481 = vrot.lane.b32.xlu1 %v1456_v58, %s8621_s29  ;;  %1786 = vperm.xlu0 %8001, %v1459_v59   ;;  %v9057_v0 = vpack.c.bf16 %v1467_v63, %v1464_v40 }
 0x568   : > { %v7352_v2 = vpop.f32.mrf.mxu0 }
 0x569   : > { %7354 = vmatpush3.bf16.msra.mxu1 %v9057_v0 }
 0x56a   : > { %7355 = vmatprep.subr.bf16.mxu1 %v8617_v1 }
 0x56b   : > { %1483 = vrot.lane.b32.xlu0 %v1459_v59, %s8621_s29  ;;  %1731 = vrot.lane.b32.xlu1 %v1464_v40, %s8622_s30 }
 0x56d   : > { %7356 = vmatpush3.bf16.msra.mxu1 %v9063_v4 }
 0x56e   : > { %7357 = vmatprep.subr.bf16.mxu1 %v8617_v1 }
 0x56f   : > { %1790 = vperm.xlu1 %8002, %v1464_v40   ;;  %1733 = vrot.lane.b32.xlu0 %v1467_v63, %s8622_s30 }
 0x571   : > { %7358 = vmatpush3.bf16.msra.mxu1 %v9068_v5 }
 0x572   : > { %7389 = vmatprep.subr.bf16.mxu1 %v8617_v1 }
 0x573   : > { %1485 = vrot.lane.b32.xlu1 %v1464_v40, %s8621_s29  ;;  %1794 = vperm.xlu0 %8001, %v1467_v63  }
 0x577   : > { %1487 = vrot.lane.b32.xlu0 %v1467_v63, %s8621_s29 }
 0x578   : > { %8003 = vset.pattern.permute.xlu0 %v8620_v15 }
 0x57b   : > { %1528 = vperm.xlu0 %8003, %v1448_v34  }
 0x57f   : > { %1532 = vperm.xlu0 %8003, %v1451_v49  }
 0x583   : > { %1536 = vperm.xlu0 %8003, %v1456_v58  }
 0x587   : > { %1540 = vperm.xlu0 %8003, %v1459_v59  }
 0x58b   : > { %1544 = vperm.xlu0 %8003, %v1464_v40  }
 0x5c5   : > { %v1724_v51 = vpop.permute.xlu1 %1723 }
 0x5c6   : > { %1741 = vxpose.xlu1.b32.start [1/6] (short) (narrow) %v1724_v51, 8 }
 0x5c9   : > { %v1726_v50 = vpop.permute.xlu0 %1725 }
 0x5ca   : > { %1742 = vxpose.xlu1.b32.cont [2/6] (short) (narrow) %v1726_v50, 8 }
 0x5d2   : > { %v1775_v6 = vpop.permute.xlu1 %1774 }
 0x5d6   : > { %v9075_v8 = vpop.permute.xlu1 %1477  ;;  %v1779_v9 = vpop.permute.xlu0 %1778 }
 0x5da   : > { %v9077_v10 = vpop.permute.xlu0 %1479  ;;  %v1728_v11 = vpop.permute.xlu1 %1727 }
 0x5db   : > { %1743 = vxpose.xlu1.b32.cont [3/6] (short) (narrow) %v1728_v11, 8 }
 0x5de   : > { %v1783_v12 = vpop.permute.xlu1 %1782  ;;  %v1730_v7 = vpop.permute.xlu0 %1729 }
 0x5df   : > { %1744 = vxpose.xlu1.b32.cont [4/6] (short) (narrow) %v1730_v7, 8 }
 0x5e2   : > { %v1482_v55 = vpop.permute.xlu1 %1481  ;;  %v1787_v14 = vpop.permute.xlu0 %1786 }
 0x5e6   : > { %v1484_v18 = vpop.permute.xlu0 %1483  ;;  %v1732_v16 = vpop.permute.xlu1 %1731 }
 0x5e7   : > { %1745 = vxpose.xlu1.b32.cont [5/6] (short) (narrow) %v1732_v16, 8 }
 0x5ea   : > { %v1734_v19 = vpop.permute.xlu0 %1733  ;;  %v1791_v20 = vpop.permute.xlu1 %1790 }
 0x5eb   : > { %1746 = vxpose.xlu1.b32.end [6/6] (short) (narrow) %v1734_v19, 8 }
 0x5ee   : > { %v1486_v24 = vpop.permute.xlu1 %1485  ;;  %v1795_v31 = vpop.permute.xlu0 %1794 }
 0x5f2   : > { %v1488_v2 = vpop.permute.xlu0 %1487 }
 0x5f6   : > { %v1529_v51 = vpop.permute.xlu0 %1528 }
 0x609   : > { %8004 = vset.pattern.permute.xlu1 %v8620_v15 }
 0x60a   : > { %1548 = vperm.xlu1 %8004, %v1467_v63  }
 0x60e   : > { %8005 = vset.pattern.permute.xlu1 %v8619_v3 }
 0x653   : > { %v1757_v25 = vpop.trf.xlu1 }
 0x654   : > { %v1800_v26 = vrot.slane %v1757_v25, %v8816_v56 }
 0x656   : > { %v1804_v35 = vadd.f32 %v1800_v26, %v1787_v14  ;;  %v1801_v23 = vadd.f32 %v1800_v26, %v1775_v6  ;;  %v1805_v32 = vadd.f32 %v1800_v26, %v1791_v20  ;;  %v1802_v21 = vadd.f32 %v1800_v26, %v1779_v9  ;;  %v1533_v9 = vpop.permute.xlu0 %1532 }
 0x657   : > { %v1803_v36 = vadd.f32 %v1800_v26, %v1783_v12  ;;  %v1806_v17 = vadd.f32 %v1800_v26, %v1795_v31 }
 0x658   : > { %vm1810_vm13 = vcmp.gt.f32.partialorder %v1804_v35, 0.0  ;;  %v1816_v37 = vmul.f32 0.2, %v1804_v35  ;;  %vm1807_vm14 = vcmp.gt.f32.partialorder %v1801_v23, 0.0  ;;  %v1813_v27 = vmul.f32 0.2, %v1801_v23 }
 0x659   : > { %vm1811_vm7 = vcmp.gt.f32.partialorder %v1805_v32, 0.0  ;;  %v1817_v22 = vmul.f32 0.2, %v1805_v32  ;;  %vm1808_vm8 = vcmp.gt.f32.partialorder %v1802_v21, 0.0  ;;  %v1814_v30 = vmul.f32 0.2, %v1802_v21 }
 0x65a   : > { %v1822_v39 = vsel %vm1810_vm13, %v1804_v35, %v1816_v37  ;;  %v1819_v29 = vsel %vm1807_vm14, %v1801_v23, %v1813_v27  ;;  %vm1809_vm9 = vcmp.gt.f32.partialorder %v1803_v36, 0.0  ;;  %v1815_v44 = vmul.f32 0.2, %v1803_v36  ;;  %v1537_v12 = vpop.permute.xlu0 %1536 }
 0x65b   : > { %v9084_v28 = vsel %vm886_vm11, %v1822_v39, -1e+30  ;;  %v9088_v46 = vsel %vm883_vm4, %v1819_v29, -1e+30  ;;  %v1823_v43 = vsel %vm1811_vm7, %v1805_v32, %v1817_v22  ;;  %v1820_v42 = vsel %vm1808_vm8, %v1802_v21, %v1814_v30 }
 0x65c   : > { %v1840_v45 = vsel %vm895_vm3, %v9084_v28, -inf  ;;  %v1831_v47 = vsel %vm895_vm3, %v9088_v46, -inf  ;;  %v9096_v34 = vsel %vm887_vm15, %v1823_v43, -1e+30  ;;  %v9100_v48 = vsel %vm884_vm2, %v1820_v42, -1e+30 }
 0x65d   : > { %1841 = vmax.xlane.f32.xlu1 %v1840_v45  ;;  %1832 = vmax.xlane.f32.xlu0 %v1831_v47  ;;  %vm1812_vm10 = vcmp.gt.f32.partialorder %v1806_v17, 0.0  ;;  %v1821_v49 = vsel %vm1809_vm9, %v1803_v36, %v1815_v44  ;;  %v1818_v52 = vmul.f32 0.2, %v1806_v17  ;;  %v1843_v58 = vsel %vm895_vm3, %v9096_v34, -inf }
 0x65e   : > { %v1834_v33 = vsel %vm895_vm3, %v9100_v48, -inf  ;;  %v9108_v54 = vsel %vm885_vm5, %v1821_v49, -1e+30 }
 0x65f   : > { %v1824_v59 = vsel %vm1812_vm10, %v1806_v17, %v1818_v52  ;;  %v1837_v60 = vsel %vm895_vm3, %v9108_v54, -inf }
 0x660   : > { %v1830_v40 = vsel %vm888_vm6, %v1824_v59, -1e+30 }
 0x661   : > { %1844 = vmax.xlane.f32.xlu1 %v1843_v58  ;;  %1835 = vmax.xlane.f32.xlu0 %v1834_v33  ;;  %v1846_v63 = vsel %vm895_vm3, %v1830_v40, -inf }
 0x665   : > { %1838 = vmax.xlane.f32.xlu0 %v1837_v60  ;;  %1847 = vmax.xlane.f32.xlu1 %v1846_v63 }
 0x685   : > { %v1549_v50 = vpop.permute.xlu1 %1548 }
 0x692   : > { %1495 = vxpose.xlu0.b32.start [1/6] (short) (narrow) %v9075_v8, 8  ;;  %v1541_v8 = vpop.permute.xlu0 %1540 }
 0x696   : > { %1496 = vxpose.xlu0.b32.cont [2/6] (short) (narrow) %v9077_v10, 8  ;;  %v1545_v19 = vpop.permute.xlu0 %1544 }
 0x69a   : > { %1497 = vxpose.xlu0.b32.cont [3/6] (short) (narrow) %v1482_v55, 8 }
 0x69e   : > { %1498 = vxpose.xlu0.b32.cont [4/6] (short) (narrow) %v1484_v18, 8 }
 0x6a2   : > { %1499 = vxpose.xlu0.b32.cont [5/6] (short) (narrow) %v1486_v24, 8 }
 0x6a6   : > { %1500 = vxpose.xlu0.b32.end [6/6] (short) (narrow) %v1488_v2, 8 }
 0x6e6   : > { %v9117_v6 = vpop.xlane.xlu1 %1841  ;;  %v1833_v10 = vpop.xlane.xlu0 %1832 }
 0x6e7   : > { %v1849_v30 = vsub.f32 %v9088_v46, %v1833_v10 }
 0x6e9   : > { %v1855_v45 = vmul.f32 1.442695, %v1849_v30 }
 0x6ea   : > { %v9119_v11 = vpop.xlane.xlu1 %1844  ;;  %v1836_v20 = vpop.xlane.xlu0 %1835 }
 0x6eb   : > { %v1850_v47 = vsub.f32 %v9100_v48, %v1836_v20 }
 0x6ed   : > { %v1857_v59 = vmul.f32 1.442695, %v1850_v47 }
 0x6ee   : > { %v1848_v7 = vpop.xlane.xlu1 %1847  ;;  %v1839_v24 = vpop.xlane.xlu0 %1838 }
 0x6ef   : > { %v1854_v14 = vsub.f32 %v1830_v40, %v1848_v7  ;;  %v1851_v40 = vsub.f32 %v9108_v54, %v1839_v24 }
 0x6f1   : > { %v1865_v16 = vmul.f32 1.442695, %v1854_v14  ;;  %v1853_v14 = vsub.f32 %v9096_v34, %v9119_v11 }
 0x6f3   : > { %8117 = vpow2.f32 %v1865_v16 }
 0x6f4   : > { %8119 = vpow2.f32 %v1855_v45 }
 0x6f5   : > { %8121 = vpow2.f32 %v1857_v59 }
 0x700   : > { %v9121_v55 = vpop.eup %8117 }
 0x701   : > { %v1882_v18 = vsel %vm895_vm3, %v9121_v55, 0.0 }
 0x702   : > { %1883 = vadd.xlane.f32.xlu0 %v1882_v18 }
 0x70e   : > { %v1511_v25 = vpop.trf.xlu0 }
 0x70f   : > { %v1554_v26 = vrot.slane %v1511_v25, %v8816_v56 }
 0x711   : > { %v1555_v31 = vadd.f32 %v1554_v26, %v1529_v51  ;;  %v1556_v35 = vadd.f32 %v1554_v26, %v1533_v9  ;;  %v1557_v23 = vadd.f32 %v1554_v26, %v1537_v12  ;;  %v1558_v27 = vadd.f32 %v1554_v26, %v1541_v8 }
 0x712   : > { %v1559_v42 = vadd.f32 %v1554_v26, %v1545_v19  ;;  %v1560_v33 = vadd.f32 %v1554_v26, %v1549_v50  ;;  %v1852_v51 = vsub.f32 %v9084_v28, %v9117_v6  ;;  %v1859_v9 = vmul.f32 1.442695, %v1851_v40  ;;  %v9157_v19 = vpop.eup %8119 }
 0x713   : > { %vm1561_vm13 = vcmp.gt.f32.partialorder %v1555_v31, 0.0  ;;  %v1567_v32 = vmul.f32 0.2, %v1555_v31  ;;  %vm1562_vm14 = vcmp.gt.f32.partialorder %v1556_v35, 0.0  ;;  %v1568_v21 = vmul.f32 0.2, %v1556_v35  ;;  %v9161_v18 = vpop.eup %8121 }
 0x714   : > { %v1569_v37 = vmul.f32 0.2, %v1557_v23  ;;  %vm1563_vm7 = vcmp.gt.f32.partialorder %v1557_v23, 0.0  ;;  %v1570_v43 = vmul.f32 0.2, %v1558_v27  ;;  %vm1564_vm8 = vcmp.gt.f32.partialorder %v1558_v27, 0.0 }
 0x715   : > { %v1573_v36 = vsel %vm1561_vm13, %v1555_v31, %v1567_v32  ;;  %v1574_v17 = vsel %vm1562_vm14, %v1556_v35, %v1568_v21  ;;  %v1571_v58 = vmul.f32 0.2, %v1559_v42  ;;  %vm1565_vm9 = vcmp.gt.f32.partialorder %v1559_v42, 0.0 }
 0x716   : > { %v9128_v22 = vsel %vm883_vm4, %v1573_v36, -1e+30  ;;  %v9135_v29 = vsel %vm884_vm2, %v1574_v17, -1e+30  ;;  %v1575_v44 = vsel %vm1563_vm7, %v1557_v23, %v1569_v37  ;;  %v1576_v52 = vsel %vm1564_vm8, %v1558_v27, %v1570_v43 }
 0x717   : > { %v1585_v39 = vsel %vm895_vm3, %v9128_v22, -inf  ;;  %v1588_v49 = vsel %vm895_vm3, %v9135_v29, -inf  ;;  %v1581_v46 = vsel %vm885_vm5, %v1575_v44, -1e+30  ;;  %v1582_v48 = vsel %vm886_vm11, %v1576_v52, -1e+30 }
 0x718   : > { %1586 = vmax.xlane.f32.xlu1 %v1585_v39  ;;  %v1591_v60 = vsel %vm895_vm3, %v1581_v46, -inf  ;;  %v1577_v63 = vsel %vm1565_vm9, %v1559_v42, %v1571_v58  ;;  %v1572_v2 = vmul.f32 0.2, %v1560_v33  ;;  %vm1566_vm10 = vcmp.gt.f32.partialorder %v1560_v33, 0.0 }
 0x719   : > { %v1594_v50 = vsel %vm895_vm3, %v1582_v48, -inf  ;;  %v1583_v54 = vsel %vm887_vm15, %v1577_v63, -1e+30  ;;  %v1861_v7 = vmul.f32 1.442695, %v1852_v51  ;;  %8123 = vpow2.f32 %v1859_v9 }
 0x71a   : > { %v1578_v12 = vsel %vm1566_vm10, %v1560_v33, %v1572_v2  ;;  %v1597_v16 = vsel %vm895_vm3, %v1583_v54, -inf  ;;  %v1863_v6 = vmul.f32 1.442695, %v1853_v14  ;;  %v1867_v10 = vsel %vm895_vm3, %v9157_v19, 0.0 }
 0x71b   : > { %v1584_v28 = vsel %vm888_vm6, %v1578_v12, -1e+30  ;;  %8125 = vpow2.f32 %v1861_v7  ;;  %v1870_v34 = vsel %vm895_vm3, %v9161_v18, 0.0 }
 0x71c   : > { %1589 = vmax.xlane.f32.xlu1 %v1588_v49  ;;  %v1600_v8 = vsel %vm895_vm3, %v1584_v28, -inf  ;;  %8127 = vpow2.f32 %v1863_v6 }
 0x720   : > { %1592 = vmax.xlane.f32.xlu1 %v1591_v60 }
 0x724   : > { %1595 = vmax.xlane.f32.xlu1 %v1594_v50 }
 0x726   : > { %v9165_v11 = vpop.eup %8123 }
 0x727   : > { %v1873_v20 = vsel %vm895_vm3, %v9165_v11, 0.0 }
 0x728   : > { %1598 = vmax.xlane.f32.xlu1 %v1597_v16  ;;  %v9169_v24 = vpop.eup %8125 }
 0x729   : > { %v1876_v25 = vsel %vm895_vm3, %v9169_v24, 0.0  ;;  %v9173_v26 = vpop.eup %8127 }
 0x72a   : > { %v1879_v31 = vsel %vm895_vm3, %v9173_v26, 0.0 }
 0x72c   : > { %1601 = vmax.xlane.f32.xlu1 %v1600_v8 }
 0x730   : > { %1868 = vadd.xlane.f32.xlu1 %v1867_v10 }
 0x734   : > { %1871 = vadd.xlane.f32.xlu1 %v1870_v34 }
 0x738   : > { %1874 = vadd.xlane.f32.xlu1 %v1873_v20 }
 0x73c   : > { %1877 = vadd.xlane.f32.xlu1 %v1876_v25 }
 0x740   : > { %1880 = vadd.xlane.f32.xlu1 %v1879_v31 }
 0x751   : > { %1907 = vrot.lane.b32.xlu1 %v9057_v0, %s8623_s21 }
 0x755   : > { %1905 = vrot.lane.b32.xlu1 %v9063_v4, %s8623_s21 }
 0x759   : > { %1903 = vrot.lane.b32.xlu1 %v9068_v5, %s8623_s21 }
 0x7a1   : > { %v1587_v35 = vpop.xlane.xlu1 %1586 }
 0x7a2   : > { %v1603_v23 = vsub.f32 %v9128_v22, %v1587_v35 }
 0x7a4   : > { %v1609_v32 = vmul.f32 1.442695, %v1603_v23 }
 0x7a5   : > { %v1590_v21 = vpop.xlane.xlu1 %1589 }
 0x7a6   : > { %8129 = vpow2.f32 %v1609_v32  ;;  %v1604_v36 = vsub.f32 %v9135_v29, %v1590_v21 }
 0x7a8   : > { %v1611_v17 = vmul.f32 1.442695, %v1604_v36 }
 0x7a9   : > { %v1593_v37 = vpop.xlane.xlu1 %1592 }
 0x7aa   : > { %8131 = vpow2.f32 %v1611_v17  ;;  %v1605_v27 = vsub.f32 %v1581_v46, %v1593_v37 }
 0x7ac   : > { %v1613_v30 = vmul.f32 1.442695, %v1605_v27 }
 0x7ad   : > { %v1596_v0 = vpop.xlane.xlu1 %1595 }
 0x7ae   : > { %8133 = vpow2.f32 %v1613_v30  ;;  %v1606_v39 = vsub.f32 %v1582_v48, %v1596_v0 }
 0x7b0   : > { %v1615_v4 = vmul.f32 1.442695, %v1606_v39 }
 0x7b1   : > { %v1599_v44 = vpop.xlane.xlu1 %1598 }
 0x7b2   : > { %8135 = vpow2.f32 %v1615_v4  ;;  %v1607_v5 = vsub.f32 %v1583_v54, %v1599_v44 }
 0x7b3   : > { %v9185_v43 = vpop.eup %8129 }
 0x7b4   : > { %v1617_v22 = vmul.f32 1.442695, %v1607_v5  ;;  %v1621_v42 = vsel %vm895_vm3, %v9185_v43, 0.0 }
 0x7b5   : > { %v1602_v45 = vpop.xlane.xlu1 %1601  ;;  %1622 = vadd.xlane.f32.xlu1 %v1621_v42 }
 0x7b6   : > { %8137 = vpow2.f32 %v1617_v22  ;;  %v1608_v29 = vsub.f32 %v1584_v28, %v1602_v45  ;;  %v1884_v28 = vpop.xlane.xlu0 %1883 }
 0x7b7   : > { %v9189_v47 = vpop.eup %8131 }
 0x7b8   : > { %v1619_v49 = vmul.f32 1.442695, %v1608_v29  ;;  %v1624_v46 = vsel %vm895_vm3, %v9189_v47, 0.0 }
 0x7b9   : > { %1625 = vadd.xlane.f32.xlu0 %v1624_v46  ;;  %v1869_v52 = vpop.xlane.xlu1 %1868 }
 0x7ba   : > { %8139 = vpow2.f32 %v1619_v49 }
 0x7bb   : > { %v9193_v58 = vpop.eup %8133 }
 0x7bc   : > { %v1627_v33 = vsel %vm895_vm3, %v9193_v58, 0.0 }
 0x7bd   : > { %1628 = vadd.xlane.f32.xlu0 %v1627_v33  ;;  %v1872_v59 = vpop.xlane.xlu1 %1871 }
 0x7be   : > { %8141 = vrcp.f32 %v1872_v59 }
 0x7bf   : > { %v9197_v40 = vpop.eup %8135  ;;  %8143 = vrcp.f32 %v1869_v52 }
 0x7c0   : > { %v1630_v60 = vsel %vm895_vm3, %v9197_v40, 0.0 }
 0x7c1   : > { %1631 = vadd.xlane.f32.xlu0 %v1630_v60  ;;  %v1875_v48 = vpop.xlane.xlu1 %1874 }
 0x7c3   : > { %v9201_v63 = vpop.eup %8137 }
 0x7c4   : > { %v1633_v2 = vsel %vm895_vm3, %v9201_v63, 0.0 }
 0x7c5   : > { %1634 = vadd.xlane.f32.xlu0 %v1633_v2  ;;  %v1878_v51 = vpop.xlane.xlu1 %1877 }
 0x7c6   : > { %8145 = vrcp.f32 %v1878_v51 }
 0x7c7   : > { %v9205_v9 = vpop.eup %8139  ;;  %8147 = vrcp.f32 %v1875_v48 }
 0x7c8   : > { %v1636_v50 = vsel %vm895_vm3, %v9205_v9, 0.0 }
 0x7c9   : > { %1637 = vadd.xlane.f32.xlu0 %v1636_v50  ;;  %v1881_v54 = vpop.xlane.xlu1 %1880 }
 0x7ca   : > { %8149 = vrcp.f32 %v1881_v54 }
 0x7cb   : > { %v8142_v7 = vpop.eup %8141  ;;  %8151 = vrcp.f32 %v1884_v28 }
 0x7cc   : > { %v8144_v16 = vpop.eup %8143  ;;  %v1892_v6 = vmul.f32 %v8142_v7, %v9161_v18  ;;  %v8029_v7 = vld [vmem:[%s10950_s6 + $0x48] sm:$0xff]  }
 0x7cd   : > { %v1908_v12 = vpop.permute.xlu1 %1907  ;;  %v1891_v8 = vmul.f32 %v8144_v16, %v9157_v19  ;;  %v6824_v16 = vld [vmem:[%s10951_s7 + $0x1] ss:$0 sm:$0xff] }
 0x7ce   : > { %7372 = vmatpush3.bf16.msra.mxu0 %v1908_v12  ;;  %v8028_v12 = vld [vmem:[%s10950_s6 + $0x50] sm:$0xff]  }
 0x7cf   : > { %7373 = vmatprep.subr.bf16.mxu0 %v8617_v1  ;;  %v1897_v34 = vpack.c.bf16 %v1892_v6, %v1891_v8 }
 0x7d1   : > { %v1906_v14 = vpop.permute.xlu1 %1905 }
 0x7d2   : > { %7374 = vmatpush3.bf16.msra.mxu0 %v1906_v14  ;;  %v8030_v14 = vld [vmem:[%s10950_s6 + $0x40] sm:$0xff]  }
 0x7d3   : > { %7375 = vmatprep.subr.bf16.mxu0 %v8617_v1  ;;  %v8146_v20 = vpop.eup %8145 }
 0x7d4   : > { %v8148_v25 = vpop.eup %8147  ;;  %v1894_v18 = vmul.f32 %v8146_v20, %v9169_v24 }
 0x7d5   : > { %v1904_v10 = vpop.permute.xlu1 %1903  ;;  %v1893_v31 = vmul.f32 %v8148_v25, %v9165_v11 }
 0x7d6   : > { %7376 = vmatpush3.bf16.msra.mxu0 %v1904_v10 }
 0x7d7   : > { %7409 = vmatprep.subr.bf16.mxu0 %v8617_v1  ;;  %v1898_v35 = vpack.c.bf16 %v1894_v18, %v1893_v31  ;;  %v8150_v23 = vpop.eup %8149 }
 0x7d8   : > { %v8152_v19 = vpop.eup %8151  ;;  %v1895_v32 = vmul.f32 %v8150_v23, %v9173_v26 }
 0x7d9   : > { %7378 = vmatmul.mubr.msk.bf16.vlgmr.msra.gmra.mxu0 %vm895_vm3, %v1897_v34  ;;  %v1896_v21 = vmul.f32 %v8152_v19, %v9121_v55 }
 0x7da   : > { %7381 = vmatprep.mubr.msk.bf16.mxu0 %vm8618_vm0, %v8617_v1 }
 0x7db   : > { %v1899_v36 = vpack.c.bf16 %v1896_v21, %v1895_v32 }
 0x7e1   : > { %7382 = vmatmul.mubr.msk.bf16.gmra.mxu0 %vm895_vm3, %v1898_v35 }
 0x7e2   : > { %7385 = vmatprep.mubr.msk.bf16.mxu0 %vm8618_vm0, %v8617_v1 }
 0x7e9   : > { %7386 = vmatmul.mubr.msk.bf16.gmra.mxu0 %vm895_vm3, %v1899_v36 }
 0x7ea   : > { %7415 = vmatprep.mubr.msk.bf16.mxu0 %vm8618_vm0, %v8617_v1 }
 0x83e   : > { %v1623_v24 = vpop.xlane.xlu1 %1622 }
 0x83f   : > { %8153 = vrcp.f32 %v1623_v24 }
 0x842   : > { %v1626_v11 = vpop.xlane.xlu0 %1625 }
 0x843   : > { %8155 = vrcp.f32 %v1626_v11 }
 0x846   : > { %v1629_v17 = vpop.xlane.xlu0 %1628 }
 0x847   : > { %8157 = vrcp.f32 %v1629_v17 }
 0x84a   : > { %v1632_v37 = vpop.xlane.xlu0 %1631 }
 0x84b   : > { %8159 = vrcp.f32 %v1632_v37 }
 0x84c   : > { %v8154_v27 = vpop.eup %8153 }
 0x84d   : > { %v1645_v26 = vmul.f32 %v8154_v27, %v9185_v43 }
 0x84e   : > { %v1635_v30 = vpop.xlane.xlu0 %1634 }
 0x84f   : > { %8161 = vrcp.f32 %v1635_v30 }
 0x850   : > { %v8156_v0 = vpop.eup %8155 }
 0x851   : > { %v1646_v55 = vmul.f32 %v8156_v0, %v9189_v47 }
 0x852   : > { %v1638_v39 = vpop.xlane.xlu0 %1637 }
 0x853   : > { %8163 = vrcp.f32 %v1638_v39  ;;  %v1651_v4 = vpack.c.bf16 %v1646_v55, %v1645_v26 }
 0x854   : > { %v8158_v44 = vpop.eup %8157 }
 0x855   : > { %7360 = vmatmul.mubr.msk.bf16.vlgmr.msra.gmra.mxu1 %vm895_vm3, %v1651_v4  ;;  %v1647_v22 = vmul.f32 %v8158_v44, %v9193_v58 }
 0x856   : > { %7363 = vmatprep.mubr.msk.bf16.mxu1 %vm8618_vm0, %v8617_v1 }
 0x858   : > { %v8160_v5 = vpop.eup %8159 }
 0x859   : > { %v1648_v42 = vmul.f32 %v8160_v5, %v9197_v40 }
 0x85b   : > { %v1652_v45 = vpack.c.bf16 %v1648_v42, %v1647_v22 }
 0x85c   : > { %v8162_v43 = vpop.eup %8161 }
 0x85d   : > { %7364 = vmatmul.mubr.msk.bf16.gmra.mxu1 %vm895_vm3, %v1652_v45  ;;  %v1649_v47 = vmul.f32 %v8162_v43, %v9201_v63 }
 0x85e   : > { %7367 = vmatprep.mubr.msk.bf16.mxu1 %vm8618_vm0, %v8617_v1 }
 0x860   : > { %v8164_v29 = vpop.eup %8163 }
 0x861   : > { %v1650_v49 = vmul.f32 %v8164_v29, %v9205_v9  ;;  %v8027_v9 = vld [vmem:[%s10950_s6 + $0x58] sm:$0xff]  }
 0x862   : > { %7390 = vmatpush3.bf16.msra.mxu1 %v8027_v9 }
 0x863   : > { %v1653_v46 = vpack.c.bf16 %v1650_v49, %v1649_v47  ;;  %7391 = vmatprep.subr.bf16.mxu1 %v8617_v1 }
 0x865   : > { %7368 = vmatmul.mubr.msk.bf16.gmra.mxu1 %vm895_vm3, %v1653_v46 }
 0x866   : > { %7397 = vmatprep.mubr.msk.bf16.mxu1 %vm8618_vm0, %v8617_v1  ;;  %7392 = vmatpush3.bf16.msra.mxu1 %v8028_v12 }
 0x867   : > { %7393 = vmatprep.subr.bf16.mxu1 %v8617_v1 }
 0x86a   : > { %7394 = vmatpush3.bf16.msra.mxu1 %v8029_v7 }
 0x86b   : > { %7395 = vmatprep.subr.bf16.mxu1 %v8617_v1 }
 0x86e   : > { %7396 = vmatpush3.bf16.msra.mxu1 %v8030_v14 }
 0x86f   : > { %7427 = vmatprep.subr.bf16.mxu1 %v8617_v1 }
 0x899   : > { %v1955_v52 = vpop.f32.mrf.mxu0 }
 0x89a   : > { %1984 = vrot.lane.b32.xlu1 %v1955_v52, %s8624_s22 }
 0x89b   : > { %v7379_v58 = vpop.f32.mrf.mxu0 }
 0x89d   : > { %v1958_v33 = vpop.f32.mrf.mxu0 }
 0x89e   : > { %1986 = vrot.lane.b32.xlu0 %v1958_v33, %s8624_s22 }
 0x89f   : > { %v7380_v59 = vpop.f32.mrf.mxu0 }
 0x8a1   : > { %v1963_v40 = vpop.f32.mrf.mxu0 }
 0x8a2   : > { %1988 = vrot.lane.b32.xlu1 %v1963_v40, %s8624_s22 }
 0x8a3   : > { %v7383_v60 = vpop.f32.mrf.mxu0 }
 0x8a5   : > { %v1966_v48 = vpop.f32.mrf.mxu0 }
 0x8a6   : > { %1990 = vrot.lane.b32.xlu1 %v1966_v48, %s8624_s22 }
 0x8a7   : > { %v7384_v63 = vpop.f32.mrf.mxu0 }
 0x8a9   : > { %v1971_v2 = vpop.f32.mrf.mxu0 }
 0x8aa   : > { %1992 = vrot.lane.b32.xlu0 %v1971_v2, %s8624_s22 }
 0x8ab   : > { %v7387_v51 = vpop.f32.mrf.mxu0 }
 0x8ad   : > { %v1974_v50 = vpop.f32.mrf.mxu0 }
 0x8ae   : > { %1994 = vrot.lane.b32.xlu1 %v1974_v50, %s8624_s22 }
 0x8af   : > { %v7388_v54 = vpop.f32.mrf.mxu0 }
 0x90c   : > { %v1985_v28 = vpop.permute.xlu1 %1984 }
 0x910   : > { %v1987_v20 = vpop.permute.xlu0 %1986 }
 0x914   : > { %v1989_v35 = vpop.permute.xlu1 %1988 }
 0x915   : > { %v1700_v6 = vpop.f32.mrf.mxu1 }
 0x916   : > { %v2002_v8 = vsel %vm1313_vm12, %v1700_v6, %v1985_v28 }
 0x917   : > { %v2016_v10 = vadd.f32 %v6824_v16, %v2002_v8  ;;  %v7361_v34 = vpop.f32.mrf.mxu1 }
 0x918   : > { %v1991_v27 = vpop.permute.xlu1 %1990 }
 0x919   : > { %v2028_v25 = vmin.f32 %v2016_v10, 0.0  ;;  %v1703_v18 = vpop.f32.mrf.mxu1  ;;  %vm2022_vm13 = vcmp.gt.f32.partialorder %v2016_v10, 0.0 }
 0x91a   : > { %v2003_v31 = vsel %vm1313_vm12, %v1703_v18, %v1987_v20 }
 0x91b   : > { %v2034_v23 = vmul.f32 1.442695, %v2028_v25  ;;  %v2017_v19 = vadd.f32 %v6824_v16, %v2003_v31  ;;  %v7362_v32 = vpop.f32.mrf.mxu1 }
 0x91c   : > { %v1993_v44 = vpop.permute.xlu0 %1992 }
 0x91d   : > { %8165 = vpow2.f32 %v2034_v23  ;;  %v2029_v21 = vmin.f32 %v2017_v19, 0.0  ;;  %v1708_v36 = vpop.f32.mrf.mxu1  ;;  %vm2023_vm14 = vcmp.gt.f32.partialorder %v2017_v19, 0.0 }
 0x91e   : > { %v2004_v24 = vsel %vm1313_vm12, %v1708_v36, %v1989_v35 }
 0x91f   : > { %v2036_v11 = vmul.f32 1.442695, %v2029_v21  ;;  %v2018_v17 = vadd.f32 %v6824_v16, %v2004_v24  ;;  %v7365_v37 = vpop.f32.mrf.mxu1 }
 0x920   : > { %v1995_v47 = vpop.permute.xlu1 %1994 }
 0x921   : > { %8167 = vpow2.f32 %v2036_v11  ;;  %v2030_v30 = vmin.f32 %v2018_v17, 0.0  ;;  %v1711_v0 = vpop.f32.mrf.mxu1  ;;  %vm2024_vm7 = vcmp.gt.f32.partialorder %v2018_v17, 0.0 }
 0x922   : > { %v2005_v26 = vsel %vm1313_vm12, %v1711_v0, %v1991_v27 }
 0x923   : > { %v2038_v55 = vmul.f32 1.442695, %v2030_v30  ;;  %v2019_v39 = vadd.f32 %v6824_v16, %v2005_v26  ;;  %v7366_v4 = vpop.f32.mrf.mxu1 }
 0x925   : > { %8169 = vpow2.f32 %v2038_v55  ;;  %v2031_v5 = vmin.f32 %v2019_v39, 0.0  ;;  %v1716_v22 = vpop.f32.mrf.mxu1  ;;  %vm2025_vm8 = vcmp.gt.f32.partialorder %v2019_v39, 0.0 }
 0x926   : > { %v2006_v42 = vsel %vm1313_vm12, %v1716_v22, %v1993_v44 }
 0x927   : > { %v2040_v45 = vmul.f32 1.442695, %v2031_v5  ;;  %v2020_v43 = vadd.f32 %v6824_v16, %v2006_v42  ;;  %v7369_v29 = vpop.f32.mrf.mxu1 }
 0x929   : > { %8171 = vpow2.f32 %v2040_v45  ;;  %v2032_v49 = vmin.f32 %v2020_v43, 0.0  ;;  %v1719_v46 = vpop.f32.mrf.mxu1  ;;  %vm2026_vm9 = vcmp.gt.f32.partialorder %v2020_v43, 0.0 }
 0x92a   : > { %v8166_v52 = vpop.eup %8165  ;;  %v2007_v58 = vsel %vm1313_vm12, %v1719_v46, %v1995_v47 }
 0x92b   : > { %v2042_v33 = vmul.f32 1.442695, %v2032_v49  ;;  %v2021_v59 = vadd.f32 %v6824_v16, %v2007_v58  ;;  %v7370_v40 = vpop.f32.mrf.mxu1  ;;  %v6825_v60 = vadd.f32 -1.0, %v8166_v52 }
 0x92d   : > { %8173 = vpow2.f32 %v2042_v33  ;;  %v2033_v48 = vmin.f32 %v2021_v59, 0.0  ;;  %v2052_v9 = vsel %vm2022_vm13, %v2016_v10, %v6825_v60  ;;  %vm2027_vm10 = vcmp.gt.f32.partialorder %v2021_v59, 0.0 }
 0x92e   : > { %v8168_v63 = vpop.eup %8167 }
 0x92f   : > { %v6826_v2 = vadd.f32 -1.0, %v8168_v63  ;;  %v2044_v51 = vmul.f32 1.442695, %v2033_v48 }
 0x931   : > { %v2053_v50 = vsel %vm2023_vm14, %v2017_v19, %v6826_v2  ;;  %8175 = vpow2.f32 %v2044_v51 }
 0x932   : > { %v8170_v54 = vpop.eup %8169  ;;  %v2067_v12 = vpack.c.bf16 %v2053_v50, %v2052_v9 }
 0x933   : > { %v6827_v7 = vadd.f32 -1.0, %v8170_v54 }
 0x934   : > { %7398 = vmatmul.mubr.msk.bf16.vlgmr.msra.gmra.mxu1 %vm708_vm1, %v2067_v12 }
 0x935   : > { %7401 = vmatprep.mubr.msk.bf16.mxu1 %vm8618_vm0, %v8617_v1  ;;  %v2054_v28 = vsel %vm2024_vm7, %v2018_v17, %v6827_v7 }
 0x936   : > { %v8172_v14 = vpop.eup %8171 }
 0x937   : > { %v6828_v16 = vadd.f32 -1.0, %v8172_v14 }
 0x939   : > { %v2055_v6 = vsel %vm2025_vm8, %v2019_v39, %v6828_v16 }
 0x93a   : > { %v8174_v8 = vpop.eup %8173  ;;  %v2068_v34 = vpack.c.bf16 %v2055_v6, %v2054_v28 }
 0x93b   : > { %v6829_v10 = vadd.f32 -1.0, %v8174_v8 }
 0x93c   : > { %7402 = vmatmul.mubr.msk.bf16.gmra.mxu1 %vm708_vm1, %v2068_v34 }
 0x93d   : > { %7405 = vmatprep.mubr.msk.bf16.mxu1 %vm8618_vm0, %v8617_v1  ;;  %v2056_v18 = vsel %vm2026_vm9, %v2020_v43, %v6829_v10 }
 0x93e   : > { %v8176_v20 = vpop.eup %8175 }
 0x93f   : > { %v6830_v25 = vadd.f32 -1.0, %v8176_v20 }
 0x941   : > { %v2057_v31 = vsel %vm2027_vm10, %v2021_v59, %v6830_v25 }
 0x942   : > { %v2069_v35 = vpack.c.bf16 %v2057_v31, %v2056_v18 }
 0x944   : > { %7406 = vmatmul.mubr.msk.bf16.gmra.mxu1 %vm708_vm1, %v2069_v35 }
 0x945   : > { %7433 = vmatprep.mubr.msk.bf16.mxu1 %vm8618_vm0, %v8617_v1 }
 0x9f4   : > { %v2137_v23 = vpop.f32.mrf.mxu1 }
 0x9f5   : > { %2412 = vrot.lane.b32.xlu0 %v2137_v23, %s8622_s30  ;;  %2166 = vrot.lane.b32.xlu1 %v2137_v23, %s8621_s29 }
 0x9f6   : > { %v7399_v19 = vpop.f32.mrf.mxu1 }
 0x9f8   : > { %v2140_v32 = vpop.f32.mrf.mxu1 }
 0x9f9   : > { %2168 = vrot.lane.b32.xlu0 %v2140_v32, %s8621_s29  ;;  %2414 = vrot.lane.b32.xlu1 %v2140_v32, %s8622_s30  ;;  %v9301_v39 = vpack.c.bf16 %v2140_v32, %v2137_v23 }
 0x9fa   : > { %v7400_v21 = vpop.f32.mrf.mxu1 }
 0x9fc   : > { %v2145_v36 = vpop.f32.mrf.mxu1 }
 0x9fd   : > { %2416 = vrot.lane.b32.xlu0 %v2145_v36, %s8622_s30  ;;  %2467 = vperm.xlu1 %8005, %v2140_v32  }
 0x9fe   : > { %v7403_v24 = vpop.f32.mrf.mxu1 }
 0xa00   : > { %v2148_v11 = vpop.f32.mrf.mxu1 }
 0xa01   : > { %2172 = vrot.lane.b32.xlu0 %v2148_v11, %s8621_s29  ;;  %2471 = vperm.xlu1 %8005, %v2145_v36   ;;  %v9296_v55 = vpack.c.bf16 %v2148_v11, %v2145_v36 }
 0xa02   : > { %v7404_v17 = vpop.f32.mrf.mxu1 }
 0xa04   : > { %v2153_v37 = vpop.f32.mrf.mxu1 }
 0xa05   : > { %2170 = vrot.lane.b32.xlu1 %v2145_v36, %s8621_s29  ;;  %2420 = vrot.lane.b32.xlu0 %v2153_v37, %s8622_s30 }
 0xa06   : > { %v7407_v27 = vpop.f32.mrf.mxu1 }
 0xa08   : > { %v2156_v30 = vpop.f32.mrf.mxu1 }
 0xa09   : > { %2418 = vrot.lane.b32.xlu1 %v2148_v11, %s8622_s30  ;;  %2176 = vrot.lane.b32.xlu0 %v2156_v30, %s8621_s29  ;;  %v9292_v0 = vpack.c.bf16 %v2156_v30, %v2153_v37 }
 0xa0a   : > { %v7408_v26 = vpop.f32.mrf.mxu1 }
 0xa0b   : > { %7410 = vmatpush3.bf16.msra.mxu0 %v9292_v0 }
 0xa0c   : > { %7411 = vmatprep.subr.bf16.mxu0 %v8617_v1 }
 0xa0d   : > { %2479 = vperm.xlu1 %8005, %v2153_v37   ;;  %2217 = vperm.xlu0 %8003, %v2137_v23  }
 0xa0f   : > { %7412 = vmatpush3.bf16.msra.mxu0 %v9296_v55 }
 0xa10   : > { %7413 = vmatprep.subr.bf16.mxu0 %v8617_v1 }
 0xa11   : > { %2174 = vrot.lane.b32.xlu1 %v2153_v37, %s8621_s29  ;;  %2221 = vperm.xlu0 %8003, %v2140_v32  }
 0xa13   : > { %7414 = vmatpush3.bf16.msra.mxu0 %v9301_v39 }
 0xa14   : > { %7445 = vmatprep.subr.bf16.mxu0 %v8617_v1 }
 0xa15   : > { %2225 = vperm.xlu0 %8003, %v2145_v36   ;;  %2422 = vrot.lane.b32.xlu1 %v2156_v30, %s8622_s30 }
 0xa19   : > { %2229 = vperm.xlu0 %8003, %v2148_v11  }
 0xa1d   : > { %2233 = vperm.xlu0 %8003, %v2153_v37  }
 0xa21   : > { %8006 = vset.pattern.permute.xlu0 %v8619_v3 }
 0xa22   : > { %2463 = vperm.xlu0 %8006, %v2137_v23  }
 0xa26   : > { %2475 = vperm.xlu0 %8006, %v2148_v11  }
 0xa2a   : > { %2483 = vperm.xlu0 %8006, %v2156_v30  }
 0xa67   : > { %v2413_v4 = vpop.permute.xlu0 %2412  ;;  %v9307_v44 = vpop.permute.xlu1 %2166 }
 0xa68   : > { %2430 = vxpose.xlu1.b32.start [1/6] (short) (narrow) %v2413_v4, 8 }
 0xa6b   : > { %v9309_v5 = vpop.permute.xlu0 %2168  ;;  %v2415_v22 = vpop.permute.xlu1 %2414 }
 0xa6c   : > { %2431 = vxpose.xlu1.b32.cont [2/6] (short) (narrow) %v2415_v22, 8 }
 0xa6f   : > { %v2417_v42 = vpop.permute.xlu0 %2416 }
 0xa70   : > { %2432 = vxpose.xlu1.b32.cont [3/6] (short) (narrow) %v2417_v42, 8 }
 0xa73   : > { %v9313_v47 = vpop.permute.xlu0 %2172 }
 0xa77   : > { %v2421_v46 = vpop.permute.xlu0 %2420 }
 0xa78   : > { %v2468_v45 = vpop.permute.xlu1 %2467 }
 0xa7b   : > { %v2177_v59 = vpop.permute.xlu0 %2176 }
 0xa7c   : > { %v2472_v43 = vpop.permute.xlu1 %2471 }
 0xa80   : > { %v9311_v29 = vpop.permute.xlu1 %2170 }
 0xa84   : > { %v2419_v49 = vpop.permute.xlu1 %2418 }
 0xa85   : > { %2433 = vxpose.xlu1.b32.cont [4/6] (short) (narrow) %v2419_v49, 8 }
 0xa88   : > { %v2480_v52 = vpop.permute.xlu1 %2479  ;;  %v9317_v40 = vpop.permute.xlu0 %2217 }
 0xa89   : > { %2434 = vxpose.xlu1.b32.cont [5/6] (short) (narrow) %v2421_v46, 8 }
 0xa8c   : > { %v2175_v58 = vpop.permute.xlu1 %2174  ;;  %v9319_v60 = vpop.permute.xlu0 %2221 }
 0xa90   : > { %v2423_v33 = vpop.permute.xlu1 %2422  ;;  %v9321_v48 = vpop.permute.xlu0 %2225 }
 0xa91   : > { %2435 = vxpose.xlu1.b32.end [6/6] (short) (narrow) %v2423_v33, 8 }
 0xa94   : > { %v9323_v63 = vpop.permute.xlu0 %2229 }
 0xa98   : > { %v9325_v2 = vpop.permute.xlu0 %2233 }
 0xa9d   : > { %v2464_v51 = vpop.permute.xlu0 %2463 }
 0xaa1   : > { %v2476_v9 = vpop.permute.xlu0 %2475 }
 0xaa5   : > { %v2484_v12 = vpop.permute.xlu0 %2483 }
 0xaaf   : > { %8007 = vset.pattern.permute.xlu1 %v8620_v15 }
 0xab0   : > { %2237 = vperm.xlu1 %8007, %v2156_v30  }
 0xab4   : > { %8009 = vset.pattern.permute.xlu1 %v8619_v3 }
 0xaf9   : > { %v2446_v50 = vpop.trf.xlu1 }
 0xafa   : > { %v2489_v54 = vrot.slane %v2446_v50, %v8816_v56 }
 0xafc   : > { %v2493_v7 = vadd.f32 %v2489_v54, %v2476_v9  ;;  %v2490_v14 = vadd.f32 %v2489_v54, %v2464_v51  ;;  %v2494_v16 = vadd.f32 %v2489_v54, %v2480_v52  ;;  %v2491_v28 = vadd.f32 %v2489_v54, %v2468_v45 }
 0xafd   : > { %v2495_v6 = vadd.f32 %v2489_v54, %v2484_v12  ;;  %v2492_v8 = vadd.f32 %v2489_v54, %v2472_v43 }
 0xafe   : > { %vm2499_vm13 = vcmp.gt.f32.partialorder %v2493_v7, 0.0  ;;  %v2505_v34 = vmul.f32 0.2, %v2493_v7  ;;  %vm2496_vm14 = vcmp.gt.f32.partialorder %v2490_v14, 0.0  ;;  %v2502_v10 = vmul.f32 0.2, %v2490_v14 }
 0xaff   : > { %vm2500_vm7 = vcmp.gt.f32.partialorder %v2494_v16, 0.0  ;;  %v2506_v20 = vmul.f32 0.2, %v2494_v16  ;;  %vm2497_vm8 = vcmp.gt.f32.partialorder %v2491_v28, 0.0  ;;  %v2503_v25 = vmul.f32 0.2, %v2491_v28 }
 0xb00   : > { %v2511_v18 = vsel %vm2499_vm13, %v2493_v7, %v2505_v34  ;;  %v2508_v31 = vsel %vm2496_vm14, %v2490_v14, %v2502_v10  ;;  %vm2501_vm9 = vcmp.gt.f32.partialorder %v2495_v6, 0.0  ;;  %v2507_v35 = vmul.f32 0.2, %v2495_v6 }
 0xb01   : > { %v9330_v23 = vsel %vm886_vm11, %v2511_v18, -1e+30  ;;  %v9334_v19 = vsel %vm883_vm4, %v2508_v31, -1e+30  ;;  %v2512_v32 = vsel %vm2500_vm7, %v2494_v16, %v2506_v20  ;;  %v2509_v21 = vsel %vm2497_vm8, %v2491_v28, %v2503_v25 }
 0xb02   : > { %v2529_v36 = vsel %vm895_vm3, %v9330_v23, -inf  ;;  %v2520_v24 = vsel %vm895_vm3, %v9334_v19, -inf  ;;  %v9342_v11 = vsel %vm887_vm15, %v2512_v32, -1e+30  ;;  %v9346_v17 = vsel %vm884_vm2, %v2509_v21, -1e+30 }
 0xb03   : > { %2530 = vmax.xlane.f32.xlu1 %v2529_v36  ;;  %2521 = vmax.xlane.f32.xlu0 %v2520_v24  ;;  %vm2498_vm10 = vcmp.gt.f32.partialorder %v2492_v8, 0.0  ;;  %v2513_v37 = vsel %vm2501_vm9, %v2495_v6, %v2507_v35  ;;  %v2504_v27 = vmul.f32 0.2, %v2492_v8  ;;  %v2532_v30 = vsel %vm895_vm3, %v9342_v11, -inf }
 0xb04   : > { %v2523_v26 = vsel %vm895_vm3, %v9346_v17, -inf  ;;  %v2519_v22 = vsel %vm888_vm6, %v2513_v37, -1e+30 }
 0xb05   : > { %v2510_v4 = vsel %vm2498_vm10, %v2492_v8, %v2504_v27  ;;  %v2535_v45 = vsel %vm895_vm3, %v2519_v22, -inf }
 0xb06   : > { %v9356_v42 = vsel %vm885_vm5, %v2510_v4, -1e+30 }
 0xb07   : > { %2533 = vmax.xlane.f32.xlu1 %v2532_v30  ;;  %2524 = vmax.xlane.f32.xlu0 %v2523_v26  ;;  %v2526_v43 = vsel %vm895_vm3, %v9356_v42, -inf }
 0xb0b   : > { %2536 = vmax.xlane.f32.xlu1 %v2535_v45  ;;  %2527 = vmax.xlane.f32.xlu0 %v2526_v43 }
 0xb2b   : > { %v2238_v49 = vpop.permute.xlu1 %2237 }
 0xb38   : > { %2184 = vxpose.xlu0.b32.start [1/6] (short) (narrow) %v9307_v44, 8 }
 0xb3c   : > { %2185 = vxpose.xlu0.b32.cont [2/6] (short) (narrow) %v9309_v5, 8 }
 0xb40   : > { %2186 = vxpose.xlu0.b32.cont [3/6] (short) (narrow) %v9311_v29, 8 }
 0xb44   : > { %2187 = vxpose.xlu0.b32.cont [4/6] (short) (narrow) %v9313_v47, 8 }
 0xb48   : > { %2188 = vxpose.xlu0.b32.cont [5/6] (short) (narrow) %v2175_v58, 8 }
 0xb4c   : > { %2189 = vxpose.xlu0.b32.end [6/6] (short) (narrow) %v2177_v59, 8 }
 0xb8c   : > { %v2531_v46 = vpop.xlane.xlu1 %2530  ;;  %v2522_v50 = vpop.xlane.xlu0 %2521 }
 0xb8d   : > { %v2541_v26 = vsub.f32 %v9330_v23, %v2531_v46 }
 0xb8f   : > { %v2550_v43 = vmul.f32 1.442695, %v2541_v26 }
 0xb90   : > { %v9365_v52 = vpop.xlane.xlu1 %2533  ;;  %v2525_v5 = vpop.xlane.xlu0 %2524 }
 0xb91   : > { %v2539_v31 = vsub.f32 %v9346_v17, %v2525_v5 }
 0xb93   : > { %v2546_v24 = vmul.f32 1.442695, %v2539_v31 }
 0xb94   : > { %v2537_v33 = vpop.xlane.xlu1 %2536  ;;  %v2528_v29 = vpop.xlane.xlu0 %2527 }
 0xb95   : > { %v2543_v51 = vsub.f32 %v2519_v22, %v2537_v33  ;;  %v2540_v37 = vsub.f32 %v9356_v42, %v2528_v29 }
 0xb97   : > { %v2554_v9 = vmul.f32 1.442695, %v2543_v51  ;;  %v2548_v4 = vmul.f32 1.442695, %v2540_v37 }
 0xb99   : > { %8177 = vpow2.f32 %v2554_v9 }
 0xba6   : > { %v9367_v54 = vpop.eup %8177 }
 0xba7   : > { %v2571_v44 = vsel %vm895_vm3, %v9367_v54, 0.0 }
 0xba8   : > { %2572 = vadd.xlane.f32.xlu0 %v2571_v44 }
 0xbb4   : > { %v2200_v47 = vpop.trf.xlu0 }
 0xbb5   : > { %v2243_v58 = vrot.slane %v2200_v47, %v8816_v56 }
 0xbb7   : > { %v2244_v59 = vadd.f32 %v2243_v58, %v9317_v40  ;;  %v2245_v12 = vadd.f32 %v2243_v58, %v9319_v60  ;;  %v2246_v7 = vadd.f32 %v2243_v58, %v9321_v48  ;;  %v2247_v34 = vadd.f32 %v2243_v58, %v9323_v63 }
 0xbb8   : > { %v2538_v40 = vsub.f32 %v9334_v19, %v2522_v50  ;;  %v2248_v18 = vadd.f32 %v2243_v58, %v9325_v2  ;;  %v2249_v36 = vadd.f32 %v2243_v58, %v2238_v49  ;;  %v2542_v49 = vsub.f32 %v9342_v11, %v9365_v52 }
 0xbb9   : > { %vm2250_vm13 = vcmp.gt.f32.partialorder %v2244_v59, 0.0  ;;  %v2256_v14 = vmul.f32 0.2, %v2244_v59  ;;  %vm2251_vm14 = vcmp.gt.f32.partialorder %v2245_v12, 0.0  ;;  %v2257_v16 = vmul.f32 0.2, %v2245_v12 }
 0xbba   : > { %v2258_v8 = vmul.f32 0.2, %v2246_v7  ;;  %vm2252_vm7 = vcmp.gt.f32.partialorder %v2246_v7, 0.0  ;;  %v2259_v25 = vmul.f32 0.2, %v2247_v34  ;;  %vm2253_vm8 = vcmp.gt.f32.partialorder %v2247_v34, 0.0 }
 0xbbb   : > { %v2262_v28 = vsel %vm2250_vm13, %v2244_v59, %v2256_v14  ;;  %v2263_v6 = vsel %vm2251_vm14, %v2245_v12, %v2257_v16  ;;  %v2544_v63 = vmul.f32 1.442695, %v2538_v40  ;;  %v2260_v21 = vmul.f32 0.2, %v2248_v18 }
 0xbbc   : > { %v9378_v10 = vsel %vm883_vm4, %v2262_v28, -1e+30  ;;  %v9385_v48 = vsel %vm884_vm2, %v2263_v6, -1e+30  ;;  %v2264_v20 = vsel %vm2252_vm7, %v2246_v7, %v2258_v8  ;;  %v2265_v32 = vsel %vm2253_vm8, %v2247_v34, %v2259_v25 }
 0xbbd   : > { %v2274_v60 = vsel %vm895_vm3, %v9378_v10, -inf  ;;  %v2277_v35 = vsel %vm895_vm3, %v9385_v48, -inf  ;;  %v2270_v19 = vsel %vm885_vm5, %v2264_v20, -1e+30  ;;  %vm2254_vm9 = vcmp.gt.f32.partialorder %v2248_v18, 0.0 }
 0xbbe   : > { %2275 = vmax.xlane.f32.xlu1 %v2274_v60  ;;  %8179 = vpow2.f32 %v2544_v63  ;;  %v2280_v2 = vsel %vm895_vm3, %v2270_v19, -inf  ;;  %v2271_v17 = vsel %vm886_vm11, %v2265_v32, -1e+30  ;;  %v2266_v27 = vsel %vm2254_vm9, %v2248_v18, %v2260_v21 }
 0xbbf   : > { %v2261_v30 = vmul.f32 0.2, %v2249_v36  ;;  %vm2255_vm10 = vcmp.gt.f32.partialorder %v2249_v36, 0.0  ;;  %8181 = vpow2.f32 %v2546_v24  ;;  %v2283_v22 = vsel %vm895_vm3, %v2271_v17, -inf }
 0xbc0   : > { %v2272_v45 = vsel %vm887_vm15, %v2266_v27, -1e+30  ;;  %8183 = vpow2.f32 %v2548_v4  ;;  %v2552_v46 = vmul.f32 1.442695, %v2542_v49 }
 0xbc1   : > { %v2267_v42 = vsel %vm2255_vm10, %v2249_v36, %v2261_v30  ;;  %v2286_v33 = vsel %vm895_vm3, %v2272_v45, -inf  ;;  %8185 = vpow2.f32 %v2550_v43 }
 0xbc2   : > { %2278 = vmax.xlane.f32.xlu1 %v2277_v35  ;;  %v2273_v23 = vsel %vm888_vm6, %v2267_v42, -1e+30  ;;  %8187 = vpow2.f32 %v2552_v46 }
 0xbc3   : > { %v2289_v51 = vsel %vm895_vm3, %v2273_v23, -inf }
 0xbc6   : > { %2281 = vmax.xlane.f32.xlu1 %v2280_v2 }
 0xbca   : > { %2284 = vmax.xlane.f32.xlu1 %v2283_v22 }
 0xbcb   : > { %v9407_v9 = vpop.eup %8179 }
 0xbcc   : > { %v2556_v50 = vsel %vm895_vm3, %v9407_v9, 0.0  ;;  %v9411_v44 = vpop.eup %8181 }
 0xbcd   : > { %v2559_v11 = vsel %vm895_vm3, %v9411_v44, 0.0  ;;  %v9415_v52 = vpop.eup %8183 }
 0xbce   : > { %2287 = vmax.xlane.f32.xlu1 %v2286_v33  ;;  %v2562_v5 = vsel %vm895_vm3, %v9415_v52, 0.0  ;;  %v9419_v29 = vpop.eup %8185 }
 0xbcf   : > { %v2565_v47 = vsel %vm895_vm3, %v9419_v29, 0.0  ;;  %v9423_v58 = vpop.eup %8187 }
 0xbd0   : > { %v2568_v59 = vsel %vm895_vm3, %v9423_v58, 0.0 }
 0xbd2   : > { %2290 = vmax.xlane.f32.xlu1 %v2289_v51 }
 0xbd6   : > { %2557 = vadd.xlane.f32.xlu1 %v2556_v50 }
 0xbda   : > { %2560 = vadd.xlane.f32.xlu1 %v2559_v11 }
 0xbde   : > { %2563 = vadd.xlane.f32.xlu1 %v2562_v5 }
 0xbe2   : > { %2566 = vadd.xlane.f32.xlu1 %v2565_v47 }
 0xbe6   : > { %2569 = vadd.xlane.f32.xlu1 %v2568_v59 }
 0xbf7   : > { %2596 = vrot.lane.b32.xlu1 %v9292_v0, %s8623_s21 }
 0xbfb   : > { %2594 = vrot.lane.b32.xlu1 %v9296_v55, %s8623_s21 }
 0xbff   : > { %2592 = vrot.lane.b32.xlu1 %v9301_v39, %s8623_s21 }
 0xc47   : > { %v2276_v12 = vpop.xlane.xlu1 %2275 }
 0xc48   : > { %v2292_v7 = vsub.f32 %v9378_v10, %v2276_v12 }
 0xc4a   : > { %v2298_v14 = vmul.f32 1.442695, %v2292_v7 }
 0xc4b   : > { %v2279_v16 = vpop.xlane.xlu1 %2278 }
 0xc4c   : > { %8189 = vpow2.f32 %v2298_v14  ;;  %v2293_v28 = vsub.f32 %v9385_v48, %v2279_v16 }
 0xc4e   : > { %v2300_v6 = vmul.f32 1.442695, %v2293_v28 }
 0xc4f   : > { %v2282_v8 = vpop.xlane.xlu1 %2281 }
 0xc50   : > { %8191 = vpow2.f32 %v2300_v6  ;;  %v2294_v34 = vsub.f32 %v2270_v19, %v2282_v8 }
 0xc52   : > { %v2302_v40 = vmul.f32 1.442695, %v2294_v34 }
 0xc53   : > { %v2285_v0 = vpop.xlane.xlu1 %2284 }
 0xc54   : > { %8193 = vpow2.f32 %v2302_v40  ;;  %v2295_v60 = vsub.f32 %v2271_v17, %v2285_v0 }
 0xc56   : > { %v2304_v55 = vmul.f32 1.442695, %v2295_v60 }
 0xc57   : > { %v2288_v20 = vpop.xlane.xlu1 %2287 }
 0xc58   : > { %8195 = vpow2.f32 %v2304_v55  ;;  %v2296_v39 = vsub.f32 %v2272_v45, %v2288_v20 }
 0xc59   : > { %v9435_v25 = vpop.eup %8189 }
 0xc5a   : > { %v2306_v10 = vmul.f32 1.442695, %v2296_v39  ;;  %v2310_v18 = vsel %vm895_vm3, %v9435_v25, 0.0 }
 0xc5b   : > { %2311 = vadd.xlane.f32.xlu1 %v2310_v18  ;;  %v2291_v48 = vpop.xlane.xlu1 %2290 }
 0xc5c   : > { %8197 = vpow2.f32 %v2306_v10  ;;  %v2297_v63 = vsub.f32 %v2273_v23, %v2291_v48  ;;  %v2573_v23 = vpop.xlane.xlu0 %2572 }
 0xc5d   : > { %v9439_v31 = vpop.eup %8191 }
 0xc5e   : > { %v2308_v35 = vmul.f32 1.442695, %v2297_v63  ;;  %v2313_v19 = vsel %vm895_vm3, %v9439_v31, 0.0 }
 0xc5f   : > { %2314 = vadd.xlane.f32.xlu0 %v2313_v19  ;;  %v2558_v32 = vpop.xlane.xlu1 %2557 }
 0xc60   : > { %8199 = vpow2.f32 %v2308_v35 }
 0xc61   : > { %v9443_v21 = vpop.eup %8193 }
 0xc62   : > { %v2316_v36 = vsel %vm895_vm3, %v9443_v21, 0.0 }
 0xc63   : > { %2317 = vadd.xlane.f32.xlu0 %v2316_v36  ;;  %v2561_v24 = vpop.xlane.xlu1 %2560 }
 0xc64   : > { %8201 = vrcp.f32 %v2561_v24 }
 0xc65   : > { %v9447_v37 = vpop.eup %8195  ;;  %8203 = vrcp.f32 %v2558_v32 }
 0xc66   : > { %v2319_v2 = vsel %vm895_vm3, %v9447_v37, 0.0 }
 0xc67   : > { %2320 = vadd.xlane.f32.xlu0 %v2319_v2  ;;  %v2564_v17 = vpop.xlane.xlu1 %2563 }
 0xc69   : > { %v9451_v27 = vpop.eup %8197 }
 0xc6a   : > { %v2322_v30 = vsel %vm895_vm3, %v9451_v27, 0.0 }
 0xc6b   : > { %2323 = vadd.xlane.f32.xlu0 %v2322_v30  ;;  %v2567_v26 = vpop.xlane.xlu1 %2566 }
 0xc6c   : > { %8205 = vrcp.f32 %v2567_v26 }
 0xc6d   : > { %v9455_v4 = vpop.eup %8199  ;;  %8207 = vrcp.f32 %v2564_v17 }
 0xc6e   : > { %v2325_v22 = vsel %vm895_vm3, %v9455_v4, 0.0 }
 0xc6f   : > { %2326 = vadd.xlane.f32.xlu0 %v2325_v22  ;;  %v2570_v45 = vpop.xlane.xlu1 %2569 }
 0xc70   : > { %8209 = vrcp.f32 %v2570_v45 }
 0xc71   : > { %v8202_v43 = vpop.eup %8201  ;;  %8211 = vrcp.f32 %v2573_v23 }
 0xc72   : > { %v8204_v33 = vpop.eup %8203  ;;  %v2581_v46 = vmul.f32 %v8202_v43, %v9411_v44  ;;  %v8033_v43 = vld [vmem:[%s10950_s6 + $0x68] sm:$0xff]  }
 0xc73   : > { %v2597_v42 = vpop.permute.xlu1 %2596  ;;  %v2580_v51 = vmul.f32 %v8204_v33, %v9407_v9  ;;  %v6853_v33 = vld [vmem:[%s10951_s7 + $0x2] ss:$0 sm:$0xff] }
 0xc74   : > { %7428 = vmatpush3.bf16.msra.mxu1 %v2597_v42  ;;  %v8032_v42 = vld [vmem:[%s10950_s6 + $0x70] sm:$0xff]  }
 0xc75   : > { %7429 = vmatprep.subr.bf16.mxu1 %v8617_v1  ;;  %v2586_v11 = vpack.c.bf16 %v2581_v46, %v2580_v51 }
 0xc77   : > { %v2595_v49 = vpop.permute.xlu1 %2594 }
 0xc78   : > { %7430 = vmatpush3.bf16.msra.mxu1 %v2595_v49  ;;  %v8034_v49 = vld [vmem:[%s10950_s6 + $0x60] sm:$0xff]  }
 0xc79   : > { %7431 = vmatprep.subr.bf16.mxu1 %v8617_v1  ;;  %v8206_v5 = vpop.eup %8205 }
 0xc7a   : > { %v8208_v47 = vpop.eup %8207  ;;  %v2583_v44 = vmul.f32 %v8206_v5, %v9419_v29 }
 0xc7b   : > { %v2593_v50 = vpop.permute.xlu1 %2592  ;;  %v2582_v59 = vmul.f32 %v8208_v47, %v9415_v52 }
 0xc7c   : > { %7432 = vmatpush3.bf16.msra.mxu1 %v2593_v50 }
 0xc7d   : > { %7465 = vmatprep.subr.bf16.mxu1 %v8617_v1  ;;  %v2587_v12 = vpack.c.bf16 %v2583_v44, %v2582_v59  ;;  %v8210_v7 = vpop.eup %8209 }
 0xc7e   : > { %v8212_v9 = vpop.eup %8211  ;;  %v2584_v14 = vmul.f32 %v8210_v7, %v9423_v58 }
 0xc7f   : > { %7434 = vmatmul.mubr.msk.bf16.vlgmr.msra.gmra.mxu1 %vm895_vm3, %v2586_v11  ;;  %v2585_v16 = vmul.f32 %v8212_v9, %v9367_v54 }
 0xc80   : > { %7437 = vmatprep.mubr.msk.bf16.mxu1 %vm8618_vm0, %v8617_v1 }
 0xc81   : > { %v2588_v28 = vpack.c.bf16 %v2585_v16, %v2584_v14 }
 0xc87   : > { %7438 = vmatmul.mubr.msk.bf16.gmra.mxu1 %vm895_vm3, %v2587_v12 }
 0xc88   : > { %7441 = vmatprep.mubr.msk.bf16.mxu1 %vm8618_vm0, %v8617_v1 }
 0xc8f   : > { %7442 = vmatmul.mubr.msk.bf16.gmra.mxu1 %vm895_vm3, %v2588_v28 }
 0xc90   : > { %7471 = vmatprep.mubr.msk.bf16.mxu1 %vm8618_vm0, %v8617_v1 }
 0xce4   : > { %v2312_v29 = vpop.xlane.xlu1 %2311 }
 0xce5   : > { %8213 = vrcp.f32 %v2312_v29 }
 0xce8   : > { %v2315_v52 = vpop.xlane.xlu0 %2314 }
 0xce9   : > { %8215 = vrcp.f32 %v2315_v52 }
 0xcec   : > { %v2318_v6 = vpop.xlane.xlu0 %2317 }
 0xced   : > { %8217 = vrcp.f32 %v2318_v6 }
 0xcf0   : > { %v2321_v8 = vpop.xlane.xlu0 %2320 }
 0xcf1   : > { %8219 = vrcp.f32 %v2321_v8 }
 0xcf2   : > { %v8214_v34 = vpop.eup %8213 }
 0xcf3   : > { %v2334_v58 = vmul.f32 %v8214_v34, %v9435_v25 }
 0xcf4   : > { %v2324_v40 = vpop.xlane.xlu0 %2323 }
 0xcf5   : > { %8221 = vrcp.f32 %v2324_v40 }
 0xcf6   : > { %v8216_v0 = vpop.eup %8215 }
 0xcf7   : > { %v2335_v54 = vmul.f32 %v8216_v0, %v9439_v31 }
 0xcf8   : > { %v2327_v60 = vpop.xlane.xlu0 %2326 }
 0xcf9   : > { %8223 = vrcp.f32 %v2327_v60  ;;  %v2340_v55 = vpack.c.bf16 %v2335_v54, %v2334_v58 }
 0xcfa   : > { %v8218_v20 = vpop.eup %8217 }
 0xcfb   : > { %7416 = vmatmul.mubr.msk.bf16.vlgmr.msra.gmra.mxu0 %vm895_vm3, %v2340_v55  ;;  %v2336_v10 = vmul.f32 %v8218_v20, %v9443_v21 }
 0xcfc   : > { %7419 = vmatprep.mubr.msk.bf16.mxu0 %vm8618_vm0, %v8617_v1 }
 0xcfe   : > { %v8220_v39 = vpop.eup %8219 }
 0xcff   : > { %v2337_v18 = vmul.f32 %v8220_v39, %v9447_v37 }
 0xd01   : > { %v2341_v48 = vpack.c.bf16 %v2337_v18, %v2336_v10 }
 0xd02   : > { %v8222_v25 = vpop.eup %8221 }
 0xd03   : > { %7420 = vmatmul.mubr.msk.bf16.gmra.mxu0 %vm895_vm3, %v2341_v48  ;;  %v2338_v31 = vmul.f32 %v8222_v25, %v9451_v27 }
 0xd04   : > { %7423 = vmatprep.mubr.msk.bf16.mxu0 %vm8618_vm0, %v8617_v1 }
 0xd06   : > { %v8224_v63 = vpop.eup %8223 }
 0xd07   : > { %v2339_v35 = vmul.f32 %v8224_v63, %v9455_v4  ;;  %v8031_v4 = vld [vmem:[%s10950_s6 + $0x78] sm:$0xff]  }
 0xd08   : > { %7446 = vmatpush3.bf16.msra.mxu0 %v8031_v4 }
 0xd09   : > { %v2342_v19 = vpack.c.bf16 %v2339_v35, %v2338_v31  ;;  %7447 = vmatprep.subr.bf16.mxu0 %v8617_v1 }
 0xd0b   : > { %7424 = vmatmul.mubr.msk.bf16.gmra.mxu0 %vm895_vm3, %v2342_v19 }
 0xd0c   : > { %7453 = vmatprep.mubr.msk.bf16.mxu0 %vm8618_vm0, %v8617_v1  ;;  %7448 = vmatpush3.bf16.msra.mxu0 %v8032_v42 }
 0xd0d   : > { %7449 = vmatprep.subr.bf16.mxu0 %v8617_v1 }
 0xd10   : > { %7450 = vmatpush3.bf16.msra.mxu0 %v8033_v43 }
 0xd11   : > { %7451 = vmatprep.subr.bf16.mxu0 %v8617_v1 }
 0xd14   : > { %7452 = vmatpush3.bf16.msra.mxu0 %v8034_v49 }
 0xd15   : > { %7483 = vmatprep.subr.bf16.mxu0 %v8617_v1 }
 0xd3f   : > { %v2644_v32 = vpop.f32.mrf.mxu1 }
 0xd40   : > { %2673 = vrot.lane.b32.xlu1 %v2644_v32, %s8624_s22 }
 0xd41   : > { %v7435_v21 = vpop.f32.mrf.mxu1 }
 0xd43   : > { %v2647_v36 = vpop.f32.mrf.mxu1 }
 0xd44   : > { %2675 = vrot.lane.b32.xlu0 %v2647_v36, %s8624_s22 }
 0xd45   : > { %v7436_v24 = vpop.f32.mrf.mxu1 }
 0xd47   : > { %v2652_v37 = vpop.f32.mrf.mxu1 }
 0xd48   : > { %2677 = vrot.lane.b32.xlu1 %v2652_v37, %s8624_s22 }
 0xd49   : > { %v7439_v2 = vpop.f32.mrf.mxu1 }
 0xd4b   : > { %v2655_v17 = vpop.f32.mrf.mxu1 }
 0xd4c   : > { %2679 = vrot.lane.b32.xlu1 %v2655_v17, %s8624_s22 }
 0xd4d   : > { %v7440_v27 = vpop.f32.mrf.mxu1 }
 0xd4f   : > { %v2660_v30 = vpop.f32.mrf.mxu1 }
 0xd50   : > { %2681 = vrot.lane.b32.xlu0 %v2660_v30, %s8624_s22 }
 0xd51   : > { %v7443_v26 = vpop.f32.mrf.mxu1 }
 0xd53   : > { %v2663_v22 = vpop.f32.mrf.mxu1 }
 0xd54   : > { %2683 = vrot.lane.b32.xlu1 %v2663_v22, %s8624_s22 }
 0xd55   : > { %v7444_v45 = vpop.f32.mrf.mxu1 }
 0xdb2   : > { %v2674_v23 = vpop.permute.xlu1 %2673 }
 0xdb6   : > { %v2676_v5 = vpop.permute.xlu0 %2675 }
 0xdba   : > { %v2678_v12 = vpop.permute.xlu1 %2677 }
 0xdbb   : > { %v2389_v46 = vpop.f32.mrf.mxu0 }
 0xdbc   : > { %v2691_v51 = vsel %vm1313_vm12, %v2389_v46, %v2674_v23 }
 0xdbd   : > { %v2705_v50 = vadd.f32 %v6853_v33, %v2691_v51  ;;  %v7417_v11 = vpop.f32.mrf.mxu0 }
 0xdbe   : > { %v2680_v34 = vpop.permute.xlu1 %2679 }
 0xdbf   : > { %v2717_v47 = vmin.f32 %v2705_v50, 0.0  ;;  %v2392_v44 = vpop.f32.mrf.mxu0  ;;  %vm2711_vm13 = vcmp.gt.f32.partialorder %v2705_v50, 0.0 }
 0xdc0   : > { %v2692_v59 = vsel %vm1313_vm12, %v2392_v44, %v2676_v5 }
 0xdc1   : > { %v2723_v7 = vmul.f32 1.442695, %v2717_v47  ;;  %v2706_v9 = vadd.f32 %v6853_v33, %v2692_v59  ;;  %v7418_v14 = vpop.f32.mrf.mxu0 }
 0xdc2   : > { %v2682_v20 = vpop.permute.xlu0 %2681 }
 0xdc3   : > { %8225 = vpow2.f32 %v2723_v7  ;;  %v2718_v16 = vmin.f32 %v2706_v9, 0.0  ;;  %v2397_v28 = vpop.f32.mrf.mxu0  ;;  %vm2712_vm14 = vcmp.gt.f32.partialorder %v2706_v9, 0.0 }
 0xdc4   : > { %v2693_v29 = vsel %vm1313_vm12, %v2397_v28, %v2678_v12 }
 0xdc5   : > { %v2725_v52 = vmul.f32 1.442695, %v2718_v16  ;;  %v2707_v6 = vadd.f32 %v6853_v33, %v2693_v29  ;;  %v7421_v8 = vpop.f32.mrf.mxu0 }
 0xdc6   : > { %v2684_v31 = vpop.permute.xlu1 %2683 }
 0xdc7   : > { %8227 = vpow2.f32 %v2725_v52  ;;  %v2719_v40 = vmin.f32 %v2707_v6, 0.0  ;;  %v2400_v0 = vpop.f32.mrf.mxu0  ;;  %vm2713_vm7 = vcmp.gt.f32.partialorder %v2707_v6, 0.0 }
 0xdc8   : > { %v2694_v58 = vsel %vm1313_vm12, %v2400_v0, %v2680_v34 }
 0xdc9   : > { %v2727_v54 = vmul.f32 1.442695, %v2719_v40  ;;  %v2708_v60 = vadd.f32 %v6853_v33, %v2694_v58  ;;  %v7422_v55 = vpop.f32.mrf.mxu0 }
 0xdcb   : > { %8229 = vpow2.f32 %v2727_v54  ;;  %v2720_v39 = vmin.f32 %v2708_v60, 0.0  ;;  %v2405_v10 = vpop.f32.mrf.mxu0  ;;  %vm2714_vm8 = vcmp.gt.f32.partialorder %v2708_v60, 0.0 }
 0xdcc   : > { %v2695_v18 = vsel %vm1313_vm12, %v2405_v10, %v2682_v20 }
 0xdcd   : > { %v2729_v48 = vmul.f32 1.442695, %v2720_v39  ;;  %v2709_v25 = vadd.f32 %v6853_v33, %v2695_v18  ;;  %v7425_v63 = vpop.f32.mrf.mxu0 }
 0xdcf   : > { %8231 = vpow2.f32 %v2729_v48  ;;  %v2721_v35 = vmin.f32 %v2709_v25, 0.0  ;;  %v2408_v19 = vpop.f32.mrf.mxu0  ;;  %vm2715_vm9 = vcmp.gt.f32.partialorder %v2709_v25, 0.0 }
 0xdd0   : > { %v8226_v32 = vpop.eup %8225  ;;  %v2696_v21 = vsel %vm1313_vm12, %v2408_v19, %v2684_v31 }
 0xdd1   : > { %v2731_v36 = vmul.f32 1.442695, %v2721_v35  ;;  %v2710_v24 = vadd.f32 %v6853_v33, %v2696_v21  ;;  %v7426_v37 = vpop.f32.mrf.mxu0  ;;  %v6854_v2 = vadd.f32 -1.0, %v8226_v32 }
 0xdd3   : > { %8233 = vpow2.f32 %v2731_v36  ;;  %v2722_v17 = vmin.f32 %v2710_v24, 0.0  ;;  %v2741_v4 = vsel %vm2711_vm13, %v2705_v50, %v6854_v2  ;;  %vm2716_vm10 = vcmp.gt.f32.partialorder %v2710_v24, 0.0 }
 0xdd4   : > { %v8228_v27 = vpop.eup %8227 }
 0xdd5   : > { %v6855_v30 = vadd.f32 -1.0, %v8228_v27  ;;  %v2733_v26 = vmul.f32 1.442695, %v2722_v17 }
 0xdd7   : > { %v2742_v22 = vsel %vm2712_vm14, %v2706_v9, %v6855_v30  ;;  %8235 = vpow2.f32 %v2733_v26 }
 0xdd8   : > { %v8230_v45 = vpop.eup %8229  ;;  %v2756_v42 = vpack.c.bf16 %v2742_v22, %v2741_v4 }
 0xdd9   : > { %v6856_v43 = vadd.f32 -1.0, %v8230_v45 }
 0xdda   : > { %7454 = vmatmul.mubr.msk.bf16.vlgmr.msra.gmra.mxu0 %vm708_vm1, %v2756_v42 }
 0xddb   : > { %7457 = vmatprep.mubr.msk.bf16.mxu0 %vm8618_vm0, %v8617_v1  ;;  %v2743_v23 = vsel %vm2713_vm7, %v2707_v6, %v6856_v43 }
 0xddc   : > { %v8232_v49 = vpop.eup %8231 }
 0xddd   : > { %v6857_v33 = vadd.f32 -1.0, %v8232_v49 }
 0xddf   : > { %v2744_v46 = vsel %vm2714_vm8, %v2708_v60, %v6857_v33 }
 0xde0   : > { %v8234_v51 = vpop.eup %8233  ;;  %v2757_v11 = vpack.c.bf16 %v2744_v46, %v2743_v23 }
 0xde1   : > { %v6858_v50 = vadd.f32 -1.0, %v8234_v51 }
 0xde2   : > { %7458 = vmatmul.mubr.msk.bf16.gmra.mxu0 %vm708_vm1, %v2757_v11 }
 0xde3   : > { %7461 = vmatprep.mubr.msk.bf16.mxu0 %vm8618_vm0, %v8617_v1  ;;  %v2745_v44 = vsel %vm2715_vm9, %v2709_v25, %v6858_v50 }
 0xde4   : > { %v8236_v5 = vpop.eup %8235 }
 0xde5   : > { %v6859_v47 = vadd.f32 -1.0, %v8236_v5 }
 0xde7   : > { %v2746_v59 = vsel %vm2716_vm10, %v2710_v24, %v6859_v47 }
 0xde8   : > { %v2758_v12 = vpack.c.bf16 %v2746_v59, %v2745_v44 }
 0xdea   : > { %7462 = vmatmul.mubr.msk.bf16.gmra.mxu0 %vm708_vm1, %v2758_v12 }
 0xdeb   : > { %7489 = vmatprep.mubr.msk.bf16.mxu0 %vm8618_vm0, %v8617_v1 }
 0xe9a   : > { %v2826_v7 = vpop.f32.mrf.mxu0 }
 0xe9b   : > { %2855 = vrot.lane.b32.xlu1 %v2826_v7, %s8621_s29  ;;  %3101 = vrot.lane.b32.xlu0 %v2826_v7, %s8622_s30 }
 0xe9c   : > { %v7455_v9 = vpop.f32.mrf.mxu0 }
 0xe9e   : > { %v2829_v14 = vpop.f32.mrf.mxu0 }
 0xe9f   : > { %3152 = vperm.xlu0 %8006, %v2826_v7   ;;  %3103 = vrot.lane.b32.xlu1 %v2829_v14, %s8622_s30  ;;  %v9549_v60 = vpack.c.bf16 %v2829_v14, %v2826_v7 }
 0xea0   : > { %v7456_v16 = vpop.f32.mrf.mxu0 }
 0xea2   : > { %v2834_v28 = vpop.f32.mrf.mxu0 }
 0xea3   : > { %8008 = vset.pattern.permute.xlu0 %v8620_v15  ;;  %3156 = vperm.xlu1 %8009, %v2829_v14  }
 0xea4   : > { %2906 = vperm.xlu0 %8008, %v2826_v7   ;;  %v7459_v29 = vpop.f32.mrf.mxu0 }
 0xea6   : > { %v2837_v52 = vpop.f32.mrf.mxu0 }
 0xea7   : > { %3160 = vperm.xlu1 %8009, %v2834_v28   ;;  %v9544_v54 = vpack.c.bf16 %v2837_v52, %v2834_v28 }
 0xea8   : > { %2857 = vrot.lane.b32.xlu0 %v2829_v14, %s8621_s29  ;;  %v7460_v6 = vpop.f32.mrf.mxu0 }
 0xeaa   : > { %v2842_v8 = vpop.f32.mrf.mxu0 }
 0xeab   : > { %2859 = vrot.lane.b32.xlu1 %v2834_v28, %s8621_s29 }
 0xeac   : > { %2910 = vperm.xlu0 %8008, %v2829_v14   ;;  %v7463_v34 = vpop.f32.mrf.mxu0 }
 0xeae   : > { %v2845_v40 = vpop.f32.mrf.mxu0 }
 0xeaf   : > { %3107 = vrot.lane.b32.xlu1 %v2837_v52, %s8622_s30  ;;  %v9539_v0 = vpack.c.bf16 %v2845_v40, %v2842_v8 }
 0xeb0   : > { %3105 = vrot.lane.b32.xlu0 %v2834_v28, %s8622_s30  ;;  %v7464_v58 = vpop.f32.mrf.mxu0 }
 0xeb1   : > { %7466 = vmatpush3.bf16.msra.mxu1 %v9539_v0 }
 0xeb2   : > { %7467 = vmatprep.subr.bf16.mxu1 %v8617_v1 }
 0xeb3   : > { %3168 = vperm.xlu1 %8009, %v2842_v8  }
 0xeb4   : > { %2914 = vperm.xlu0 %8008, %v2834_v28  }
 0xeb5   : > { %7468 = vmatpush3.bf16.msra.mxu1 %v9544_v54 }
 0xeb6   : > { %7469 = vmatprep.subr.bf16.mxu1 %v8617_v1 }
 0xeb7   : > { %2863 = vrot.lane.b32.xlu1 %v2842_v8, %s8621_s29 }
 0xeb8   : > { %8010 = vset.pattern.permute.xlu0 %v8619_v3  ;;  %8013 = vset.pattern.permute.xlu1 %v8620_v15 }
 0xeb9   : > { %3164 = vperm.xlu0 %8010, %v2837_v52   ;;  %7470 = vmatpush3.bf16.msra.mxu1 %v9549_v60 }
 0xeba   : > { %7501 = vmatprep.subr.bf16.mxu1 %v8617_v1 }
 0xebb   : > { %3111 = vrot.lane.b32.xlu1 %v2845_v40, %s8622_s30 }
 0xebd   : > { %2861 = vrot.lane.b32.xlu0 %v2837_v52, %s8621_s29 }
 0xebe   : > { %8011 = vset.pattern.permute.xlu0 %v8620_v15 }
 0xebf   : > { %2926 = vperm.xlu1 %8013, %v2845_v40  }
 0xec1   : > { %3109 = vrot.lane.b32.xlu0 %v2842_v8, %s8622_s30  ;;  %s8625_s30 = smov 65  }
 0xec5   : > { %2918 = vperm.xlu0 %8011, %v2837_v52  }
 0xec9   : > { %2922 = vperm.xlu0 %8011, %v2842_v8  }
 0xecd   : > { %8012 = vset.pattern.permute.xlu0 %v8619_v3 }
 0xece   : > { %3172 = vperm.xlu0 %8012, %v2845_v40  }
 0xed2   : > { %2865 = vrot.lane.b32.xlu0 %v2845_v40, %s8621_s29 }
 0xf0d   : > { %v9561_v55 = vpop.permute.xlu1 %2855  ;;  %v3102_v20 = vpop.permute.xlu0 %3101 }
 0xf0e   : > { %3119 = vxpose.xlu1.b32.start [1/6] (short) (narrow) %v3102_v20, 8 }
 0xf11   : > { %v3104_v39 = vpop.permute.xlu1 %3103 }
 0xf12   : > { %3120 = vxpose.xlu1.b32.cont [2/6] (short) (narrow) %v3104_v39, 8 }
 0xf1a   : > { %v3153_v10 = vpop.permute.xlu0 %3152 }
 0xf1e   : > { %v3157_v18 = vpop.permute.xlu1 %3156 }
 0xf1f   : > { %v9563_v48 = vpop.permute.xlu0 %2906 }
 0xf22   : > { %v3161_v15 = vpop.permute.xlu1 %3160 }
 0xf23   : > { %v9565_v25 = vpop.permute.xlu0 %2857 }
 0xf26   : > { %v9569_v31 = vpop.permute.xlu1 %2859 }
 0xf27   : > { %v9567_v63 = vpop.permute.xlu0 %2910 }
 0xf2a   : > { %v3108_v35 = vpop.permute.xlu1 %3107 }
 0xf2b   : > { %v3106_v3 = vpop.permute.xlu0 %3105 }
 0xf2c   : > { %3121 = vxpose.xlu1.b32.cont [3/6] (short) (narrow) %v3106_v3, 8 }
 0xf2e   : > { %v3169_v32 = vpop.permute.xlu1 %3168 }
 0xf2f   : > { %v9571_v19 = vpop.permute.xlu0 %2914 }
 0xf30   : > { %3122 = vxpose.xlu1.b32.cont [4/6] (short) (narrow) %v3108_v35, 8 }
 0xf32   : > { %v2864_v24 = vpop.permute.xlu1 %2863 }
 0xf34   : > { %v3165_v21 = vpop.permute.xlu0 %3164 }
 0xf36   : > { %v3112_v2 = vpop.permute.xlu1 %3111 }
 0xf38   : > { %v2862_v36 = vpop.permute.xlu0 %2861 }
 0xf3a   : > { %v9575_v27 = vpop.permute.xlu1 %2926 }
 0xf3c   : > { %v3110_v37 = vpop.permute.xlu0 %3109 }
 0xf3d   : > { %3123 = vxpose.xlu1.b32.cont [5/6] (short) (narrow) %v3110_v37, 8 }
 0xf40   : > { %v9573_v17 = vpop.permute.xlu0 %2918 }
 0xf41   : > { %3124 = vxpose.xlu1.b32.end [6/6] (short) (narrow) %v3112_v2, 8 }
 0xf44   : > { %v9577_v30 = vpop.permute.xlu0 %2922 }
 0xf49   : > { %v3173_v22 = vpop.permute.xlu0 %3172 }
 0xfa9   : > { %v3135_v26 = vpop.trf.xlu1 }
 0xfaa   : > { %v3178_v4 = vrot.slane %v3135_v26, %v8816_v56 }
 0xfac   : > { %v3182_v45 = vadd.f32 %v3178_v4, %v3165_v21  ;;  %v3179_v42 = vadd.f32 %v3178_v4, %v3153_v10  ;;  %v3183_v43 = vadd.f32 %v3178_v4, %v3169_v32  ;;  %v3180_v49 = vadd.f32 %v3178_v4, %v3157_v18  ;;  %v2866_v18 = vpop.permute.xlu0 %2865 }
 0xfad   : > { %v3184_v33 = vadd.f32 %v3178_v4, %v3173_v22  ;;  %v3181_v23 = vadd.f32 %v3178_v4, %v3161_v15 }
 0xfae   : > { %vm3188_vm13 = vcmp.gt.f32.partialorder %v3182_v45, 0.0  ;;  %v3194_v46 = vmul.f32 0.2, %v3182_v45  ;;  %vm3185_vm14 = vcmp.gt.f32.partialorder %v3179_v42, 0.0  ;;  %v3191_v51 = vmul.f32 0.2, %v3179_v42 }
 0xfaf   : > { %vm3189_vm7 = vcmp.gt.f32.partialorder %v3183_v43, 0.0  ;;  %v3195_v11 = vmul.f32 0.2, %v3183_v43  ;;  %vm3186_vm8 = vcmp.gt.f32.partialorder %v3180_v49, 0.0  ;;  %v3192_v50 = vmul.f32 0.2, %v3180_v49 }
 0xfb0   : > { %v3200_v5 = vsel %vm3188_vm13, %v3182_v45, %v3194_v46  ;;  %v3197_v47 = vsel %vm3185_vm14, %v3179_v42, %v3191_v51  ;;  %vm3190_vm9 = vcmp.gt.f32.partialorder %v3184_v33, 0.0  ;;  %v3196_v44 = vmul.f32 0.2, %v3184_v33 }
 0xfb1   : > { %v9582_v59 = vsel %vm886_vm11, %v3200_v5, -1e+30  ;;  %v9586_v12 = vsel %vm883_vm4, %v3197_v47, -1e+30  ;;  %v3201_v7 = vsel %vm3189_vm7, %v3183_v43, %v3195_v11  ;;  %v3198_v9 = vsel %vm3186_vm8, %v3180_v49, %v3192_v50 }
 0xfb2   : > { %v3218_v14 = vsel %vm895_vm3, %v9582_v59, -inf  ;;  %v3209_v16 = vsel %vm895_vm3, %v9586_v12, -inf  ;;  %v3207_v28 = vsel %vm887_vm15, %v3201_v7, -1e+30  ;;  %v9596_v29 = vsel %vm884_vm2, %v3198_v9, -1e+30 }
 0xfb3   : > { %3219 = vmax.xlane.f32.xlu1 %v3218_v14  ;;  %3210 = vmax.xlane.f32.xlu0 %v3209_v16  ;;  %vm3187_vm10 = vcmp.gt.f32.partialorder %v3181_v23, 0.0  ;;  %v3202_v52 = vsel %vm3190_vm9, %v3184_v33, %v3196_v44  ;;  %v3193_v6 = vmul.f32 0.2, %v3181_v23  ;;  %v3221_v8 = vsel %vm895_vm3, %v3207_v28, -inf }
 0xfb4   : > { %v3212_v34 = vsel %vm895_vm3, %v9596_v29, -inf  ;;  %v9603_v58 = vsel %vm888_vm6, %v3202_v52, -1e+30  ;;  %vm3573_vm9 = vcmask 257024  }
 0xfb5   : > { %v3199_v40 = vsel %vm3187_vm10, %v3181_v23, %v3193_v6  ;;  %v3224_v39 = vsel %vm895_vm3, %v9603_v58, -inf }
 0xfb6   : > { %v9607_v20 = vsel %vm885_vm5, %v3199_v40, -1e+30 }
 0xfb7   : > { %3222 = vmax.xlane.f32.xlu1 %v3221_v8  ;;  %3213 = vmax.xlane.f32.xlu0 %v3212_v34  ;;  %v3215_v10 = vsel %vm895_vm3, %v9607_v20, -inf }
 0xfbb   : > { %3225 = vmax.xlane.f32.xlu1 %v3224_v39  ;;  %3216 = vmax.xlane.f32.xlu0 %v3215_v10 }
 0xfe8   : > { %2873 = vxpose.xlu0.b32.start [1/6] (short) (narrow) %v9561_v55, 8 }
 0xfec   : > { %2874 = vxpose.xlu0.b32.cont [2/6] (short) (narrow) %v9565_v25, 8 }
 0xff0   : > { %2875 = vxpose.xlu0.b32.cont [3/6] (short) (narrow) %v9569_v31, 8 }
 0xff4   : > { %2876 = vxpose.xlu0.b32.cont [4/6] (short) (narrow) %v2862_v36, 8 }
 0xff8   : > { %2877 = vxpose.xlu0.b32.cont [5/6] (short) (narrow) %v2864_v24, 8 }
 0xffc   : > { %2878 = vxpose.xlu0.b32.end [6/6] (short) (narrow) %v2866_v18, 8 }
0x103c   : > { %v3220_v15 = vpop.xlane.xlu1 %3219  ;;  %v3211_v2 = vpop.xlane.xlu0 %3210 }
0x103d   : > { %v3230_v62 = vsub.f32 %v9582_v59, %v3220_v15 }
0x103f   : > { %v3239_v52 = vmul.f32 1.442695, %v3230_v62 }
0x1040   : > { %v3223_v3 = vpop.xlane.xlu1 %3222  ;;  %v3214_v55 = vpop.xlane.xlu0 %3213 }
0x1041   : > { %v3231_v35 = vsub.f32 %v3207_v28, %v3223_v3  ;;  %v3228_v61 = vsub.f32 %v9596_v29, %v3214_v55 }
0x1043   : > { %v3241_v32 = vmul.f32 1.442695, %v3231_v35  ;;  %v3235_v44 = vmul.f32 1.442695, %v3228_v61 }
0x1044   : > { %v3217_v25 = vpop.xlane.xlu0 %3216  ;;  %v3226_v18 = vpop.xlane.xlu1 %3225 }
0x1045   : > { %8237 = vpow2.f32 %v3241_v32  ;;  %v3232_v15 = vsub.f32 %v9603_v58, %v3226_v18 }
0x1047   : > { %v3243_v3 = vmul.f32 1.442695, %v3232_v15 }
0x1052   : > { %v9616_v21 = vpop.eup %8237 }
0x1053   : > { %v3257_v37 = vsel %vm895_vm3, %v9616_v21, 0.0 }
0x1054   : > { %3258 = vadd.xlane.f32.xlu0 %v3257_v37 }
0x1064   : > { %v2889_v26 = vpop.trf.xlu0 }
0x1065   : > { %v2932_v31 = vrot.slane %v2889_v26, %v8816_v56  ;;  %v3227_v56 = vsub.f32 %v9586_v12, %v3211_v2 }
0x1067   : > { %v2933_v36 = vadd.f32 %v2932_v31, %v9563_v48  ;;  %v2934_v24 = vadd.f32 %v2932_v31, %v9567_v63  ;;  %v2935_v4 = vadd.f32 %v2932_v31, %v9571_v19  ;;  %v2936_v33 = vadd.f32 %v2932_v31, %v9573_v17 }
0x1068   : > { %v2937_v51 = vadd.f32 %v2932_v31, %v9577_v30  ;;  %v3233_v17 = vmul.f32 1.442695, %v3227_v56  ;;  %v2938_v57 = vadd.f32 %v2932_v31, %v9575_v27  ;;  %v3229_v30 = vsub.f32 %v9607_v20, %v3217_v25 }
0x1069   : > { %vm2939_vm13 = vcmp.gt.f32.partialorder %v2933_v36, 0.0  ;;  %v2945_v22 = vmul.f32 0.2, %v2933_v36  ;;  %vm2940_vm14 = vcmp.gt.f32.partialorder %v2934_v24, 0.0  ;;  %v2946_v45 = vmul.f32 0.2, %v2934_v24 }
0x106a   : > { %v2947_v49 = vmul.f32 0.2, %v2935_v4  ;;  %vm2941_vm7 = vcmp.gt.f32.partialorder %v2935_v4, 0.0  ;;  %v2948_v46 = vmul.f32 0.2, %v2936_v33  ;;  %vm2942_vm8 = vcmp.gt.f32.partialorder %v2936_v33, 0.0 }
0x106b   : > { %v2951_v42 = vsel %vm2939_vm13, %v2933_v36, %v2945_v22  ;;  %v2952_v43 = vsel %vm2940_vm14, %v2934_v24, %v2946_v45  ;;  %v2949_v47 = vmul.f32 0.2, %v2937_v51  ;;  %8239 = vpow2.f32 %v3233_v17 }
0x106c   : > { %v9627_v23 = vsel %vm883_vm4, %v2951_v42, -1e+30  ;;  %v9634_v63 = vsel %vm884_vm2, %v2952_v43, -1e+30  ;;  %v2953_v19 = vsel %vm2941_vm7, %v2935_v4, %v2947_v49  ;;  %v2954_v5 = vsel %vm2942_vm8, %v2936_v33, %v2948_v46 }
0x106d   : > { %v2963_v48 = vsel %vm895_vm3, %v9627_v23, -inf  ;;  %v2966_v11 = vsel %vm895_vm3, %v9634_v63, -inf  ;;  %v2959_v50 = vsel %vm885_vm5, %v2953_v19, -1e+30  ;;  %vm2943_vm2 = vcmp.gt.f32.partialorder %v2937_v51, 0.0 }
0x106e   : > { %2964 = vmax.xlane.f32.xlu1 %v2963_v48  ;;  %v2969_v12 = vsel %vm895_vm3, %v2959_v50, -inf  ;;  %v2960_v7 = vsel %vm886_vm11, %v2954_v5, -1e+30  ;;  %v2955_v9 = vsel %vm2943_vm2, %v2937_v51, %v2949_v47  ;;  %v2950_v14 = vmul.f32 0.2, %v2938_v57 }
0x106f   : > { %vm2944_vm4 = vcmp.gt.f32.partialorder %v2938_v57, 0.0  ;;  %8241 = vpow2.f32 %v3235_v44  ;;  %v3237_v16 = vmul.f32 1.442695, %v3229_v30  ;;  %v2972_v27 = vsel %vm895_vm3, %v2960_v7, -inf }
0x1070   : > { %v2961_v28 = vsel %vm887_vm15, %v2955_v9, -1e+30  ;;  %v2956_v29 = vsel %vm2944_vm4, %v2938_v57, %v2950_v14  ;;  %vm3525_vm5 = vcmask 1040384   ;;  %vm3465_vm11 = vcmask 531456  }
0x1071   : > { %8243 = vpow2.f32 %v3237_v16  ;;  %v2975_v6 = vsel %vm895_vm3, %v2961_v28, -inf  ;;  %v2962_v13 = vsel %vm888_vm6, %v2956_v29, -1e+30  ;;  %vm3467_vm15 = vcmask 596992  }
0x1072   : > { %2967 = vmax.xlane.f32.xlu1 %v2966_v11  ;;  %8245 = vpow2.f32 %v3239_v52  ;;  %v2978_v59 = vsel %vm895_vm3, %v2962_v13, -inf  ;;  %vm3521_vm6 = vcmask 662528  }
0x1073   : > { %8247 = vpow2.f32 %v3243_v3 }
0x1076   : > { %2970 = vmax.xlane.f32.xlu1 %v2969_v12 }
0x1078   : > { %v9655_v8 = vpop.eup %8239 }
0x1079   : > { %v3245_v34 = vsel %vm895_vm3, %v9655_v8, 0.0 }
0x107a   : > { %2973 = vmax.xlane.f32.xlu1 %v2972_v27 }
0x107c   : > { %v9659_v38 = vpop.eup %8241 }
0x107d   : > { %v3248_v40 = vsel %vm895_vm3, %v9659_v38, 0.0 }
0x107e   : > { %2976 = vmax.xlane.f32.xlu1 %v2975_v6  ;;  %v9663_v20 = vpop.eup %8243 }
0x107f   : > { %v3251_v41 = vsel %vm895_vm3, %v9663_v20, 0.0  ;;  %v9667_v39 = vpop.eup %8245 }
0x1080   : > { %v3254_v10 = vsel %vm895_vm3, %v9667_v39, 0.0  ;;  %v9676_v35 = vpop.eup %8247 }
0x1081   : > { %v3260_v32 = vsel %vm895_vm3, %v9676_v35, 0.0 }
0x1082   : > { %2979 = vmax.xlane.f32.xlu1 %v2978_v59 }
0x1086   : > { %3246 = vadd.xlane.f32.xlu1 %v3245_v34 }
0x108a   : > { %3249 = vadd.xlane.f32.xlu1 %v3248_v40 }
0x108e   : > { %3252 = vadd.xlane.f32.xlu1 %v3251_v41 }
0x1092   : > { %3255 = vadd.xlane.f32.xlu1 %v3254_v10 }
0x10a3   : > { %3285 = vrot.lane.b32.xlu1 %v9539_v0, %s8623_s21 }
0x10a7   : > { %3283 = vrot.lane.b32.xlu1 %v9544_v54, %s8623_s21 }
0x10cb   : > { %3261 = vadd.xlane.f32.xlu1 %v3260_v32 }
0x10dc   : > { %3281 = vrot.lane.b32.xlu1 %v9549_v60, %s8623_s21 }
0x10dd   : > { %v3259_v62 = vpop.xlane.xlu0 %3258 }
0x10f7   : > { %v2965_v37 = vpop.xlane.xlu1 %2964 }
0x10f8   : > { %v2981_v0 = vsub.f32 %v9627_v23, %v2965_v37 }
0x10fa   : > { %v2987_v2 = vmul.f32 1.442695, %v2981_v0 }
0x10fb   : > { %v2968_v55 = vpop.xlane.xlu1 %2967 }
0x10fc   : > { %8249 = vpow2.f32 %v2987_v2  ;;  %v2982_v54 = vsub.f32 %v9634_v63, %v2968_v55 }
0x10fe   : > { %v2989_v58 = vmul.f32 1.442695, %v2982_v54 }
0x10ff   : > { %v2971_v25 = vpop.xlane.xlu1 %2970 }
0x1100   : > { %8251 = vpow2.f32 %v2989_v58  ;;  %v2983_v26 = vsub.f32 %v2959_v50, %v2971_v25 }
0x1102   : > { %v2991_v31 = vmul.f32 1.442695, %v2983_v26 }
0x1103   : > { %v2974_v36 = vpop.xlane.xlu1 %2973 }
0x1104   : > { %8253 = vpow2.f32 %v2991_v31  ;;  %v2984_v24 = vsub.f32 %v2960_v7, %v2974_v36 }
0x1106   : > { %v2993_v4 = vmul.f32 1.442695, %v2984_v24 }
0x1107   : > { %v2977_v22 = vpop.xlane.xlu1 %2976 }
0x1108   : > { %8255 = vpow2.f32 %v2993_v4  ;;  %v2985_v60 = vsub.f32 %v2961_v28, %v2977_v22 }
0x1109   : > { %v9684_v45 = vpop.eup %8249 }
0x110a   : > { %v2995_v42 = vmul.f32 1.442695, %v2985_v60  ;;  %v2999_v43 = vsel %vm895_vm3, %v9684_v45, 0.0 }
0x110b   : > { %v2980_v49 = vpop.xlane.xlu1 %2979  ;;  %3000 = vadd.xlane.f32.xlu1 %v2999_v43 }
0x110c   : > { %8257 = vpow2.f32 %v2995_v42  ;;  %v2986_v33 = vsub.f32 %v2962_v13, %v2980_v49 }
0x110d   : > { %v9688_v23 = vpop.eup %8251 }
0x110e   : > { %v2997_v56 = vmul.f32 1.442695, %v2986_v33  ;;  %v3002_v48 = vsel %vm895_vm3, %v9688_v23, 0.0 }
0x110f   : > { %3003 = vadd.xlane.f32.xlu0 %v3002_v48  ;;  %v3247_v63 = vpop.xlane.xlu1 %3246 }
0x1110   : > { %8259 = vpow2.f32 %v2997_v56 }
0x1111   : > { %v9692_v19 = vpop.eup %8253 }
0x1112   : > { %v3005_v46 = vsel %vm895_vm3, %v9692_v19, 0.0 }
0x1113   : > { %3006 = vadd.xlane.f32.xlu0 %v3005_v46  ;;  %v3250_v51 = vpop.xlane.xlu1 %3249 }
0x1114   : > { %8261 = vrcp.f32 %v3250_v51 }
0x1115   : > { %v9696_v17 = vpop.eup %8255  ;;  %8263 = vrcp.f32 %v3247_v63 }
0x1116   : > { %v3008_v61 = vsel %vm895_vm3, %v9696_v17, 0.0 }
0x1117   : > { %3009 = vadd.xlane.f32.xlu0 %v3008_v61  ;;  %v3253_v11 = vpop.xlane.xlu1 %3252 }
0x1119   : > { %v9700_v50 = vpop.eup %8257 }
0x111a   : > { %v3011_v5 = vsel %vm895_vm3, %v9700_v50, 0.0 }
0x111b   : > { %3012 = vadd.xlane.f32.xlu0 %v3011_v5  ;;  %v3256_v47 = vpop.xlane.xlu1 %3255 }
0x111c   : > { %8265 = vrcp.f32 %v3256_v47 }
0x111d   : > { %v9704_v57 = vpop.eup %8259  ;;  %8267 = vrcp.f32 %v3253_v11 }
0x111e   : > { %v3014_v44 = vsel %vm895_vm3, %v9704_v57, 0.0 }
0x111f   : > { %3015 = vadd.xlane.f32.xlu0 %v3014_v44  ;;  %v3286_v30 = vpop.permute.xlu1 %3285 }
0x1120   : > { %7484 = vmatpush3.bf16.msra.mxu0 %v3286_v30 }
0x1121   : > { %7485 = vmatprep.subr.bf16.mxu0 %v8617_v1  ;;  %v8262_v7 = vpop.eup %8261 }
0x1122   : > { %v8264_v14 = vpop.eup %8263  ;;  %v3270_v16 = vmul.f32 %v8262_v7, %v9659_v38 }
0x1123   : > { %v3284_v12 = vpop.permute.xlu1 %3283  ;;  %v3269_v27 = vmul.f32 %v8264_v14, %v9655_v8 }
0x1124   : > { %7486 = vmatpush3.bf16.msra.mxu0 %v3284_v12 }
0x1125   : > { %7487 = vmatprep.subr.bf16.mxu0 %v8617_v1  ;;  %v3275_v29 = vpack.c.bf16 %v3270_v16, %v3269_v27  ;;  %v6882_v27 = vld [vmem:[%s10951_s7 + $0x3] ss:$0 sm:$0xff] }
0x1129   : > { %v8266_v52 = vpop.eup %8265 }
0x112a   : > { %v8268_v6 = vpop.eup %8267  ;;  %v3272_v13 = vmul.f32 %v8266_v52, %v9667_v39 }
0x112b   : > { %v3271_v59 = vmul.f32 %v8268_v6, %v9663_v20 }
0x112d   : > { %v3276_v34 = vpack.c.bf16 %v3272_v13, %v3271_v59 }
0x1154   : > { %v3262_v9 = vpop.xlane.xlu1 %3261 }
0x1155   : > { %8269 = vrcp.f32 %v3262_v9 }
0x1156   : > { %8271 = vrcp.f32 %v3259_v62 }
0x1158   : > { %v3282_v28 = vpop.permute.xlu1 %3281 }
0x1159   : > { %7488 = vmatpush3.bf16.msra.mxu0 %v3282_v28 }
0x115a   : > { %7511 = vmatprep.subr.bf16.mxu0 %v8617_v1 }
0x115c   : > { %7490 = vmatmul.mubr.msk.bf16.vlgmr.msra.gmra.mxu0 %vm895_vm3, %v3275_v29 }
0x115d   : > { %7493 = vmatprep.mubr.msk.bf16.mxu0 %vm8618_vm0, %v8617_v1 }
0x1162   : > { %v8270_v38 = vpop.eup %8269 }
0x1163   : > { %v8272_v8 = vpop.eup %8271  ;;  %v3274_v40 = vmul.f32 %v8270_v38, %v9676_v35 }
0x1164   : > { %7494 = vmatmul.mubr.msk.bf16.gmra.mxu0 %vm895_vm3, %v3276_v34  ;;  %v3273_v41 = vmul.f32 %v8272_v8, %v9616_v21 }
0x1165   : > { %7497 = vmatprep.mubr.msk.bf16.mxu0 %vm8618_vm0, %v8617_v1 }
0x1166   : > { %v3277_v10 = vpack.c.bf16 %v3274_v40, %v3273_v41 }
0x116c   : > { %7498 = vmatmul.mubr.msk.bf16.gmra.mxu0 %vm895_vm3, %v3277_v10 }
0x116d   : > { %7523 = vmatprep.mubr.msk.bf16.mxu0 %vm8618_vm0, %v8617_v1 }
0x1194   : > { %v3001_v39 = vpop.xlane.xlu1 %3000 }
0x1195   : > { %8273 = vrcp.f32 %v3001_v39 }
0x1198   : > { %v3004_v20 = vpop.xlane.xlu0 %3003 }
0x1199   : > { %8275 = vrcp.f32 %v3004_v20 }
0x119c   : > { %v3007_v18 = vpop.xlane.xlu0 %3006 }
0x119d   : > { %8277 = vrcp.f32 %v3007_v18 }
0x11a0   : > { %v3010_v15 = vpop.xlane.xlu0 %3009 }
0x11a1   : > { %8279 = vrcp.f32 %v3010_v15 }
0x11a2   : > { %v8274_v3 = vpop.eup %8273 }
0x11a3   : > { %v3023_v35 = vmul.f32 %v8274_v3, %v9684_v45  ;;  %v3400_v3 = vld [vmem:[%s644_s20] sm:$0xf] }
0x11a4   : > { %v3013_v32 = vpop.xlane.xlu0 %3012 }
0x11a5   : > { %8281 = vrcp.f32 %v3013_v32 }
0x11a6   : > { %v8276_v37 = vpop.eup %8275 }
0x11a7   : > { %v3024_v21 = vmul.f32 %v8276_v37, %v9688_v23  ;;  %v3401_v37 = vpack.c.bf16 %v3400_v3, %v3400_v3 }
0x11a8   : > { %v3016_v0 = vpop.xlane.xlu0 %3015 }
0x11a9   : > { %8283 = vrcp.f32 %v3016_v0  ;;  %v3029_v2 = vpack.c.bf16 %v3024_v21, %v3023_v35  ;;  %v3449_v35 = vld [vmem:[%s652_s24] sm:$0xf]  ;;  %v8035_v21 = vld [vmem:[%s10952_s8 + $0x28] ss:$0 sps:$4 sm:$0x11]   ;;  %v8626_v0 = vmov 0  }
0x11aa   : > { %v8278_v55 = vpop.eup %8277  ;;  %s8628_s24 = smov 73  }
0x11ab   : > { %7472 = vmatmul.mubr.msk.bf16.vlgmr.msra.gmra.mxu1 %vm895_vm3, %v3029_v2  ;;  %v3025_v58 = vmul.f32 %v8278_v55, %v9692_v19  ;;  %v3527_v2 = vsel %vm3525_vm5, 65535, %v8626_v0 }
0x11ac   : > { %7475 = vmatprep.mubr.msk.bf16.mxu1 %vm8618_vm0, %v8617_v1  ;;  %v3529_v55 = vand.u32 %v8035_v21, %v3527_v2  ;;  %v3738_v2 = vand.u32 127, %v855_v53 }
0x11ae   : > { %v8280_v54 = vpop.eup %8279  ;;  %7512 = vmatpush3.bf16.msra.mxu0 %v3529_v55  ;;  %vm3739_vm10 = vcmp.ge.s32.totalorder %v3738_v2, 64  ;;  %vm3740_vm13 = vcmp.lt.s32.totalorder %v3738_v2, 96  ;;  %v8054_v55 = vld [vmem:[%s10958_s14] sm:$0xff]  }
0x11af   : > { %v3026_v25 = vmul.f32 %v8280_v54, %v9696_v17  ;;  %v8036_v54 = vld [vmem:[%s10952_s8 + $0x20] sm:$0xff]   ;;  %7513 = vmatprep.subr.bf16.mxu0 %v8617_v1  ;;  %vm9875_vm14 = vmand %vm3739_vm10, %vm3740_vm13 }
0x11b1   : > { %v3030_v26 = vpack.c.bf16 %v3026_v25, %v3025_v58  ;;  %v8037_v58 = vld [vmem:[%s10952_s8 + $0x18] sm:$0xff]   ;;  %v8038_v25 = vld [vmem:[%s10952_s8 + $0x10] sm:$0xff]  }
0x11b2   : > { %v8282_v31 = vpop.eup %8281  ;;  %7514 = vmatpush3.bf16.msra.mxu0 %v8036_v54 }
0x11b3   : > { %7476 = vmatmul.mubr.msk.bf16.gmra.mxu1 %vm895_vm3, %v3030_v26  ;;  %v3027_v24 = vmul.f32 %v8282_v31, %v9700_v50  ;;  %7515 = vmatprep.subr.bf16.mxu0 %v8617_v1  ;;  %v8039_v26 = vld [vmem:[%s10952_s8 + $0x8] sm:$0xff]   ;;  %v8040_v31 = vld [vmem:[%s10952_s8] sm:$0xff]  }
0x11b4   : > { %7479 = vmatprep.mubr.msk.bf16.mxu1 %vm8618_vm0, %v8617_v1 }
0x11b6   : > { %v8284_v36 = vpop.eup %8283  ;;  %7516 = vmatpush3.bf16.msra.mxu0 %v8037_v58 }
0x11b7   : > { %v3028_v4 = vmul.f32 %v8284_v36, %v9704_v57  ;;  %7517 = vmatprep.subr.bf16.mxu0 %v8617_v1 }
0x11b9   : > { %v3031_v22 = vpack.c.bf16 %v3028_v4, %v3027_v24  ;;  %v3450_v24 = vld [vmem:[%s656_s2] sm:$0xf] }
0x11ba   : > { %7518 = vmatpush3.bf16.msra.mxu0 %v8038_v25 }
0x11bb   : > { %7480 = vmatmul.mubr.msk.bf16.gmra.mxu1 %vm895_vm3, %v3031_v22  ;;  %7519 = vmatprep.subr.bf16.mxu0 %v8617_v1 }
0x11bc   : > { %7507 = vmatprep.mubr.msk.bf16.mxu1 %vm8618_vm0, %v8617_v1 }
0x11be   : > { %7520 = vmatpush3.bf16.msra.mxu0 %v8039_v26 }
0x11bf   : > { %7521 = vmatprep.subr.bf16.mxu0 %v8617_v1 }
0x11c2   : > { %7522 = vmatpush3.bf16.msra.mxu0 %v8040_v31 }
0x11c3   : > { %7539 = vmatprep.subr.bf16.mxu0 %v8617_v1 }
0x121c   : > { %v3333_v60 = vpop.f32.mrf.mxu0 }
0x121e   : > { %v7491_v45 = vpop.f32.mrf.mxu0 }
0x121f   : > { %v3448_v45 = vld [vmem:[%s648_s0] sm:$0xf] }
0x1220   : > { %v3336_v42 = vpop.f32.mrf.mxu0 }
0x1222   : > { %v7492_v43 = vpop.f32.mrf.mxu0 }
0x1224   : > { %v3341_v49 = vpop.f32.mrf.mxu0 }
0x1225   : > { %3366 = vrot.lane.b32.xlu1 %v3341_v49, %s8624_s22 }
0x1226   : > { %v7495_v33 = vpop.f32.mrf.mxu0 }
0x1228   : > { %v3344_v23 = vpop.f32.mrf.mxu0 }
0x122a   : > { %v7496_v56 = vpop.f32.mrf.mxu0 }
0x122c   : > { %v3349_v48 = vpop.f32.mrf.mxu0 }
0x122d   : > { %3370 = vrot.lane.b32.xlu0 %v3349_v48, %s8624_s22 }
0x122e   : > { %v7499_v63 = vpop.f32.mrf.mxu0 }
0x122f   : > { %v6884_v63 = vld [vmem:[%s10953_s9] ss:$0 sm:$0xff] }
0x1230   : > { %v3352_v19 = vpop.f32.mrf.mxu0 }
0x1231   : > { %3362 = vrot.lane.b32.xlu0 %v3333_v60, %s8624_s22  ;;  %3372 = vrot.lane.b32.xlu1 %v3352_v19, %s8624_s22 }
0x1232   : > { %v7500_v46 = vpop.f32.mrf.mxu0 }
0x1235   : > { %3368 = vrot.lane.b32.xlu1 %v3344_v23, %s8624_s22 }
0x1239   : > { %3364 = vrot.lane.b32.xlu1 %v3336_v42, %s8624_s22 }
0x123d   : > { %3456 = vrot.lane.b32.xlu1 %v3449_v35, %s8625_s30 }
0x126b   : > { %v3078_v51 = vpop.f32.mrf.mxu1 }
0x126d   : > { %v7473_v17 = vpop.f32.mrf.mxu1 }
0x126f   : > { %v3081_v61 = vpop.f32.mrf.mxu1 }
0x1271   : > { %v7474_v11 = vpop.f32.mrf.mxu1 }
0x1273   : > { %v3086_v50 = vpop.f32.mrf.mxu1 }
0x1275   : > { %v7477_v5 = vpop.f32.mrf.mxu1 }
0x1277   : > { %v3089_v47 = vpop.f32.mrf.mxu1 }
0x1279   : > { %v7478_v57 = vpop.f32.mrf.mxu1 }
0x127b   : > { %v3094_v44 = vpop.f32.mrf.mxu1 }
0x127d   : > { %v7481_v30 = vpop.f32.mrf.mxu1 }
0x127e   : > { %v9821_v30 = vld [vmem:[%s10956_s12 + $0x18] sm:$0xff]  }
0x127f   : > { %v3097_v12 = vpop.f32.mrf.mxu1 }
0x1281   : > { %v7482_v7 = vpop.f32.mrf.mxu1 }
0x1282   : > { %v9834_v7 = vld [vmem:[%s10956_s12 + $0x8] sm:$0xff]  }
0x1297   : > { %v3367_v9 = vpop.permute.xlu1 %3366 }
0x1298   : > { %v3382_v6 = vsel %vm1313_vm12, %v3086_v50, %v3367_v9  ;;  %v9841_v9 = vld [vmem:[%s10956_s12] sm:$0xff]  }
0x1299   : > { %v3396_v8 = vadd.f32 %v6882_v27, %v3382_v6 }
0x129f   : > { %v3371_v14 = vpop.permute.xlu0 %3370 }
0x12a0   : > { %v3384_v62 = vsel %vm1313_vm12, %v3094_v44, %v3371_v14 }
0x12a1   : > { %v3398_v29 = vadd.f32 %v6882_v27, %v3384_v62 }
0x12a3   : > { %v3373_v16 = vpop.permute.xlu1 %3372  ;;  %v3363_v13 = vpop.permute.xlu0 %3362 }
0x12a4   : > { %v3385_v28 = vsel %vm1313_vm12, %v3097_v12, %v3373_v16  ;;  %v3380_v41 = vsel %vm1313_vm12, %v3078_v51, %v3363_v13  ;;  %v9827_v12 = vld [vmem:[%s10956_s12 + $0x10] sm:$0xff]   ;;  %v9855_v13 = vld [vmem:[%s10955_s11] ss:$0 sm:$0xff] }
0x12a5   : > { %v3399_v52 = vadd.f32 %v6882_v27, %v3385_v28  ;;  %v3394_v18 = vadd.f32 %v6882_v27, %v3380_v41 }
0x12a7   : > { %v3404_v59 = vpack.c.bf16 %v3399_v52, %v3398_v29  ;;  %v3369_v34 = vpop.permute.xlu1 %3368  ;;  %v9850_v52 = vld [vmem:[%s10954_s10] ss:$0 sm:$0xff] }
0x12a8   : > { %v3383_v38 = vsel %vm1313_vm12, %v3089_v47, %v3369_v34 }
0x12a9   : > { %v3397_v40 = vadd.f32 %v6882_v27, %v3383_v38  ;;  %7502 = vmatpush3.bf16.msra.mxu1 %v3404_v59 }
0x12aa   : > { %7503 = vmatprep.subr.bf16.mxu1 %v8617_v1 }
0x12ab   : > { %v3403_v10 = vpack.c.bf16 %v3397_v40, %v3396_v8  ;;  %v3365_v39 = vpop.permute.xlu1 %3364 }
0x12ac   : > { %v3381_v20 = vsel %vm1313_vm12, %v3081_v61, %v3365_v39 }
0x12ad   : > { %v3395_v15 = vadd.f32 %v6882_v27, %v3381_v20  ;;  %7504 = vmatpush3.bf16.msra.mxu1 %v3403_v10  ;;  %v9871_v20 = vld [vmem:[%s10957_s13] sm:$0x1] }
0x12ae   : > { %7505 = vmatprep.subr.bf16.mxu1 %v8617_v1 }
0x12af   : > { %v3402_v32 = vpack.c.bf16 %v3395_v15, %v3394_v18  ;;  %v3457_v49 = vpop.permute.xlu1 %3456 }
0x12b1   : > { %7506 = vmatpush3.bf16.msra.mxu1 %v3402_v32 }
0x12b2   : > { %7527 = vmatprep.subr.bf16.mxu1 %v8617_v1 }
0x12b4   : > { %7508 = vmatmul.mubr.msk.bf16.vlgmr.msra.gmra.mxu1 %vm895_vm3, %v3401_v37  ;;  %vm3463_vm3 = vcmask 7168  }
0x12b5   : > { %7535 = vmatprep.mubr.msk.bf16.mxu1 %vm8618_vm0, %v8617_v1  ;;  %7528 = vmatpush3.bf16.msra.mxu1 %v9821_v30 }
0x12b6   : > { %7529 = vmatprep.subr.bf16.mxu1 %v8617_v1 }
0x12b9   : > { %7530 = vmatpush3.bf16.msra.mxu1 %v9827_v12 }
0x12ba   : > { %7531 = vmatprep.subr.bf16.mxu1 %v8617_v1 }
0x12bd   : > { %7532 = vmatpush3.bf16.msra.mxu1 %v9834_v7 }
0x12be   : > { %7533 = vmatprep.subr.bf16.mxu1 %v8617_v1 }
0x12c1   : > { %7534 = vmatpush3.bf16.msra.mxu1 %v9841_v9 }
0x12c2   : > { %7551 = vmatprep.subr.bf16.mxu1 %v8617_v1 }
0x1374   : > { %v3442_v36 = vpop.f32.mrf.mxu1 }
0x1375   : > { %3452 = vrot.lane.b32.xlu0 %v3442_v36, %s8627_s23 }
0x1376   : > { %v7509_v4 = vpop.f32.mrf.mxu1 }
0x1378   : > { %v3445_v22 = vpop.f32.mrf.mxu1 }
0x1379   : > { %3460 = vrot.lane.b32.xlu0 %v3450_v24, %s8628_s24 }
0x137a   : > { %v7510_v60 = vpop.f32.mrf.mxu1 }
0x13e7   : > { %v3453_v42 = vpop.permute.xlu0 %3452 }
0x13e8   : > { %v3464_v43 = vsel %vm3463_vm3, %v3448_v45, %v3453_v42  ;;  %v9893_v45 = vld [vmem:[%s10956_s12 + $0x38] sm:$0xff]   ;;  %v9899_v42 = vld [vmem:[%s10956_s12 + $0x30] sm:$0xff]  }
0x13e9   : > { %v3466_v33 = vsel %vm3465_vm11, %v3464_v43, %v3457_v49  ;;  %v9908_v43 = vld [vmem:[%s10956_s12 + $0x28] sm:$0xff]   ;;  %v9915_v49 = vld [vmem:[%s10956_s12 + $0x20] sm:$0xff]  }
0x13eb   : > { %v3461_v23 = vpop.permute.xlu0 %3460 }
0x13ec   : > { %v3468_v56 = vsel %vm3467_vm15, %v3466_v33, %v3461_v23 }
0x13ed   : > { %v3480_v48 = vpack.c.bf16 %v3468_v56, %v3468_v56 }
0x13ef   : > { %7524 = vmatmul.mubr.msk.bf16.vlgmr.msra.gmra.mxu0 %vm3521_vm6, %v3480_v48 }
0x13f0   : > { %7547 = vmatprep.mubr.msk.bf16.mxu0 %vm8618_vm0, %v8617_v1  ;;  %7540 = vmatpush3.bf16.msra.mxu0 %v9893_v45 }
0x13f1   : > { %7541 = vmatprep.subr.bf16.mxu0 %v8617_v1 }
0x13f4   : > { %7542 = vmatpush3.bf16.msra.mxu0 %v9899_v42 }
0x13f5   : > { %7543 = vmatprep.subr.bf16.mxu0 %v8617_v1 }
0x13f8   : > { %7544 = vmatpush3.bf16.msra.mxu0 %v9908_v43 }
0x13f9   : > { %7545 = vmatprep.subr.bf16.mxu0 %v8617_v1 }
0x13fc   : > { %7546 = vmatpush3.bf16.msra.mxu0 %v9915_v49 }
0x13fd   : > { %7563 = vmatprep.subr.bf16.mxu0 %v8617_v1 }
0x14af   : > { %v3565_v19 = vpop.f32.mrf.mxu0 }
0x14b0   : > { %v9810_v46 = vadd.f32 %v6884_v63, %v3565_v19 }
0x14b1   : > { %v7525_v51 = vpop.f32.mrf.mxu0 }
0x14b2   : > { %v3574_v17 = vsel %vm3573_vm9, %v9810_v46, 0.0 }
0x14b3   : > { %3575 = vadd.xlane.f32.xlu1 %v3574_v17  ;;  %v3568_v61 = vpop.f32.mrf.mxu0 }
0x14b5   : > { %v7526_v11 = vpop.f32.mrf.mxu0 }
0x153c   : > { %v3576_v50 = vpop.xlane.xlu1 %3575 }
0x153d   : > { %v3578_v5 = vmul.f32 0.03125, %v3576_v50 }
0x153f   : > { %v3579_v47 = vsub.f32 %v9810_v46, %v3578_v5 }
0x1541   : > { %v3580_v57 = vmul.f32 %v3579_v47, %v3579_v47 }
0x1543   : > { %v3581_v44 = vsel %vm3573_vm9, %v3580_v57, 0.0 }
0x1544   : > { %3582 = vadd.xlane.f32.xlu0 %v3581_v44 }
0x155a   : > { %3603 = vrot.lane.b32.xlu0 %v9810_v46, %s8623_s21 }
0x15cd   : > { %v3583_v14 = vpop.xlane.xlu0 %3582 }
0x15ce   : > { %v3584_v62 = vmul.f32 0.03125, %v3583_v14 }
0x15d0   : > { %v3585_v16 = vadd.f32 1e-05, %v3584_v62 }
0x15d1   : > { %v3604_v27 = vpop.permute.xlu0 %3603 }
0x15d2   : > { %8285 = vrsqrt.f32 %v3585_v16  ;;  %v3606_v28 = vsel %vm3573_vm9, %v3604_v27, 0.0 }
0x15d3   : > { %3607 = vadd.xlane.f32.xlu1 %v3606_v28 }
0x15df   : > { %v8286_v29 = vpop.eup %8285 }
0x15e0   : > { %v3587_v6 = vmul.f32 %v8286_v29, %v3579_v47  ;;  %v9948_v29 = vld [vmem:[%s10957_s13 + $0x1] sm:$0x1] }
0x15e2   : > { %v3594_v59 = vmul.f32 %v9850_v52, %v3587_v6 }
0x15e4   : > { %v9859_v34 = vadd.f32 %v9855_v13, %v3594_v59 }
0x15e6   : > { %v3659_v38 = vsel %vm1313_vm12, %v9859_v34, 0.0 }
0x15e7   : > { %v3668_v8 = vpack.c.bf16 %v3659_v38, %v3659_v38 }
0x15e9   : > { %7536 = vmatmul.mubr.msk.bf16.vlgmr.msra.gmra.mxu1 %vm708_vm1, %v3668_v8 }
0x15ea   : > { %7559 = vmatprep.mubr.msk.bf16.mxu1 %vm8618_vm0, %v8617_v1 }
0x165c   : > { %v3608_v40 = vpop.xlane.xlu1 %3607 }
0x165d   : > { %v3609_v41 = vmul.f32 0.03125, %v3608_v40 }
0x165f   : > { %v3610_v10 = vsub.f32 %v9810_v46, %v3609_v41 }
0x1661   : > { %v3611_v39 = vmul.f32 %v3610_v10, %v3610_v10 }
0x1663   : > { %3613 = vrot.lane.b32.xlu0 %v3611_v39, %s8623_s21 }
0x16a9   : > { %v3731_v18 = vpop.f32.mrf.mxu1 }
0x16aa   : > { %v3732_v15 = vadd.f32 %v3731_v18, %v9871_v20 }
0x16ab   : > { %v7537_v3 = vpop.f32.mrf.mxu1 }
0x16ac   : > { %v6899_v32 = vmul.f32 -1.442695, %v3732_v15 }
0x16ad   : > { %v3734_v37 = vpop.f32.mrf.mxu1 }
0x16ae   : > { %8287 = vpow2.f32 %v6899_v32 }
0x16af   : > { %v7538_v35 = vpop.f32.mrf.mxu1  ;;  %8289 = vtanh.f32 %v3732_v15 }
0x16bb   : > { %v8288_v21 = vpop.eup %8287 }
0x16bc   : > { %v3746_v0 = vadd.f32 1.0, %v8288_v21  ;;  %v8290_v54 = vpop.eup %8289 }
0x16be   : > { %8291 = vrcp.f32 %v3746_v0 }
0x16cb   : > { %v8292_v58 = vpop.eup %8291 }
0x16cc   : > { %v3749_v25 = vsel %vm9875_vm14, %v8290_v54, %v8292_v58 }
0x16cd   : > { %3752 = vrot.lane.b32.xlu1 %v3749_v25, %s8621_s29  ;;  %v3750_v53 = vmul.f32 0.0, %v3749_v25 }
0x16d5   : > { %v3614_v26 = vpop.permute.xlu0 %3613 }
0x16d6   : > { %v3616_v31 = vsel %vm3573_vm9, %v3614_v26, 0.0 }
0x16d7   : > { %3617 = vadd.xlane.f32.xlu0 %v3616_v31 }
0x173f   : > { %v3753_v36 = vpop.permute.xlu1 %3752 }
0x1740   : > { %v3755_v24 = vmul.f32 %v3753_v36, %v3749_v25 }
0x1742   : > { %3757 = vrot.lane.b32.xlu1 %v3755_v24, %s8624_s22 }
0x1760   : > { %v3618_v33 = vpop.xlane.xlu0 %3617 }
0x1761   : > { %v3619_v23 = vmul.f32 0.03125, %v3618_v33 }
0x1763   : > { %v3620_v56 = vadd.f32 1e-05, %v3619_v23 }
0x17b4   : > { %v3758_v4 = vpop.permute.xlu1 %3757 }
0x17b5   : > { %v9884_v22 = vadd.f32 %v3758_v4, %v3750_v53 }
0x17b7   : > { %8293 = vtanh.f32 %v9884_v22 }
0x17b8   : > { %8295 = vrsqrt.f32 %v3620_v56 }
0x17c4   : > { %v8294_v60 = vpop.eup %8293 }
0x17c5   : > { %3763 = vrot.lane.b32.xlu1 %v8294_v60, %s8621_s29  ;;  %v8296_v19 = vpop.eup %8295 }
0x17c6   : > { %v3622_v17 = vmul.f32 %v8296_v19, %v3610_v10 }
0x17c9   : > { %3623 = vrot.lane.b32.xlu1 %v9850_v52, %s8624_s22 }
0x17cd   : > { %3627 = vrot.lane.b32.xlu1 %v9855_v13, %s8624_s22 }
0x1837   : > { %v3764_v48 = vpop.permute.xlu1 %3763 }
0x1838   : > { %v3766_v63 = vmul.f32 %v3764_v48, %v3749_v25 }
0x183a   : > { %3768 = vrot.lane.b32.xlu1 %v3766_v63, %s8624_s22 }
0x183b   : > { %v3624_v51 = vpop.permute.xlu1 %3623 }
0x183c   : > { %v3626_v61 = vmul.f32 %v3624_v51, %v3622_v17 }
0x183f   : > { %v3628_v11 = vpop.permute.xlu1 %3627 }
0x1840   : > { %v3630_v50 = vadd.f32 %v3628_v11, %v3626_v61 }
0x1842   : > { %3986 = vrot.lane.b32.xlu1 %v3630_v50, %s8623_s21 }
0x1846   : > { %3989 = vrot.lane.b32.xlu1 %v3766_v63, %s8621_s29 }
0x184a   : > { %3631 = vrot.lane.b32.xlu1 %v9810_v46, %s8621_s29 }
0x18ac   : > { %v3769_v5 = vpop.permute.xlu1 %3768 }
0x18ad   : > { %v3771_v47 = vsel %vm1313_vm12, %v3769_v5, 0.0 }
0x18ae   : > { %v3781_v57 = vpack.c.bf16 %v3771_v47, %v3771_v47  ;;  %v9985_v47 = vld [vmem:[%s10956_s12 + $0x50] sm:$0xff]  }
0x18b0   : > { %7548 = vmatmul.mubr.msk.bf16.vlgmr.msra.gmra.mxu0 %vm708_vm1, %v3781_v57 }
0x18b1   : > { %7564 = vmatpush3.bf16.msra.mxu0 %v9821_v30  ;;  %7571 = vmatprep.mubr.msk.bf16.mxu0 %vm8618_vm0, %v8617_v1 }
0x18b2   : > { %7565 = vmatprep.subr.bf16.mxu0 %v8617_v1 }
0x18b4   : > { %v9931_v44 = vpop.permute.xlu1 %3986 }
0x18b5   : > { %7566 = vmatpush3.bf16.msra.mxu0 %v9827_v12 }
0x18b6   : > { %7567 = vmatprep.subr.bf16.mxu0 %v8617_v1 }
0x18b8   : > { %v3990_v14 = vpop.permute.xlu1 %3989 }
0x18b9   : > { %7568 = vmatpush3.bf16.msra.mxu0 %v9834_v7  ;;  %v3992_v62 = vsel %vm1313_vm12, %v9931_v44, %v3990_v14 }
0x18ba   : > { %7569 = vmatprep.subr.bf16.mxu0 %v8617_v1  ;;  %v3993_v28 = vpack.c.bf16 %v3992_v62, %v3992_v62 }
0x18bc   : > { %v3632_v16 = vpop.permute.xlu1 %3631 }
0x18bd   : > { %7570 = vmatpush3.bf16.msra.mxu0 %v9841_v9  ;;  %v3634_v27 = vsel %vm3573_vm9, %v3632_v16, 0.0 }
0x18be   : > { %3635 = vadd.xlane.f32.xlu0 %v3634_v27  ;;  %7587 = vmatprep.subr.bf16.mxu0 %v8617_v1 }
0x18c0   : > { %7572 = vmatmul.mubr.msk.bf16.vlgmr.msra.gmra.mxu0 %vm708_vm1, %v3993_v28 }
0x18c1   : > { %7595 = vmatprep.mubr.msk.bf16.mxu0 %vm8618_vm0, %v8617_v1 }
0x1947   : > { %v3636_v36 = vpop.xlane.xlu0 %3635 }
0x1948   : > { %v3637_v24 = vmul.f32 0.03125, %v3636_v36 }
0x194a   : > { %v3638_v4 = vsub.f32 %v9810_v46, %v3637_v24 }
0x194c   : > { %v3639_v33 = vmul.f32 %v3638_v4, %v3638_v4 }
0x1970   : > { %v3845_v6 = vpop.f32.mrf.mxu0 }
0x1971   : > { %v3846_v59 = vadd.f32 %v9948_v29, %v3845_v6 }
0x1972   : > { %v7549_v38 = vpop.f32.mrf.mxu0 }
0x1973   : > { %v6914_v8 = vmul.f32 -1.442695, %v3846_v59 }
0x1974   : > { %v3848_v40 = vpop.f32.mrf.mxu0 }
0x1975   : > { %8297 = vpow2.f32 %v6914_v8 }
0x1976   : > { %v7550_v41 = vpop.f32.mrf.mxu0  ;;  %8299 = vtanh.f32 %v3846_v59 }
0x1980   : > { %v4031_v10 = vpop.f32.mrf.mxu0 }
0x1981   : > { %v4032_v39 = vadd.f32 %v4031_v10, %v9871_v20 }
0x1982   : > { %v8298_v18 = vpop.eup %8297  ;;  %v7573_v15 = vpop.f32.mrf.mxu0 }
0x1983   : > { %v3855_v3 = vadd.f32 1.0, %v8298_v18  ;;  %v6931_v32 = vmul.f32 -1.442695, %v4032_v39  ;;  %v8300_v21 = vpop.eup %8299 }
0x1984   : > { %v4034_v37 = vpop.f32.mrf.mxu0 }
0x1985   : > { %8301 = vrcp.f32 %v3855_v3 }
0x1986   : > { %8303 = vpow2.f32 %v6931_v32  ;;  %v7574_v35 = vpop.f32.mrf.mxu0 }
0x1987   : > { %8305 = vtanh.f32 %v4032_v39 }
0x1992   : > { %v8302_v0 = vpop.eup %8301 }
0x1993   : > { %v8304_v2 = vpop.eup %8303  ;;  %v3858_v54 = vsel %vm9875_vm14, %v8300_v21, %v8302_v0 }
0x1994   : > { %v4041_v58 = vadd.f32 1.0, %v8304_v2  ;;  %3861 = vrot.lane.b32.xlu1 %v3858_v54, %s8621_s29  ;;  %v8306_v25 = vpop.eup %8305  ;;  %v3859_v48 = vmul.f32 0.0, %v3858_v54 }
0x1996   : > { %8307 = vrcp.f32 %v4041_v58 }
0x19a3   : > { %v8308_v26 = vpop.eup %8307 }
0x19a4   : > { %v4044_v31 = vsel %vm9875_vm14, %v8306_v25, %v8308_v26  ;;  %v10058_v26 = vld [vmem:[%s10957_s13 + $0x2] sm:$0x1] }
0x19a5   : > { %4047 = vrot.lane.b32.xlu0 %v4044_v31, %s8621_s29  ;;  %v4045_v61 = vmul.f32 %v4044_v31, %v9884_v22  ;;  %v9979_v22 = vld [vmem:[%s10956_s12 + $0x58] sm:$0xff]  }
0x19a6   : > { %7552 = vmatpush3.bf16.msra.mxu1 %v9979_v22  ;;  %7588 = vmatpush3.bf16.msra.mxu0 %v9979_v22 }
0x19a7   : > { %7553 = vmatprep.subr.bf16.mxu1 %v8617_v1  ;;  %7589 = vmatprep.subr.bf16.mxu0 %v8617_v1 }
0x19aa   : > { %7554 = vmatpush3.bf16.msra.mxu1 %v9985_v47  ;;  %7590 = vmatpush3.bf16.msra.mxu0 %v9985_v47 }
0x19ab   : > { %7555 = vmatprep.subr.bf16.mxu1 %v8617_v1  ;;  %7591 = vmatprep.subr.bf16.mxu0 %v8617_v1 }
0x1a06   : > { %v3862_v53 = vpop.permute.xlu1 %3861 }
0x1a07   : > { %v3864_v60 = vmul.f32 %v3862_v53, %v3858_v54 }
0x1a09   : > { %3866 = vrot.lane.b32.xlu1 %v3864_v60, %s8624_s22 }
0x1a0d   : > { %3641 = vrot.lane.b32.xlu1 %v3639_v33, %s8621_s29 }
0x1a17   : > { %v4048_v23 = vpop.permute.xlu0 %4047 }
0x1a18   : > { %v4050_v56 = vmul.f32 %v4048_v23, %v4044_v31 }
0x1a1a   : > { %4052 = vrot.lane.b32.xlu1 %v4050_v56, %s8624_s22 }
0x1a7b   : > { %v3867_v63 = vpop.permute.xlu1 %3866 }
0x1a7c   : > { %v9962_v19 = vadd.f32 %v3867_v63, %v3859_v48 }
0x1a7e   : > { %8309 = vtanh.f32 %v9962_v19 }
0x1a7f   : > { %v3642_v51 = vpop.permute.xlu1 %3641 }
0x1a80   : > { %v3644_v17 = vsel %vm3573_vm9, %v3642_v51, 0.0 }
0x1a81   : > { %3645 = vadd.xlane.f32.xlu1 %v3644_v17 }
0x1a8b   : > { %v8310_v46 = vpop.eup %8309 }
0x1a8c   : > { %v4053_v11 = vpop.permute.xlu1 %4052  ;;  %3872 = vrot.lane.b32.xlu0 %v8310_v46, %s8621_s29 }
0x1a8d   : > { %v9968_v50 = vadd.f32 %v4053_v11, %v4045_v61 }
0x1a8f   : > { %8311 = vtanh.f32 %v9968_v50 }
0x1a9c   : > { %v8312_v5 = vpop.eup %8311 }
0x1a9d   : > { %4058 = vrot.lane.b32.xlu0 %v8312_v5, %s8621_s29 }
0x1aa1   : > { %3651 = vrot.lane.b32.xlu0 %v9850_v52, %s8621_s29  ;;  %v9994_v52 = vld [vmem:[%s10956_s12 + $0x48] sm:$0xff]  }
0x1aa2   : > { %7556 = vmatpush3.bf16.msra.mxu1 %v9994_v52  ;;  %7592 = vmatpush3.bf16.msra.mxu0 %v9994_v52 }
0x1aa3   : > { %7557 = vmatprep.subr.bf16.mxu1 %v8617_v1  ;;  %7593 = vmatprep.subr.bf16.mxu0 %v8617_v1 }
0x1aa5   : > { %3655 = vrot.lane.b32.xlu0 %v9855_v13, %s8621_s29  ;;  %v10006_v13 = vld [vmem:[%s10956_s12 + $0x40] sm:$0xff]  }
0x1aa6   : > { %7558 = vmatpush3.bf16.msra.mxu1 %v10006_v13  ;;  %7594 = vmatpush3.bf16.msra.mxu0 %v10006_v13 }
0x1aa7   : > { %7575 = vmatprep.subr.bf16.mxu1 %v8617_v1  ;;  %7611 = vmatprep.subr.bf16.mxu0 %v8617_v1 }
0x1afe   : > { %v3873_v57 = vpop.permute.xlu0 %3872 }
0x1aff   : > { %v3875_v14 = vmul.f32 %v3873_v57, %v3858_v54 }
0x1b01   : > { %3877 = vrot.lane.b32.xlu0 %v3875_v14, %s8624_s22 }
0x1b0a   : > { %v3646_v62 = vpop.xlane.xlu1 %3645 }
0x1b0b   : > { %v3647_v16 = vmul.f32 0.03125, %v3646_v62 }
0x1b0d   : > { %v3648_v27 = vadd.f32 1e-05, %v3647_v16 }
0x1b0f   : > { %8313 = vrsqrt.f32 %v3648_v27  ;;  %v4059_v28 = vpop.permute.xlu0 %4058 }
0x1b10   : > { %v4061_v6 = vmul.f32 %v4059_v28, %v4044_v31 }
0x1b12   : > { %4063 = vrot.lane.b32.xlu0 %v4061_v6, %s8624_s22 }
0x1b13   : > { %v3652_v59 = vpop.permute.xlu0 %3651 }
0x1b16   : > { %4066 = vrot.lane.b32.xlu0 %v3875_v14, %s8621_s29 }
0x1b17   : > { %v3656_v40 = vpop.permute.xlu0 %3655 }
0x1b1c   : > { %v8314_v38 = vpop.eup %8313 }
0x1b1d   : > { %v3650_v8 = vmul.f32 %v8314_v38, %v3638_v4 }
0x1b1f   : > { %v3654_v41 = vmul.f32 %v3652_v59, %v3650_v8 }
0x1b21   : > { %v3658_v10 = vadd.f32 %v3656_v40, %v3654_v41 }
0x1b23   : > { %v8014_v39 = vpack.i.bf16 %v4061_v6, %v3658_v10 }
0x1b25   : > { %8015 = vrot.lane.b32.xlu1 %v8014_v39, %s8621_s29 }
0x1b73   : > { %v3878_v18 = vpop.permute.xlu0 %3877 }
0x1b74   : > { %v3880_v15 = vsel %vm1313_vm12, %v3878_v18, 0.0 }
0x1b75   : > { %v3890_v3 = vpack.c.bf16 %v3880_v15, %v3880_v15 }
0x1b77   : > { %7560 = vmatmul.mubr.msk.bf16.vlgmr.msra.gmra.mxu1 %vm708_vm1, %v3890_v3 }
0x1b78   : > { %7576 = vmatpush3.bf16.msra.mxu1 %v9893_v45  ;;  %7583 = vmatprep.mubr.msk.bf16.mxu1 %vm8618_vm0, %v8617_v1 }
0x1b79   : > { %7577 = vmatprep.subr.bf16.mxu1 %v8617_v1 }
0x1b7c   : > { %7578 = vmatpush3.bf16.msra.mxu1 %v9899_v42 }
0x1b7d   : > { %7579 = vmatprep.subr.bf16.mxu1 %v8617_v1 }
0x1b80   : > { %7580 = vmatpush3.bf16.msra.mxu1 %v9908_v43 }
0x1b81   : > { %7581 = vmatprep.subr.bf16.mxu1 %v8617_v1 }
0x1b84   : > { %v4064_v32 = vpop.permute.xlu0 %4063  ;;  %7582 = vmatpush3.bf16.msra.mxu1 %v9915_v49 }
0x1b85   : > { %7599 = vmatprep.subr.bf16.mxu1 %v8617_v1 }
0x1b88   : > { %v4067_v37 = vpop.permute.xlu0 %4066 }
0x1b89   : > { %v4069_v35 = vsel %vm1313_vm12, %v4064_v32, %v4067_v37 }
0x1b8a   : > { %v4070_v21 = vpack.c.bf16 %v4069_v35, %v4069_v35 }
0x1b8c   : > { %7584 = vmatmul.mubr.msk.bf16.vlgmr.msra.gmra.mxu1 %vm708_vm1, %v4070_v21 }
0x1b8d   : > { %7600 = vmatpush3.bf16.msra.mxu1 %v9821_v30  ;;  %7607 = vmatprep.mubr.msk.bf16.mxu1 %vm8618_vm0, %v8617_v1 }
0x1b8e   : > { %7601 = vmatprep.subr.bf16.mxu1 %v8617_v1 }
0x1b91   : > { %7602 = vmatpush3.bf16.msra.mxu1 %v9827_v12 }
0x1b92   : > { %7603 = vmatprep.subr.bf16.mxu1 %v8617_v1 }
0x1b95   : > { %7604 = vmatpush3.bf16.msra.mxu1 %v9834_v7 }
0x1b96   : > { %7605 = vmatprep.subr.bf16.mxu1 %v8617_v1 }
0x1b97   : > { %v8016_v0 = vpop.permute.xlu1 %8015 }
0x1b98   : > { %v8018_v2 = vunpack.i.h.bf16 %v8016_v0  ;;  %v10038_v54 = vunpack.i.l.bf16 %v8016_v0 }
0x1b99   : > { %7606 = vmatpush3.bf16.msra.mxu1 %v9841_v9 }
0x1b9a   : > { %v4224_v58 = vsel %vm1313_vm12, %v10038_v54, %v8018_v2  ;;  %7623 = vmatprep.subr.bf16.mxu1 %v8617_v1 }
0x1b9b   : > { %v4225_v25 = vpack.c.bf16 %v4224_v58, %v4224_v58 }
0x1b9d   : > { %7608 = vmatmul.mubr.msk.bf16.vlgmr.msra.gmra.mxu1 %vm708_vm1, %v4225_v25 }
0x1b9e   : > { %7624 = vmatpush3.bf16.msra.mxu1 %v9979_v22  ;;  %7631 = vmatprep.mubr.msk.bf16.mxu1 %vm8618_vm0, %v8617_v1 }
0x1b9f   : > { %7625 = vmatprep.subr.bf16.mxu1 %v8617_v1 }
0x1ba2   : > { %7626 = vmatpush3.bf16.msra.mxu1 %v9985_v47 }
0x1ba3   : > { %7627 = vmatprep.subr.bf16.mxu1 %v8617_v1 }
0x1ba6   : > { %7628 = vmatpush3.bf16.msra.mxu1 %v9994_v52 }
0x1ba7   : > { %7629 = vmatprep.subr.bf16.mxu1 %v8617_v1 }
0x1baa   : > { %7630 = vmatpush3.bf16.msra.mxu1 %v10006_v13 }
0x1bab   : > { %7647 = vmatprep.subr.bf16.mxu1 %v8617_v1 }
0x1c37   : > { %v3954_v31 = vpop.f32.mrf.mxu1 }
0x1c38   : > { %v3955_v36 = vadd.f32 %v10058_v26, %v3954_v31 }
0x1c39   : > { %v7561_v24 = vpop.f32.mrf.mxu1 }
0x1c3a   : > { %v6929_v53 = vmul.f32 -1.442695, %v3955_v36 }
0x1c3b   : > { %v3957_v4 = vpop.f32.mrf.mxu1 }
0x1c3c   : > { %8315 = vpow2.f32 %v6929_v53 }
0x1c3d   : > { %v7562_v60 = vpop.f32.mrf.mxu1  ;;  %8317 = vtanh.f32 %v3955_v36 }
0x1c49   : > { %v8316_v33 = vpop.eup %8315 }
0x1c4a   : > { %v3964_v23 = vadd.f32 1.0, %v8316_v33  ;;  %v8318_v61 = vpop.eup %8317 }
0x1c4c   : > { %8319 = vrcp.f32 %v3964_v23  ;;  %v4108_v56 = vpop.f32.mrf.mxu1 }
0x1c4d   : > { %v4109_v48 = vadd.f32 %v9948_v29, %v4108_v56 }
0x1c4e   : > { %v7585_v63 = vpop.f32.mrf.mxu1 }
0x1c4f   : > { %v6933_v51 = vmul.f32 -1.442695, %v4109_v48 }
0x1c50   : > { %v4111_v17 = vpop.f32.mrf.mxu1 }
0x1c51   : > { %8321 = vpow2.f32 %v6933_v51 }
0x1c52   : > { %v7586_v46 = vpop.f32.mrf.mxu1  ;;  %8323 = vtanh.f32 %v4109_v48 }
0x1c59   : > { %v8320_v11 = vpop.eup %8319 }
0x1c5a   : > { %v3967_v5 = vsel %vm9875_vm14, %v8318_v61, %v8320_v11 }
0x1c5b   : > { %3970 = vrot.lane.b32.xlu0 %v3967_v5, %s8621_s29  ;;  %v3968_v2 = vmul.f32 0.0, %v3967_v5 }
0x1c5d   : > { %v4263_v57 = vpop.f32.mrf.mxu1 }
0x1c5e   : > { %v8322_v14 = vpop.eup %8321  ;;  %v4264_v62 = vadd.f32 %v4263_v57, %v9871_v20 }
0x1c5f   : > { %v4118_v16 = vadd.f32 1.0, %v8322_v14  ;;  %v7609_v27 = vpop.f32.mrf.mxu1  ;;  %v8324_v38 = vpop.eup %8323 }
0x1c60   : > { %v6937_v28 = vmul.f32 -1.442695, %v4264_v62 }
0x1c61   : > { %8325 = vrcp.f32 %v4118_v16  ;;  %v4266_v6 = vpop.f32.mrf.mxu1 }
0x1c62   : > { %8327 = vpow2.f32 %v6937_v28 }
0x1c63   : > { %v7610_v59 = vpop.f32.mrf.mxu1  ;;  %8329 = vtanh.f32 %v4264_v62 }
0x1c6e   : > { %v8326_v8 = vpop.eup %8325 }
0x1c6f   : > { %v8328_v40 = vpop.eup %8327  ;;  %v4121_v41 = vsel %vm9875_vm14, %v8324_v38, %v8326_v8 }
0x1c70   : > { %v4273_v10 = vadd.f32 1.0, %v8328_v40  ;;  %4124 = vrot.lane.b32.xlu0 %v4121_v41, %s8621_s29  ;;  %v8330_v39 = vpop.eup %8329  ;;  %v4122_v36 = vmul.f32 %v4121_v41, %v9962_v19 }
0x1c72   : > { %8331 = vrcp.f32 %v4273_v10 }
0x1c7f   : > { %v8332_v18 = vpop.eup %8331 }
0x1c80   : > { %v4276_v15 = vsel %vm9875_vm14, %v8330_v39, %v8332_v18 }
0x1c81   : > { %4279 = vrot.lane.b32.xlu0 %v4276_v15, %s8621_s29  ;;  %v4277_v60 = vmul.f32 %v4276_v15, %v9968_v50 }
0x1ccd   : > { %v3971_v3 = vpop.permute.xlu0 %3970 }
0x1cce   : > { %v3973_v32 = vmul.f32 %v3971_v3, %v3967_v5 }
0x1cd0   : > { %3975 = vrot.lane.b32.xlu0 %v3973_v32, %s8624_s22 }
0x1ce2   : > { %v4125_v37 = vpop.permute.xlu0 %4124 }
0x1ce3   : > { %v4127_v35 = vmul.f32 %v4125_v37, %v4121_v41 }
0x1ce5   : > { %4129 = vrot.lane.b32.xlu1 %v4127_v35, %s8624_s22 }
0x1cf3   : > { %v4280_v21 = vpop.permute.xlu0 %4279 }
0x1cf4   : > { %v4282_v0 = vmul.f32 %v4280_v21, %v4276_v15 }
0x1cf6   : > { %4284 = vrot.lane.b32.xlu0 %v4282_v0, %s8624_s22 }
0x1d42   : > { %v3976_v58 = vpop.permute.xlu0 %3975 }
0x1d43   : > { %v10075_v25 = vadd.f32 %v3976_v58, %v3968_v2 }
0x1d45   : > { %8333 = vtanh.f32 %v10075_v25 }
0x1d52   : > { %v8334_v31 = vpop.eup %8333 }
0x1d53   : > { %3981 = vrot.lane.b32.xlu1 %v8334_v31, %s8621_s29 }
0x1d57   : > { %v4130_v24 = vpop.permute.xlu1 %4129 }
0x1d58   : > { %v10080_v53 = vadd.f32 %v4130_v24, %v4122_v36 }
0x1d5a   : > { %8335 = vtanh.f32 %v10080_v53 }
0x1d67   : > { %v8336_v4 = vpop.eup %8335 }
0x1d68   : > { %4135 = vrot.lane.b32.xlu0 %v8336_v4, %s8621_s29  ;;  %v4285_v33 = vpop.permute.xlu0 %4284 }
0x1d69   : > { %v10085_v23 = vadd.f32 %v4285_v33, %v4277_v60 }
0x1d6b   : > { %8337 = vtanh.f32 %v10085_v23 }
0x1d78   : > { %v8338_v56 = vpop.eup %8337 }
0x1d79   : > { %4290 = vrot.lane.b32.xlu1 %v8338_v56, %s8621_s29 }
0x1dc5   : > { %v3982_v48 = vpop.permute.xlu1 %3981 }
0x1dc6   : > { %v3984_v19 = vmul.f32 %v3982_v48, %v3967_v5 }
0x1dc8   : > { %4144 = vrot.lane.b32.xlu1 %v3984_v19, %s8621_s29 }
0x1dda   : > { %v4136_v63 = vpop.permute.xlu0 %4135 }
0x1ddb   : > { %v4138_v51 = vmul.f32 %v4136_v63, %v4121_v41 }
0x1ddd   : > { %4298 = vrot.lane.b32.xlu1 %v4138_v51, %s8621_s29  ;;  %4140 = vrot.lane.b32.xlu0 %v4138_v51, %s8624_s22 }
0x1deb   : > { %v4291_v50 = vpop.permute.xlu1 %4290 }
0x1dec   : > { %v4293_v17 = vmul.f32 %v4291_v50, %v4276_v15 }
0x1dee   : > { %4295 = vrot.lane.b32.xlu0 %v4293_v17, %s8624_s22  ;;  %v4449_v46 = vrot.slane %v4293_v17, 7 }
0x1df2   : > { %4450 = vrot.lane.b32.xlu0 %v4449_v46, %s8621_s29 }
0x1e3a   : > { %v4145_v61 = vpop.permute.xlu1 %4144 }
0x1e4f   : > { %v4141_v11 = vpop.permute.xlu0 %4140  ;;  %v4299_v14 = vpop.permute.xlu1 %4298 }
0x1e50   : > { %v4147_v57 = vsel %vm1313_vm12, %v4141_v11, %v4145_v61 }
0x1e51   : > { %v4148_v5 = vpack.c.bf16 %v4147_v57, %v4147_v57 }
0x1e53   : > { %7596 = vmatmul.mubr.msk.bf16.vlgmr.msra.gmra.mxu0 %vm708_vm1, %v4148_v5 }
0x1e54   : > { %7612 = vmatpush3.bf16.msra.mxu0 %v9893_v45  ;;  %7619 = vmatprep.mubr.msk.bf16.mxu0 %vm8618_vm0, %v8617_v1 }
0x1e55   : > { %7613 = vmatprep.subr.bf16.mxu0 %v8617_v1 }
0x1e58   : > { %7614 = vmatpush3.bf16.msra.mxu0 %v9899_v42 }
0x1e59   : > { %7615 = vmatprep.subr.bf16.mxu0 %v8617_v1 }
0x1e5c   : > { %7616 = vmatpush3.bf16.msra.mxu0 %v9908_v43 }
0x1e5d   : > { %7617 = vmatprep.subr.bf16.mxu0 %v8617_v1 }
0x1e60   : > { %7618 = vmatpush3.bf16.msra.mxu0 %v9915_v49  ;;  %v4296_v62 = vpop.permute.xlu0 %4295 }
0x1e61   : > { %v4301_v16 = vsel %vm1313_vm12, %v4296_v62, %v4299_v14  ;;  %7635 = vmatprep.subr.bf16.mxu0 %v8617_v1 }
0x1e62   : > { %v4302_v27 = vpack.c.bf16 %v4301_v16, %v4301_v16 }
0x1e64   : > { %7620 = vmatmul.mubr.msk.bf16.vlgmr.msra.gmra.mxu0 %vm708_vm1, %v4302_v27  ;;  %v4451_v28 = vpop.permute.xlu0 %4450 }
0x1e65   : > { %7636 = vmatpush3.bf16.msra.mxu0 %v9821_v30  ;;  %7643 = vmatprep.mubr.msk.bf16.mxu0 %vm8618_vm0, %v8617_v1  ;;  %v4453_v6 = vsel %vm1313_vm12, %v9859_v34, %v4451_v28 }
0x1e66   : > { %7637 = vmatprep.subr.bf16.mxu0 %v8617_v1  ;;  %v4454_v59 = vpack.c.bf16 %v4453_v6, %v4453_v6 }
0x1e68   : > { %v4456_v38 = vshrl.u32 %v4454_v59, 16 }
0x1e69   : > { %7638 = vmatpush3.bf16.msra.mxu0 %v9827_v12 }
0x1e6a   : > { %7639 = vmatprep.subr.bf16.mxu0 %v8617_v1 }
0x1e6d   : > { %7640 = vmatpush3.bf16.msra.mxu0 %v9834_v7 }
0x1e6e   : > { %7641 = vmatprep.subr.bf16.mxu0 %v8617_v1 }
0x1e71   : > { %7642 = vmatpush3.bf16.msra.mxu0 %v9841_v9 }
0x1e72   : > { %7659 = vmatprep.subr.bf16.mxu0 %v8617_v1 }
0x1e74   : > { %7644 = vmatmul.mubr.msk.bf16.vlgmr.msra.gmra.mxu0 %vm708_vm1, %v4456_v38 }
0x1e75   : > { %7660 = vmatpush3.bf16.msra.mxu0 %v9979_v22  ;;  %7667 = vmatprep.mubr.msk.bf16.mxu0 %vm8618_vm0, %v8617_v1 }
0x1e76   : > { %7661 = vmatprep.subr.bf16.mxu0 %v8617_v1 }
0x1e79   : > { %7662 = vmatpush3.bf16.msra.mxu0 %v9985_v47 }
0x1e7a   : > { %7663 = vmatprep.subr.bf16.mxu0 %v8617_v1 }
0x1e7d   : > { %7664 = vmatpush3.bf16.msra.mxu0 %v9994_v52 }
0x1e7e   : > { %7665 = vmatprep.subr.bf16.mxu0 %v8617_v1 }
0x1e81   : > { %7666 = vmatpush3.bf16.msra.mxu0 %v10006_v13 }
0x1e82   : > { %7683 = vmatprep.subr.bf16.mxu0 %v8617_v1 }
0x1f13   : > { %v4186_v8 = vpop.f32.mrf.mxu0 }
0x1f14   : > { %v4187_v40 = vadd.f32 %v10058_v26, %v4186_v8 }
0x1f15   : > { %v7597_v41 = vpop.f32.mrf.mxu0 }
0x1f16   : > { %v6935_v10 = vmul.f32 -1.442695, %v4187_v40 }
0x1f17   : > { %v4189_v39 = vpop.f32.mrf.mxu0 }
0x1f18   : > { %8339 = vpow2.f32 %v6935_v10 }
0x1f19   : > { %v7598_v18 = vpop.f32.mrf.mxu0  ;;  %8341 = vtanh.f32 %v4187_v40 }
0x1f24   : > { %v4340_v15 = vpop.f32.mrf.mxu0 }
0x1f25   : > { %v8340_v3 = vpop.eup %8339  ;;  %v4341_v32 = vadd.f32 %v9948_v29, %v4340_v15 }
0x1f26   : > { %v4196_v37 = vadd.f32 1.0, %v8340_v3  ;;  %v7621_v35 = vpop.f32.mrf.mxu0  ;;  %v8342_v58 = vpop.eup %8341 }
0x1f27   : > { %v6939_v21 = vmul.f32 -1.442695, %v4341_v32 }
0x1f28   : > { %8343 = vrcp.f32 %v4196_v37  ;;  %v4343_v0 = vpop.f32.mrf.mxu0 }
0x1f29   : > { %8345 = vpow2.f32 %v6939_v21 }
0x1f2a   : > { %v7622_v2 = vpop.f32.mrf.mxu0  ;;  %8347 = vtanh.f32 %v4341_v32 }
0x1f34   : > { %v4495_v31 = vpop.f32.mrf.mxu0 }
0x1f35   : > { %v8344_v36 = vpop.eup %8343  ;;  %v4496_v24 = vadd.f32 %v4495_v31, %v9871_v20 }
0x1f36   : > { %v8346_v4 = vpop.eup %8345  ;;  %v4199_v60 = vsel %vm9875_vm14, %v8342_v58, %v8344_v36  ;;  %v7645_v33 = vpop.f32.mrf.mxu0 }
0x1f37   : > { %v4350_v56 = vadd.f32 1.0, %v8346_v4  ;;  %v6943_v48 = vmul.f32 -1.442695, %v4496_v24  ;;  %4202 = vrot.lane.b32.xlu1 %v4199_v60, %s8621_s29  ;;  %v8348_v51 = vpop.eup %8347  ;;  %v4200_v59 = vmul.f32 %v4199_v60, %v10075_v25 }
0x1f38   : > { %v4498_v19 = vpop.f32.mrf.mxu0 }
0x1f39   : > { %8349 = vrcp.f32 %v4350_v56 }
0x1f3a   : > { %8351 = vpow2.f32 %v6943_v48  ;;  %v7646_v63 = vpop.f32.mrf.mxu0 }
0x1f3b   : > { %8353 = vtanh.f32 %v4496_v24 }
0x1f46   : > { %v8350_v50 = vpop.eup %8349 }
0x1f47   : > { %v8352_v17 = vpop.eup %8351  ;;  %v4353_v46 = vsel %vm9875_vm14, %v8348_v51, %v8350_v50 }
0x1f48   : > { %v4505_v61 = vadd.f32 1.0, %v8352_v17  ;;  %4356 = vrot.lane.b32.xlu0 %v4353_v46, %s8621_s29  ;;  %v8354_v11 = vpop.eup %8353  ;;  %v4354_v41 = vmul.f32 %v4353_v46, %v10080_v53 }
0x1f4a   : > { %8355 = vrcp.f32 %v4505_v61 }
0x1f57   : > { %v8356_v57 = vpop.eup %8355 }
0x1f58   : > { %v4508_v5 = vsel %vm9875_vm14, %v8354_v11, %v8356_v57 }
0x1f59   : > { %4511 = vrot.lane.b32.xlu1 %v4508_v5, %s8621_s29  ;;  %v4509_v15 = vmul.f32 %v4508_v5, %v10085_v23 }
0x1fa9   : > { %v4203_v14 = vpop.permute.xlu1 %4202 }
0x1faa   : > { %v4205_v62 = vmul.f32 %v4203_v14, %v4199_v60 }
0x1fac   : > { %4207 = vrot.lane.b32.xlu0 %v4205_v62, %s8624_s22 }
0x1fba   : > { %v4357_v16 = vpop.permute.xlu0 %4356 }
0x1fbb   : > { %v4359_v27 = vmul.f32 %v4357_v16, %v4353_v46 }
0x1fbd   : > { %4361 = vrot.lane.b32.xlu1 %v4359_v27, %s8624_s22 }
0x1fcb   : > { %v4512_v28 = vpop.permute.xlu1 %4511 }
0x1fcc   : > { %v4514_v6 = vmul.f32 %v4512_v28, %v4508_v5 }
0x1fce   : > { %4516 = vrot.lane.b32.xlu0 %v4514_v6, %s8624_s22 }
0x201e   : > { %v4208_v38 = vpop.permute.xlu0 %4207 }
0x201f   : > { %v10147_v8 = vadd.f32 %v4208_v38, %v4200_v59 }
0x2021   : > { %8357 = vtanh.f32 %v10147_v8 }
0x202e   : > { %v8358_v40 = vpop.eup %8357 }
0x202f   : > { %4213 = vrot.lane.b32.xlu1 %v8358_v40, %s8621_s29  ;;  %v4362_v10 = vpop.permute.xlu1 %4361 }
0x2030   : > { %v10152_v39 = vadd.f32 %v4362_v10, %v4354_v41 }
0x2032   : > { %8359 = vtanh.f32 %v10152_v39 }
0x203f   : > { %v8360_v18 = vpop.eup %8359 }
0x2040   : > { %v4517_v3 = vpop.permute.xlu0 %4516  ;;  %4367 = vrot.lane.b32.xlu0 %v8360_v18, %s8621_s29 }
0x2041   : > { %v10157_v25 = vadd.f32 %v4517_v3, %v4509_v15 }
0x2043   : > { %8361 = vtanh.f32 %v10157_v25 }
0x2050   : > { %v8362_v32 = vpop.eup %8361 }
0x2051   : > { %4522 = vrot.lane.b32.xlu1 %v8362_v32, %s8621_s29 }
0x20a1   : > { %v4214_v53 = vpop.permute.xlu1 %4213 }
0x20a2   : > { %v4216_v37 = vmul.f32 %v4214_v53, %v4199_v60 }
0x20a4   : > { %4376 = vrot.lane.b32.xlu1 %v4216_v37, %s8621_s29 }
0x20b2   : > { %v4368_v35 = vpop.permute.xlu0 %4367 }
0x20b3   : > { %v4370_v21 = vmul.f32 %v4368_v35, %v4353_v46 }
0x20b5   : > { %4372 = vrot.lane.b32.xlu0 %v4370_v21, %s8624_s22  ;;  %4530 = vrot.lane.b32.xlu1 %v4370_v21, %s8621_s29 }
0x20c3   : > { %v4523_v23 = vpop.permute.xlu1 %4522 }
0x20c4   : > { %v4525_v0 = vmul.f32 %v4523_v23, %v4508_v5 }
0x20c6   : > { %4527 = vrot.lane.b32.xlu0 %v4525_v0, %s8624_s22  ;;  %v4681_v2 = vrot.slane %v4525_v0, 7 }
0x20ca   : > { %4682 = vrot.lane.b32.xlu0 %v4681_v2, %s8621_s29 }
0x2116   : > { %v4377_v58 = vpop.permute.xlu1 %4376 }
0x2127   : > { %v4373_v31 = vpop.permute.xlu0 %4372  ;;  %v4531_v4 = vpop.permute.xlu1 %4530 }
0x2128   : > { %v4379_v36 = vsel %vm1313_vm12, %v4373_v31, %v4377_v58 }
0x2129   : > { %v4380_v24 = vpack.c.bf16 %v4379_v36, %v4379_v36 }
0x212b   : > { %7632 = vmatmul.mubr.msk.bf16.vlgmr.msra.gmra.mxu1 %vm708_vm1, %v4380_v24 }
0x212c   : > { %7648 = vmatpush3.bf16.msra.mxu1 %v9893_v45  ;;  %7655 = vmatprep.mubr.msk.bf16.mxu1 %vm8618_vm0, %v8617_v1 }
0x212d   : > { %7649 = vmatprep.subr.bf16.mxu1 %v8617_v1 }
0x2130   : > { %7650 = vmatpush3.bf16.msra.mxu1 %v9899_v42 }
0x2131   : > { %7651 = vmatprep.subr.bf16.mxu1 %v8617_v1 }
0x2134   : > { %7652 = vmatpush3.bf16.msra.mxu1 %v9908_v43 }
0x2135   : > { %7653 = vmatprep.subr.bf16.mxu1 %v8617_v1 }
0x2138   : > { %v4528_v60 = vpop.permute.xlu0 %4527  ;;  %7654 = vmatpush3.bf16.msra.mxu1 %v9915_v49 }
0x2139   : > { %v4533_v33 = vsel %vm1313_vm12, %v4528_v60, %v4531_v4  ;;  %7671 = vmatprep.subr.bf16.mxu1 %v8617_v1 }
0x213a   : > { %v4534_v45 = vpack.c.bf16 %v4533_v33, %v4533_v33 }
0x213c   : > { %7656 = vmatmul.mubr.msk.bf16.vlgmr.msra.gmra.mxu1 %vm708_vm1, %v4534_v45  ;;  %v4683_v42 = vpop.permute.xlu0 %4682 }
0x213d   : > { %7672 = vmatpush3.bf16.msra.mxu1 %v9821_v30  ;;  %7679 = vmatprep.mubr.msk.bf16.mxu1 %vm8618_vm0, %v8617_v1  ;;  %v4685_v43 = vsel %vm1313_vm12, %v9931_v44, %v4683_v42 }
0x213e   : > { %7673 = vmatprep.subr.bf16.mxu1 %v8617_v1  ;;  %v4686_v49 = vpack.c.bf16 %v4685_v43, %v4685_v43 }
0x2140   : > { %v4688_v30 = vshrl.u32 %v4686_v49, 16 }
0x2141   : > { %7674 = vmatpush3.bf16.msra.mxu1 %v9827_v12 }
0x2142   : > { %7675 = vmatprep.subr.bf16.mxu1 %v8617_v1 }
0x2145   : > { %7676 = vmatpush3.bf16.msra.mxu1 %v9834_v7 }
0x2146   : > { %7677 = vmatprep.subr.bf16.mxu1 %v8617_v1 }
0x2149   : > { %7678 = vmatpush3.bf16.msra.mxu1 %v9841_v9 }
0x214a   : > { %7695 = vmatprep.subr.bf16.mxu1 %v8617_v1 }
0x214c   : > { %7680 = vmatmul.mubr.msk.bf16.vlgmr.msra.gmra.mxu1 %vm708_vm1, %v4688_v30 }
0x214d   : > { %7696 = vmatpush3.bf16.msra.mxu1 %v9979_v22  ;;  %7703 = vmatprep.mubr.msk.bf16.mxu1 %vm8618_vm0, %v8617_v1 }
0x214e   : > { %7697 = vmatprep.subr.bf16.mxu1 %v8617_v1 }
0x2151   : > { %7698 = vmatpush3.bf16.msra.mxu1 %v9985_v47 }
0x2152   : > { %7699 = vmatprep.subr.bf16.mxu1 %v8617_v1 }
0x2155   : > { %7700 = vmatpush3.bf16.msra.mxu1 %v9994_v52 }
0x2156   : > { %7701 = vmatprep.subr.bf16.mxu1 %v8617_v1 }
0x2159   : > { %7702 = vmatpush3.bf16.msra.mxu1 %v10006_v13 }
0x215a   : > { %7719 = vmatprep.subr.bf16.mxu1 %v8617_v1 }
0x21eb   : > { %v4418_v12 = vpop.f32.mrf.mxu1 }
0x21ec   : > { %v4419_v7 = vadd.f32 %v10058_v26, %v4418_v12 }
0x21ed   : > { %v7633_v9 = vpop.f32.mrf.mxu1 }
0x21ee   : > { %v6941_v56 = vmul.f32 -1.442695, %v4419_v7 }
0x21ef   : > { %v4421_v48 = vpop.f32.mrf.mxu1 }
0x21f0   : > { %8363 = vpow2.f32 %v6941_v56 }
0x21f1   : > { %v7634_v19 = vpop.f32.mrf.mxu1  ;;  %8365 = vtanh.f32 %v4419_v7 }
0x21fc   : > { %v4572_v63 = vpop.f32.mrf.mxu1 }
0x21fd   : > { %v8364_v51 = vpop.eup %8363  ;;  %v4573_v50 = vadd.f32 %v9948_v29, %v4572_v63 }
0x21fe   : > { %v4428_v17 = vadd.f32 1.0, %v8364_v51  ;;  %v7657_v46 = vpop.f32.mrf.mxu1  ;;  %v8366_v5 = vpop.eup %8365 }
0x21ff   : > { %v6945_v61 = vmul.f32 -1.442695, %v4573_v50  ;;  %v10259_v46 = vld [vmem:[%s10956_s12 + $0x28] sm:$0xff]  }
0x2200   : > { %8367 = vrcp.f32 %v4428_v17  ;;  %v4575_v11 = vpop.f32.mrf.mxu1  ;;  %v10252_v17 = vld [vmem:[%s10956_s12 + $0x30] sm:$0xff]  }
0x2201   : > { %8369 = vpow2.f32 %v6945_v61 }
0x2202   : > { %v7658_v57 = vpop.f32.mrf.mxu1  ;;  %8371 = vtanh.f32 %v4573_v50  ;;  %v10243_v50 = vld [vmem:[%s10956_s12 + $0x38] sm:$0xff]  }
0x2203   : > { %v10266_v57 = vld [vmem:[%s10956_s12 + $0x20] sm:$0xff]  }
0x220c   : > { %v4727_v14 = vpop.f32.mrf.mxu1 }
0x220d   : > { %v8368_v62 = vpop.eup %8367  ;;  %v4728_v16 = vadd.f32 %v4727_v14, %v9871_v20 }
0x220e   : > { %v8370_v27 = vpop.eup %8369  ;;  %v7681_v28 = vpop.f32.mrf.mxu1  ;;  %v4431_v6 = vsel %vm9875_vm14, %v8366_v5, %v8368_v62  ;;  %v10275_v62 = vld [vmem:[%s10956_s12 + $0x18] sm:$0xff]  }
0x220f   : > { %v4582_v59 = vadd.f32 1.0, %v8370_v27  ;;  %v6949_v29 = vmul.f32 -1.442695, %v4728_v16  ;;  %4434 = vrot.lane.b32.xlu1 %v4431_v6, %s8621_s29  ;;  %v8372_v41 = vpop.eup %8371  ;;  %v4432_v58 = vmul.f32 %v4431_v6, %v10147_v8  ;;  %v10284_v27 = vld [vmem:[%s10956_s12 + $0x10] sm:$0xff]  }
0x2210   : > { %v4730_v38 = vpop.f32.mrf.mxu1 }
0x2211   : > { %8373 = vrcp.f32 %v4582_v59 }
0x2212   : > { %8375 = vpow2.f32 %v6949_v29  ;;  %v7682_v40 = vpop.f32.mrf.mxu1  ;;  %v10300_v29 = vld [vmem:[%s10956_s12] sm:$0xff]  }
0x2213   : > { %8377 = vtanh.f32 %v4728_v16 }
0x221e   : > { %v8374_v10 = vpop.eup %8373 }
0x221f   : > { %v8376_v18 = vpop.eup %8375  ;;  %v4585_v20 = vsel %vm9875_vm14, %v8372_v41, %v8374_v10 }
0x2220   : > { %v4737_v15 = vadd.f32 1.0, %v8376_v18  ;;  %4588 = vrot.lane.b32.xlu0 %v4585_v20, %s8621_s29  ;;  %v8378_v3 = vpop.eup %8377  ;;  %v4586_v4 = vmul.f32 %v4585_v20, %v10152_v39 }
0x2222   : > { %8379 = vrcp.f32 %v4737_v15 }
0x222f   : > { %v8380_v32 = vpop.eup %8379 }
0x2230   : > { %v4740_v53 = vsel %vm9875_vm14, %v8378_v3, %v8380_v32 }
0x2231   : > { %4743 = vrot.lane.b32.xlu1 %v4740_v53, %s8621_s29  ;;  %v4741_v42 = vmul.f32 %v4740_v53, %v10157_v25 }
0x2281   : > { %v4435_v37 = vpop.permute.xlu1 %4434 }
0x2282   : > { %v4437_v35 = vmul.f32 %v4435_v37, %v4431_v6 }
0x2284   : > { %4439 = vrot.lane.b32.xlu0 %v4437_v35, %s8624_s22 }
0x2292   : > { %v4589_v21 = vpop.permute.xlu0 %4588 }
0x2293   : > { %v4591_v23 = vmul.f32 %v4589_v21, %v4585_v20 }
0x2295   : > { %4593 = vrot.lane.b32.xlu1 %v4591_v23, %s8624_s22 }
0x22a3   : > { %v4744_v0 = vpop.permute.xlu1 %4743 }
0x22a4   : > { %v4746_v2 = vmul.f32 %v4744_v0, %v4740_v53 }
0x22a6   : > { %4748 = vrot.lane.b32.xlu0 %v4746_v2, %s8624_s22  ;;  %v10325_v2 = vld [vmem:[%s10957_s13] sm:$0x1] }
0x22f6   : > { %v4440_v31 = vpop.permute.xlu0 %4439 }
0x22f7   : > { %v10219_v36 = vadd.f32 %v4440_v31, %v4432_v58 }
0x22f9   : > { %8381 = vtanh.f32 %v10219_v36 }
0x2306   : > { %v8382_v24 = vpop.eup %8381 }
0x2307   : > { %v4594_v60 = vpop.permute.xlu1 %4593  ;;  %4445 = vrot.lane.b32.xlu1 %v8382_v24, %s8621_s29 }
0x2308   : > { %v10224_v33 = vadd.f32 %v4594_v60, %v4586_v4 }
0x230a   : > { %8383 = vtanh.f32 %v10224_v33 }
0x2317   : > { %v8384_v45 = vpop.eup %8383 }
0x2318   : > { %v4749_v43 = vpop.permute.xlu0 %4748  ;;  %4599 = vrot.lane.b32.xlu0 %v8384_v45, %s8621_s29 }
0x2319   : > { %v10229_v8 = vadd.f32 %v4749_v43, %v4741_v42 }
0x231b   : > { %8385 = vtanh.f32 %v10229_v8 }
0x2328   : > { %v8386_v49 = vpop.eup %8385 }
0x2329   : > { %4754 = vrot.lane.b32.xlu1 %v8386_v49, %s8621_s29 }
0x2379   : > { %v4446_v39 = vpop.permute.xlu1 %4445 }
0x237a   : > { %v4448_v30 = vmul.f32 %v4446_v39, %v4431_v6  ;;  %v10293_v6 = vld [vmem:[%s10956_s12 + $0x8] sm:$0xff]  }
0x237c   : > { %4608 = vrot.lane.b32.xlu1 %v4448_v30, %s8621_s29 }
0x238a   : > { %v4600_v12 = vpop.permute.xlu0 %4599 }
0x238b   : > { %v4602_v7 = vmul.f32 %v4600_v12, %v4585_v20 }
0x238d   : > { %4604 = vrot.lane.b32.xlu0 %v4602_v7, %s8624_s22  ;;  %4762 = vrot.lane.b32.xlu1 %v4602_v7, %s8621_s29 }
0x239b   : > { %v4755_v25 = vpop.permute.xlu1 %4754 }
0x239c   : > { %v4757_v9 = vmul.f32 %v4755_v25, %v4740_v53 }
0x239e   : > { %4759 = vrot.lane.b32.xlu0 %v4757_v9, %s8624_s22  ;;  %v4913_v56 = vrot.slane %v4757_v9, 7 }
0x23a2   : > { %4914 = vrot.lane.b32.xlu0 %v4913_v56, %s8621_s29 }
0x23ee   : > { %v4609_v48 = vpop.permute.xlu1 %4608 }
0x23ff   : > { %v4605_v19 = vpop.permute.xlu0 %4604  ;;  %v4763_v61 = vpop.permute.xlu1 %4762 }
0x2400   : > { %v4611_v63 = vsel %vm1313_vm12, %v4605_v19, %v4609_v48 }
0x2401   : > { %v4612_v51 = vpack.c.bf16 %v4611_v63, %v4611_v63 }
0x2403   : > { %7668 = vmatmul.mubr.msk.bf16.vlgmr.msra.gmra.mxu0 %vm708_vm1, %v4612_v51 }
0x2404   : > { %7684 = vmatpush3.bf16.msra.mxu0 %v10243_v50  ;;  %7691 = vmatprep.mubr.msk.bf16.mxu0 %vm8618_vm0, %v8617_v1 }
0x2405   : > { %7685 = vmatprep.subr.bf16.mxu0 %v8617_v1 }
0x2408   : > { %7686 = vmatpush3.bf16.msra.mxu0 %v10252_v17 }
0x2409   : > { %7687 = vmatprep.subr.bf16.mxu0 %v8617_v1 }
0x240c   : > { %7688 = vmatpush3.bf16.msra.mxu0 %v10259_v46 }
0x240d   : > { %7689 = vmatprep.subr.bf16.mxu0 %v8617_v1 }
0x2410   : > { %v4760_v11 = vpop.permute.xlu0 %4759  ;;  %7690 = vmatpush3.bf16.msra.mxu0 %v10266_v57 }
0x2411   : > { %v4765_v5 = vsel %vm1313_vm12, %v4760_v11, %v4763_v61  ;;  %7707 = vmatprep.subr.bf16.mxu0 %v8617_v1 }
0x2412   : > { %v4766_v14 = vpack.c.bf16 %v4765_v5, %v4765_v5 }
0x2414   : > { %7692 = vmatmul.mubr.msk.bf16.vlgmr.msra.gmra.mxu0 %vm708_vm1, %v4766_v14  ;;  %v4915_v16 = vpop.permute.xlu0 %4914 }
0x2415   : > { %7708 = vmatpush3.bf16.msra.mxu0 %v10275_v62  ;;  %7715 = vmatprep.mubr.msk.bf16.mxu0 %vm8618_vm0, %v8617_v1  ;;  %v4917_v28 = vsel %vm1313_vm12, %v10038_v54, %v4915_v16 }
0x2416   : > { %7709 = vmatprep.subr.bf16.mxu0 %v8617_v1  ;;  %v4918_v59 = vpack.c.bf16 %v4917_v28, %v4917_v28 }
0x2418   : > { %v4920_v38 = vshrl.u32 %v4918_v59, 16 }
0x2419   : > { %7710 = vmatpush3.bf16.msra.mxu0 %v10284_v27 }
0x241a   : > { %7711 = vmatprep.subr.bf16.mxu0 %v8617_v1 }
0x241d   : > { %7712 = vmatpush3.bf16.msra.mxu0 %v10293_v6 }
0x241e   : > { %7713 = vmatprep.subr.bf16.mxu0 %v8617_v1 }
0x2421   : > { %7714 = vmatpush3.bf16.msra.mxu0 %v10300_v29 }
0x2422   : > { %7731 = vmatprep.subr.bf16.mxu0 %v8617_v1 }
0x2424   : > { %7716 = vmatmul.mubr.msk.bf16.vlgmr.msra.gmra.mxu0 %vm708_vm1, %v4920_v38 }
0x2425   : > { %7732 = vmatpush3.bf16.msra.mxu0 %v9979_v22  ;;  %7739 = vmatprep.mubr.msk.bf16.mxu0 %vm8618_vm0, %v8617_v1 }
0x2426   : > { %7733 = vmatprep.subr.bf16.mxu0 %v8617_v1 }
0x2429   : > { %7734 = vmatpush3.bf16.msra.mxu0 %v9985_v47 }
0x242a   : > { %7735 = vmatprep.subr.bf16.mxu0 %v8617_v1 }
0x242d   : > { %7736 = vmatpush3.bf16.msra.mxu0 %v9994_v52  ;;  %v10319_v52 = vld [vmem:[%s10957_s13 + $0x1] sm:$0x1] }
0x242e   : > { %7737 = vmatprep.subr.bf16.mxu0 %v8617_v1 }
0x2431   : > { %7738 = vmatpush3.bf16.msra.mxu0 %v10006_v13 }
0x2432   : > { %7755 = vmatprep.subr.bf16.mxu0 %v8617_v1 }
0x24c3   : > { %v4650_v40 = vpop.f32.mrf.mxu0 }
0x24c4   : > { %v4651_v22 = vadd.f32 %v10058_v26, %v4650_v40 }
0x24c5   : > { %v7669_v41 = vpop.f32.mrf.mxu0 }
0x24c6   : > { %v6947_v10 = vmul.f32 -1.442695, %v4651_v22 }
0x24c7   : > { %v4653_v18 = vpop.f32.mrf.mxu0 }
0x24c8   : > { %8387 = vpow2.f32 %v6947_v10 }
0x24c9   : > { %v7670_v20 = vpop.f32.mrf.mxu0  ;;  %8389 = vtanh.f32 %v4651_v22 }
0x24d4   : > { %v4804_v15 = vpop.f32.mrf.mxu0 }
0x24d5   : > { %v8388_v47 = vpop.eup %8387  ;;  %v4805_v3 = vadd.f32 %v10319_v52, %v4804_v15 }
0x24d6   : > { %v4660_v13 = vadd.f32 1.0, %v8388_v47  ;;  %v7693_v32 = vpop.f32.mrf.mxu0  ;;  %v8390_v21 = vpop.eup %8389 }
0x24d7   : > { %v6951_v53 = vmul.f32 -1.442695, %v4805_v3 }
0x24d8   : > { %8391 = vrcp.f32 %v4660_v13  ;;  %v4807_v37 = vpop.f32.mrf.mxu0 }
0x24d9   : > { %8393 = vpow2.f32 %v6951_v53 }
0x24da   : > { %v7694_v35 = vpop.f32.mrf.mxu0  ;;  %8395 = vtanh.f32 %v4805_v3 }
0x24e4   : > { %v4959_v23 = vpop.f32.mrf.mxu0 }
0x24e5   : > { %v8392_v0 = vpop.eup %8391  ;;  %v4960_v58 = vadd.f32 %v10325_v2, %v4959_v23 }
0x24e6   : > { %v8394_v31 = vpop.eup %8393  ;;  %v7717_v24 = vpop.f32.mrf.mxu0  ;;  %v4663_v4 = vsel %vm9875_vm14, %v8390_v21, %v8392_v0 }
0x24e7   : > { %v4814_v60 = vadd.f32 1.0, %v8394_v31  ;;  %v6955_v45 = vmul.f32 -1.442695, %v4960_v58  ;;  %4666 = vrot.lane.b32.xlu1 %v4663_v4, %s8621_s29  ;;  %v8396_v49 = vpop.eup %8395  ;;  %v4664_v5 = vmul.f32 %v4663_v4, %v10219_v36 }
0x24e8   : > { %v4962_v42 = vpop.f32.mrf.mxu0 }
0x24e9   : > { %8397 = vrcp.f32 %v4814_v60  ;;  %v10399_v42 = vld [vmem:[%s10956_s12 + $0x50] sm:$0xff]  }
0x24ea   : > { %8399 = vpow2.f32 %v6955_v45  ;;  %v7718_v43 = vpop.f32.mrf.mxu0  ;;  %v10390_v45 = vld [vmem:[%s10956_s12 + $0x58] sm:$0xff]  }
0x24eb   : > { %8401 = vtanh.f32 %v4960_v58  ;;  %v10406_v43 = vld [vmem:[%s10956_s12 + $0x48] sm:$0xff]  }
0x24f6   : > { %v8398_v39 = vpop.eup %8397 }
0x24f7   : > { %v8400_v30 = vpop.eup %8399  ;;  %v4817_v12 = vsel %vm9875_vm14, %v8396_v49, %v8398_v39  ;;  %v10413_v49 = vld [vmem:[%s10956_s12 + $0x40] sm:$0xff]  }
0x24f8   : > { %v4969_v7 = vadd.f32 1.0, %v8400_v30  ;;  %4820 = vrot.lane.b32.xlu0 %v4817_v12, %s8621_s29  ;;  %v8402_v25 = vpop.eup %8401  ;;  %v4818_v59 = vmul.f32 %v4817_v12, %v10224_v33 }
0x24fa   : > { %8403 = vrcp.f32 %v4969_v7 }
0x2507   : > { %v8404_v9 = vpop.eup %8403 }
0x2508   : > { %v4972_v56 = vsel %vm9875_vm14, %v8402_v25, %v8404_v9 }
0x2509   : > { %4975 = vrot.lane.b32.xlu1 %v4972_v56, %s8621_s29  ;;  %v4973_v41 = vmul.f32 %v4972_v56, %v10229_v8 }
0x2559   : > { %v4667_v48 = vpop.permute.xlu1 %4666 }
0x255a   : > { %v4669_v19 = vmul.f32 %v4667_v48, %v4663_v4 }
0x255c   : > { %4671 = vrot.lane.b32.xlu0 %v4669_v19, %s8624_s22 }
0x256a   : > { %v4821_v63 = vpop.permute.xlu0 %4820 }
0x256b   : > { %v4823_v51 = vmul.f32 %v4821_v63, %v4817_v12 }
0x256d   : > { %4825 = vrot.lane.b32.xlu1 %v4823_v51, %s8624_s22 }
0x257b   : > { %v4976_v61 = vpop.permute.xlu1 %4975 }
0x257c   : > { %v4978_v11 = vmul.f32 %v4976_v61, %v4972_v56 }
0x257e   : > { %4980 = vrot.lane.b32.xlu0 %v4978_v11, %s8624_s22 }
0x25ce   : > { %v4672_v14 = vpop.permute.xlu0 %4671 }
0x25cf   : > { %v10341_v16 = vadd.f32 %v4672_v14, %v4664_v5 }
0x25d1   : > { %8405 = vtanh.f32 %v10341_v16 }
0x25de   : > { %v8406_v28 = vpop.eup %8405 }
0x25df   : > { %v4826_v38 = vpop.permute.xlu1 %4825  ;;  %4677 = vrot.lane.b32.xlu1 %v8406_v28, %s8621_s29 }
0x25e0   : > { %v10346_v40 = vadd.f32 %v4826_v38, %v4818_v59 }
0x25e2   : > { %8407 = vtanh.f32 %v10346_v40 }
0x25ef   : > { %v8408_v22 = vpop.eup %8407 }
0x25f0   : > { %v4981_v10 = vpop.permute.xlu0 %4980  ;;  %4831 = vrot.lane.b32.xlu0 %v8408_v22, %s8621_s29 }
0x25f1   : > { %v10351_v36 = vadd.f32 %v4981_v10, %v4973_v41 }
0x25f3   : > { %8409 = vtanh.f32 %v10351_v36 }
0x2600   : > { %v8410_v18 = vpop.eup %8409 }
0x2601   : > { %4986 = vrot.lane.b32.xlu1 %v8410_v18, %s8621_s29 }
0x2651   : > { %v4678_v33 = vpop.permute.xlu1 %4677 }
0x2652   : > { %v4680_v20 = vmul.f32 %v4678_v33, %v4663_v4 }
0x2654   : > { %4840 = vrot.lane.b32.xlu1 %v4680_v20, %s8621_s29 }
0x2662   : > { %v4832_v15 = vpop.permute.xlu0 %4831 }
0x2663   : > { %v4834_v47 = vmul.f32 %v4832_v15, %v4817_v12 }
0x2665   : > { %4836 = vrot.lane.b32.xlu0 %v4834_v47, %s8624_s22  ;;  %4994 = vrot.lane.b32.xlu1 %v4834_v47, %s8621_s29 }
0x2673   : > { %v4987_v8 = vpop.permute.xlu1 %4986 }
0x2674   : > { %v4989_v3 = vmul.f32 %v4987_v8, %v4972_v56 }
0x2676   : > { %4991 = vrot.lane.b32.xlu0 %v4989_v3, %s8624_s22  ;;  %v5145_v13 = vrot.slane %v4989_v3, 6 }
0x267a   : > { %5146 = vrot.lane.b32.xlu0 %v5145_v13, %s8621_s29 }
0x26c6   : > { %v4841_v32 = vpop.permute.xlu1 %4840 }
0x26d7   : > { %v4837_v53 = vpop.permute.xlu0 %4836  ;;  %v4995_v21 = vpop.permute.xlu1 %4994 }
0x26d8   : > { %v4843_v37 = vsel %vm1313_vm12, %v4837_v53, %v4841_v32 }
0x26d9   : > { %v4844_v35 = vpack.c.bf16 %v4843_v37, %v4843_v37 }
0x26db   : > { %7704 = vmatmul.mubr.msk.bf16.vlgmr.msra.gmra.mxu1 %vm708_vm1, %v4844_v35 }
0x26dc   : > { %7720 = vmatpush3.bf16.msra.mxu1 %v10243_v50  ;;  %7727 = vmatprep.mubr.msk.bf16.mxu1 %vm8618_vm0, %v8617_v1 }
0x26dd   : > { %7721 = vmatprep.subr.bf16.mxu1 %v8617_v1 }
0x26e0   : > { %7722 = vmatpush3.bf16.msra.mxu1 %v10252_v17 }
0x26e1   : > { %7723 = vmatprep.subr.bf16.mxu1 %v8617_v1 }
0x26e4   : > { %7724 = vmatpush3.bf16.msra.mxu1 %v10259_v46 }
0x26e5   : > { %7725 = vmatprep.subr.bf16.mxu1 %v8617_v1 }
0x26e8   : > { %v4992_v23 = vpop.permute.xlu0 %4991  ;;  %7726 = vmatpush3.bf16.msra.mxu1 %v10266_v57 }
0x26e9   : > { %v4997_v0 = vsel %vm1313_vm12, %v4992_v23, %v4995_v21  ;;  %7743 = vmatprep.subr.bf16.mxu1 %v8617_v1 }
0x26ea   : > { %v4998_v58 = vpack.c.bf16 %v4997_v0, %v4997_v0 }
0x26ec   : > { %7728 = vmatmul.mubr.msk.bf16.vlgmr.msra.gmra.mxu1 %vm708_vm1, %v4998_v58  ;;  %v5147_v31 = vpop.permute.xlu0 %5146 }
0x26ed   : > { %7744 = vmatpush3.bf16.msra.mxu1 %v10275_v62  ;;  %7751 = vmatprep.mubr.msk.bf16.mxu1 %vm8618_vm0, %v8617_v1  ;;  %v5149_v24 = vsel %vm1313_vm12, %v9859_v34, %v5147_v31 }
0x26ee   : > { %7745 = vmatprep.subr.bf16.mxu1 %v8617_v1  ;;  %v5150_v4 = vpack.c.bf16 %v5149_v24, %v5149_v24 }
0x26f0   : > { %v5152_v60 = vrot.slane %v5150_v4, 1 }
0x26f1   : > { %7746 = vmatpush3.bf16.msra.mxu1 %v10284_v27 }
0x26f2   : > { %7747 = vmatprep.subr.bf16.mxu1 %v8617_v1 }
0x26f5   : > { %7748 = vmatpush3.bf16.msra.mxu1 %v10293_v6 }
0x26f6   : > { %7749 = vmatprep.subr.bf16.mxu1 %v8617_v1 }
0x26f9   : > { %7750 = vmatpush3.bf16.msra.mxu1 %v10300_v29 }
0x26fa   : > { %7767 = vmatprep.subr.bf16.mxu1 %v8617_v1 }
0x26fc   : > { %7752 = vmatmul.mubr.msk.bf16.vlgmr.msra.gmra.mxu1 %vm708_vm1, %v5152_v60 }
0x26fd   : > { %7768 = vmatpush3.bf16.msra.mxu1 %v10390_v45  ;;  %7775 = vmatprep.mubr.msk.bf16.mxu1 %vm8618_vm0, %v8617_v1 }
0x26fe   : > { %7769 = vmatprep.subr.bf16.mxu1 %v8617_v1 }
0x2701   : > { %7770 = vmatpush3.bf16.msra.mxu1 %v10399_v42 }
0x2702   : > { %7771 = vmatprep.subr.bf16.mxu1 %v8617_v1 }
0x2705   : > { %7772 = vmatpush3.bf16.msra.mxu1 %v10406_v43 }
0x2706   : > { %7773 = vmatprep.subr.bf16.mxu1 %v8617_v1 }
0x2709   : > { %7774 = vmatpush3.bf16.msra.mxu1 %v10413_v49 }
0x270a   : > { %7791 = vmatprep.subr.bf16.mxu1 %v8617_v1 }
0x279b   : > { %v4882_v39 = vpop.f32.mrf.mxu1 }
0x279c   : > { %v4883_v30 = vadd.f32 %v10058_v26, %v4882_v39 }
0x279d   : > { %v7705_v12 = vpop.f32.mrf.mxu1 }
0x279e   : > { %v6953_v7 = vmul.f32 -1.442695, %v4883_v30 }
0x279f   : > { %v4885_v25 = vpop.f32.mrf.mxu1 }
0x27a0   : > { %8411 = vpow2.f32 %v6953_v7 }
0x27a1   : > { %v7706_v9 = vpop.f32.mrf.mxu1  ;;  %8413 = vtanh.f32 %v4883_v30 }
0x27ac   : > { %v5036_v56 = vpop.f32.mrf.mxu1 }
0x27ad   : > { %v8412_v48 = vpop.eup %8411  ;;  %v5037_v19 = vadd.f32 %v10319_v52, %v5036_v56 }
0x27ae   : > { %v4892_v63 = vadd.f32 1.0, %v8412_v48  ;;  %v7729_v51 = vpop.f32.mrf.mxu1  ;;  %v8414_v14 = vpop.eup %8413 }
0x27af   : > { %v6957_v61 = vmul.f32 -1.442695, %v5037_v19 }
0x27b0   : > { %8415 = vrcp.f32 %v4892_v63  ;;  %v5039_v11 = vpop.f32.mrf.mxu1 }
0x27b1   : > { %8417 = vpow2.f32 %v6957_v61 }
0x27b2   : > { %v7730_v5 = vpop.f32.mrf.mxu1  ;;  %8419 = vtanh.f32 %v5037_v19 }
0x27bc   : > { %v5190_v28 = vpop.f32.mrf.mxu1 }
0x27bd   : > { %v8416_v26 = vpop.eup %8415  ;;  %v5191_v59 = vadd.f32 %v10325_v2, %v5190_v28 }
0x27be   : > { %v8418_v38 = vpop.eup %8417  ;;  %v7753_v22 = vpop.f32.mrf.mxu1  ;;  %v4895_v41 = vsel %vm9875_vm14, %v8414_v14, %v8416_v26 }
0x27bf   : > { %v5046_v10 = vadd.f32 1.0, %v8418_v38  ;;  %v6961_v18 = vmul.f32 -1.442695, %v5191_v59  ;;  %4898 = vrot.lane.b32.xlu1 %v4895_v41, %s8621_s29  ;;  %v8420_v15 = vpop.eup %8419  ;;  %v4896_v24 = vmul.f32 %v4895_v41, %v10341_v16 }
0x27c0   : > { %v5193_v33 = vpop.f32.mrf.mxu1 }
0x27c1   : > { %8421 = vrcp.f32 %v5046_v10 }
0x27c2   : > { %8423 = vpow2.f32 %v6961_v18  ;;  %v7754_v20 = vpop.f32.mrf.mxu1 }
0x27c3   : > { %8425 = vtanh.f32 %v5191_v59 }
0x27ce   : > { %v8422_v47 = vpop.eup %8421 }
0x27cf   : > { %v8424_v8 = vpop.eup %8423  ;;  %v5049_v3 = vsel %vm9875_vm14, %v8420_v15, %v8422_v47  ;;  %v10492_v47 = vld [vmem:[%s10957_s13 + $0x2] sm:$0x1] }
0x27d0   : > { %v5200_v13 = vadd.f32 1.0, %v8424_v8  ;;  %5052 = vrot.lane.b32.xlu0 %v5049_v3, %s8621_s29  ;;  %v8426_v32 = vpop.eup %8425  ;;  %v5050_v30 = vmul.f32 %v5049_v3, %v10346_v40 }
0x27d2   : > { %8427 = vrcp.f32 %v5200_v13 }
0x27df   : > { %v8428_v53 = vpop.eup %8427 }
0x27e0   : > { %v5203_v37 = vsel %vm9875_vm14, %v8426_v32, %v8428_v53 }
0x27e1   : > { %5206 = vrot.lane.b32.xlu1 %v5203_v37, %s8621_s29  ;;  %v5204_v9 = vmul.f32 %v5203_v37, %v10351_v36 }
0x2831   : > { %v4899_v35 = vpop.permute.xlu1 %4898 }
0x2832   : > { %v4901_v21 = vmul.f32 %v4899_v35, %v4895_v41 }
0x2834   : > { %4903 = vrot.lane.b32.xlu0 %v4901_v21, %s8624_s22 }
0x2842   : > { %v5053_v23 = vpop.permute.xlu0 %5052 }
0x2843   : > { %v5055_v0 = vmul.f32 %v5053_v23, %v5049_v3 }
0x2845   : > { %5057 = vrot.lane.b32.xlu1 %v5055_v0, %s8624_s22 }
0x2853   : > { %v5207_v58 = vpop.permute.xlu1 %5206 }
0x2854   : > { %v5209_v31 = vmul.f32 %v5207_v58, %v5203_v37 }
0x2856   : > { %5211 = vrot.lane.b32.xlu0 %v5209_v31, %s8624_s22 }
0x28a6   : > { %v4904_v4 = vpop.permute.xlu0 %4903 }
0x28a7   : > { %v10433_v60 = vadd.f32 %v4904_v4, %v4896_v24 }
0x28a9   : > { %8429 = vtanh.f32 %v10433_v60 }
0x28b6   : > { %v8430_v39 = vpop.eup %8429 }
0x28b7   : > { %v5058_v12 = vpop.permute.xlu1 %5057  ;;  %4909 = vrot.lane.b32.xlu1 %v8430_v39, %s8621_s29 }
0x28b8   : > { %v10438_v7 = vadd.f32 %v5058_v12, %v5050_v30 }
0x28ba   : > { %8431 = vtanh.f32 %v10438_v7 }
0x28c7   : > { %v8432_v25 = vpop.eup %8431 }
0x28c8   : > { %v5212_v56 = vpop.permute.xlu0 %5211  ;;  %5063 = vrot.lane.b32.xlu0 %v8432_v25, %s8621_s29 }
0x28c9   : > { %v10443_v16 = vadd.f32 %v5212_v56, %v5204_v9 }
0x28cb   : > { %8433 = vtanh.f32 %v10443_v16 }
0x28d8   : > { %v8434_v48 = vpop.eup %8433 }
0x28d9   : > { %5217 = vrot.lane.b32.xlu1 %v8434_v48, %s8621_s29 }
0x2929   : > { %v4910_v40 = vpop.permute.xlu1 %4909 }
0x292a   : > { %v4912_v19 = vmul.f32 %v4910_v40, %v4895_v41 }
0x292c   : > { %5072 = vrot.lane.b32.xlu1 %v4912_v19, %s8621_s29 }
0x293a   : > { %v5064_v63 = vpop.permute.xlu0 %5063 }
0x293b   : > { %v5066_v51 = vmul.f32 %v5064_v63, %v5049_v3 }
0x293d   : > { %5068 = vrot.lane.b32.xlu0 %v5066_v51, %s8624_s22  ;;  %5225 = vrot.lane.b32.xlu1 %v5066_v51, %s8621_s29 }
0x294b   : > { %v5218_v36 = vpop.permute.xlu1 %5217 }
0x294c   : > { %v5220_v61 = vmul.f32 %v5218_v36, %v5203_v37 }
0x294e   : > { %5222 = vrot.lane.b32.xlu0 %v5220_v61, %s8624_s22  ;;  %v5376_v11 = vrot.slane %v5220_v61, 6 }
0x2952   : > { %5377 = vrot.lane.b32.xlu0 %v5376_v11, %s8621_s29 }
0x299e   : > { %v5073_v5 = vpop.permute.xlu1 %5072 }
0x29af   : > { %v5069_v14 = vpop.permute.xlu0 %5068  ;;  %v5226_v59 = vpop.permute.xlu1 %5225 }
0x29b0   : > { %v5075_v28 = vsel %vm1313_vm12, %v5069_v14, %v5073_v5 }
0x29b1   : > { %v5076_v26 = vpack.c.bf16 %v5075_v28, %v5075_v28 }
0x29b3   : > { %7740 = vmatmul.mubr.msk.bf16.vlgmr.msra.gmra.mxu0 %vm708_vm1, %v5076_v26 }
0x29b4   : > { %7756 = vmatpush3.bf16.msra.mxu0 %v10243_v50  ;;  %7763 = vmatprep.mubr.msk.bf16.mxu0 %vm8618_vm0, %v8617_v1 }
0x29b5   : > { %7757 = vmatprep.subr.bf16.mxu0 %v8617_v1 }
0x29b8   : > { %7758 = vmatpush3.bf16.msra.mxu0 %v10252_v17 }
0x29b9   : > { %7759 = vmatprep.subr.bf16.mxu0 %v8617_v1 }
0x29bc   : > { %7760 = vmatpush3.bf16.msra.mxu0 %v10259_v46 }
0x29bd   : > { %7761 = vmatprep.subr.bf16.mxu0 %v8617_v1 }
0x29c0   : > { %v5223_v38 = vpop.permute.xlu0 %5222  ;;  %7762 = vmatpush3.bf16.msra.mxu0 %v10266_v57 }
0x29c1   : > { %v5228_v22 = vsel %vm1313_vm12, %v5223_v38, %v5226_v59  ;;  %7779 = vmatprep.subr.bf16.mxu0 %v8617_v1 }
0x29c2   : > { %v5229_v41 = vpack.c.bf16 %v5228_v22, %v5228_v22 }
0x29c4   : > { %7764 = vmatmul.mubr.msk.bf16.vlgmr.msra.gmra.mxu0 %vm708_vm1, %v5229_v41  ;;  %v5378_v10 = vpop.permute.xlu0 %5377 }
0x29c5   : > { %7780 = vmatpush3.bf16.msra.mxu0 %v10275_v62  ;;  %7787 = vmatprep.mubr.msk.bf16.mxu0 %vm8618_vm0, %v8617_v1  ;;  %v5380_v18 = vsel %vm1313_vm12, %v9931_v44, %v5378_v10 }
0x29c6   : > { %7781 = vmatprep.subr.bf16.mxu0 %v8617_v1  ;;  %v5381_v33 = vpack.c.bf16 %v5380_v18, %v5380_v18 }
0x29c8   : > { %v5383_v20 = vrot.slane %v5381_v33, 1 }
0x29c9   : > { %7782 = vmatpush3.bf16.msra.mxu0 %v10284_v27 }
0x29ca   : > { %7783 = vmatprep.subr.bf16.mxu0 %v8617_v1 }
0x29cd   : > { %7784 = vmatpush3.bf16.msra.mxu0 %v10293_v6 }
0x29ce   : > { %7785 = vmatprep.subr.bf16.mxu0 %v8617_v1 }
0x29d1   : > { %7786 = vmatpush3.bf16.msra.mxu0 %v10300_v29 }
0x29d2   : > { %7803 = vmatprep.subr.bf16.mxu0 %v8617_v1 }
0x29d4   : > { %7788 = vmatmul.mubr.msk.bf16.vlgmr.msra.gmra.mxu0 %vm708_vm1, %v5383_v20 }
0x29d5   : > { %7804 = vmatpush3.bf16.msra.mxu0 %v10390_v45  ;;  %7811 = vmatprep.mubr.msk.bf16.mxu0 %vm8618_vm0, %v8617_v1 }
0x29d6   : > { %7805 = vmatprep.subr.bf16.mxu0 %v8617_v1 }
0x29d9   : > { %7806 = vmatpush3.bf16.msra.mxu0 %v10399_v42 }
0x29da   : > { %7807 = vmatprep.subr.bf16.mxu0 %v8617_v1 }
0x29dd   : > { %7808 = vmatpush3.bf16.msra.mxu0 %v10406_v43 }
0x29de   : > { %7809 = vmatprep.subr.bf16.mxu0 %v8617_v1 }
0x29e1   : > { %7810 = vmatpush3.bf16.msra.mxu0 %v10413_v49 }
0x29e2   : > { %7827 = vmatprep.subr.bf16.mxu0 %v8617_v1 }
0x2a73   : > { %v5114_v15 = vpop.f32.mrf.mxu0 }
0x2a74   : > { %v5115_v8 = vadd.f32 %v10492_v47, %v5114_v15 }
0x2a75   : > { %v7741_v3 = vpop.f32.mrf.mxu0 }
0x2a76   : > { %v6959_v13 = vmul.f32 -1.442695, %v5115_v8 }
0x2a77   : > { %v5117_v32 = vpop.f32.mrf.mxu0 }
0x2a78   : > { %8435 = vpow2.f32 %v6959_v13 }
0x2a79   : > { %v7742_v53 = vpop.f32.mrf.mxu0  ;;  %8437 = vtanh.f32 %v5115_v8 }
0x2a84   : > { %v5267_v37 = vpop.f32.mrf.mxu0 }
0x2a85   : > { %v8436_v35 = vpop.eup %8435  ;;  %v5268_v21 = vadd.f32 %v10319_v52, %v5267_v37 }
0x2a86   : > { %v5124_v23 = vadd.f32 1.0, %v8436_v35  ;;  %v7765_v0 = vpop.f32.mrf.mxu0  ;;  %v8438_v4 = vpop.eup %8437 }
0x2a87   : > { %v6963_v58 = vmul.f32 -1.442695, %v5268_v21 }
0x2a88   : > { %8439 = vrcp.f32 %v5124_v23  ;;  %v5270_v31 = vpop.f32.mrf.mxu0 }
0x2a89   : > { %8441 = vpow2.f32 %v6963_v58 }
0x2a8a   : > { %v7766_v24 = vpop.f32.mrf.mxu0  ;;  %8443 = vtanh.f32 %v5268_v21 }
0x2a94   : > { %v5421_v39 = vpop.f32.mrf.mxu0 }
0x2a95   : > { %v8440_v30 = vpop.eup %8439  ;;  %v5422_v12 = vadd.f32 %v10325_v2, %v5421_v39 }
0x2a96   : > { %v8442_v25 = vpop.eup %8441  ;;  %v7789_v9 = vpop.f32.mrf.mxu0  ;;  %v5127_v56 = vsel %vm9875_vm14, %v8438_v4, %v8440_v30 }
0x2a97   : > { %v5277_v48 = vadd.f32 1.0, %v8442_v25  ;;  %v6967_v40 = vmul.f32 -1.442695, %v5422_v12  ;;  %5130 = vrot.lane.b32.xlu1 %v5127_v56, %s8621_s29  ;;  %v8444_v51 = vpop.eup %8443  ;;  %v5128_v33 = vmul.f32 %v5127_v56, %v10433_v60 }
0x2a98   : > { %v5424_v19 = vpop.f32.mrf.mxu0 }
0x2a99   : > { %8445 = vrcp.f32 %v5277_v48 }
0x2a9a   : > { %8447 = vpow2.f32 %v6967_v40  ;;  %v7790_v63 = vpop.f32.mrf.mxu0 }
0x2a9b   : > { %8449 = vtanh.f32 %v5422_v12 }
0x2aa6   : > { %v8446_v36 = vpop.eup %8445 }
0x2aa7   : > { %v8448_v61 = vpop.eup %8447  ;;  %v5280_v11 = vsel %vm9875_vm14, %v8444_v51, %v8446_v36 }
0x2aa8   : > { %v5431_v5 = vadd.f32 1.0, %v8448_v61  ;;  %5283 = vrot.lane.b32.xlu0 %v5280_v11, %s8621_s29  ;;  %v8450_v14 = vpop.eup %8449  ;;  %v5281_v3 = vmul.f32 %v5280_v11, %v10438_v7 }
0x2aaa   : > { %8451 = vrcp.f32 %v5431_v5 }
0x2ab7   : > { %v8452_v28 = vpop.eup %8451 }
0x2ab8   : > { %v5434_v26 = vsel %vm9875_vm14, %v8450_v14, %v8452_v28 }
0x2ab9   : > { %5437 = vrot.lane.b32.xlu1 %v5434_v26, %s8621_s29  ;;  %v5435_v37 = vmul.f32 %v5434_v26, %v10443_v16 }
0x2b09   : > { %v5131_v59 = vpop.permute.xlu1 %5130 }
0x2b0a   : > { %v5133_v38 = vmul.f32 %v5131_v59, %v5127_v56 }
0x2b0c   : > { %5135 = vrot.lane.b32.xlu0 %v5133_v38, %s8624_s22 }
0x2b1a   : > { %v5284_v22 = vpop.permute.xlu0 %5283 }
0x2b1b   : > { %v5286_v41 = vmul.f32 %v5284_v22, %v5280_v11 }
0x2b1d   : > { %5288 = vrot.lane.b32.xlu1 %v5286_v41, %s8624_s22 }
0x2b2b   : > { %v5438_v10 = vpop.permute.xlu1 %5437 }
0x2b2c   : > { %v5440_v18 = vmul.f32 %v5438_v10, %v5434_v26 }
0x2b2e   : > { %5442 = vrot.lane.b32.xlu0 %v5440_v18, %s8624_s22 }
0x2b7e   : > { %v5136_v20 = vpop.permute.xlu0 %5135 }
0x2b7f   : > { %v10510_v15 = vadd.f32 %v5136_v20, %v5128_v33 }
0x2b81   : > { %8453 = vtanh.f32 %v10510_v15 }
0x2b8e   : > { %v8454_v8 = vpop.eup %8453 }
0x2b8f   : > { %v5289_v13 = vpop.permute.xlu1 %5288  ;;  %5141 = vrot.lane.b32.xlu1 %v8454_v8, %s8621_s29 }
0x2b90   : > { %v10515_v32 = vadd.f32 %v5289_v13, %v5281_v3 }
0x2b92   : > { %8455 = vtanh.f32 %v10515_v32 }
0x2b9f   : > { %v8456_v53 = vpop.eup %8455 }
0x2ba0   : > { %v5443_v35 = vpop.permute.xlu0 %5442  ;;  %5294 = vrot.lane.b32.xlu0 %v8456_v53, %s8621_s29 }
0x2ba1   : > { %v10520_v60 = vadd.f32 %v5443_v35, %v5435_v37 }
0x2ba3   : > { %8457 = vtanh.f32 %v10520_v60 }
0x2bb0   : > { %v8458_v21 = vpop.eup %8457 }
0x2bb1   : > { %5448 = vrot.lane.b32.xlu1 %v8458_v21, %s8621_s29 }
0x2c01   : > { %v5142_v7 = vpop.permute.xlu1 %5141 }
0x2c02   : > { %v5144_v23 = vmul.f32 %v5142_v7, %v5127_v56 }
0x2c04   : > { %5303 = vrot.lane.b32.xlu1 %v5144_v23, %s8621_s29 }
0x2c12   : > { %v5295_v0 = vpop.permute.xlu0 %5294 }
0x2c13   : > { %v5297_v58 = vmul.f32 %v5295_v0, %v5280_v11 }
0x2c15   : > { %5299 = vrot.lane.b32.xlu0 %v5297_v58, %s8624_s22  ;;  %5456 = vrot.lane.b32.xlu1 %v5297_v58, %s8621_s29 }
0x2c23   : > { %v5449_v16 = vpop.permute.xlu1 %5448 }
0x2c24   : > { %v5451_v31 = vmul.f32 %v5449_v16, %v5434_v26 }
0x2c26   : > { %5453 = vrot.lane.b32.xlu0 %v5451_v31, %s8624_s22  ;;  %v5607_v24 = vrot.slane %v5451_v31, 6 }
0x2c2a   : > { %5608 = vrot.lane.b32.xlu0 %v5607_v24, %s8621_s29 }
0x2c76   : > { %v5304_v4 = vpop.permute.xlu1 %5303 }
0x2c87   : > { %v5300_v39 = vpop.permute.xlu0 %5299  ;;  %v5457_v25 = vpop.permute.xlu1 %5456 }
0x2c88   : > { %v5306_v30 = vsel %vm1313_vm12, %v5300_v39, %v5304_v4 }
0x2c89   : > { %v5307_v12 = vpack.c.bf16 %v5306_v30, %v5306_v30 }
0x2c8b   : > { %7776 = vmatmul.mubr.msk.bf16.vlgmr.msra.gmra.mxu1 %vm708_vm1, %v5307_v12 }
0x2c8c   : > { %7792 = vmatpush3.bf16.msra.mxu1 %v10243_v50  ;;  %7799 = vmatprep.mubr.msk.bf16.mxu1 %vm8618_vm0, %v8617_v1 }
0x2c8d   : > { %7793 = vmatprep.subr.bf16.mxu1 %v8617_v1 }
0x2c90   : > { %7794 = vmatpush3.bf16.msra.mxu1 %v10252_v17 }
0x2c91   : > { %7795 = vmatprep.subr.bf16.mxu1 %v8617_v1 }
0x2c94   : > { %7796 = vmatpush3.bf16.msra.mxu1 %v10259_v46 }
0x2c95   : > { %7797 = vmatprep.subr.bf16.mxu1 %v8617_v1 }
0x2c98   : > { %v5454_v9 = vpop.permute.xlu0 %5453  ;;  %7798 = vmatpush3.bf16.msra.mxu1 %v10266_v57 }
0x2c99   : > { %v5459_v56 = vsel %vm1313_vm12, %v5454_v9, %v5457_v25  ;;  %7815 = vmatprep.subr.bf16.mxu1 %v8617_v1 }
0x2c9a   : > { %v5460_v48 = vpack.c.bf16 %v5459_v56, %v5459_v56 }
0x2c9c   : > { %7800 = vmatmul.mubr.msk.bf16.vlgmr.msra.gmra.mxu1 %vm708_vm1, %v5460_v48  ;;  %v5609_v40 = vpop.permute.xlu0 %5608 }
0x2c9d   : > { %7816 = vmatpush3.bf16.msra.mxu1 %v10275_v62  ;;  %7823 = vmatprep.mubr.msk.bf16.mxu1 %vm8618_vm0, %v8617_v1  ;;  %v5611_v19 = vsel %vm1313_vm12, %v10038_v54, %v5609_v40 }
0x2c9e   : > { %7817 = vmatprep.subr.bf16.mxu1 %v8617_v1  ;;  %v5612_v63 = vpack.c.bf16 %v5611_v19, %v5611_v19 }
0x2ca0   : > { %v5614_v51 = vrot.slane %v5612_v63, 1 }
0x2ca1   : > { %7818 = vmatpush3.bf16.msra.mxu1 %v10284_v27 }
0x2ca2   : > { %7819 = vmatprep.subr.bf16.mxu1 %v8617_v1 }
0x2ca5   : > { %7820 = vmatpush3.bf16.msra.mxu1 %v10293_v6 }
0x2ca6   : > { %7821 = vmatprep.subr.bf16.mxu1 %v8617_v1 }
0x2ca9   : > { %7822 = vmatpush3.bf16.msra.mxu1 %v10300_v29 }
0x2caa   : > { %7839 = vmatprep.subr.bf16.mxu1 %v8617_v1 }
0x2cac   : > { %7824 = vmatmul.mubr.msk.bf16.vlgmr.msra.gmra.mxu1 %vm708_vm1, %v5614_v51 }
0x2cad   : > { %7840 = vmatpush3.bf16.msra.mxu1 %v10390_v45  ;;  %7847 = vmatprep.mubr.msk.bf16.mxu1 %vm8618_vm0, %v8617_v1 }
0x2cae   : > { %7841 = vmatprep.subr.bf16.mxu1 %v8617_v1 }
0x2cb1   : > { %7842 = vmatpush3.bf16.msra.mxu1 %v10399_v42 }
0x2cb2   : > { %7843 = vmatprep.subr.bf16.mxu1 %v8617_v1 }
0x2cb5   : > { %7844 = vmatpush3.bf16.msra.mxu1 %v10406_v43 }
0x2cb6   : > { %7845 = vmatprep.subr.bf16.mxu1 %v8617_v1 }
0x2cb9   : > { %7846 = vmatpush3.bf16.msra.mxu1 %v10413_v49 }
0x2cba   : > { %7863 = vmatprep.subr.bf16.mxu1 %v8617_v1 }
0x2d4b   : > { %v5345_v36 = vpop.f32.mrf.mxu1 }
0x2d4c   : > { %v5346_v61 = vadd.f32 %v10492_v47, %v5345_v36 }
0x2d4d   : > { %v7777_v11 = vpop.f32.mrf.mxu1 }
0x2d4e   : > { %v6965_v5 = vmul.f32 -1.442695, %v5346_v61 }
0x2d4f   : > { %v5348_v14 = vpop.f32.mrf.mxu1 }
0x2d50   : > { %8459 = vpow2.f32 %v6965_v5 }
0x2d51   : > { %v7778_v28 = vpop.f32.mrf.mxu1  ;;  %8461 = vtanh.f32 %v5346_v61 }
0x2d5c   : > { %v5498_v26 = vpop.f32.mrf.mxu1 }
0x2d5d   : > { %v8460_v59 = vpop.eup %8459  ;;  %v5499_v38 = vadd.f32 %v10319_v52, %v5498_v26 }
0x2d5e   : > { %v5355_v22 = vadd.f32 1.0, %v8460_v59  ;;  %v7801_v41 = vpop.f32.mrf.mxu1  ;;  %v8462_v20 = vpop.eup %8461 }
0x2d5f   : > { %v6969_v10 = vmul.f32 -1.442695, %v5499_v38 }
0x2d60   : > { %8463 = vrcp.f32 %v5355_v22  ;;  %v5501_v18 = vpop.f32.mrf.mxu1 }
0x2d61   : > { %8465 = vpow2.f32 %v6969_v10 }
0x2d62   : > { %v7802_v33 = vpop.f32.mrf.mxu1  ;;  %8467 = vtanh.f32 %v5499_v38 }
0x2d6c   : > { %v5652_v8 = vpop.f32.mrf.mxu1 }
0x2d6d   : > { %v8464_v3 = vpop.eup %8463  ;;  %v5653_v13 = vadd.f32 %v10325_v2, %v5652_v8 }
0x2d6e   : > { %v8466_v53 = vpop.eup %8465  ;;  %v7825_v37 = vpop.f32.mrf.mxu1  ;;  %v5358_v35 = vsel %vm9875_vm14, %v8462_v20, %v8464_v3 }
0x2d6f   : > { %v5508_v21 = vadd.f32 1.0, %v8466_v53  ;;  %v6973_v7 = vmul.f32 -1.442695, %v5653_v13  ;;  %5361 = vrot.lane.b32.xlu1 %v5358_v35, %s8621_s29  ;;  %v8468_v58 = vpop.eup %8467  ;;  %v5359_v63 = vmul.f32 %v5358_v35, %v10510_v15 }
0x2d70   : > { %v5655_v23 = vpop.f32.mrf.mxu1 }
0x2d71   : > { %8469 = vrcp.f32 %v5508_v21 }
0x2d72   : > { %8471 = vpow2.f32 %v6973_v7  ;;  %v7826_v0 = vpop.f32.mrf.mxu1 }
0x2d73   : > { %8473 = vtanh.f32 %v5653_v13 }
0x2d7e   : > { %v8470_v16 = vpop.eup %8469 }
0x2d7f   : > { %v8472_v31 = vpop.eup %8471  ;;  %v5511_v24 = vsel %vm9875_vm14, %v8468_v58, %v8470_v16 }
0x2d80   : > { %v5662_v4 = vadd.f32 1.0, %v8472_v31  ;;  %5514 = vrot.lane.b32.xlu0 %v5511_v24, %s8621_s29  ;;  %v8474_v39 = vpop.eup %8473  ;;  %v5512_v11 = vmul.f32 %v5511_v24, %v10515_v32 }
0x2d82   : > { %8475 = vrcp.f32 %v5662_v4 }
0x2d8f   : > { %v8476_v30 = vpop.eup %8475 }
0x2d90   : > { %v5665_v12 = vsel %vm9875_vm14, %v8474_v39, %v8476_v30 }
0x2d91   : > { %5668 = vrot.lane.b32.xlu1 %v5665_v12, %s8621_s29  ;;  %v5666_v26 = vmul.f32 %v5665_v12, %v10520_v60 }
0x2de1   : > { %v5362_v25 = vpop.permute.xlu1 %5361 }
0x2de2   : > { %v5364_v9 = vmul.f32 %v5362_v25, %v5358_v35 }
0x2de4   : > { %5366 = vrot.lane.b32.xlu0 %v5364_v9, %s8624_s22 }
0x2df2   : > { %v5515_v56 = vpop.permute.xlu0 %5514 }
0x2df3   : > { %v5517_v48 = vmul.f32 %v5515_v56, %v5511_v24 }
0x2df5   : > { %5519 = vrot.lane.b32.xlu1 %v5517_v48, %s8624_s22 }
0x2e03   : > { %v5669_v40 = vpop.permute.xlu1 %5668 }
0x2e04   : > { %v5671_v19 = vmul.f32 %v5669_v40, %v5665_v12 }
0x2e06   : > { %5673 = vrot.lane.b32.xlu0 %v5671_v19, %s8624_s22 }
0x2e56   : > { %v5367_v51 = vpop.permute.xlu0 %5366 }
0x2e57   : > { %v10582_v36 = vadd.f32 %v5367_v51, %v5359_v63 }
0x2e59   : > { %8477 = vtanh.f32 %v10582_v36 }
0x2e66   : > { %v8478_v61 = vpop.eup %8477 }
0x2e67   : > { %v5520_v5 = vpop.permute.xlu1 %5519  ;;  %5372 = vrot.lane.b32.xlu1 %v8478_v61, %s8621_s29 }
0x2e68   : > { %v10587_v14 = vadd.f32 %v5520_v5, %v5512_v11 }
0x2e6a   : > { %8479 = vtanh.f32 %v10587_v14 }
0x2e77   : > { %v8480_v28 = vpop.eup %8479 }
0x2e78   : > { %v5674_v59 = vpop.permute.xlu0 %5673  ;;  %5525 = vrot.lane.b32.xlu0 %v8480_v28, %s8621_s29 }
0x2e79   : > { %v10592_v15 = vadd.f32 %v5674_v59, %v5666_v26 }
0x2e7b   : > { %8481 = vtanh.f32 %v10592_v15 }
0x2e88   : > { %v8482_v38 = vpop.eup %8481 }
0x2e89   : > { %5679 = vrot.lane.b32.xlu1 %v8482_v38, %s8621_s29 }
0x2ed9   : > { %v5373_v32 = vpop.permute.xlu1 %5372 }
0x2eda   : > { %v5375_v22 = vmul.f32 %v5373_v32, %v5358_v35 }
0x2edc   : > { %5534 = vrot.lane.b32.xlu1 %v5375_v22, %s8621_s29 }
0x2eea   : > { %v5526_v41 = vpop.permute.xlu0 %5525 }
0x2eeb   : > { %v5528_v10 = vmul.f32 %v5526_v41, %v5511_v24 }
0x2eed   : > { %5530 = vrot.lane.b32.xlu0 %v5528_v10, %s8624_s22  ;;  %5687 = vrot.lane.b32.xlu1 %v5528_v10, %s8621_s29 }
0x2efb   : > { %v5680_v60 = vpop.permute.xlu1 %5679 }
0x2efc   : > { %v5682_v18 = vmul.f32 %v5680_v60, %v5665_v12 }
0x2efe   : > { %5684 = vrot.lane.b32.xlu0 %v5682_v18, %s8624_s22  ;;  %v5838_v33 = vrot.slane %v5682_v18, 5 }
0x2f02   : > { %5839 = vrot.lane.b32.xlu0 %v5838_v33, %s8621_s29 }
0x2f4e   : > { %v5535_v20 = vpop.permute.xlu1 %5534 }
0x2f5f   : > { %v5531_v8 = vpop.permute.xlu0 %5530  ;;  %v5688_v53 = vpop.permute.xlu1 %5687 }
0x2f60   : > { %v5537_v3 = vsel %vm1313_vm12, %v5531_v8, %v5535_v20 }
0x2f61   : > { %v5538_v13 = vpack.c.bf16 %v5537_v3, %v5537_v3 }
0x2f63   : > { %7812 = vmatmul.mubr.msk.bf16.vlgmr.msra.gmra.mxu0 %vm708_vm1, %v5538_v13 }
0x2f64   : > { %7828 = vmatpush3.bf16.msra.mxu0 %v10243_v50  ;;  %7835 = vmatprep.mubr.msk.bf16.mxu0 %vm8618_vm0, %v8617_v1 }
0x2f65   : > { %7829 = vmatprep.subr.bf16.mxu0 %v8617_v1 }
0x2f68   : > { %7830 = vmatpush3.bf16.msra.mxu0 %v10252_v17 }
0x2f69   : > { %7831 = vmatprep.subr.bf16.mxu0 %v8617_v1 }
0x2f6c   : > { %7832 = vmatpush3.bf16.msra.mxu0 %v10259_v46 }
0x2f6d   : > { %7833 = vmatprep.subr.bf16.mxu0 %v8617_v1 }
0x2f70   : > { %v5685_v37 = vpop.permute.xlu0 %5684  ;;  %7834 = vmatpush3.bf16.msra.mxu0 %v10266_v57 }
0x2f71   : > { %v5690_v35 = vsel %vm1313_vm12, %v5685_v37, %v5688_v53  ;;  %7851 = vmatprep.subr.bf16.mxu0 %v8617_v1 }
0x2f72   : > { %v5691_v50 = vpack.c.bf16 %v5690_v35, %v5690_v35 }
0x2f74   : > { %v5840_v21 = vpop.permute.xlu0 %5839  ;;  %7836 = vmatmul.mubr.msk.bf16.vlgmr.msra.gmra.mxu0 %vm708_vm1, %v5691_v50 }
0x2f75   : > { %7852 = vmatpush3.bf16.msra.mxu0 %v10275_v62  ;;  %7859 = vmatprep.mubr.msk.bf16.mxu0 %vm8618_vm0, %v8617_v1  ;;  %v5842_v17 = vsel %vm1313_vm12, %v9859_v34, %v5840_v21 }
0x2f76   : > { %7853 = vmatprep.subr.bf16.mxu0 %v8617_v1  ;;  %v5843_v46 = vpack.c.bf16 %v5842_v17, %v5842_v17 }
0x2f78   : > { %v5845_v57 = vshrl.u32 %v5843_v46, 16 }
0x2f79   : > { %7854 = vmatpush3.bf16.msra.mxu0 %v10284_v27 }
0x2f7a   : > { %7855 = vmatprep.subr.bf16.mxu0 %v8617_v1  ;;  %v5847_v62 = vrot.slane %v5845_v57, 1 }
0x2f7d   : > { %7856 = vmatpush3.bf16.msra.mxu0 %v10293_v6 }
0x2f7e   : > { %7857 = vmatprep.subr.bf16.mxu0 %v8617_v1 }
0x2f81   : > { %7858 = vmatpush3.bf16.msra.mxu0 %v10300_v29 }
0x2f82   : > { %7875 = vmatprep.subr.bf16.mxu0 %v8617_v1 }
0x2f84   : > { %7860 = vmatmul.mubr.msk.bf16.vlgmr.msra.gmra.mxu0 %vm708_vm1, %v5847_v62 }
0x2f85   : > { %7876 = vmatpush3.bf16.msra.mxu0 %v10390_v45  ;;  %7883 = vmatprep.mubr.msk.bf16.mxu0 %vm8618_vm0, %v8617_v1 }
0x2f86   : > { %7877 = vmatprep.subr.bf16.mxu0 %v8617_v1 }
0x2f89   : > { %7878 = vmatpush3.bf16.msra.mxu0 %v10399_v42 }
0x2f8a   : > { %7879 = vmatprep.subr.bf16.mxu0 %v8617_v1 }
0x2f8d   : > { %7880 = vmatpush3.bf16.msra.mxu0 %v10406_v43 }
0x2f8e   : > { %7881 = vmatprep.subr.bf16.mxu0 %v8617_v1 }
0x2f91   : > { %7882 = vmatpush3.bf16.msra.mxu0 %v10413_v49 }
0x2f92   : > { %7899 = vmatprep.subr.bf16.mxu0 %v8617_v1 }
0x3023   : > { %v5576_v34 = vpop.f32.mrf.mxu0 }
0x3024   : > { %v5577_v27 = vadd.f32 %v10492_v47, %v5576_v34 }
0x3025   : > { %v7813_v6 = vpop.f32.mrf.mxu0 }
0x3026   : > { %v6971_v29 = vmul.f32 -1.442695, %v5577_v27 }
0x3027   : > { %v5579_v7 = vpop.f32.mrf.mxu0 }
0x3028   : > { %8483 = vpow2.f32 %v6971_v29 }
0x3029   : > { %v7814_v23 = vpop.f32.mrf.mxu0  ;;  %8485 = vtanh.f32 %v5577_v27 }
0x3034   : > { %v5729_v0 = vpop.f32.mrf.mxu0 }
0x3035   : > { %v8484_v58 = vpop.eup %8483  ;;  %v5730_v16 = vadd.f32 %v10319_v52, %v5729_v0 }
0x3036   : > { %v5586_v31 = vadd.f32 1.0, %v8484_v58  ;;  %v7837_v24 = vpop.f32.mrf.mxu0  ;;  %v8486_v12 = vpop.eup %8485  ;;  %v10678_v58 = vld [vmem:[%s10956_s12 + $0x38] sm:$0xff]  }
0x3037   : > { %v6975_v4 = vmul.f32 -1.442695, %v5730_v16 }
0x3038   : > { %8487 = vrcp.f32 %v5586_v31  ;;  %v5732_v39 = vpop.f32.mrf.mxu0  ;;  %v10694_v31 = vld [vmem:[%s10956_s12 + $0x28] sm:$0xff]  }
0x3039   : > { %8489 = vpow2.f32 %v6975_v4  ;;  %v10701_v39 = vld [vmem:[%s10956_s12 + $0x20] sm:$0xff]  }
0x303a   : > { %v7838_v30 = vpop.f32.mrf.mxu0  ;;  %8491 = vtanh.f32 %v5730_v16  ;;  %v10687_v16 = vld [vmem:[%s10956_s12 + $0x30] sm:$0xff]  }
0x3044   : > { %v5885_v25 = vpop.f32.mrf.mxu0 }
0x3045   : > { %v8488_v9 = vpop.eup %8487  ;;  %v5886_v56 = vadd.f32 %v10325_v2, %v5885_v25 }
0x3046   : > { %v8490_v48 = vpop.eup %8489  ;;  %v7861_v40 = vpop.f32.mrf.mxu0  ;;  %v5589_v19 = vsel %vm9875_vm14, %v8486_v12, %v8488_v9  ;;  %v10710_v9 = vld [vmem:[%s10956_s12 + $0x18] sm:$0xff]  }
0x3047   : > { %v5739_v63 = vadd.f32 1.0, %v8490_v48  ;;  %v6979_v52 = vmul.f32 -1.442695, %v5886_v56  ;;  %5592 = vrot.lane.b32.xlu1 %v5589_v19, %s8621_s29  ;;  %v8492_v11 = vpop.eup %8491  ;;  %v5590_v20 = vmul.f32 %v5589_v19, %v10582_v36  ;;  %v10721_v48 = vld [vmem:[%s10956_s12 + $0x10] sm:$0xff]  }
0x3048   : > { %v5888_v51 = vpop.f32.mrf.mxu0 }
0x3049   : > { %8493 = vrcp.f32 %v5739_v63 }
0x304a   : > { %8495 = vpow2.f32 %v6979_v52  ;;  %v7862_v61 = vpop.f32.mrf.mxu0 }
0x304b   : > { %8497 = vtanh.f32 %v5886_v56 }
0x3056   : > { %v8494_v5 = vpop.eup %8493 }
0x3057   : > { %v8496_v28 = vpop.eup %8495  ;;  %v5742_v2 = vsel %vm9875_vm14, %v8492_v11, %v8494_v5 }
0x3058   : > { %v5895_v26 = vadd.f32 1.0, %v8496_v28  ;;  %5745 = vrot.lane.b32.xlu0 %v5742_v2, %s8621_s29  ;;  %v8498_v59 = vpop.eup %8497  ;;  %v5743_v53 = vmul.f32 %v5742_v2, %v10587_v14 }
0x305a   : > { %8499 = vrcp.f32 %v5895_v26 }
0x3067   : > { %v8500_v38 = vpop.eup %8499 }
0x3068   : > { %v5898_v32 = vsel %vm9875_vm14, %v8498_v59, %v8500_v38 }
0x3069   : > { %5901 = vrot.lane.b32.xlu1 %v5898_v32, %s8621_s29  ;;  %v5899_v21 = vmul.f32 %v5898_v32, %v10592_v15 }
0x30b9   : > { %v5593_v22 = vpop.permute.xlu1 %5592 }
0x30ba   : > { %v5595_v41 = vmul.f32 %v5593_v22, %v5589_v19 }
0x30bc   : > { %5597 = vrot.lane.b32.xlu0 %v5595_v41, %s8624_s22 }
0x30ca   : > { %v5746_v10 = vpop.permute.xlu0 %5745 }
0x30cb   : > { %v5748_v60 = vmul.f32 %v5746_v10, %v5742_v2 }
0x30cd   : > { %5750 = vrot.lane.b32.xlu1 %v5748_v60, %s8624_s22 }
0x30db   : > { %v5902_v18 = vpop.permute.xlu1 %5901 }
0x30dc   : > { %v5904_v33 = vmul.f32 %v5902_v18, %v5898_v32  ;;  %v10760_v18 = vld [vmem:[%s10957_s13] sm:$0x1] }
0x30de   : > { %5906 = vrot.lane.b32.xlu0 %v5904_v33, %s8624_s22 }
0x312e   : > { %v5598_v8 = vpop.permute.xlu0 %5597 }
0x312f   : > { %v10654_v3 = vadd.f32 %v5598_v8, %v5590_v20 }
0x3131   : > { %8501 = vtanh.f32 %v10654_v3 }
0x313e   : > { %v8502_v13 = vpop.eup %8501 }
0x313f   : > { %v5751_v37 = vpop.permute.xlu1 %5750  ;;  %5603 = vrot.lane.b32.xlu1 %v8502_v13, %s8621_s29 }
0x3140   : > { %v10659_v35 = vadd.f32 %v5751_v37, %v5743_v53 }
0x3142   : > { %8503 = vtanh.f32 %v10659_v35 }
0x314f   : > { %v8504_v50 = vpop.eup %8503 }
0x3150   : > { %v5907_v17 = vpop.permute.xlu0 %5906  ;;  %5756 = vrot.lane.b32.xlu0 %v8504_v50, %s8621_s29 }
0x3151   : > { %v10664_v36 = vadd.f32 %v5907_v17, %v5899_v21 }
0x3153   : > { %8505 = vtanh.f32 %v10664_v36 }
0x3160   : > { %v8506_v46 = vpop.eup %8505 }
0x3161   : > { %5912 = vrot.lane.b32.xlu1 %v8506_v46, %s8621_s29 }
0x31b1   : > { %v5604_v14 = vpop.permute.xlu1 %5603 }
0x31b2   : > { %v5606_v57 = vmul.f32 %v5604_v14, %v5589_v19  ;;  %v10728_v19 = vld [vmem:[%s10956_s12 + $0x8] sm:$0xff]  }
0x31b4   : > { %5765 = vrot.lane.b32.xlu1 %v5606_v57, %s8621_s29 }
0x31c2   : > { %v5757_v62 = vpop.permute.xlu0 %5756 }
0x31c3   : > { %v5759_v34 = vmul.f32 %v5757_v62, %v5742_v2 }
0x31c5   : > { %5761 = vrot.lane.b32.xlu0 %v5759_v34, %s8624_s22  ;;  %5920 = vrot.lane.b32.xlu1 %v5759_v34, %s8621_s29 }
0x31d3   : > { %v5913_v15 = vpop.permute.xlu1 %5912 }
0x31d4   : > { %v5915_v27 = vmul.f32 %v5913_v15, %v5898_v32 }
0x31d6   : > { %5917 = vrot.lane.b32.xlu0 %v5915_v27, %s8624_s22  ;;  %v6071_v6 = vrot.slane %v5915_v27, 5 }
0x31da   : > { %6072 = vrot.lane.b32.xlu0 %v6071_v6, %s8621_s29 }
0x3226   : > { %v5766_v29 = vpop.permute.xlu1 %5765 }
0x3237   : > { %v5762_v7 = vpop.permute.xlu0 %5761  ;;  %v5921_v24 = vpop.permute.xlu1 %5920 }
0x3238   : > { %v5768_v23 = vsel %vm1313_vm12, %v5762_v7, %v5766_v29 }
0x3239   : > { %v5769_v0 = vpack.c.bf16 %v5768_v23, %v5768_v23 }
0x323b   : > { %7848 = vmatmul.mubr.msk.bf16.vlgmr.msra.gmra.mxu1 %vm708_vm1, %v5769_v0 }
0x323c   : > { %7864 = vmatpush3.bf16.msra.mxu1 %v10678_v58  ;;  %7871 = vmatprep.mubr.msk.bf16.mxu1 %vm8618_vm0, %v8617_v1 }
0x323d   : > { %7865 = vmatprep.subr.bf16.mxu1 %v8617_v1 }
0x3240   : > { %7866 = vmatpush3.bf16.msra.mxu1 %v10687_v16 }
0x3241   : > { %7867 = vmatprep.subr.bf16.mxu1 %v8617_v1 }
0x3244   : > { %7868 = vmatpush3.bf16.msra.mxu1 %v10694_v31 }
0x3245   : > { %7869 = vmatprep.subr.bf16.mxu1 %v8617_v1 }
0x3248   : > { %v5918_v4 = vpop.permute.xlu0 %5917  ;;  %7870 = vmatpush3.bf16.msra.mxu1 %v10701_v39 }
0x3249   : > { %v5923_v30 = vsel %vm1313_vm12, %v5918_v4, %v5921_v24  ;;  %7887 = vmatprep.subr.bf16.mxu1 %v8617_v1 }
0x324a   : > { %v5924_v12 = vpack.c.bf16 %v5923_v30, %v5923_v30 }
0x324c   : > { %v6073_v25 = vpop.permute.xlu0 %6072  ;;  %7872 = vmatmul.mubr.msk.bf16.vlgmr.msra.gmra.mxu1 %vm708_vm1, %v5924_v12 }
0x324d   : > { %7888 = vmatpush3.bf16.msra.mxu1 %v10710_v9  ;;  %7895 = vmatprep.mubr.msk.bf16.mxu1 %vm8618_vm0, %v8617_v1  ;;  %v6075_v56 = vsel %vm1313_vm12, %v9931_v44, %v6073_v25  ;;  %v10735_v44 = vld [vmem:[%s10956_s12] sm:$0xff]  }
0x324e   : > { %7889 = vmatprep.subr.bf16.mxu1 %v8617_v1  ;;  %v6076_v40 = vpack.c.bf16 %v6075_v56, %v6075_v56 }
0x3250   : > { %v6078_v63 = vshrl.u32 %v6076_v40, 16 }
0x3251   : > { %7890 = vmatpush3.bf16.msra.mxu1 %v10721_v48 }
0x3252   : > { %7891 = vmatprep.subr.bf16.mxu1 %v8617_v1  ;;  %v6080_v52 = vrot.slane %v6078_v63, 1 }
0x3255   : > { %7892 = vmatpush3.bf16.msra.mxu1 %v10728_v19 }
0x3256   : > { %7893 = vmatprep.subr.bf16.mxu1 %v8617_v1 }
0x3259   : > { %7894 = vmatpush3.bf16.msra.mxu1 %v10735_v44 }
0x325a   : > { %7911 = vmatprep.subr.bf16.mxu1 %v8617_v1 }
0x325c   : > { %7896 = vmatmul.mubr.msk.bf16.vlgmr.msra.gmra.mxu1 %vm708_vm1, %v6080_v52 }
0x325d   : > { %7912 = vmatpush3.bf16.msra.mxu1 %v10390_v45  ;;  %7919 = vmatprep.mubr.msk.bf16.mxu1 %vm8618_vm0, %v8617_v1 }
0x325e   : > { %7913 = vmatprep.subr.bf16.mxu1 %v8617_v1 }
0x3261   : > { %7914 = vmatpush3.bf16.msra.mxu1 %v10399_v42 }
0x3262   : > { %7915 = vmatprep.subr.bf16.mxu1 %v8617_v1 }
0x3265   : > { %7916 = vmatpush3.bf16.msra.mxu1 %v10406_v43  ;;  %v10754_v43 = vld [vmem:[%s10957_s13 + $0x1] sm:$0x1] }
0x3266   : > { %7917 = vmatprep.subr.bf16.mxu1 %v8617_v1 }
0x3269   : > { %7918 = vmatpush3.bf16.msra.mxu1 %v10413_v49 }
0x326a   : > { %7935 = vmatprep.subr.bf16.mxu1 %v8617_v1 }
0x32fb   : > { %v5807_v51 = vpop.f32.mrf.mxu1 }
0x32fc   : > { %v5808_v45 = vadd.f32 %v10492_v47, %v5807_v51 }
0x32fd   : > { %v7849_v61 = vpop.f32.mrf.mxu1 }
0x32fe   : > { %v6977_v11 = vmul.f32 -1.442695, %v5808_v45 }
0x32ff   : > { %v5810_v5 = vpop.f32.mrf.mxu1 }
0x3300   : > { %8507 = vpow2.f32 %v6977_v11 }
0x3301   : > { %v7850_v28 = vpop.f32.mrf.mxu1  ;;  %8509 = vtanh.f32 %v5808_v45 }
0x330c   : > { %v5962_v2 = vpop.f32.mrf.mxu1 }
0x330d   : > { %v8508_v42 = vpop.eup %8507  ;;  %v5963_v26 = vadd.f32 %v10754_v43, %v5962_v2 }
0x330e   : > { %v5817_v49 = vadd.f32 1.0, %v8508_v42  ;;  %v7873_v59 = vpop.f32.mrf.mxu1  ;;  %v8510_v41 = vpop.eup %8509 }
0x330f   : > { %v6981_v38 = vmul.f32 -1.442695, %v5963_v26 }
0x3310   : > { %8511 = vrcp.f32 %v5817_v49  ;;  %v5965_v32 = vpop.f32.mrf.mxu1 }
0x3311   : > { %8513 = vpow2.f32 %v6981_v38 }
0x3312   : > { %v7874_v22 = vpop.f32.mrf.mxu1  ;;  %8515 = vtanh.f32 %v5963_v26 }
0x331c   : > { %v6118_v10 = vpop.f32.mrf.mxu1 }
0x331d   : > { %v8512_v60 = vpop.eup %8511  ;;  %v6119_v33 = vadd.f32 %v10760_v18, %v6118_v10 }
0x331e   : > { %v8514_v20 = vpop.eup %8513  ;;  %v7897_v8 = vpop.f32.mrf.mxu1  ;;  %v5820_v13 = vsel %vm9875_vm14, %v8510_v41, %v8512_v60 }
0x331f   : > { %v5972_v53 = vadd.f32 1.0, %v8514_v20  ;;  %v6985_v37 = vmul.f32 -1.442695, %v6119_v33  ;;  %5823 = vrot.lane.b32.xlu1 %v5820_v13, %s8621_s29  ;;  %v8516_v17 = vpop.eup %8515  ;;  %v5821_v4 = vmul.f32 %v5820_v13, %v10654_v3 }
0x3320   : > { %v6121_v50 = vpop.f32.mrf.mxu1 }
0x3321   : > { %8517 = vrcp.f32 %v5972_v53 }
0x3322   : > { %8519 = vpow2.f32 %v6985_v37  ;;  %v7898_v21 = vpop.f32.mrf.mxu1 }
0x3323   : > { %8521 = vtanh.f32 %v6119_v33 }
0x332e   : > { %v8518_v46 = vpop.eup %8517 }
0x332f   : > { %v8520_v14 = vpop.eup %8519  ;;  %v5975_v57 = vsel %vm9875_vm14, %v8516_v17, %v8518_v46 }
0x3330   : > { %v6128_v62 = vadd.f32 1.0, %v8520_v14  ;;  %5978 = vrot.lane.b32.xlu0 %v5975_v57, %s8621_s29  ;;  %v8522_v34 = vpop.eup %8521  ;;  %v5976_v56 = vmul.f32 %v5975_v57, %v10659_v35 }
0x3332   : > { %8523 = vrcp.f32 %v6128_v62 }
0x333f   : > { %v8524_v15 = vpop.eup %8523 }
0x3340   : > { %v6131_v27 = vsel %vm9875_vm14, %v8522_v34, %v8524_v15 }
0x3341   : > { %6134 = vrot.lane.b32.xlu1 %v6131_v27, %s8621_s29  ;;  %v6132_v51 = vmul.f32 %v6131_v27, %v10664_v36 }
0x3391   : > { %v5824_v6 = vpop.permute.xlu1 %5823 }
0x3392   : > { %v5826_v29 = vmul.f32 %v5824_v6, %v5820_v13 }
0x3394   : > { %5828 = vrot.lane.b32.xlu0 %v5826_v29, %s8624_s22 }
0x33a2   : > { %v5979_v7 = vpop.permute.xlu0 %5978 }
0x33a3   : > { %v5981_v23 = vmul.f32 %v5979_v7, %v5975_v57 }
0x33a5   : > { %5983 = vrot.lane.b32.xlu1 %v5981_v23, %s8624_s22 }
0x33b3   : > { %v6135_v0 = vpop.permute.xlu1 %6134 }
0x33b4   : > { %v6137_v24 = vmul.f32 %v6135_v0, %v6131_v27 }
0x33b6   : > { %6139 = vrot.lane.b32.xlu0 %v6137_v24, %s8624_s22 }
0x3406   : > { %v5829_v30 = vpop.permute.xlu0 %5828 }
0x3407   : > { %v10776_v12 = vadd.f32 %v5829_v30, %v5821_v4 }
0x3409   : > { %8525 = vtanh.f32 %v10776_v12 }
0x3416   : > { %v8526_v25 = vpop.eup %8525 }
0x3417   : > { %v5984_v40 = vpop.permute.xlu1 %5983  ;;  %5834 = vrot.lane.b32.xlu1 %v8526_v25, %s8621_s29 }
0x3418   : > { %v10781_v63 = vadd.f32 %v5984_v40, %v5976_v56 }
0x341a   : > { %8527 = vtanh.f32 %v10781_v63 }
0x3427   : > { %v8528_v52 = vpop.eup %8527 }
0x3428   : > { %v6140_v45 = vpop.permute.xlu0 %6139  ;;  %5989 = vrot.lane.b32.xlu0 %v8528_v52, %s8621_s29 }
0x3429   : > { %v10786_v3 = vadd.f32 %v6140_v45, %v6132_v51 }
0x342b   : > { %8529 = vtanh.f32 %v10786_v3 }
0x3438   : > { %v8530_v61 = vpop.eup %8529 }
0x3439   : > { %6145 = vrot.lane.b32.xlu1 %v8530_v61, %s8621_s29 }
0x3489   : > { %v5835_v35 = vpop.permute.xlu1 %5834 }
0x348a   : > { %v5837_v11 = vmul.f32 %v5835_v35, %v5820_v13 }
0x348c   : > { %5998 = vrot.lane.b32.xlu1 %v5837_v11, %s8621_s29 }
0x349a   : > { %v5990_v5 = vpop.permute.xlu0 %5989 }
0x349b   : > { %v5992_v28 = vmul.f32 %v5990_v5, %v5975_v57 }
0x349d   : > { %5994 = vrot.lane.b32.xlu0 %v5992_v28, %s8624_s22  ;;  %6153 = vrot.lane.b32.xlu1 %v5992_v28, %s8621_s29 }
0x34ab   : > { %v6146_v36 = vpop.permute.xlu1 %6145 }
0x34ac   : > { %v6148_v2 = vmul.f32 %v6146_v36, %v6131_v27 }
0x34ae   : > { %6150 = vrot.lane.b32.xlu0 %v6148_v2, %s8624_s22  ;;  %v6304_v42 = vrot.slane %v6148_v2, 5 }
0x34b2   : > { %6305 = vrot.lane.b32.xlu0 %v6304_v42, %s8621_s29 }
0x34fe   : > { %v5999_v26 = vpop.permute.xlu1 %5998 }
0x350f   : > { %v5995_v49 = vpop.permute.xlu0 %5994  ;;  %v6154_v32 = vpop.permute.xlu1 %6153 }
0x3510   : > { %v6001_v59 = vsel %vm1313_vm12, %v5995_v49, %v5999_v26 }
0x3511   : > { %v6002_v38 = vpack.c.bf16 %v6001_v59, %v6001_v59 }
0x3513   : > { %7884 = vmatmul.mubr.msk.bf16.vlgmr.msra.gmra.mxu0 %vm708_vm1, %v6002_v38 }
0x3514   : > { %7900 = vmatpush3.bf16.msra.mxu0 %v10678_v58  ;;  %7907 = vmatprep.mubr.msk.bf16.mxu0 %vm8618_vm0, %v8617_v1 }
0x3515   : > { %7901 = vmatprep.subr.bf16.mxu0 %v8617_v1 }
0x3518   : > { %7902 = vmatpush3.bf16.msra.mxu0 %v10687_v16 }
0x3519   : > { %7903 = vmatprep.subr.bf16.mxu0 %v8617_v1 }
0x351c   : > { %7904 = vmatpush3.bf16.msra.mxu0 %v10694_v31 }
0x351d   : > { %7905 = vmatprep.subr.bf16.mxu0 %v8617_v1 }
0x3520   : > { %v6151_v22 = vpop.permute.xlu0 %6150  ;;  %7906 = vmatpush3.bf16.msra.mxu0 %v10701_v39 }
0x3521   : > { %v6156_v41 = vsel %vm1313_vm12, %v6151_v22, %v6154_v32  ;;  %7923 = vmatprep.subr.bf16.mxu0 %v8617_v1 }
0x3522   : > { %v6157_v10 = vpack.c.bf16 %v6156_v41, %v6156_v41 }
0x3524   : > { %v6306_v60 = vpop.permute.xlu0 %6305  ;;  %7908 = vmatmul.mubr.msk.bf16.vlgmr.msra.gmra.mxu0 %vm708_vm1, %v6157_v10 }
0x3525   : > { %7924 = vmatpush3.bf16.msra.mxu0 %v10710_v9  ;;  %7931 = vmatprep.mubr.msk.bf16.mxu0 %vm8618_vm0, %v8617_v1  ;;  %v6308_v33 = vsel %vm1313_vm12, %v10038_v54, %v6306_v60  ;;  %v8604_v54 = vld [vmem:[%s10956_s12 + $0x58] sm:$0xff]  }
0x3526   : > { %7925 = vmatprep.subr.bf16.mxu0 %v8617_v1  ;;  %v6309_v20 = vpack.c.bf16 %v6308_v33, %v6308_v33 }
0x3528   : > { %v6311_v8 = vshrl.u32 %v6309_v20, 16 }
0x3529   : > { %7926 = vmatpush3.bf16.msra.mxu0 %v10721_v48  ;;  %v8605_v48 = vld [vmem:[%s10956_s12 + $0x50] sm:$0xff]  }
0x352a   : > { %7927 = vmatprep.subr.bf16.mxu0 %v8617_v1  ;;  %v6313_v9 = vrot.slane %v6311_v8, 1 }
0x352d   : > { %7928 = vmatpush3.bf16.msra.mxu0 %v10728_v19  ;;  %v8606_v19 = vld [vmem:[%s10956_s12 + $0x48] sm:$0xff]  }
0x352e   : > { %7929 = vmatprep.subr.bf16.mxu0 %v8617_v1 }
0x3531   : > { %7930 = vmatpush3.bf16.msra.mxu0 %v10735_v44  ;;  %v8607_v44 = vld [vmem:[%s10956_s12 + $0x40] sm:$0xff]  }
0x3532   : > { %7947 = vmatprep.subr.bf16.mxu0 %v8617_v1 }
0x3534   : > { %7932 = vmatmul.mubr.msk.bf16.vlgmr.msra.gmra.mxu0 %vm708_vm1, %v6313_v9 }
0x3535   : > { %7948 = vmatpush3.bf16.msra.mxu0 %v8604_v54  ;;  %7955 = vmatprep.mubr.msk.bf16.mxu0 %vm8618_vm0, %v8617_v1 }
0x3536   : > { %7949 = vmatprep.subr.bf16.mxu0 %v8617_v1 }
0x3539   : > { %7950 = vmatpush3.bf16.msra.mxu0 %v8605_v48 }
0x353a   : > { %7951 = vmatprep.subr.bf16.mxu0 %v8617_v1 }
0x353d   : > { %7952 = vmatpush3.bf16.msra.mxu0 %v8606_v19 }
0x353e   : > { %7953 = vmatprep.subr.bf16.mxu0 %v8617_v1 }
0x3541   : > { %7954 = vmatpush3.bf16.msra.mxu0 %v8607_v44 }
0x3542   : > { %7967 = vmatprep.subr.bf16.mxu0 %v8617_v1 }
0x35d3   : > { %v6040_v13 = vpop.f32.mrf.mxu0 }
0x35d4   : > { %v6041_v53 = vadd.f32 %v10492_v47, %v6040_v13 }
0x35d5   : > { %v7885_v37 = vpop.f32.mrf.mxu0 }
0x35d6   : > { %v6983_v50 = vmul.f32 -1.442695, %v6041_v53 }
0x35d7   : > { %v6043_v21 = vpop.f32.mrf.mxu0 }
0x35d8   : > { %8531 = vpow2.f32 %v6983_v50 }
0x35d9   : > { %v7886_v17 = vpop.f32.mrf.mxu0  ;;  %8533 = vtanh.f32 %v6041_v53 }
0x35e4   : > { %v6195_v46 = vpop.f32.mrf.mxu0 }
0x35e5   : > { %v8532_v14 = vpop.eup %8531  ;;  %v6196_v57 = vadd.f32 %v10754_v43, %v6195_v46 }
0x35e6   : > { %v6050_v62 = vadd.f32 1.0, %v8532_v14  ;;  %v7909_v34 = vpop.f32.mrf.mxu0  ;;  %v8534_v29 = vpop.eup %8533 }
0x35e7   : > { %v6987_v15 = vmul.f32 -1.442695, %v6196_v57 }
0x35e8   : > { %8535 = vrcp.f32 %v6050_v62  ;;  %v6198_v27 = vpop.f32.mrf.mxu0 }
0x35e9   : > { %8537 = vpow2.f32 %v6987_v15 }
0x35ea   : > { %v7910_v6 = vpop.f32.mrf.mxu0  ;;  %8539 = vtanh.f32 %v6196_v57 }
0x35f4   : > { %v6351_v7 = vpop.f32.mrf.mxu0 }
0x35f5   : > { %v8536_v47 = vpop.eup %8535  ;;  %v6352_v23 = vadd.f32 %v10760_v18, %v6351_v7 }
0x35f6   : > { %v8538_v0 = vpop.eup %8537  ;;  %v7933_v24 = vpop.f32.mrf.mxu0  ;;  %v6053_v4 = vsel %vm9875_vm14, %v8534_v29, %v8536_v47 }
0x35f7   : > { %v6205_v30 = vadd.f32 1.0, %v8538_v0  ;;  %v6991_v25 = vmul.f32 -1.442695, %v6352_v23  ;;  %6056 = vrot.lane.b32.xlu1 %v6053_v4, %s8621_s29  ;;  %v8540_v52 = vpop.eup %8539  ;;  %v6054_v59 = vmul.f32 %v6053_v4, %v10776_v12 }
0x35f8   : > { %v6354_v56 = vpop.f32.mrf.mxu0 }
0x35f9   : > { %8541 = vrcp.f32 %v6205_v30 }
0x35fa   : > { %8543 = vpow2.f32 %v6991_v25  ;;  %v7934_v40 = vpop.f32.mrf.mxu0 }
0x35fb   : > { %8545 = vtanh.f32 %v6352_v23 }
0x3606   : > { %v8542_v51 = vpop.eup %8541 }
0x3607   : > { %v8544_v45 = vpop.eup %8543  ;;  %v6208_v18 = vsel %vm9875_vm14, %v8540_v52, %v8542_v51 }
0x3608   : > { %v6361_v61 = vadd.f32 1.0, %v8544_v45  ;;  %6211 = vrot.lane.b32.xlu0 %v6208_v18, %s8621_s29  ;;  %v8546_v35 = vpop.eup %8545  ;;  %v6209_v41 = vmul.f32 %v6208_v18, %v10781_v63 }
0x360a   : > { %8547 = vrcp.f32 %v6361_v61 }
0x3617   : > { %v8548_v11 = vpop.eup %8547 }
0x3618   : > { %v6364_v5 = vsel %vm9875_vm14, %v8546_v35, %v8548_v11 }
0x3619   : > { %6367 = vrot.lane.b32.xlu1 %v6364_v5, %s8621_s29  ;;  %v6365_v20 = vmul.f32 %v6364_v5, %v10786_v3 }
0x3669   : > { %v6057_v28 = vpop.permute.xlu1 %6056 }
0x366a   : > { %v6059_v36 = vmul.f32 %v6057_v28, %v6053_v4 }
0x366c   : > { %6061 = vrot.lane.b32.xlu0 %v6059_v36, %s8624_s22 }
0x367a   : > { %v6212_v2 = vpop.permute.xlu0 %6211 }
0x367b   : > { %v6214_v42 = vmul.f32 %v6212_v2, %v6208_v18 }
0x367d   : > { %6216 = vrot.lane.b32.xlu1 %v6214_v42, %s8624_s22 }
0x368b   : > { %v6368_v26 = vpop.permute.xlu1 %6367 }
0x368c   : > { %v6370_v49 = vmul.f32 %v6368_v26, %v6364_v5 }
0x368e   : > { %6372 = vrot.lane.b32.xlu0 %v6370_v49, %s8624_s22 }
0x36de   : > { %v6062_v38 = vpop.permute.xlu0 %6061 }
0x36df   : > { %v10856_v32 = vadd.f32 %v6062_v38, %v6054_v59 }
0x36e1   : > { %8549 = vtanh.f32 %v10856_v32 }
0x36ee   : > { %v8550_v22 = vpop.eup %8549 }
0x36ef   : > { %v6217_v10 = vpop.permute.xlu1 %6216  ;;  %6067 = vrot.lane.b32.xlu1 %v8550_v22, %s8621_s29 }
0x36f0   : > { %v10861_v60 = vadd.f32 %v6217_v10, %v6209_v41 }
0x36f2   : > { %8551 = vtanh.f32 %v10861_v60 }
0x36ff   : > { %v8552_v33 = vpop.eup %8551 }
0x3700   : > { %v6373_v8 = vpop.permute.xlu0 %6372  ;;  %6222 = vrot.lane.b32.xlu0 %v8552_v33, %s8621_s29 }
0x3701   : > { %v6375_v12 = vadd.f32 %v6373_v8, %v6365_v20 }
0x3703   : > { %8553 = vtanh.f32 %v6375_v12 }
0x3710   : > { %v8554_v9 = vpop.eup %8553 }
0x3711   : > { %6378 = vrot.lane.b32.xlu1 %v8554_v9, %s8621_s29 }
0x3761   : > { %v6068_v54 = vpop.permute.xlu1 %6067 }
0x3762   : > { %v6070_v63 = vmul.f32 %v6068_v54, %v6053_v4 }
0x3764   : > { %6231 = vrot.lane.b32.xlu1 %v6070_v63, %s8621_s29 }
0x3772   : > { %v6223_v48 = vpop.permute.xlu0 %6222 }
0x3773   : > { %v6225_v19 = vmul.f32 %v6223_v48, %v6208_v18 }
0x3775   : > { %6227 = vrot.lane.b32.xlu0 %v6225_v19, %s8624_s22  ;;  %6386 = vrot.lane.b32.xlu1 %v6225_v19, %s8621_s29 }
0x3783   : > { %v6379_v44 = vpop.permute.xlu1 %6378 }
0x3784   : > { %v6381_v3 = vmul.f32 %v6379_v44, %v6364_v5 }
0x3786   : > { %6383 = vrot.lane.b32.xlu0 %v6381_v3, %s8624_s22 }
0x37d6   : > { %v6232_v13 = vpop.permute.xlu1 %6231 }
0x37e7   : > { %v6228_v53 = vpop.permute.xlu0 %6227  ;;  %v6387_v21 = vpop.permute.xlu1 %6386 }
0x37e8   : > { %v6234_v37 = vsel %vm1313_vm12, %v6228_v53, %v6232_v13 }
0x37e9   : > { %v6235_v50 = vpack.c.bf16 %v6234_v37, %v6234_v37 }
0x37eb   : > { %7920 = vmatmul.mubr.msk.bf16.vlgmr.msra.gmra.mxu1 %vm708_vm1, %v6235_v50 }
0x37ec   : > { %7936 = vmatpush3.bf16.msra.mxu1 %v10678_v58  ;;  %7943 = vmatprep.mubr.msk.bf16.mxu1 %vm8618_vm0, %v8617_v1 }
0x37ed   : > { %7937 = vmatprep.subr.bf16.mxu1 %v8617_v1 }
0x37f0   : > { %7938 = vmatpush3.bf16.msra.mxu1 %v10687_v16 }
0x37f1   : > { %7939 = vmatprep.subr.bf16.mxu1 %v8617_v1 }
0x37f4   : > { %7940 = vmatpush3.bf16.msra.mxu1 %v10694_v31  ;;  %v8608_v31 = vld [vmem:[%s10957_s13 + $0x2] sm:$0x1] }
0x37f5   : > { %7941 = vmatprep.subr.bf16.mxu1 %v8617_v1 }
0x37f8   : > { %v6384_v17 = vpop.permute.xlu0 %6383  ;;  %7942 = vmatpush3.bf16.msra.mxu1 %v10701_v39 }
0x37f9   : > { %v6389_v46 = vsel %vm1313_vm12, %v6384_v17, %v6387_v21  ;;  %7959 = vmatprep.subr.bf16.mxu1 %v8617_v1  ;;  %v8053_v17 = vld [vmem:[%s10958_s14 + $0x8] sm:$0xff]  }
0x37fa   : > { %v6390_v58 = vpack.c.bf16 %v6389_v46, %v6389_v46 }
0x37fc   : > { %7944 = vmatmul.mubr.msk.bf16.vlgmr.msra.gmra.mxu1 %vm708_vm1, %v6390_v58  ;;  %v8055_v58 = vld [vmem:[%s10960_s16 + $0x8] sm:$0xff]  }
0x37fd   : > { %7963 = vmatprep.mubr.msk.bf16.mxu1 %vm8618_vm0, %v8617_v1  ;;  %7960 = vmatpush3.bf16.msra.mxu1 %v8053_v17 }
0x37fe   : > { %7961 = vmatprep.subr.bf16.mxu1 %v8617_v1 }
0x3801   : > { %7962 = vmatpush3.bf16.msra.mxu1 %v8054_v55 }
0x38ab   : > { %v6273_v16 = vpop.f32.mrf.mxu1 }
0x38ac   : > { %v6274_v14 = vadd.f32 %v8608_v31, %v6273_v16 }
0x38ad   : > { %v7921_v57 = vpop.f32.mrf.mxu1 }
0x38ae   : > { %v6989_v62 = vmul.f32 -1.442695, %v6274_v14 }
0x38af   : > { %v6276_v34 = vpop.f32.mrf.mxu1 }
0x38b0   : > { %8555 = vpow2.f32 %v6989_v62  ;;  %v8056_v62 = vld [vmem:[%s10960_s16] sm:$0xff]  }
0x38b1   : > { %v7922_v39 = vpop.f32.mrf.mxu1  ;;  %8557 = vtanh.f32 %v6274_v14  ;;  %v6542_v34 = vld [vmem:[%s10959_s15] sm:$0x1] }
0x38bc   : > { %v6428_v15 = vpop.f32.mrf.mxu1 }
0x38bd   : > { %v8556_v27 = vpop.eup %8555  ;;  %v6429_v6 = vadd.f32 %v10754_v43, %v6428_v15 }
0x38be   : > { %v6283_v29 = vadd.f32 1.0, %v8556_v27  ;;  %v7945_v7 = vpop.f32.mrf.mxu1  ;;  %v8558_v24 = vpop.eup %8557 }
0x38bf   : > { %v6993_v47 = vmul.f32 -1.442695, %v6429_v6  ;;  %v6606_v7 = vld [vmem:[%s10961_s17] sm:$0x1] }
0x38c0   : > { %8559 = vrcp.f32 %v6283_v29  ;;  %v6431_v23 = vpop.f32.mrf.mxu1 }
0x38c1   : > { %8561 = vpow2.f32 %v6993_v47 }
0x38c2   : > { %v7946_v0 = vpop.f32.mrf.mxu1  ;;  %8563 = vtanh.f32 %v6429_v6 }
0x38cd   : > { %v8560_v4 = vpop.eup %8559 }
0x38ce   : > { %v8562_v30 = vpop.eup %8561  ;;  %v6286_v25 = vsel %vm9875_vm14, %v8558_v24, %v8560_v4 }
0x38cf   : > { %v6438_v56 = vadd.f32 1.0, %v8562_v30  ;;  %6289 = vrot.lane.b32.xlu0 %v6286_v25, %s8621_s29  ;;  %v8564_v43 = vpop.eup %8563  ;;  %v6287_v35 = vmul.f32 %v6286_v25, %v10856_v32 }
0x38d1   : > { %8565 = vrcp.f32 %v6438_v56 }
0x38de   : > { %v8566_v40 = vpop.eup %8565 }
0x38df   : > { %v6441_v52 = vsel %vm9875_vm14, %v8564_v43, %v8566_v40 }
0x38e0   : > { %6444 = vrot.lane.b32.xlu1 %v6441_v52, %s8621_s29  ;;  %v6442_v36 = vmul.f32 %v6441_v52, %v10861_v60 }
0x3941   : > { %v6290_v51 = vpop.permute.xlu0 %6289 }
0x3942   : > { %v6292_v45 = vmul.f32 %v6290_v51, %v6286_v25 }
0x3944   : > { %6294 = vrot.lane.b32.xlu0 %v6292_v45, %s8624_s22 }
0x3952   : > { %v6445_v18 = vpop.permute.xlu1 %6444 }
0x3953   : > { %v6447_v61 = vmul.f32 %v6445_v18, %v6441_v52 }
0x3955   : > { %6449 = vrot.lane.b32.xlu1 %v6447_v61, %s8624_s22 }
0x39b6   : > { %v6295_v11 = vpop.permute.xlu0 %6294 }
0x39b7   : > { %v6297_v5 = vadd.f32 %v6295_v11, %v6287_v35 }
0x39b9   : > { %8567 = vtanh.f32 %v6297_v5 }
0x39c6   : > { %v8568_v28 = vpop.eup %8567 }
0x39c7   : > { %v6450_v2 = vpop.permute.xlu1 %6449  ;;  %6300 = vrot.lane.b32.xlu0 %v8568_v28, %s8621_s29 }
0x39c8   : > { %v6452_v42 = vadd.f32 %v6450_v2, %v6442_v36 }
0x39ca   : > { %8569 = vtanh.f32 %v6452_v42 }
0x39d7   : > { %v8570_v26 = vpop.eup %8569 }
0x39d8   : > { %6455 = vrot.lane.b32.xlu1 %v8570_v26, %s8621_s29 }
0x3a39   : > { %v6301_v49 = vpop.permute.xlu0 %6300 }
0x3a3a   : > { %v6303_v59 = vmul.f32 %v6301_v49, %v6286_v25 }
0x3a3c   : > { %6464 = vrot.lane.b32.xlu1 %v6303_v59, %s8621_s29 }
0x3a4a   : > { %v6456_v38 = vpop.permute.xlu1 %6455 }
0x3a4b   : > { %v6458_v32 = vmul.f32 %v6456_v38, %v6441_v52 }
0x3a4d   : > { %6460 = vrot.lane.b32.xlu0 %v6458_v32, %s8624_s22 }
0x3aae   : > { %v6465_v22 = vpop.permute.xlu1 %6464 }
0x3abf   : > { %v6461_v41 = vpop.permute.xlu0 %6460 }
0x3ac0   : > { %v6467_v10 = vsel %vm1313_vm12, %v6461_v41, %v6465_v22 }
0x3ac1   : > { %v6468_v60 = vpack.c.bf16 %v6467_v10, %v6467_v10 }
0x3ac3   : > { %7956 = vmatmul.mubr.msk.bf16.vlgmr.msra.gmra.mxu0 %vm708_vm1, %v6468_v60 }
0x3ac4   : > { %7971 = vmatprep.mubr.msk.bf16.mxu0 %vm8618_vm0, %v8617_v1  ;;  %7968 = vmatpush3.bf16.msra.mxu0 %v8055_v58  ;;  %vm6662_vm0 = vcmask 122880  }
0x3ac5   : > { %7969 = vmatprep.subr.bf16.mxu0 %v8617_v1 }
0x3ac8   : > { %7970 = vmatpush3.bf16.msra.mxu0 %v8056_v62 }
0x3b83   : > { %v6506_v33 = vpop.f32.mrf.mxu0 }
0x3b84   : > { %v6507_v20 = vadd.f32 %v8608_v31, %v6506_v33 }
0x3b85   : > { %v7957_v8 = vpop.f32.mrf.mxu0 }
0x3b86   : > { %v6995_v12 = vmul.f32 -1.442695, %v6507_v20 }
0x3b87   : > { %v6509_v9 = vpop.f32.mrf.mxu0 }
0x3b88   : > { %8571 = vpow2.f32 %v6995_v12 }
0x3b89   : > { %v7958_v54 = vpop.f32.mrf.mxu0  ;;  %8573 = vtanh.f32 %v6507_v20 }
0x3b95   : > { %v8572_v63 = vpop.eup %8571 }
0x3b96   : > { %v6516_v48 = vadd.f32 1.0, %v8572_v63  ;;  %v8574_v19 = vpop.eup %8573 }
0x3b98   : > { %8575 = vrcp.f32 %v6516_v48 }
0x3ba5   : > { %v8576_v44 = vpop.eup %8575 }
0x3ba6   : > { %v6519_v3 = vsel %vm9875_vm14, %v8574_v19, %v8576_v44 }
0x3ba7   : > { %6522 = vrot.lane.b32.xlu0 %v6519_v3, %s8621_s29  ;;  %v6520_v37 = vmul.f32 %v6519_v3, %v6297_v5 }
0x3c19   : > { %v6523_v13 = vpop.permute.xlu0 %6522 }
0x3c1a   : > { %v6525_v53 = vmul.f32 %v6523_v13, %v6519_v3 }
0x3c1c   : > { %6527 = vrot.lane.b32.xlu1 %v6525_v53, %s8624_s22 }
0x3c8e   : > { %v6528_v50 = vpop.permute.xlu1 %6527 }
0x3c8f   : > { %v6530_v21 = vadd.f32 %v6528_v50, %v6520_v37 }
0x3c91   : > { %8577 = vtanh.f32 %v6530_v21 }
0x3c9e   : > { %v8578_v46 = vpop.eup %8577 }
0x3c9f   : > { %6533 = vrot.lane.b32.xlu0 %v8578_v46, %s8621_s29 }
0x3d11   : > { %v6534_v16 = vpop.permute.xlu0 %6533 }
0x3d12   : > { %v6536_v31 = vmul.f32 %v6534_v16, %v6519_v3 }
0x3d14   : > { %v6541_v14 = vpack.c.bf16 %v6536_v31, %v6536_v31 }
0x3d16   : > { %6544 = vrot.lane.b32.xlu1 %v6541_v14, %s8624_s22 }
0x3d88   : > { %v6545_v57 = vpop.permute.xlu1 %6544 }
0x3d89   : > { %7964 = vmatmul.mubr.msk.bf16.vlgmr.msra.gmra.mxu1 %vm1313_vm12, %v6545_v57 }
0x3e49   : > { %v6595_v39 = vpop.f32.mrf.mxu1 }
0x3e4a   : > { %v6596_v1 = vadd.f32 %v6595_v39, %v6542_v34 }
0x3e4b   : > { %v7965_v15 = vpop.f32.mrf.mxu1 }
0x3e4c   : > { %v6605_v27 = vpack.c.bf16 %v6596_v1, %v6596_v1 }
0x3e4d   : > { %v6598_v6 = vpop.f32.mrf.mxu1 }
0x3e4e   : > { %7972 = vmatmul.mubr.msk.bf16.vlgmr.msra.gmra.mxu0 %vm1313_vm12, %v6605_v27 }
0x3e4f   : > { %v7966_v29 = vpop.f32.mrf.mxu1 }
0x3f0e   : > { %v6656_v47 = vpop.f32.mrf.mxu0 }
0x3f0f   : > { %v6657_v23 = vadd.f32 %v6656_v47, %v6606_v7 }
0x3f10   : > { %v7973_v0 = vpop.f32.mrf.mxu0 }
0x3f11   : > { %6663 = vst.msk [vmem:[%s659_s19] sm:$0x1] %vm6662_vm0, %v6657_v23 }
0x3f12   : > { %v6659_v24 = vpop.f32.mrf.mxu0 }
0x3f14   : > { %v7974_v4 = vpop.f32.mrf.mxu0 }
0x3f15 PF: > { %s28_s27 = sadd.s32 1, %s8615_s27  }
0x3f16   : > { %p25_p4 = scmp.ge.s32.totalorder %s28_s27, 4  }
0x3f18   :  { %27 = sbr.rel (!%p25_p4) target bundleno = 4 (0x4), region = 147 }

</bundles_post_ra>
